<compile_context>
chip_gen: v7x
topology: tpu7x:2x2x1
jax: 0.10.0
libtpu: 0.0.40
codegen_flags: <defaults>
</compile_context>

<pallas_src>
import math

import jax
import jax.numpy as jnp
from jax.experimental import pallas as pl
from jax.experimental.pallas import tpu as pltpu

# ----------------------------- model constants ------------------------------
E = 64                      # emb_size (4096 in the original module)
NUM_HEADS = 8
DH = E // NUM_HEADS         # 8
SCALE = 1.0 / math.sqrt(DH)
HD = 32                     # lstm_hidden_size (200 in the original module)
F = 16                      # user_r / text_word feature dim (256 originally)
LABELS = 3
B = 2
S = 8                       # inputs seq len
ST = 8                      # text_word seq len
SC = 8                      # user_c seq len
SR = 8                      # user_r seq len
SS = 8                      # user_s seq len

# -------- packed weight-slab column layout (offsets in elements) ------------
# w_proj: all E-row projection matrices, concatenated along columns.
OFF_Q5 = 0 * E
OFF_KV5 = 1 * E             # K5 | V5                       (2E wide)
OFF_O5 = 3 * E
OFF_LW = 4 * E
OFF_Q1 = 5 * E
OFF_Q2 = 6 * E
OFF_Q3 = 7 * E
OFF_KV123 = 8 * E           # K1|V1|K2|V2|K3|V3             (6E wide)
OFF_O1 = 14 * E
OFF_O2 = 15 * E
OFF_O3 = 16 * E
OFF_LC = 17 * E
OFF_LR = 18 * E
OFF_LS = 19 * E
W_PROJ_COLS = 20 * E        # 1280

# b_all: every bias, concatenated along lanes.
OFF_B_FR = 0
OFF_B_FT = E
OFF_B_PROJ = 2 * E                        # proj biases, same layout as w_proj
OFF_B_HEAD = OFF_B_PROJ + W_PROJ_COLS     # 22E
OFF_B_OUT2 = OFF_B_HEAD + HD
B_ALL_COLS = OFF_B_OUT2 + LABELS          # 1443


# ------------------------------ fused forward kernel -------------------------
def _fused_forward_kernel(x_ref, uc_ref, ur_ref, us_ref, tw_ref,
                          w_in_ref, w_proj_ref, w_head_ref, w_out2_ref,
                          b_all_ref, logits_ref):
    bf16 = jnp.bfloat16

    def dense_in(v, w_off, b_off):
        # fr / ft: [B*L, F] @ [F, E] + b
        return (jnp.dot(v.astype(bf16), w_in_ref[:, w_off:w_off + E],
                        preferred_element_type=jnp.float32)
                + b_all_ref[:, b_off:b_off + E])

    def dense_proj(v, off, width):
        # [B*L, E] @ [E, width] + b, weights sliced out of the packed slab.
        return (jnp.dot(v.astype(bf16), w_proj_ref[:, off:off + width],
                        preferred_element_type=jnp.float32)
                + b_all_ref[:, OFF_B_PROJ + off:OFF_B_PROJ + off + width])

    def mha(q2d, k2d, v2d, o_off, lq, lk):
        """Multi-head attention for the whole batch, batched over (B*H).

        q2d: [B*lq, E]; k2d/v2d: [B*lk, E].  Returns [B*lq, E] after the
        (single) output projection.
        """
        def split_heads(m2d, l):
            return jnp.stack(
                [m2d[b * l:(b + 1) * l, h * DH:(h + 1) * DH]
                 for b in range(B) for h in range(NUM_HEADS)], axis=0)

        qh = split_heads(q2d, lq)                       # [B*H, lq, DH]
        kh = split_heads(k2d, lk)                       # [B*H, lk, DH]
        vh = split_heads(v2d, lk)                       # [B*H, lk, DH]

        s = jnp.einsum('gqd,gkd->gqk', qh, kh,
                       preferred_element_type=jnp.float32) * SCALE
        s = s - jnp.max(s, axis=-1, keepdims=True)      # one batched reduce
        p = jnp.exp(s)
        p = p / jnp.sum(p, axis=-1, keepdims=True)      # exact normalization
        o = jnp.einsum('gqk,gkd->gqd', p, vh,
                       preferred_element_type=jnp.float32)   # [B*H, lq, DH]

        # merge heads back to [B*lq, E] (batch on sublanes, heads on lanes)
        o_cat = jnp.concatenate(
            [jnp.concatenate([o[b * NUM_HEADS + h] for h in range(NUM_HEADS)],
                             axis=1)
             for b in range(B)], axis=0)

        # single output-projection GEMM (was 8 dependent per-head matmuls)
        return (jnp.dot(o_cat.astype(bf16), w_proj_ref[:, o_off:o_off + E],
                        preferred_element_type=jnp.float32)
                + b_all_ref[:, OFF_B_PROJ + o_off:OFF_B_PROJ + o_off + E])

    x = x_ref[...]        # [B*S,  E]
    uc = uc_ref[...]      # [B*SC, E]
    ur = ur_ref[...]      # [B*SR, F]
    us = us_ref[...]      # [B*SS, E]
    tw = tw_ref[...]      # [B*ST, F]

    # user_r = sigmoid(fr(user_r)); text_word = sigmoid(ft(text_word))
    ur_e = jax.nn.sigmoid(dense_in(ur, 0, OFF_B_FR))    # [B*SR, E]
    tw_e = jax.nn.sigmoid(dense_in(tw, E, OFF_B_FT))    # [B*ST, E]

    # --- MHA5: Q = text_word, K = V = inputs --------------------------------
    q5 = dense_proj(tw_e, OFF_Q5, E)                    # [B*ST, E]
    kv5 = dense_proj(x, OFF_KV5, 2 * E)                 # [B*S, 2E] = K5|V5
    att_w = mha(q5, kv5[:, 0:E], kv5[:, E:2 * E], OFF_O5, ST, S)

    # inputs = att_w * sigmoid(sigmoid(linear_w(att_w)))   (matches original)
    inputs2 = att_w * jax.nn.sigmoid(
        jax.nn.sigmoid(dense_proj(att_w, OFF_LW, E)))

    # --- MHA1/2/3 share the K/V source: one packed [E,6E] projection --------
    kv123 = dense_proj(inputs2, OFF_KV123, 6 * E)       # [B*ST, 6E]
    q1 = dense_proj(uc, OFF_Q1, E)                      # mha1: user_c
    q2 = dense_proj(us, OFF_Q2, E)                      # mha2: user_s
    q3 = dense_proj(ur_e, OFF_Q3, E)                    # mha3: user_r

    att_c = mha(q1, kv123[:, 0 * E:1 * E], kv123[:, 1 * E:2 * E], OFF_O1, SC, ST)
    att_s = mha(q2, kv123[:, 2 * E:3 * E], kv123[:, 3 * E:4 * E], OFF_O2, SS, ST)
    att_r = mha(q3, kv123[:, 4 * E:5 * E], kv123[:, 5 * E:6 * E], OFF_O3, SR, ST)

    # sigmoid gating: user_x = att_x * sigmoid(linear_x(att_x))
    user_c2 = att_c * jax.nn.sigmoid(dense_proj(att_c, OFF_LC, E))
    user_r2 = att_r * jax.nn.sigmoid(dense_proj(att_r, OFF_LR, E))
    user_s2 = att_s * jax.nn.sigmoid(dense_proj(att_s, OFF_LS, E))

    # per-batch sequence means -> [B, 4E] lane-packed feature row
    def seq_mean(m2d, l, b):
        return jnp.mean(m2d[b * l:(b + 1) * l, :], axis=0, keepdims=True)

    feats = jnp.concatenate(
        [jnp.concatenate([seq_mean(inputs2, ST, b), seq_mean(user_c2, SC, b),
                          seq_mean(user_r2, SR, b), seq_mean(user_s2, SS, b)],
                         axis=1)
         for b in range(B)], axis=0)                    # [B, 4E]

    # classifier head: one [B,4E]@[4E,HD] GEMM (head_w rows = out1|Wc|Wr|Ws,
    # head bias = sum of the four biases), then out2.
    z = (jnp.dot(feats.astype(bf16), w_head_ref[...],
                 preferred_element_type=jnp.float32)
         + b_all_ref[:, OFF_B_HEAD:OFF_B_HEAD + HD])
    hid = jax.nn.sigmoid(z)                             # [B, HD]
    logits_ref[...] = (jnp.dot(hid.astype(bf16), w_out2_ref[...],
                               preferred_element_type=jnp.float32)
                       + b_all_ref[:, OFF_B_OUT2:OFF_B_OUT2 + LABELS])


# ------------------------------- forward pass --------------------------------
def chatglm_classifier_forward(params, inputs, label, user_c, user_r, user_s,
                               text_word):
    """inputs: [B,S,E]; user_c/user_s: [B,L,E]; user_r/text_word: [B,L,F]."""
    b = inputs.shape[0]

    # Flatten batch into the sublane axis so every dense layer is one GEMM
    # over the whole batch (done once in XLA, layout-preserving).
    x2 = inputs.reshape(b * inputs.shape[1], inputs.shape[2])
    uc2 = user_c.reshape(b * user_c.shape[1], user_c.shape[2])
    ur2 = user_r.reshape(b * user_r.shape[1], user_r.shape[2])
    us2 = user_s.reshape(b * user_s.shape[1], user_s.shape[2])
    tw2 = text_word.reshape(b * text_word.shape[1], text_word.shape[2])

    data = (x2, uc2, ur2, us2, tw2)
    weights = (params["w_in"], params["w_proj"], params["w_head"],
               params["w_out2"], params["b_all"])
    in_specs = [pl.BlockSpec(a.shape, lambda i: (0, 0)) for a in data + weights]

    logits = pl.pallas_call(
        _fused_forward_kernel,
        out_shape=jax.ShapeDtypeStruct((b, LABELS), jnp.float32),
        grid=(1,),                                      # whole batch per step
        in_specs=in_specs,
        out_specs=pl.BlockSpec((b, LABELS), lambda i: (0, 0)),
        compiler_params=pltpu.CompilerParams(
            dimension_semantics=("arbitrary",)),
    )(*data, *weights)

    # glue: NLLLoss(LogSoftmax(logits), label) — B x 3 values, negligible.
    logp = jax.nn.log_softmax(logits, axis=-1)
    loss = -jnp.mean(logp[jnp.arange(b), label])
    return loss, logits


# ------------------------------- param init ----------------------------------
def init_params(key):
    """PyTorch-style linear init, packed into a handful of VMEM slabs."""

    def lin(k, fan_in, fan_out):
        k1, k2 = jax.random.split(k)
        bound = 1.0 / math.sqrt(fan_in)
        w = jax.random.uniform(k1, (fan_in, fan_out), jnp.float32, -bound, bound)
        bias = jax.random.uniform(k2, (1, fan_out), jnp.float32, -bound, bound)
        return w, bias

    def mha_w(k):
        ks = jax.random.split(k, 4)
        return [lin(ks[i], E, E) for i in range(4)]      # q, k, v, o

    keys = iter(jax.random.split(key, 16))

    fr_w, fr_b = lin(next(keys), F, E)
    ft_w, ft_b = lin(next(keys), F, E)

    (q5w, q5b), (k5w, k5b), (v5w, v5b), (o5w, o5b) = mha_w(next(keys))
    (q1w, q1b), (k1w, k1b), (v1w, v1b), (o1w, o1b) = mha_w(next(keys))
    (q2w, q2b), (k2w, k2b), (v2w, v2b), (o2w, o2b) = mha_w(next(keys))
    (q3w, q3b), (k3w, k3b), (v3w, v3b), (o3w, o3b) = mha_w(next(keys))

    lw_w, lw_b = lin(next(keys), E, E)
    lc_w, lc_b = lin(next(keys), E, E)
    lr_w, lr_b = lin(next(keys), E, E)
    ls_w, ls_b = lin(next(keys), E, E)

    out1_w, out1_b = lin(next(keys), E, HD)
    wc_w, wc_b = lin(next(keys), E, HD)
    wr_w, wr_b = lin(next(keys), E, HD)
    ws_w, ws_b = lin(next(keys), E, HD)
    out2_w, out2_b = lin(next(keys), HD, LABELS)

    # column order must match the OFF_* constants above
    proj_w = [q5w, k5w, v5w, o5w, lw_w, q1w, q2w, q3w,
              k1w, v1w, k2w, v2w, k3w, v3w,
              o1w, o2w, o3w, lc_w, lr_w, ls_w]
    proj_b = [q5b, k5b, v5b, o5b, lw_b, q1b, q2b, q3b,
              k1b, v1b, k2b, v2b, k3b, v3b,
              o1b, o2b, o3b, lc_b, lr_b, ls_b]

    p = {}
    p["w_in"] = jnp.concatenate([fr_w, ft_w], axis=1).astype(jnp.bfloat16)
    p["w_proj"] = jnp.concatenate(proj_w, axis=1).astype(jnp.bfloat16)
    p["w_head"] = jnp.concatenate([out1_w, wc_w, wr_w, ws_w],
                                  axis=0).astype(jnp.bfloat16)
    p["w_out2"] = out2_w.astype(jnp.bfloat16)
    head_b = out1_b + wc_b + wr_b + ws_b
    p["b_all"] = jnp.concatenate([fr_b, ft_b] + proj_b + [head_b, out2_b],
                                 axis=1)                 # [1, B_ALL_COLS] f32
    assert p["b_all"].shape == (1, B_ALL_COLS)
    assert p["w_proj"].shape == (E, W_PROJ_COLS)
    return p


# ---------------------------------- main --------------------------------------
if __name__ == "__main__":
    key = jax.random.PRNGKey(0)
    kp, k1, k2, k3, k4, k5, k6 = jax.random.split(key, 7)
    params = init_params(kp)

    inputs = jax.random.normal(k1, (B, S, E), jnp.float32)
    user_c = jax.random.normal(k2, (B, SC, E), jnp.float32)
    user_r = jax.random.normal(k3, (B, SR, F), jnp.float32)
    user_s = jax.random.normal(k4, (B, SS, E), jnp.float32)
    text_word = jax.random.normal(k5, (B, ST, F), jnp.float32)
    label = jax.random.randint(k6, (B,), 0, LABELS)

    fwd = jax.jit(chatglm_classifier_forward)
    loss, logits = fwd(params, inputs, label, user_c, user_r, user_s, text_word)
    jax.block_until_ready((loss, logits))
    assert logits.shape == (B, LABELS)
    assert loss.shape == ()
    print("KERNEL_OK")
</pallas_src>

<mosaic_0001>
module attributes {stable_mosaic.version = 11 : i64} {
  func.func @_fused_forward_kernel(%arg0: i32, %arg1: memref<16x64xf32, #tpu.memory_space<vmem>>, %arg2: memref<16x64xf32, #tpu.memory_space<vmem>>, %arg3: memref<16x16xf32, #tpu.memory_space<vmem>>, %arg4: memref<16x64xf32, #tpu.memory_space<vmem>>, %arg5: memref<16x16xf32, #tpu.memory_space<vmem>>, %arg6: memref<16x128xbf16, #tpu.memory_space<vmem>>, %arg7: memref<64x1280xbf16, #tpu.memory_space<vmem>>, %arg8: memref<256x32xbf16, #tpu.memory_space<vmem>>, %arg9: memref<32x3xbf16, #tpu.memory_space<vmem>>, %arg10: memref<1x1443xf32, #tpu.memory_space<vmem>>, %arg11: memref<2x3xf32, #tpu.memory_space<vmem>>) attributes {dimension_semantics = [#tpu.dimension_semantics<arbitrary>], iteration_bounds = array<i64: 1>, scalar_prefetch = 0 : i64, scratch_operands = 0 : i64, tpu.core_type = #tpu.core_type<tc>, window_params = [{pipeline_mode = #tpu.pipeline_mode<synchronous>, transform_indices = @transform_0, window_bounds = array<i64: 16, 64>}, {pipeline_mode = #tpu.pipeline_mode<synchronous>, transform_indices = @transform_1, window_bounds = array<i64: 16, 64>}, {pipeline_mode = #tpu.pipeline_mode<synchronous>, transform_indices = @transform_2, window_bounds = array<i64: 16, 16>}, {pipeline_mode = #tpu.pipeline_mode<synchronous>, transform_indices = @transform_3, window_bounds = array<i64: 16, 64>}, {pipeline_mode = #tpu.pipeline_mode<synchronous>, transform_indices = @transform_4, window_bounds = array<i64: 16, 16>}, {pipeline_mode = #tpu.pipeline_mode<synchronous>, transform_indices = @transform_5, window_bounds = array<i64: 16, 128>}, {pipeline_mode = #tpu.pipeline_mode<synchronous>, transform_indices = @transform_6, window_bounds = array<i64: 64, 1280>}, {pipeline_mode = #tpu.pipeline_mode<synchronous>, transform_indices = @transform_7, window_bounds = array<i64: 256, 32>}, {pipeline_mode = #tpu.pipeline_mode<synchronous>, transform_indices = @transform_8, window_bounds = array<i64: 32, 3>}, {pipeline_mode = #tpu.pipeline_mode<synchronous>, transform_indices = @transform_9, window_bounds = array<i64: 1, 1443>}, {pipeline_mode = #tpu.pipeline_mode<synchronous>, transform_indices = @transform_10, window_bounds = array<i64: 2, 3>}]} {
    %c0 = arith.constant 0 : index
    %c0_0 = arith.constant 0 : index
    %0 = vector.load %arg1[%c0, %c0_0] : memref<16x64xf32, #tpu.memory_space<vmem>>, vector<16x64xf32>
    %c0_1 = arith.constant 0 : index
    %c0_2 = arith.constant 0 : index
    %1 = vector.load %arg2[%c0_1, %c0_2] : memref<16x64xf32, #tpu.memory_space<vmem>>, vector<16x64xf32>
    %c0_3 = arith.constant 0 : index
    %c0_4 = arith.constant 0 : index
    %2 = vector.load %arg3[%c0_3, %c0_4] : memref<16x16xf32, #tpu.memory_space<vmem>>, vector<16x16xf32>
    %c0_5 = arith.constant 0 : index
    %c0_6 = arith.constant 0 : index
    %3 = vector.load %arg4[%c0_5, %c0_6] : memref<16x64xf32, #tpu.memory_space<vmem>>, vector<16x64xf32>
    %c0_7 = arith.constant 0 : index
    %c0_8 = arith.constant 0 : index
    %4 = vector.load %arg5[%c0_7, %c0_8] : memref<16x16xf32, #tpu.memory_space<vmem>>, vector<16x16xf32>
    %5 = arith.truncf %2 : vector<16x16xf32> to vector<16x16xbf16>
    %c0_9 = arith.constant 0 : index
    %c0_10 = arith.constant 0 : index
    %6 = vector.load %arg6[%c0_9, %c0_10] : memref<16x128xbf16, #tpu.memory_space<vmem>>, vector<16x64xbf16>
    %cst = arith.constant dense<0.000000e+00> : vector<16x64xf32>
    %7 = tpu.matmul %5, %6, %cst {dimension_numbers = #tpu.dot_dimension_numbers<[1], [0], [0], [1], [0, 0, 1, 1], [], []>} : vector<16x16xbf16>, vector<16x64xbf16>, vector<16x64xf32> -> vector<16x64xf32>
    %c0_11 = arith.constant 0 : index
    %c0_12 = arith.constant 0 : index
    %8 = vector.load %arg10[%c0_11, %c0_12] : memref<1x1443xf32, #tpu.memory_space<vmem>>, vector<1x64xf32>
    %9 = vector.broadcast %8 : vector<1x64xf32> to vector<16x64xf32>
    %10 = arith.addf %7, %9 : vector<16x64xf32>
    %11 = arith.negf %10 : vector<16x64xf32>
    %12 = math.exp %11 : vector<16x64xf32>
    %cst_13 = arith.constant 1.000000e+00 : f32
    %13 = vector.broadcast %cst_13 : f32 to vector<16x64xf32>
    %14 = arith.addf %13, %12 : vector<16x64xf32>
    %15 = arith.divf %13, %14 : vector<16x64xf32>
    %16 = arith.truncf %4 : vector<16x16xf32> to vector<16x16xbf16>
    %c0_14 = arith.constant 0 : index
    %c64 = arith.constant 64 : index
    %17 = vector.load %arg6[%c0_14, %c64] : memref<16x128xbf16, #tpu.memory_space<vmem>>, vector<16x64xbf16>
    %cst_15 = arith.constant dense<0.000000e+00> : vector<16x64xf32>
    %18 = tpu.matmul %16, %17, %cst_15 {dimension_numbers = #tpu.dot_dimension_numbers<[1], [0], [0], [1], [0, 0, 1, 1], [], []>} : vector<16x16xbf16>, vector<16x64xbf16>, vector<16x64xf32> -> vector<16x64xf32>
    %c0_16 = arith.constant 0 : index
    %c64_17 = arith.constant 64 : index
    %19 = vector.load %arg10[%c0_16, %c64_17] : memref<1x1443xf32, #tpu.memory_space<vmem>>, vector<1x64xf32>
    %20 = vector.broadcast %19 : vector<1x64xf32> to vector<16x64xf32>
    %21 = arith.addf %18, %20 : vector<16x64xf32>
    %22 = arith.negf %21 : vector<16x64xf32>
    %23 = math.exp %22 : vector<16x64xf32>
    %cst_18 = arith.constant 1.000000e+00 : f32
    %24 = vector.broadcast %cst_18 : f32 to vector<16x64xf32>
    %25 = arith.addf %24, %23 : vector<16x64xf32>
    %26 = arith.divf %24, %25 : vector<16x64xf32>
    %27 = arith.truncf %26 : vector<16x64xf32> to vector<16x64xbf16>
    %c0_19 = arith.constant 0 : index
    %c0_20 = arith.constant 0 : index
    %28 = vector.load %arg7[%c0_19, %c0_20] : memref<64x1280xbf16, #tpu.memory_space<vmem>>, vector<64x64xbf16>
    %cst_21 = arith.constant dense<0.000000e+00> : vector<16x64xf32>
    %29 = tpu.matmul %27, %28, %cst_21 {dimension_numbers = #tpu.dot_dimension_numbers<[1], [0], [0], [1], [0, 0, 1, 1], [], []>} : vector<16x64xbf16>, vector<64x64xbf16>, vector<16x64xf32> -> vector<16x64xf32>
    %c0_22 = arith.constant 0 : index
    %c128 = arith.constant 128 : index
    %30 = vector.load %arg10[%c0_22, %c128] : memref<1x1443xf32, #tpu.memory_space<vmem>>, vector<1x64xf32>
    %31 = vector.broadcast %30 : vector<1x64xf32> to vector<16x64xf32>
    %32 = arith.addf %29, %31 : vector<16x64xf32>
    %33 = arith.truncf %0 : vector<16x64xf32> to vector<16x64xbf16>
    %c0_23 = arith.constant 0 : index
    %c64_24 = arith.constant 64 : index
    %34 = vector.load %arg7[%c0_23, %c64_24] : memref<64x1280xbf16, #tpu.memory_space<vmem>>, vector<64x128xbf16>
    %cst_25 = arith.constant dense<0.000000e+00> : vector<16x128xf32>
    %35 = tpu.matmul %33, %34, %cst_25 {dimension_numbers = #tpu.dot_dimension_numbers<[1], [0], [0], [1], [0, 0, 1, 1], [], []>} : vector<16x64xbf16>, vector<64x128xbf16>, vector<16x128xf32> -> vector<16x128xf32>
    %c0_26 = arith.constant 0 : index
    %c192 = arith.constant 192 : index
    %36 = vector.load %arg10[%c0_26, %c192] : memref<1x1443xf32, #tpu.memory_space<vmem>>, vector<1x128xf32>
    %37 = vector.broadcast %36 : vector<1x128xf32> to vector<16x128xf32>
    %38 = arith.addf %35, %37 : vector<16x128xf32>
    %39 = vector.extract_strided_slice %38 {offsets = [0, 0], sizes = [16, 64], strides = [1, 1]} : vector<16x128xf32> to vector<16x64xf32>
    %40 = vector.extract_strided_slice %38 {offsets = [0, 64], sizes = [16, 64], strides = [1, 1]} : vector<16x128xf32> to vector<16x64xf32>
    %41 = vector.extract_strided_slice %32 {offsets = [0, 0], sizes = [8, 8], strides = [1, 1]} : vector<16x64xf32> to vector<8x8xf32>
    %42 = vector.extract_strided_slice %32 {offsets = [0, 8], sizes = [8, 8], strides = [1, 1]} : vector<16x64xf32> to vector<8x8xf32>
    %43 = vector.extract_strided_slice %32 {offsets = [0, 16], sizes = [8, 8], strides = [1, 1]} : vector<16x64xf32> to vector<8x8xf32>
    %44 = vector.extract_strided_slice %32 {offsets = [0, 24], sizes = [8, 8], strides = [1, 1]} : vector<16x64xf32> to vector<8x8xf32>
    %45 = vector.extract_strided_slice %32 {offsets = [0, 32], sizes = [8, 8], strides = [1, 1]} : vector<16x64xf32> to vector<8x8xf32>
    %46 = vector.extract_strided_slice %32 {offsets = [0, 40], sizes = [8, 8], strides = [1, 1]} : vector<16x64xf32> to vector<8x8xf32>
    %47 = vector.extract_strided_slice %32 {offsets = [0, 48], sizes = [8, 8], strides = [1, 1]} : vector<16x64xf32> to vector<8x8xf32>
    %48 = vector.extract_strided_slice %32 {offsets = [0, 56], sizes = [8, 8], strides = [1, 1]} : vector<16x64xf32> to vector<8x8xf32>
    %49 = vector.extract_strided_slice %32 {offsets = [8, 0], sizes = [8, 8], strides = [1, 1]} : vector<16x64xf32> to vector<8x8xf32>
    %50 = vector.extract_strided_slice %32 {offsets = [8, 8], sizes = [8, 8], strides = [1, 1]} : vector<16x64xf32> to vector<8x8xf32>
    %51 = vector.extract_strided_slice %32 {offsets = [8, 16], sizes = [8, 8], strides = [1, 1]} : vector<16x64xf32> to vector<8x8xf32>
    %52 = vector.extract_strided_slice %32 {offsets = [8, 24], sizes = [8, 8], strides = [1, 1]} : vector<16x64xf32> to vector<8x8xf32>
    %53 = vector.extract_strided_slice %32 {offsets = [8, 32], sizes = [8, 8], strides = [1, 1]} : vector<16x64xf32> to vector<8x8xf32>
    %54 = vector.extract_strided_slice %32 {offsets = [8, 40], sizes = [8, 8], strides = [1, 1]} : vector<16x64xf32> to vector<8x8xf32>
    %55 = vector.extract_strided_slice %32 {offsets = [8, 48], sizes = [8, 8], strides = [1, 1]} : vector<16x64xf32> to vector<8x8xf32>
    %56 = vector.extract_strided_slice %32 {offsets = [8, 56], sizes = [8, 8], strides = [1, 1]} : vector<16x64xf32> to vector<8x8xf32>
    %57 = vector.shape_cast %41 : vector<8x8xf32> to vector<1x8x8xf32>
    %58 = vector.shape_cast %42 : vector<8x8xf32> to vector<1x8x8xf32>
    %59 = vector.shape_cast %43 : vector<8x8xf32> to vector<1x8x8xf32>
    %60 = vector.shape_cast %44 : vector<8x8xf32> to vector<1x8x8xf32>
    %61 = vector.shape_cast %45 : vector<8x8xf32> to vector<1x8x8xf32>
    %62 = vector.shape_cast %46 : vector<8x8xf32> to vector<1x8x8xf32>
    %63 = vector.shape_cast %47 : vector<8x8xf32> to vector<1x8x8xf32>
    %64 = vector.shape_cast %48 : vector<8x8xf32> to vector<1x8x8xf32>
    %65 = vector.shape_cast %49 : vector<8x8xf32> to vector<1x8x8xf32>
    %66 = vector.shape_cast %50 : vector<8x8xf32> to vector<1x8x8xf32>
    %67 = vector.shape_cast %51 : vector<8x8xf32> to vector<1x8x8xf32>
    %68 = vector.shape_cast %52 : vector<8x8xf32> to vector<1x8x8xf32>
    %69 = vector.shape_cast %53 : vector<8x8xf32> to vector<1x8x8xf32>
    %70 = vector.shape_cast %54 : vector<8x8xf32> to vector<1x8x8xf32>
    %71 = vector.shape_cast %55 : vector<8x8xf32> to vector<1x8x8xf32>
    %72 = vector.shape_cast %56 : vector<8x8xf32> to vector<1x8x8xf32>
    %73 = tpu.concatenate %57, %58, %59, %60, %61, %62, %63, %64, %65, %66, %67, %68, %69, %70, %71, %72 in 0 : vector<1x8x8xf32>, vector<1x8x8xf32>, vector<1x8x8xf32>, vector<1x8x8xf32>, vector<1x8x8xf32>, vector<1x8x8xf32>, vector<1x8x8xf32>, vector<1x8x8xf32>, vector<1x8x8xf32>, vector<1x8x8xf32>, vector<1x8x8xf32>, vector<1x8x8xf32>, vector<1x8x8xf32>, vector<1x8x8xf32>, vector<1x8x8xf32>, vector<1x8x8xf32> -> vector<16x8x8xf32>
    %74 = vector.extract_strided_slice %39 {offsets = [0, 0], sizes = [8, 8], strides = [1, 1]} : vector<16x64xf32> to vector<8x8xf32>
    %75 = vector.extract_strided_slice %39 {offsets = [0, 8], sizes = [8, 8], strides = [1, 1]} : vector<16x64xf32> to vector<8x8xf32>
    %76 = vector.extract_strided_slice %39 {offsets = [0, 16], sizes = [8, 8], strides = [1, 1]} : vector<16x64xf32> to vector<8x8xf32>
    %77 = vector.extract_strided_slice %39 {offsets = [0, 24], sizes = [8, 8], strides = [1, 1]} : vector<16x64xf32> to vector<8x8xf32>
    %78 = vector.extract_strided_slice %39 {offsets = [0, 32], sizes = [8, 8], strides = [1, 1]} : vector<16x64xf32> to vector<8x8xf32>
    %79 = vector.extract_strided_slice %39 {offsets = [0, 40], sizes = [8, 8], strides = [1, 1]} : vector<16x64xf32> to vector<8x8xf32>
    %80 = vector.extract_strided_slice %39 {offsets = [0, 48], sizes = [8, 8], strides = [1, 1]} : vector<16x64xf32> to vector<8x8xf32>
    %81 = vector.extract_strided_slice %39 {offsets = [0, 56], sizes = [8, 8], strides = [1, 1]} : vector<16x64xf32> to vector<8x8xf32>
    %82 = vector.extract_strided_slice %39 {offsets = [8, 0], sizes = [8, 8], strides = [1, 1]} : vector<16x64xf32> to vector<8x8xf32>
    %83 = vector.extract_strided_slice %39 {offsets = [8, 8], sizes = [8, 8], strides = [1, 1]} : vector<16x64xf32> to vector<8x8xf32>
    %84 = vector.extract_strided_slice %39 {offsets = [8, 16], sizes = [8, 8], strides = [1, 1]} : vector<16x64xf32> to vector<8x8xf32>
    %85 = vector.extract_strided_slice %39 {offsets = [8, 24], sizes = [8, 8], strides = [1, 1]} : vector<16x64xf32> to vector<8x8xf32>
    %86 = vector.extract_strided_slice %39 {offsets = [8, 32], sizes = [8, 8], strides = [1, 1]} : vector<16x64xf32> to vector<8x8xf32>
    %87 = vector.extract_strided_slice %39 {offsets = [8, 40], sizes = [8, 8], strides = [1, 1]} : vector<16x64xf32> to vector<8x8xf32>
    %88 = vector.extract_strided_slice %39 {offsets = [8, 48], sizes = [8, 8], strides = [1, 1]} : vector<16x64xf32> to vector<8x8xf32>
    %89 = vector.extract_strided_slice %39 {offsets = [8, 56], sizes = [8, 8], strides = [1, 1]} : vector<16x64xf32> to vector<8x8xf32>
    %90 = vector.shape_cast %74 : vector<8x8xf32> to vector<1x8x8xf32>
    %91 = vector.shape_cast %75 : vector<8x8xf32> to vector<1x8x8xf32>
    %92 = vector.shape_cast %76 : vector<8x8xf32> to vector<1x8x8xf32>
    %93 = vector.shape_cast %77 : vector<8x8xf32> to vector<1x8x8xf32>
    %94 = vector.shape_cast %78 : vector<8x8xf32> to vector<1x8x8xf32>
    %95 = vector.shape_cast %79 : vector<8x8xf32> to vector<1x8x8xf32>
    %96 = vector.shape_cast %80 : vector<8x8xf32> to vector<1x8x8xf32>
    %97 = vector.shape_cast %81 : vector<8x8xf32> to vector<1x8x8xf32>
    %98 = vector.shape_cast %82 : vector<8x8xf32> to vector<1x8x8xf32>
    %99 = vector.shape_cast %83 : vector<8x8xf32> to vector<1x8x8xf32>
    %100 = vector.shape_cast %84 : vector<8x8xf32> to vector<1x8x8xf32>
    %101 = vector.shape_cast %85 : vector<8x8xf32> to vector<1x8x8xf32>
    %102 = vector.shape_cast %86 : vector<8x8xf32> to vector<1x8x8xf32>
    %103 = vector.shape_cast %87 : vector<8x8xf32> to vector<1x8x8xf32>
    %104 = vector.shape_cast %88 : vector<8x8xf32> to vector<1x8x8xf32>
    %105 = vector.shape_cast %89 : vector<8x8xf32> to vector<1x8x8xf32>
    %106 = tpu.concatenate %90, %91, %92, %93, %94, %95, %96, %97, %98, %99, %100, %101, %102, %103, %104, %105 in 0 : vector<1x8x8xf32>, vector<1x8x8xf32>, vector<1x8x8xf32>, vector<1x8x8xf32>, vector<1x8x8xf32>, vector<1x8x8xf32>, vector<1x8x8xf32>, vector<1x8x8xf32>, vector<1x8x8xf32>, vector<1x8x8xf32>, vector<1x8x8xf32>, vector<1x8x8xf32>, vector<1x8x8xf32>, vector<1x8x8xf32>, vector<1x8x8xf32>, vector<1x8x8xf32> -> vector<16x8x8xf32>
    %107 = vector.extract_strided_slice %40 {offsets = [0, 0], sizes = [8, 8], strides = [1, 1]} : vector<16x64xf32> to vector<8x8xf32>
    %108 = vector.extract_strided_slice %40 {offsets = [0, 8], sizes = [8, 8], strides = [1, 1]} : vector<16x64xf32> to vector<8x8xf32>
    %109 = vector.extract_strided_slice %40 {offsets = [0, 16], sizes = [8, 8], strides = [1, 1]} : vector<16x64xf32> to vector<8x8xf32>
    %110 = vector.extract_strided_slice %40 {offsets = [0, 24], sizes = [8, 8], strides = [1, 1]} : vector<16x64xf32> to vector<8x8xf32>
    %111 = vector.extract_strided_slice %40 {offsets = [0, 32], sizes = [8, 8], strides = [1, 1]} : vector<16x64xf32> to vector<8x8xf32>
    %112 = vector.extract_strided_slice %40 {offsets = [0, 40], sizes = [8, 8], strides = [1, 1]} : vector<16x64xf32> to vector<8x8xf32>
    %113 = vector.extract_strided_slice %40 {offsets = [0, 48], sizes = [8, 8], strides = [1, 1]} : vector<16x64xf32> to vector<8x8xf32>
    %114 = vector.extract_strided_slice %40 {offsets = [0, 56], sizes = [8, 8], strides = [1, 1]} : vector<16x64xf32> to vector<8x8xf32>
    %115 = vector.extract_strided_slice %40 {offsets = [8, 0], sizes = [8, 8], strides = [1, 1]} : vector<16x64xf32> to vector<8x8xf32>
    %116 = vector.extract_strided_slice %40 {offsets = [8, 8], sizes = [8, 8], strides = [1, 1]} : vector<16x64xf32> to vector<8x8xf32>
    %117 = vector.extract_strided_slice %40 {offsets = [8, 16], sizes = [8, 8], strides = [1, 1]} : vector<16x64xf32> to vector<8x8xf32>
    %118 = vector.extract_strided_slice %40 {offsets = [8, 24], sizes = [8, 8], strides = [1, 1]} : vector<16x64xf32> to vector<8x8xf32>
    %119 = vector.extract_strided_slice %40 {offsets = [8, 32], sizes = [8, 8], strides = [1, 1]} : vector<16x64xf32> to vector<8x8xf32>
    %120 = vector.extract_strided_slice %40 {offsets = [8, 40], sizes = [8, 8], strides = [1, 1]} : vector<16x64xf32> to vector<8x8xf32>
    %121 = vector.extract_strided_slice %40 {offsets = [8, 48], sizes = [8, 8], strides = [1, 1]} : vector<16x64xf32> to vector<8x8xf32>
    %122 = vector.extract_strided_slice %40 {offsets = [8, 56], sizes = [8, 8], strides = [1, 1]} : vector<16x64xf32> to vector<8x8xf32>
    %123 = vector.shape_cast %107 : vector<8x8xf32> to vector<1x8x8xf32>
    %124 = vector.shape_cast %108 : vector<8x8xf32> to vector<1x8x8xf32>
    %125 = vector.shape_cast %109 : vector<8x8xf32> to vector<1x8x8xf32>
    %126 = vector.shape_cast %110 : vector<8x8xf32> to vector<1x8x8xf32>
    %127 = vector.shape_cast %111 : vector<8x8xf32> to vector<1x8x8xf32>
    %128 = vector.shape_cast %112 : vector<8x8xf32> to vector<1x8x8xf32>
    %129 = vector.shape_cast %113 : vector<8x8xf32> to vector<1x8x8xf32>
    %130 = vector.shape_cast %114 : vector<8x8xf32> to vector<1x8x8xf32>
    %131 = vector.shape_cast %115 : vector<8x8xf32> to vector<1x8x8xf32>
    %132 = vector.shape_cast %116 : vector<8x8xf32> to vector<1x8x8xf32>
    %133 = vector.shape_cast %117 : vector<8x8xf32> to vector<1x8x8xf32>
    %134 = vector.shape_cast %118 : vector<8x8xf32> to vector<1x8x8xf32>
    %135 = vector.shape_cast %119 : vector<8x8xf32> to vector<1x8x8xf32>
    %136 = vector.shape_cast %120 : vector<8x8xf32> to vector<1x8x8xf32>
    %137 = vector.shape_cast %121 : vector<8x8xf32> to vector<1x8x8xf32>
    %138 = vector.shape_cast %122 : vector<8x8xf32> to vector<1x8x8xf32>
    %139 = tpu.concatenate %123, %124, %125, %126, %127, %128, %129, %130, %131, %132, %133, %134, %135, %136, %137, %138 in 0 : vector<1x8x8xf32>, vector<1x8x8xf32>, vector<1x8x8xf32>, vector<1x8x8xf32>, vector<1x8x8xf32>, vector<1x8x8xf32>, vector<1x8x8xf32>, vector<1x8x8xf32>, vector<1x8x8xf32>, vector<1x8x8xf32>, vector<1x8x8xf32>, vector<1x8x8xf32>, vector<1x8x8xf32>, vector<1x8x8xf32>, vector<1x8x8xf32>, vector<1x8x8xf32> -> vector<16x8x8xf32>
    "tpu.trace_start"() <{level = 10 : i32, message = "gqd,gkd->gqk"}> : () -> ()
    %cst_27 = arith.constant dense<0.000000e+00> : vector<16x8x8xf32>
    %140 = tpu.matmul %73, %106, %cst_27 {dimension_numbers = #tpu.dot_dimension_numbers<[2], [2], [1], [1], [0, 0, 0, 1, 1, 1], [0], [0]>} : vector<16x8x8xf32>, vector<16x8x8xf32>, vector<16x8x8xf32> -> vector<16x8x8xf32>
    "tpu.trace_stop"() : () -> ()
    %cst_28 = arith.constant 0.353553385 : f32
    %141 = vector.broadcast %cst_28 : f32 to vector<16x8x8xf32>
    %142 = arith.mulf %140, %141 : vector<16x8x8xf32>
    %cst_29 = arith.constant dense<0xFF800000> : vector<16x8xf32>
    %143 = vector.multi_reduction <maximumf>, %142, %cst_29 [2] : vector<16x8x8xf32> to vector<16x8xf32>
    %144 = vector.shape_cast %143 : vector<16x8xf32> to vector<16x8x1xf32>
    %145 = vector.broadcast %144 : vector<16x8x1xf32> to vector<16x8x8xf32>
    %146 = arith.subf %142, %145 : vector<16x8x8xf32>
    %147 = math.exp %146 : vector<16x8x8xf32>
    %cst_30 = arith.constant dense<0.000000e+00> : vector<16x8xf32>
    %148 = vector.multi_reduction <add>, %147, %cst_30 [2] : vector<16x8x8xf32> to vector<16x8xf32>
    %149 = vector.shape_cast %148 : vector<16x8xf32> to vector<16x8x1xf32>
    %150 = vector.broadcast %149 : vector<16x8x1xf32> to vector<16x8x8xf32>
    %151 = arith.divf %147, %150 : vector<16x8x8xf32>
    "tpu.trace_start"() <{level = 10 : i32, message = "gqk,gkd->gqd"}> : () -> ()
    %cst_31 = arith.constant dense<0.000000e+00> : vector<16x8x8xf32>
    %152 = tpu.matmul %151, %139, %cst_31 {dimension_numbers = #tpu.dot_dimension_numbers<[2], [1], [1], [2], [0, 0, 0, 1, 1, 2], [0], [0]>} : vector<16x8x8xf32>, vector<16x8x8xf32>, vector<16x8x8xf32> -> vector<16x8x8xf32>
    "tpu.trace_stop"() : () -> ()
    %153 = vector.extract_strided_slice %152 {offsets = [0, 0, 0], sizes = [1, 8, 8], strides = [1, 1, 1]} : vector<16x8x8xf32> to vector<1x8x8xf32>
    %154 = vector.shape_cast %153 : vector<1x8x8xf32> to vector<8x8xf32>
    %155 = vector.extract_strided_slice %152 {offsets = [1, 0, 0], sizes = [1, 8, 8], strides = [1, 1, 1]} : vector<16x8x8xf32> to vector<1x8x8xf32>
    %156 = vector.shape_cast %155 : vector<1x8x8xf32> to vector<8x8xf32>
    %157 = vector.extract_strided_slice %152 {offsets = [2, 0, 0], sizes = [1, 8, 8], strides = [1, 1, 1]} : vector<16x8x8xf32> to vector<1x8x8xf32>
    %158 = vector.shape_cast %157 : vector<1x8x8xf32> to vector<8x8xf32>
    %159 = vector.extract_strided_slice %152 {offsets = [3, 0, 0], sizes = [1, 8, 8], strides = [1, 1, 1]} : vector<16x8x8xf32> to vector<1x8x8xf32>
    %160 = vector.shape_cast %159 : vector<1x8x8xf32> to vector<8x8xf32>
    %161 = vector.extract_strided_slice %152 {offsets = [4, 0, 0], sizes = [1, 8, 8], strides = [1, 1, 1]} : vector<16x8x8xf32> to vector<1x8x8xf32>
    %162 = vector.shape_cast %161 : vector<1x8x8xf32> to vector<8x8xf32>
    %163 = vector.extract_strided_slice %152 {offsets = [5, 0, 0], sizes = [1, 8, 8], strides = [1, 1, 1]} : vector<16x8x8xf32> to vector<1x8x8xf32>
    %164 = vector.shape_cast %163 : vector<1x8x8xf32> to vector<8x8xf32>
    %165 = vector.extract_strided_slice %152 {offsets = [6, 0, 0], sizes = [1, 8, 8], strides = [1, 1, 1]} : vector<16x8x8xf32> to vector<1x8x8xf32>
    %166 = vector.shape_cast %165 : vector<1x8x8xf32> to vector<8x8xf32>
    %167 = vector.extract_strided_slice %152 {offsets = [7, 0, 0], sizes = [1, 8, 8], strides = [1, 1, 1]} : vector<16x8x8xf32> to vector<1x8x8xf32>
    %168 = vector.shape_cast %167 : vector<1x8x8xf32> to vector<8x8xf32>
    %169 = tpu.concatenate %154, %156, %158, %160, %162, %164, %166, %168 in 1 : vector<8x8xf32>, vector<8x8xf32>, vector<8x8xf32>, vector<8x8xf32>, vector<8x8xf32>, vector<8x8xf32>, vector<8x8xf32>, vector<8x8xf32> -> vector<8x64xf32>
    %170 = vector.extract_strided_slice %152 {offsets = [8, 0, 0], sizes = [1, 8, 8], strides = [1, 1, 1]} : vector<16x8x8xf32> to vector<1x8x8xf32>
    %171 = vector.shape_cast %170 : vector<1x8x8xf32> to vector<8x8xf32>
    %172 = vector.extract_strided_slice %152 {offsets = [9, 0, 0], sizes = [1, 8, 8], strides = [1, 1, 1]} : vector<16x8x8xf32> to vector<1x8x8xf32>
    %173 = vector.shape_cast %172 : vector<1x8x8xf32> to vector<8x8xf32>
    %174 = vector.extract_strided_slice %152 {offsets = [10, 0, 0], sizes = [1, 8, 8], strides = [1, 1, 1]} : vector<16x8x8xf32> to vector<1x8x8xf32>
    %175 = vector.shape_cast %174 : vector<1x8x8xf32> to vector<8x8xf32>
    %176 = vector.extract_strided_slice %152 {offsets = [11, 0, 0], sizes = [1, 8, 8], strides = [1, 1, 1]} : vector<16x8x8xf32> to vector<1x8x8xf32>
    %177 = vector.shape_cast %176 : vector<1x8x8xf32> to vector<8x8xf32>
    %178 = vector.extract_strided_slice %152 {offsets = [12, 0, 0], sizes = [1, 8, 8], strides = [1, 1, 1]} : vector<16x8x8xf32> to vector<1x8x8xf32>
    %179 = vector.shape_cast %178 : vector<1x8x8xf32> to vector<8x8xf32>
    %180 = vector.extract_strided_slice %152 {offsets = [13, 0, 0], sizes = [1, 8, 8], strides = [1, 1, 1]} : vector<16x8x8xf32> to vector<1x8x8xf32>
    %181 = vector.shape_cast %180 : vector<1x8x8xf32> to vector<8x8xf32>
    %182 = vector.extract_strided_slice %152 {offsets = [14, 0, 0], sizes = [1, 8, 8], strides = [1, 1, 1]} : vector<16x8x8xf32> to vector<1x8x8xf32>
    %183 = vector.shape_cast %182 : vector<1x8x8xf32> to vector<8x8xf32>
    %184 = vector.extract_strided_slice %152 {offsets = [15, 0, 0], sizes = [1, 8, 8], strides = [1, 1, 1]} : vector<16x8x8xf32> to vector<1x8x8xf32>
    %185 = vector.shape_cast %184 : vector<1x8x8xf32> to vector<8x8xf32>
    %186 = tpu.concatenate %171, %173, %175, %177, %179, %181, %183, %185 in 1 : vector<8x8xf32>, vector<8x8xf32>, vector<8x8xf32>, vector<8x8xf32>, vector<8x8xf32>, vector<8x8xf32>, vector<8x8xf32>, vector<8x8xf32> -> vector<8x64xf32>
    %187 = tpu.concatenate %169, %186 in 0 : vector<8x64xf32>, vector<8x64xf32> -> vector<16x64xf32>
    %188 = arith.truncf %187 : vector<16x64xf32> to vector<16x64xbf16>
    %c0_32 = arith.constant 0 : index
    %c192_33 = arith.constant 192 : index
    %189 = vector.load %arg7[%c0_32, %c192_33] : memref<64x1280xbf16, #tpu.memory_space<vmem>>, vector<64x64xbf16>
    %cst_34 = arith.constant dense<0.000000e+00> : vector<16x64xf32>
    %190 = tpu.matmul %188, %189, %cst_34 {dimension_numbers = #tpu.dot_dimension_numbers<[1], [0], [0], [1], [0, 0, 1, 1], [], []>} : vector<16x64xbf16>, vector<64x64xbf16>, vector<16x64xf32> -> vector<16x64xf32>
    %c0_35 = arith.constant 0 : index
    %c320 = arith.constant 320 : index
    %191 = vector.load %arg10[%c0_35, %c320] : memref<1x1443xf32, #tpu.memory_space<vmem>>, vector<1x64xf32>
    %192 = vector.broadcast %191 : vector<1x64xf32> to vector<16x64xf32>
    %193 = arith.addf %190, %192 : vector<16x64xf32>
    %194 = arith.truncf %193 : vector<16x64xf32> to vector<16x64xbf16>
    %c0_36 = arith.constant 0 : index
    %c256 = arith.constant 256 : index
    %195 = vector.load %arg7[%c0_36, %c256] : memref<64x1280xbf16, #tpu.memory_space<vmem>>, vector<64x64xbf16>
    %cst_37 = arith.constant dense<0.000000e+00> : vector<16x64xf32>
    %196 = tpu.matmul %194, %195, %cst_37 {dimension_numbers = #tpu.dot_dimension_numbers<[1], [0], [0], [1], [0, 0, 1, 1], [], []>} : vector<16x64xbf16>, vector<64x64xbf16>, vector<16x64xf32> -> vector<16x64xf32>
    %c0_38 = arith.constant 0 : index
    %c384 = arith.constant 384 : index
    %197 = vector.load %arg10[%c0_38, %c384] : memref<1x1443xf32, #tpu.memory_space<vmem>>, vector<1x64xf32>
    %198 = vector.broadcast %197 : vector<1x64xf32> to vector<16x64xf32>
    %199 = arith.addf %196, %198 : vector<16x64xf32>
    %200 = arith.negf %199 : vector<16x64xf32>
    %201 = math.exp %200 : vector<16x64xf32>
    %cst_39 = arith.constant 1.000000e+00 : f32
    %202 = vector.broadcast %cst_39 : f32 to vector<16x64xf32>
    %203 = arith.addf %202, %201 : vector<16x64xf32>
    %204 = arith.divf %202, %203 : vector<16x64xf32>
    %205 = arith.negf %204 : vector<16x64xf32>
    %206 = math.exp %205 : vector<16x64xf32>
    %cst_40 = arith.constant 1.000000e+00 : f32
    %207 = vector.broadcast %cst_40 : f32 to vector<16x64xf32>
    %208 = arith.addf %207, %206 : vector<16x64xf32>
    %209 = arith.divf %207, %208 : vector<16x64xf32>
    %210 = arith.mulf %193, %209 : vector<16x64xf32>
    %211 = arith.truncf %210 : vector<16x64xf32> to vector<16x64xbf16>
    %c0_41 = arith.constant 0 : index
    %c512 = arith.constant 512 : index
    %212 = vector.load %arg7[%c0_41, %c512] : memref<64x1280xbf16, #tpu.memory_space<vmem>>, vector<64x384xbf16>
    %cst_42 = arith.constant dense<0.000000e+00> : vector<16x384xf32>
    %213 = tpu.matmul %211, %212, %cst_42 {dimension_numbers = #tpu.dot_dimension_numbers<[1], [0], [0], [1], [0, 0, 1, 1], [], []>} : vector<16x64xbf16>, vector<64x384xbf16>, vector<16x384xf32> -> vector<16x384xf32>
    %c0_43 = arith.constant 0 : index
    %c640 = arith.constant 640 : index
    %214 = vector.load %arg10[%c0_43, %c640] : memref<1x1443xf32, #tpu.memory_space<vmem>>, vector<1x384xf32>
    %215 = vector.broadcast %214 : vector<1x384xf32> to vector<16x384xf32>
    %216 = arith.addf %213, %215 : vector<16x384xf32>
    %217 = arith.truncf %1 : vector<16x64xf32> to vector<16x64xbf16>
    %c0_44 = arith.constant 0 : index
    %c320_45 = arith.constant 320 : index
    %218 = vector.load %arg7[%c0_44, %c320_45] : memref<64x1280xbf16, #tpu.memory_space<vmem>>, vector<64x64xbf16>
    %cst_46 = arith.constant dense<0.000000e+00> : vector<16x64xf32>
    %219 = tpu.matmul %217, %218, %cst_46 {dimension_numbers = #tpu.dot_dimension_numbers<[1], [0], [0], [1], [0, 0, 1, 1], [], []>} : vector<16x64xbf16>, vector<64x64xbf16>, vector<16x64xf32> -> vector<16x64xf32>
    %c0_47 = arith.constant 0 : index
    %c448 = arith.constant 448 : index
    %220 = vector.load %arg10[%c0_47, %c448] : memref<1x1443xf32, #tpu.memory_space<vmem>>, vector<1x64xf32>
    %221 = vector.broadcast %220 : vector<1x64xf32> to vector<16x64xf32>
    %222 = arith.addf %219, %221 : vector<16x64xf32>
    %223 = arith.truncf %3 : vector<16x64xf32> to vector<16x64xbf16>
    %c0_48 = arith.constant 0 : index
    %c384_49 = arith.constant 384 : index
    %224 = vector.load %arg7[%c0_48, %c384_49] : memref<64x1280xbf16, #tpu.memory_space<vmem>>, vector<64x64xbf16>
    %cst_50 = arith.constant dense<0.000000e+00> : vector<16x64xf32>
    %225 = tpu.matmul %223, %224, %cst_50 {dimension_numbers = #tpu.dot_dimension_numbers<[1], [0], [0], [1], [0, 0, 1, 1], [], []>} : vector<16x64xbf16>, vector<64x64xbf16>, vector<16x64xf32> -> vector<16x64xf32>
    %c0_51 = arith.constant 0 : index
    %c512_52 = arith.constant 512 : index
    %226 = vector.load %arg10[%c0_51, %c512_52] : memref<1x1443xf32, #tpu.memory_space<vmem>>, vector<1x64xf32>
    %227 = vector.broadcast %226 : vector<1x64xf32> to vector<16x64xf32>
    %228 = arith.addf %225, %227 : vector<16x64xf32>
    %229 = arith.truncf %15 : vector<16x64xf32> to vector<16x64xbf16>
    %c0_53 = arith.constant 0 : index
    %c448_54 = arith.constant 448 : index
    %230 = vector.load %arg7[%c0_53, %c448_54] : memref<64x1280xbf16, #tpu.memory_space<vmem>>, vector<64x64xbf16>
    %cst_55 = arith.constant dense<0.000000e+00> : vector<16x64xf32>
    %231 = tpu.matmul %229, %230, %cst_55 {dimension_numbers = #tpu.dot_dimension_numbers<[1], [0], [0], [1], [0, 0, 1, 1], [], []>} : vector<16x64xbf16>, vector<64x64xbf16>, vector<16x64xf32> -> vector<16x64xf32>
    %c0_56 = arith.constant 0 : index
    %c576 = arith.constant 576 : index
    %232 = vector.load %arg10[%c0_56, %c576] : memref<1x1443xf32, #tpu.memory_space<vmem>>, vector<1x64xf32>
    %233 = vector.broadcast %232 : vector<1x64xf32> to vector<16x64xf32>
    %234 = arith.addf %231, %233 : vector<16x64xf32>
    %235 = vector.extract_strided_slice %216 {offsets = [0, 0], sizes = [16, 64], strides = [1, 1]} : vector<16x384xf32> to vector<16x64xf32>
    %236 = vector.extract_strided_slice %216 {offsets = [0, 64], sizes = [16, 64], strides = [1, 1]} : vector<16x384xf32> to vector<16x64xf32>
    %237 = vector.extract_strided_slice %222 {offsets = [0, 0], sizes = [8, 8], strides = [1, 1]} : vector<16x64xf32> to vector<8x8xf32>
    %238 = vector.extract_strided_slice %222 {offsets = [0, 8], sizes = [8, 8], strides = [1, 1]} : vector<16x64xf32> to vector<8x8xf32>
    %239 = vector.extract_strided_slice %222 {offsets = [0, 16], sizes = [8, 8], strides = [1, 1]} : vector<16x64xf32> to vector<8x8xf32>
    %240 = vector.extract_strided_slice %222 {offsets = [0, 24], sizes = [8, 8], strides = [1, 1]} : vector<16x64xf32> to vector<8x8xf32>
    %241 = vector.extract_strided_slice %222 {offsets = [0, 32], sizes = [8, 8], strides = [1, 1]} : vector<16x64xf32> to vector<8x8xf32>
    %242 = vector.extract_strided_slice %222 {offsets = [0, 40], sizes = [8, 8], strides = [1, 1]} : vector<16x64xf32> to vector<8x8xf32>
    %243 = vector.extract_strided_slice %222 {offsets = [0, 48], sizes = [8, 8], strides = [1, 1]} : vector<16x64xf32> to vector<8x8xf32>
    %244 = vector.extract_strided_slice %222 {offsets = [0, 56], sizes = [8, 8], strides = [1, 1]} : vector<16x64xf32> to vector<8x8xf32>
    %245 = vector.extract_strided_slice %222 {offsets = [8, 0], sizes = [8, 8], strides = [1, 1]} : vector<16x64xf32> to vector<8x8xf32>
    %246 = vector.extract_strided_slice %222 {offsets = [8, 8], sizes = [8, 8], strides = [1, 1]} : vector<16x64xf32> to vector<8x8xf32>
    %247 = vector.extract_strided_slice %222 {offsets = [8, 16], sizes = [8, 8], strides = [1, 1]} : vector<16x64xf32> to vector<8x8xf32>
    %248 = vector.extract_strided_slice %222 {offsets = [8, 24], sizes = [8, 8], strides = [1, 1]} : vector<16x64xf32> to vector<8x8xf32>
    %249 = vector.extract_strided_slice %222 {offsets = [8, 32], sizes = [8, 8], strides = [1, 1]} : vector<16x64xf32> to vector<8x8xf32>
    %250 = vector.extract_strided_slice %222 {offsets = [8, 40], sizes = [8, 8], strides = [1, 1]} : vector<16x64xf32> to vector<8x8xf32>
    %251 = vector.extract_strided_slice %222 {offsets = [8, 48], sizes = [8, 8], strides = [1, 1]} : vector<16x64xf32> to vector<8x8xf32>
    %252 = vector.extract_strided_slice %222 {offsets = [8, 56], sizes = [8, 8], strides = [1, 1]} : vector<16x64xf32> to vector<8x8xf32>
    %253 = vector.shape_cast %237 : vector<8x8xf32> to vector<1x8x8xf32>
    %254 = vector.shape_cast %238 : vector<8x8xf32> to vector<1x8x8xf32>
    %255 = vector.shape_cast %239 : vector<8x8xf32> to vector<1x8x8xf32>
    %256 = vector.shape_cast %240 : vector<8x8xf32> to vector<1x8x8xf32>
    %257 = vector.shape_cast %241 : vector<8x8xf32> to vector<1x8x8xf32>
    %258 = vector.shape_cast %242 : vector<8x8xf32> to vector<1x8x8xf32>
    %259 = vector.shape_cast %243 : vector<8x8xf32> to vector<1x8x8xf32>
    %260 = vector.shape_cast %244 : vector<8x8xf32> to vector<1x8x8xf32>
    %261 = vector.shape_cast %245 : vector<8x8xf32> to vector<1x8x8xf32>
    %262 = vector.shape_cast %246 : vector<8x8xf32> to vector<1x8x8xf32>
    %263 = vector.shape_cast %247 : vector<8x8xf32> to vector<1x8x8xf32>
    %264 = vector.shape_cast %248 : vector<8x8xf32> to vector<1x8x8xf32>
    %265 = vector.shape_cast %249 : vector<8x8xf32> to vector<1x8x8xf32>
    %266 = vector.shape_cast %250 : vector<8x8xf32> to vector<1x8x8xf32>
    %267 = vector.shape_cast %251 : vector<8x8xf32> to vector<1x8x8xf32>
    %268 = vector.shape_cast %252 : vector<8x8xf32> to vector<1x8x8xf32>
    %269 = tpu.concatenate %253, %254, %255, %256, %257, %258, %259, %260, %261, %262, %263, %264, %265, %266, %267, %268 in 0 : vector<1x8x8xf32>, vector<1x8x8xf32>, vector<1x8x8xf32>, vector<1x8x8xf32>, vector<1x8x8xf32>, vector<1x8x8xf32>, vector<1x8x8xf32>, vector<1x8x8xf32>, vector<1x8x8xf32>, vector<1x8x8xf32>, vector<1x8x8xf32>, vector<1x8x8xf32>, vector<1x8x8xf32>, vector<1x8x8xf32>, vector<1x8x8xf32>, vector<1x8x8xf32> -> vector<16x8x8xf32>
    %270 = vector.extract_strided_slice %235 {offsets = [0, 0], sizes = [8, 8], strides = [1, 1]} : vector<16x64xf32> to vector<8x8xf32>
    %271 = vector.extract_strided_slice %235 {offsets = [0, 8], sizes = [8, 8], strides = [1, 1]} : vector<16x64xf32> to vector<8x8xf32>
    %272 = vector.extract_strided_slice %235 {offsets = [0, 16], sizes = [8, 8], strides = [1, 1]} : vector<16x64xf32> to vector<8x8xf32>
    %273 = vector.extract_strided_slice %235 {offsets = [0, 24], sizes = [8, 8], strides = [1, 1]} : vector<16x64xf32> to vector<8x8xf32>
    %274 = vector.extract_strided_slice %235 {offsets = [0, 32], sizes = [8, 8], strides = [1, 1]} : vector<16x64xf32> to vector<8x8xf32>
    %275 = vector.extract_strided_slice %235 {offsets = [0, 40], sizes = [8, 8], strides = [1, 1]} : vector<16x64xf32> to vector<8x8xf32>
    %276 = vector.extract_strided_slice %235 {offsets = [0, 48], sizes = [8, 8], strides = [1, 1]} : vector<16x64xf32> to vector<8x8xf32>
    %277 = vector.extract_strided_slice %235 {offsets = [0, 56], sizes = [8, 8], strides = [1, 1]} : vector<16x64xf32> to vector<8x8xf32>
    %278 = vector.extract_strided_slice %235 {offsets = [8, 0], sizes = [8, 8], strides = [1, 1]} : vector<16x64xf32> to vector<8x8xf32>
    %279 = vector.extract_strided_slice %235 {offsets = [8, 8], sizes = [8, 8], strides = [1, 1]} : vector<16x64xf32> to vector<8x8xf32>
    %280 = vector.extract_strided_slice %235 {offsets = [8, 16], sizes = [8, 8], strides = [1, 1]} : vector<16x64xf32> to vector<8x8xf32>
    %281 = vector.extract_strided_slice %235 {offsets = [8, 24], sizes = [8, 8], strides = [1, 1]} : vector<16x64xf32> to vector<8x8xf32>
    %282 = vector.extract_strided_slice %235 {offsets = [8, 32], sizes = [8, 8], strides = [1, 1]} : vector<16x64xf32> to vector<8x8xf32>
    %283 = vector.extract_strided_slice %235 {offsets = [8, 40], sizes = [8, 8], strides = [1, 1]} : vector<16x64xf32> to vector<8x8xf32>
    %284 = vector.extract_strided_slice %235 {offsets = [8, 48], sizes = [8, 8], strides = [1, 1]} : vector<16x64xf32> to vector<8x8xf32>
    %285 = vector.extract_strided_slice %235 {offsets = [8, 56], sizes = [8, 8], strides = [1, 1]} : vector<16x64xf32> to vector<8x8xf32>
    %286 = vector.shape_cast %270 : vector<8x8xf32> to vector<1x8x8xf32>
    %287 = vector.shape_cast %271 : vector<8x8xf32> to vector<1x8x8xf32>
    %288 = vector.shape_cast %272 : vector<8x8xf32> to vector<1x8x8xf32>
    %289 = vector.shape_cast %273 : vector<8x8xf32> to vector<1x8x8xf32>
    %290 = vector.shape_cast %274 : vector<8x8xf32> to vector<1x8x8xf32>
    %291 = vector.shape_cast %275 : vector<8x8xf32> to vector<1x8x8xf32>
    %292 = vector.shape_cast %276 : vector<8x8xf32> to vector<1x8x8xf32>
    %293 = vector.shape_cast %277 : vector<8x8xf32> to vector<1x8x8xf32>
    %294 = vector.shape_cast %278 : vector<8x8xf32> to vector<1x8x8xf32>
    %295 = vector.shape_cast %279 : vector<8x8xf32> to vector<1x8x8xf32>
    %296 = vector.shape_cast %280 : vector<8x8xf32> to vector<1x8x8xf32>
    %297 = vector.shape_cast %281 : vector<8x8xf32> to vector<1x8x8xf32>
    %298 = vector.shape_cast %282 : vector<8x8xf32> to vector<1x8x8xf32>
    %299 = vector.shape_cast %283 : vector<8x8xf32> to vector<1x8x8xf32>
    %300 = vector.shape_cast %284 : vector<8x8xf32> to vector<1x8x8xf32>
    %301 = vector.shape_cast %285 : vector<8x8xf32> to vector<1x8x8xf32>
    %302 = tpu.concatenate %286, %287, %288, %289, %290, %291, %292, %293, %294, %295, %296, %297, %298, %299, %300, %301 in 0 : vector<1x8x8xf32>, vector<1x8x8xf32>, vector<1x8x8xf32>, vector<1x8x8xf32>, vector<1x8x8xf32>, vector<1x8x8xf32>, vector<1x8x8xf32>, vector<1x8x8xf32>, vector<1x8x8xf32>, vector<1x8x8xf32>, vector<1x8x8xf32>, vector<1x8x8xf32>, vector<1x8x8xf32>, vector<1x8x8xf32>, vector<1x8x8xf32>, vector<1x8x8xf32> -> vector<16x8x8xf32>
    %303 = vector.extract_strided_slice %236 {offsets = [0, 0], sizes = [8, 8], strides = [1, 1]} : vector<16x64xf32> to vector<8x8xf32>
    %304 = vector.extract_strided_slice %236 {offsets = [0, 8], sizes = [8, 8], strides = [1, 1]} : vector<16x64xf32> to vector<8x8xf32>
    %305 = vector.extract_strided_slice %236 {offsets = [0, 16], sizes = [8, 8], strides = [1, 1]} : vector<16x64xf32> to vector<8x8xf32>
    %306 = vector.extract_strided_slice %236 {offsets = [0, 24], sizes = [8, 8], strides = [1, 1]} : vector<16x64xf32> to vector<8x8xf32>
    %307 = vector.extract_strided_slice %236 {offsets = [0, 32], sizes = [8, 8], strides = [1, 1]} : vector<16x64xf32> to vector<8x8xf32>
    %308 = vector.extract_strided_slice %236 {offsets = [0, 40], sizes = [8, 8], strides = [1, 1]} : vector<16x64xf32> to vector<8x8xf32>
    %309 = vector.extract_strided_slice %236 {offsets = [0, 48], sizes = [8, 8], strides = [1, 1]} : vector<16x64xf32> to vector<8x8xf32>
    %310 = vector.extract_strided_slice %236 {offsets = [0, 56], sizes = [8, 8], strides = [1, 1]} : vector<16x64xf32> to vector<8x8xf32>
    %311 = vector.extract_strided_slice %236 {offsets = [8, 0], sizes = [8, 8], strides = [1, 1]} : vector<16x64xf32> to vector<8x8xf32>
    %312 = vector.extract_strided_slice %236 {offsets = [8, 8], sizes = [8, 8], strides = [1, 1]} : vector<16x64xf32> to vector<8x8xf32>
    %313 = vector.extract_strided_slice %236 {offsets = [8, 16], sizes = [8, 8], strides = [1, 1]} : vector<16x64xf32> to vector<8x8xf32>
    %314 = vector.extract_strided_slice %236 {offsets = [8, 24], sizes = [8, 8], strides = [1, 1]} : vector<16x64xf32> to vector<8x8xf32>
    %315 = vector.extract_strided_slice %236 {offsets = [8, 32], sizes = [8, 8], strides = [1, 1]} : vector<16x64xf32> to vector<8x8xf32>
    %316 = vector.extract_strided_slice %236 {offsets = [8, 40], sizes = [8, 8], strides = [1, 1]} : vector<16x64xf32> to vector<8x8xf32>
    %317 = vector.extract_strided_slice %236 {offsets = [8, 48], sizes = [8, 8], strides = [1, 1]} : vector<16x64xf32> to vector<8x8xf32>
    %318 = vector.extract_strided_slice %236 {offsets = [8, 56], sizes = [8, 8], strides = [1, 1]} : vector<16x64xf32> to vector<8x8xf32>
    %319 = vector.shape_cast %303 : vector<8x8xf32> to vector<1x8x8xf32>
    %320 = vector.shape_cast %304 : vector<8x8xf32> to vector<1x8x8xf32>
    %321 = vector.shape_cast %305 : vector<8x8xf32> to vector<1x8x8xf32>
    %322 = vector.shape_cast %306 : vector<8x8xf32> to vector<1x8x8xf32>
    %323 = vector.shape_cast %307 : vector<8x8xf32> to vector<1x8x8xf32>
    %324 = vector.shape_cast %308 : vector<8x8xf32> to vector<1x8x8xf32>
    %325 = vector.shape_cast %309 : vector<8x8xf32> to vector<1x8x8xf32>
    %326 = vector.shape_cast %310 : vector<8x8xf32> to vector<1x8x8xf32>
    %327 = vector.shape_cast %311 : vector<8x8xf32> to vector<1x8x8xf32>
    %328 = vector.shape_cast %312 : vector<8x8xf32> to vector<1x8x8xf32>
    %329 = vector.shape_cast %313 : vector<8x8xf32> to vector<1x8x8xf32>
    %330 = vector.shape_cast %314 : vector<8x8xf32> to vector<1x8x8xf32>
    %331 = vector.shape_cast %315 : vector<8x8xf32> to vector<1x8x8xf32>
    %332 = vector.shape_cast %316 : vector<8x8xf32> to vector<1x8x8xf32>
    %333 = vector.shape_cast %317 : vector<8x8xf32> to vector<1x8x8xf32>
    %334 = vector.shape_cast %318 : vector<8x8xf32> to vector<1x8x8xf32>
    %335 = tpu.concatenate %319, %320, %321, %322, %323, %324, %325, %326, %327, %328, %329, %330, %331, %332, %333, %334 in 0 : vector<1x8x8xf32>, vector<1x8x8xf32>, vector<1x8x8xf32>, vector<1x8x8xf32>, vector<1x8x8xf32>, vector<1x8x8xf32>, vector<1x8x8xf32>, vector<1x8x8xf32>, vector<1x8x8xf32>, vector<1x8x8xf32>, vector<1x8x8xf32>, vector<1x8x8xf32>, vector<1x8x8xf32>, vector<1x8x8xf32>, vector<1x8x8xf32>, vector<1x8x8xf32> -> vector<16x8x8xf32>
    "tpu.trace_start"() <{level = 10 : i32, message = "gqd,gkd->gqk"}> : () -> ()
    %cst_57 = arith.constant dense<0.000000e+00> : vector<16x8x8xf32>
    %336 = tpu.matmul %269, %302, %cst_57 {dimension_numbers = #tpu.dot_dimension_numbers<[2], [2], [1], [1], [0, 0, 0, 1, 1, 1], [0], [0]>} : vector<16x8x8xf32>, vector<16x8x8xf32>, vector<16x8x8xf32> -> vector<16x8x8xf32>
    "tpu.trace_stop"() : () -> ()
    %cst_58 = arith.constant 0.353553385 : f32
    %337 = vector.broadcast %cst_58 : f32 to vector<16x8x8xf32>
    %338 = arith.mulf %336, %337 : vector<16x8x8xf32>
    %cst_59 = arith.constant dense<0xFF800000> : vector<16x8xf32>
    %339 = vector.multi_reduction <maximumf>, %338, %cst_59 [2] : vector<16x8x8xf32> to vector<16x8xf32>
    %340 = vector.shape_cast %339 : vector<16x8xf32> to vector<16x8x1xf32>
    %341 = vector.broadcast %340 : vector<16x8x1xf32> to vector<16x8x8xf32>
    %342 = arith.subf %338, %341 : vector<16x8x8xf32>
    %343 = math.exp %342 : vector<16x8x8xf32>
    %cst_60 = arith.constant dense<0.000000e+00> : vector<16x8xf32>
    %344 = vector.multi_reduction <add>, %343, %cst_60 [2] : vector<16x8x8xf32> to vector<16x8xf32>
    %345 = vector.shape_cast %344 : vector<16x8xf32> to vector<16x8x1xf32>
    %346 = vector.broadcast %345 : vector<16x8x1xf32> to vector<16x8x8xf32>
    %347 = arith.divf %343, %346 : vector<16x8x8xf32>
    "tpu.trace_start"() <{level = 10 : i32, message = "gqk,gkd->gqd"}> : () -> ()
    %cst_61 = arith.constant dense<0.000000e+00> : vector<16x8x8xf32>
    %348 = tpu.matmul %347, %335, %cst_61 {dimension_numbers = #tpu.dot_dimension_numbers<[2], [1], [1], [2], [0, 0, 0, 1, 1, 2], [0], [0]>} : vector<16x8x8xf32>, vector<16x8x8xf32>, vector<16x8x8xf32> -> vector<16x8x8xf32>
    "tpu.trace_stop"() : () -> ()
    %349 = vector.extract_strided_slice %348 {offsets = [0, 0, 0], sizes = [1, 8, 8], strides = [1, 1, 1]} : vector<16x8x8xf32> to vector<1x8x8xf32>
    %350 = vector.shape_cast %349 : vector<1x8x8xf32> to vector<8x8xf32>
    %351 = vector.extract_strided_slice %348 {offsets = [1, 0, 0], sizes = [1, 8, 8], strides = [1, 1, 1]} : vector<16x8x8xf32> to vector<1x8x8xf32>
    %352 = vector.shape_cast %351 : vector<1x8x8xf32> to vector<8x8xf32>
    %353 = vector.extract_strided_slice %348 {offsets = [2, 0, 0], sizes = [1, 8, 8], strides = [1, 1, 1]} : vector<16x8x8xf32> to vector<1x8x8xf32>
    %354 = vector.shape_cast %353 : vector<1x8x8xf32> to vector<8x8xf32>
    %355 = vector.extract_strided_slice %348 {offsets = [3, 0, 0], sizes = [1, 8, 8], strides = [1, 1, 1]} : vector<16x8x8xf32> to vector<1x8x8xf32>
    %356 = vector.shape_cast %355 : vector<1x8x8xf32> to vector<8x8xf32>
    %357 = vector.extract_strided_slice %348 {offsets = [4, 0, 0], sizes = [1, 8, 8], strides = [1, 1, 1]} : vector<16x8x8xf32> to vector<1x8x8xf32>
    %358 = vector.shape_cast %357 : vector<1x8x8xf32> to vector<8x8xf32>
    %359 = vector.extract_strided_slice %348 {offsets = [5, 0, 0], sizes = [1, 8, 8], strides = [1, 1, 1]} : vector<16x8x8xf32> to vector<1x8x8xf32>
    %360 = vector.shape_cast %359 : vector<1x8x8xf32> to vector<8x8xf32>
    %361 = vector.extract_strided_slice %348 {offsets = [6, 0, 0], sizes = [1, 8, 8], strides = [1, 1, 1]} : vector<16x8x8xf32> to vector<1x8x8xf32>
    %362 = vector.shape_cast %361 : vector<1x8x8xf32> to vector<8x8xf32>
    %363 = vector.extract_strided_slice %348 {offsets = [7, 0, 0], sizes = [1, 8, 8], strides = [1, 1, 1]} : vector<16x8x8xf32> to vector<1x8x8xf32>
    %364 = vector.shape_cast %363 : vector<1x8x8xf32> to vector<8x8xf32>
    %365 = tpu.concatenate %350, %352, %354, %356, %358, %360, %362, %364 in 1 : vector<8x8xf32>, vector<8x8xf32>, vector<8x8xf32>, vector<8x8xf32>, vector<8x8xf32>, vector<8x8xf32>, vector<8x8xf32>, vector<8x8xf32> -> vector<8x64xf32>
    %366 = vector.extract_strided_slice %348 {offsets = [8, 0, 0], sizes = [1, 8, 8], strides = [1, 1, 1]} : vector<16x8x8xf32> to vector<1x8x8xf32>
    %367 = vector.shape_cast %366 : vector<1x8x8xf32> to vector<8x8xf32>
    %368 = vector.extract_strided_slice %348 {offsets = [9, 0, 0], sizes = [1, 8, 8], strides = [1, 1, 1]} : vector<16x8x8xf32> to vector<1x8x8xf32>
    %369 = vector.shape_cast %368 : vector<1x8x8xf32> to vector<8x8xf32>
    %370 = vector.extract_strided_slice %348 {offsets = [10, 0, 0], sizes = [1, 8, 8], strides = [1, 1, 1]} : vector<16x8x8xf32> to vector<1x8x8xf32>
    %371 = vector.shape_cast %370 : vector<1x8x8xf32> to vector<8x8xf32>
    %372 = vector.extract_strided_slice %348 {offsets = [11, 0, 0], sizes = [1, 8, 8], strides = [1, 1, 1]} : vector<16x8x8xf32> to vector<1x8x8xf32>
    %373 = vector.shape_cast %372 : vector<1x8x8xf32> to vector<8x8xf32>
    %374 = vector.extract_strided_slice %348 {offsets = [12, 0, 0], sizes = [1, 8, 8], strides = [1, 1, 1]} : vector<16x8x8xf32> to vector<1x8x8xf32>
    %375 = vector.shape_cast %374 : vector<1x8x8xf32> to vector<8x8xf32>
    %376 = vector.extract_strided_slice %348 {offsets = [13, 0, 0], sizes = [1, 8, 8], strides = [1, 1, 1]} : vector<16x8x8xf32> to vector<1x8x8xf32>
    %377 = vector.shape_cast %376 : vector<1x8x8xf32> to vector<8x8xf32>
    %378 = vector.extract_strided_slice %348 {offsets = [14, 0, 0], sizes = [1, 8, 8], strides = [1, 1, 1]} : vector<16x8x8xf32> to vector<1x8x8xf32>
    %379 = vector.shape_cast %378 : vector<1x8x8xf32> to vector<8x8xf32>
    %380 = vector.extract_strided_slice %348 {offsets = [15, 0, 0], sizes = [1, 8, 8], strides = [1, 1, 1]} : vector<16x8x8xf32> to vector<1x8x8xf32>
    %381 = vector.shape_cast %380 : vector<1x8x8xf32> to vector<8x8xf32>
    %382 = tpu.concatenate %367, %369, %371, %373, %375, %377, %379, %381 in 1 : vector<8x8xf32>, vector<8x8xf32>, vector<8x8xf32>, vector<8x8xf32>, vector<8x8xf32>, vector<8x8xf32>, vector<8x8xf32>, vector<8x8xf32> -> vector<8x64xf32>
    %383 = tpu.concatenate %365, %382 in 0 : vector<8x64xf32>, vector<8x64xf32> -> vector<16x64xf32>
    %384 = arith.truncf %383 : vector<16x64xf32> to vector<16x64xbf16>
    %c0_62 = arith.constant 0 : index
    %c896 = arith.constant 896 : index
    %385 = vector.load %arg7[%c0_62, %c896] : memref<64x1280xbf16, #tpu.memory_space<vmem>>, vector<64x64xbf16>
    %cst_63 = arith.constant dense<0.000000e+00> : vector<16x64xf32>
    %386 = tpu.matmul %384, %385, %cst_63 {dimension_numbers = #tpu.dot_dimension_numbers<[1], [0], [0], [1], [0, 0, 1, 1], [], []>} : vector<16x64xbf16>, vector<64x64xbf16>, vector<16x64xf32> -> vector<16x64xf32>
    %c0_64 = arith.constant 0 : index
    %c1024 = arith.constant 1024 : index
    %387 = vector.load %arg10[%c0_64, %c1024] : memref<1x1443xf32, #tpu.memory_space<vmem>>, vector<1x64xf32>
    %388 = vector.broadcast %387 : vector<1x64xf32> to vector<16x64xf32>
    %389 = arith.addf %386, %388 : vector<16x64xf32>
    %390 = vector.extract_strided_slice %216 {offsets = [0, 128], sizes = [16, 64], strides = [1, 1]} : vector<16x384xf32> to vector<16x64xf32>
    %391 = vector.extract_strided_slice %216 {offsets = [0, 192], sizes = [16, 64], strides = [1, 1]} : vector<16x384xf32> to vector<16x64xf32>
    %392 = vector.extract_strided_slice %228 {offsets = [0, 0], sizes = [8, 8], strides = [1, 1]} : vector<16x64xf32> to vector<8x8xf32>
    %393 = vector.extract_strided_slice %228 {offsets = [0, 8], sizes = [8, 8], strides = [1, 1]} : vector<16x64xf32> to vector<8x8xf32>
    %394 = vector.extract_strided_slice %228 {offsets = [0, 16], sizes = [8, 8], strides = [1, 1]} : vector<16x64xf32> to vector<8x8xf32>
    %395 = vector.extract_strided_slice %228 {offsets = [0, 24], sizes = [8, 8], strides = [1, 1]} : vector<16x64xf32> to vector<8x8xf32>
    %396 = vector.extract_strided_slice %228 {offsets = [0, 32], sizes = [8, 8], strides = [1, 1]} : vector<16x64xf32> to vector<8x8xf32>
    %397 = vector.extract_strided_slice %228 {offsets = [0, 40], sizes = [8, 8], strides = [1, 1]} : vector<16x64xf32> to vector<8x8xf32>
    %398 = vector.extract_strided_slice %228 {offsets = [0, 48], sizes = [8, 8], strides = [1, 1]} : vector<16x64xf32> to vector<8x8xf32>
    %399 = vector.extract_strided_slice %228 {offsets = [0, 56], sizes = [8, 8], strides = [1, 1]} : vector<16x64xf32> to vector<8x8xf32>
    %400 = vector.extract_strided_slice %228 {offsets = [8, 0], sizes = [8, 8], strides = [1, 1]} : vector<16x64xf32> to vector<8x8xf32>
    %401 = vector.extract_strided_slice %228 {offsets = [8, 8], sizes = [8, 8], strides = [1, 1]} : vector<16x64xf32> to vector<8x8xf32>
    %402 = vector.extract_strided_slice %228 {offsets = [8, 16], sizes = [8, 8], strides = [1, 1]} : vector<16x64xf32> to vector<8x8xf32>
    %403 = vector.extract_strided_slice %228 {offsets = [8, 24], sizes = [8, 8], strides = [1, 1]} : vector<16x64xf32> to vector<8x8xf32>
    %404 = vector.extract_strided_slice %228 {offsets = [8, 32], sizes = [8, 8], strides = [1, 1]} : vector<16x64xf32> to vector<8x8xf32>
    %405 = vector.extract_strided_slice %228 {offsets = [8, 40], sizes = [8, 8], strides = [1, 1]} : vector<16x64xf32> to vector<8x8xf32>
    %406 = vector.extract_strided_slice %228 {offsets = [8, 48], sizes = [8, 8], strides = [1, 1]} : vector<16x64xf32> to vector<8x8xf32>
    %407 = vector.extract_strided_slice %228 {offsets = [8, 56], sizes = [8, 8], strides = [1, 1]} : vector<16x64xf32> to vector<8x8xf32>
    %408 = vector.shape_cast %392 : vector<8x8xf32> to vector<1x8x8xf32>
    %409 = vector.shape_cast %393 : vector<8x8xf32> to vector<1x8x8xf32>
    %410 = vector.shape_cast %394 : vector<8x8xf32> to vector<1x8x8xf32>
    %411 = vector.shape_cast %395 : vector<8x8xf32> to vector<1x8x8xf32>
    %412 = vector.shape_cast %396 : vector<8x8xf32> to vector<1x8x8xf32>
    %413 = vector.shape_cast %397 : vector<8x8xf32> to vector<1x8x8xf32>
    %414 = vector.shape_cast %398 : vector<8x8xf32> to vector<1x8x8xf32>
    %415 = vector.shape_cast %399 : vector<8x8xf32> to vector<1x8x8xf32>
    %416 = vector.shape_cast %400 : vector<8x8xf32> to vector<1x8x8xf32>
    %417 = vector.shape_cast %401 : vector<8x8xf32> to vector<1x8x8xf32>
    %418 = vector.shape_cast %402 : vector<8x8xf32> to vector<1x8x8xf32>
    %419 = vector.shape_cast %403 : vector<8x8xf32> to vector<1x8x8xf32>
    %420 = vector.shape_cast %404 : vector<8x8xf32> to vector<1x8x8xf32>
    %421 = vector.shape_cast %405 : vector<8x8xf32> to vector<1x8x8xf32>
    %422 = vector.shape_cast %406 : vector<8x8xf32> to vector<1x8x8xf32>
    %423 = vector.shape_cast %407 : vector<8x8xf32> to vector<1x8x8xf32>
    %424 = tpu.concatenate %408, %409, %410, %411, %412, %413, %414, %415, %416, %417, %418, %419, %420, %421, %422, %423 in 0 : vector<1x8x8xf32>, vector<1x8x8xf32>, vector<1x8x8xf32>, vector<1x8x8xf32>, vector<1x8x8xf32>, vector<1x8x8xf32>, vector<1x8x8xf32>, vector<1x8x8xf32>, vector<1x8x8xf32>, vector<1x8x8xf32>, vector<1x8x8xf32>, vector<1x8x8xf32>, vector<1x8x8xf32>, vector<1x8x8xf32>, vector<1x8x8xf32>, vector<1x8x8xf32> -> vector<16x8x8xf32>
    %425 = vector.extract_strided_slice %390 {offsets = [0, 0], sizes = [8, 8], strides = [1, 1]} : vector<16x64xf32> to vector<8x8xf32>
    %426 = vector.extract_strided_slice %390 {offsets = [0, 8], sizes = [8, 8], strides = [1, 1]} : vector<16x64xf32> to vector<8x8xf32>
    %427 = vector.extract_strided_slice %390 {offsets = [0, 16], sizes = [8, 8], strides = [1, 1]} : vector<16x64xf32> to vector<8x8xf32>
    %428 = vector.extract_strided_slice %390 {offsets = [0, 24], sizes = [8, 8], strides = [1, 1]} : vector<16x64xf32> to vector<8x8xf32>
    %429 = vector.extract_strided_slice %390 {offsets = [0, 32], sizes = [8, 8], strides = [1, 1]} : vector<16x64xf32> to vector<8x8xf32>
    %430 = vector.extract_strided_slice %390 {offsets = [0, 40], sizes = [8, 8], strides = [1, 1]} : vector<16x64xf32> to vector<8x8xf32>
    %431 = vector.extract_strided_slice %390 {offsets = [0, 48], sizes = [8, 8], strides = [1, 1]} : vector<16x64xf32> to vector<8x8xf32>
    %432 = vector.extract_strided_slice %390 {offsets = [0, 56], sizes = [8, 8], strides = [1, 1]} : vector<16x64xf32> to vector<8x8xf32>
    %433 = vector.extract_strided_slice %390 {offsets = [8, 0], sizes = [8, 8], strides = [1, 1]} : vector<16x64xf32> to vector<8x8xf32>
    %434 = vector.extract_strided_slice %390 {offsets = [8, 8], sizes = [8, 8], strides = [1, 1]} : vector<16x64xf32> to vector<8x8xf32>
    %435 = vector.extract_strided_slice %390 {offsets = [8, 16], sizes = [8, 8], strides = [1, 1]} : vector<16x64xf32> to vector<8x8xf32>
    %436 = vector.extract_strided_slice %390 {offsets = [8, 24], sizes = [8, 8], strides = [1, 1]} : vector<16x64xf32> to vector<8x8xf32>
    %437 = vector.extract_strided_slice %390 {offsets = [8, 32], sizes = [8, 8], strides = [1, 1]} : vector<16x64xf32> to vector<8x8xf32>
    %438 = vector.extract_strided_slice %390 {offsets = [8, 40], sizes = [8, 8], strides = [1, 1]} : vector<16x64xf32> to vector<8x8xf32>
    %439 = vector.extract_strided_slice %390 {offsets = [8, 48], sizes = [8, 8], strides = [1, 1]} : vector<16x64xf32> to vector<8x8xf32>
    %440 = vector.extract_strided_slice %390 {offsets = [8, 56], sizes = [8, 8], strides = [1, 1]} : vector<16x64xf32> to vector<8x8xf32>
    %441 = vector.shape_cast %425 : vector<8x8xf32> to vector<1x8x8xf32>
    %442 = vector.shape_cast %426 : vector<8x8xf32> to vector<1x8x8xf32>
    %443 = vector.shape_cast %427 : vector<8x8xf32> to vector<1x8x8xf32>
    %444 = vector.shape_cast %428 : vector<8x8xf32> to vector<1x8x8xf32>
    %445 = vector.shape_cast %429 : vector<8x8xf32> to vector<1x8x8xf32>
    %446 = vector.shape_cast %430 : vector<8x8xf32> to vector<1x8x8xf32>
    %447 = vector.shape_cast %431 : vector<8x8xf32> to vector<1x8x8xf32>
    %448 = vector.shape_cast %432 : vector<8x8xf32> to vector<1x8x8xf32>
    %449 = vector.shape_cast %433 : vector<8x8xf32> to vector<1x8x8xf32>
    %450 = vector.shape_cast %434 : vector<8x8xf32> to vector<1x8x8xf32>
    %451 = vector.shape_cast %435 : vector<8x8xf32> to vector<1x8x8xf32>
    %452 = vector.shape_cast %436 : vector<8x8xf32> to vector<1x8x8xf32>
    %453 = vector.shape_cast %437 : vector<8x8xf32> to vector<1x8x8xf32>
    %454 = vector.shape_cast %438 : vector<8x8xf32> to vector<1x8x8xf32>
    %455 = vector.shape_cast %439 : vector<8x8xf32> to vector<1x8x8xf32>
    %456 = vector.shape_cast %440 : vector<8x8xf32> to vector<1x8x8xf32>
    %457 = tpu.concatenate %441, %442, %443, %444, %445, %446, %447, %448, %449, %450, %451, %452, %453, %454, %455, %456 in 0 : vector<1x8x8xf32>, vector<1x8x8xf32>, vector<1x8x8xf32>, vector<1x8x8xf32>, vector<1x8x8xf32>, vector<1x8x8xf32>, vector<1x8x8xf32>, vector<1x8x8xf32>, vector<1x8x8xf32>, vector<1x8x8xf32>, vector<1x8x8xf32>, vector<1x8x8xf32>, vector<1x8x8xf32>, vector<1x8x8xf32>, vector<1x8x8xf32>, vector<1x8x8xf32> -> vector<16x8x8xf32>
    %458 = vector.extract_strided_slice %391 {offsets = [0, 0], sizes = [8, 8], strides = [1, 1]} : vector<16x64xf32> to vector<8x8xf32>
    %459 = vector.extract_strided_slice %391 {offsets = [0, 8], sizes = [8, 8], strides = [1, 1]} : vector<16x64xf32> to vector<8x8xf32>
    %460 = vector.extract_strided_slice %391 {offsets = [0, 16], sizes = [8, 8], strides = [1, 1]} : vector<16x64xf32> to vector<8x8xf32>
    %461 = vector.extract_strided_slice %391 {offsets = [0, 24], sizes = [8, 8], strides = [1, 1]} : vector<16x64xf32> to vector<8x8xf32>
    %462 = vector.extract_strided_slice %391 {offsets = [0, 32], sizes = [8, 8], strides = [1, 1]} : vector<16x64xf32> to vector<8x8xf32>
    %463 = vector.extract_strided_slice %391 {offsets = [0, 40], sizes = [8, 8], strides = [1, 1]} : vector<16x64xf32> to vector<8x8xf32>
    %464 = vector.extract_strided_slice %391 {offsets = [0, 48], sizes = [8, 8], strides = [1, 1]} : vector<16x64xf32> to vector<8x8xf32>
    %465 = vector.extract_strided_slice %391 {offsets = [0, 56], sizes = [8, 8], strides = [1, 1]} : vector<16x64xf32> to vector<8x8xf32>
    %466 = vector.extract_strided_slice %391 {offsets = [8, 0], sizes = [8, 8], strides = [1, 1]} : vector<16x64xf32> to vector<8x8xf32>
    %467 = vector.extract_strided_slice %391 {offsets = [8, 8], sizes = [8, 8], strides = [1, 1]} : vector<16x64xf32> to vector<8x8xf32>
    %468 = vector.extract_strided_slice %391 {offsets = [8, 16], sizes = [8, 8], strides = [1, 1]} : vector<16x64xf32> to vector<8x8xf32>
    %469 = vector.extract_strided_slice %391 {offsets = [8, 24], sizes = [8, 8], strides = [1, 1]} : vector<16x64xf32> to vector<8x8xf32>
    %470 = vector.extract_strided_slice %391 {offsets = [8, 32], sizes = [8, 8], strides = [1, 1]} : vector<16x64xf32> to vector<8x8xf32>
    %471 = vector.extract_strided_slice %391 {offsets = [8, 40], sizes = [8, 8], strides = [1, 1]} : vector<16x64xf32> to vector<8x8xf32>
    %472 = vector.extract_strided_slice %391 {offsets = [8, 48], sizes = [8, 8], strides = [1, 1]} : vector<16x64xf32> to vector<8x8xf32>
    %473 = vector.extract_strided_slice %391 {offsets = [8, 56], sizes = [8, 8], strides = [1, 1]} : vector<16x64xf32> to vector<8x8xf32>
    %474 = vector.shape_cast %458 : vector<8x8xf32> to vector<1x8x8xf32>
    %475 = vector.shape_cast %459 : vector<8x8xf32> to vector<1x8x8xf32>
    %476 = vector.shape_cast %460 : vector<8x8xf32> to vector<1x8x8xf32>
    %477 = vector.shape_cast %461 : vector<8x8xf32> to vector<1x8x8xf32>
    %478 = vector.shape_cast %462 : vector<8x8xf32> to vector<1x8x8xf32>
    %479 = vector.shape_cast %463 : vector<8x8xf32> to vector<1x8x8xf32>
    %480 = vector.shape_cast %464 : vector<8x8xf32> to vector<1x8x8xf32>
    %481 = vector.shape_cast %465 : vector<8x8xf32> to vector<1x8x8xf32>
    %482 = vector.shape_cast %466 : vector<8x8xf32> to vector<1x8x8xf32>
    %483 = vector.shape_cast %467 : vector<8x8xf32> to vector<1x8x8xf32>
    %484 = vector.shape_cast %468 : vector<8x8xf32> to vector<1x8x8xf32>
    %485 = vector.shape_cast %469 : vector<8x8xf32> to vector<1x8x8xf32>
    %486 = vector.shape_cast %470 : vector<8x8xf32> to vector<1x8x8xf32>
    %487 = vector.shape_cast %471 : vector<8x8xf32> to vector<1x8x8xf32>
    %488 = vector.shape_cast %472 : vector<8x8xf32> to vector<1x8x8xf32>
    %489 = vector.shape_cast %473 : vector<8x8xf32> to vector<1x8x8xf32>
    %490 = tpu.concatenate %474, %475, %476, %477, %478, %479, %480, %481, %482, %483, %484, %485, %486, %487, %488, %489 in 0 : vector<1x8x8xf32>, vector<1x8x8xf32>, vector<1x8x8xf32>, vector<1x8x8xf32>, vector<1x8x8xf32>, vector<1x8x8xf32>, vector<1x8x8xf32>, vector<1x8x8xf32>, vector<1x8x8xf32>, vector<1x8x8xf32>, vector<1x8x8xf32>, vector<1x8x8xf32>, vector<1x8x8xf32>, vector<1x8x8xf32>, vector<1x8x8xf32>, vector<1x8x8xf32> -> vector<16x8x8xf32>
    "tpu.trace_start"() <{level = 10 : i32, message = "gqd,gkd->gqk"}> : () -> ()
    %cst_65 = arith.constant dense<0.000000e+00> : vector<16x8x8xf32>
    %491 = tpu.matmul %424, %457, %cst_65 {dimension_numbers = #tpu.dot_dimension_numbers<[2], [2], [1], [1], [0, 0, 0, 1, 1, 1], [0], [0]>} : vector<16x8x8xf32>, vector<16x8x8xf32>, vector<16x8x8xf32> -> vector<16x8x8xf32>
    "tpu.trace_stop"() : () -> ()
    %cst_66 = arith.constant 0.353553385 : f32
    %492 = vector.broadcast %cst_66 : f32 to vector<16x8x8xf32>
    %493 = arith.mulf %491, %492 : vector<16x8x8xf32>
    %cst_67 = arith.constant dense<0xFF800000> : vector<16x8xf32>
    %494 = vector.multi_reduction <maximumf>, %493, %cst_67 [2] : vector<16x8x8xf32> to vector<16x8xf32>
    %495 = vector.shape_cast %494 : vector<16x8xf32> to vector<16x8x1xf32>
    %496 = vector.broadcast %495 : vector<16x8x1xf32> to vector<16x8x8xf32>
    %497 = arith.subf %493, %496 : vector<16x8x8xf32>
    %498 = math.exp %497 : vector<16x8x8xf32>
    %cst_68 = arith.constant dense<0.000000e+00> : vector<16x8xf32>
    %499 = vector.multi_reduction <add>, %498, %cst_68 [2] : vector<16x8x8xf32> to vector<16x8xf32>
    %500 = vector.shape_cast %499 : vector<16x8xf32> to vector<16x8x1xf32>
    %501 = vector.broadcast %500 : vector<16x8x1xf32> to vector<16x8x8xf32>
    %502 = arith.divf %498, %501 : vector<16x8x8xf32>
    "tpu.trace_start"() <{level = 10 : i32, message = "gqk,gkd->gqd"}> : () -> ()
    %cst_69 = arith.constant dense<0.000000e+00> : vector<16x8x8xf32>
    %503 = tpu.matmul %502, %490, %cst_69 {dimension_numbers = #tpu.dot_dimension_numbers<[2], [1], [1], [2], [0, 0, 0, 1, 1, 2], [0], [0]>} : vector<16x8x8xf32>, vector<16x8x8xf32>, vector<16x8x8xf32> -> vector<16x8x8xf32>
    "tpu.trace_stop"() : () -> ()
    %504 = vector.extract_strided_slice %503 {offsets = [0, 0, 0], sizes = [1, 8, 8], strides = [1, 1, 1]} : vector<16x8x8xf32> to vector<1x8x8xf32>
    %505 = vector.shape_cast %504 : vector<1x8x8xf32> to vector<8x8xf32>
    %506 = vector.extract_strided_slice %503 {offsets = [1, 0, 0], sizes = [1, 8, 8], strides = [1, 1, 1]} : vector<16x8x8xf32> to vector<1x8x8xf32>
    %507 = vector.shape_cast %506 : vector<1x8x8xf32> to vector<8x8xf32>
    %508 = vector.extract_strided_slice %503 {offsets = [2, 0, 0], sizes = [1, 8, 8], strides = [1, 1, 1]} : vector<16x8x8xf32> to vector<1x8x8xf32>
    %509 = vector.shape_cast %508 : vector<1x8x8xf32> to vector<8x8xf32>
    %510 = vector.extract_strided_slice %503 {offsets = [3, 0, 0], sizes = [1, 8, 8], strides = [1, 1, 1]} : vector<16x8x8xf32> to vector<1x8x8xf32>
    %511 = vector.shape_cast %510 : vector<1x8x8xf32> to vector<8x8xf32>
    %512 = vector.extract_strided_slice %503 {offsets = [4, 0, 0], sizes = [1, 8, 8], strides = [1, 1, 1]} : vector<16x8x8xf32> to vector<1x8x8xf32>
    %513 = vector.shape_cast %512 : vector<1x8x8xf32> to vector<8x8xf32>
    %514 = vector.extract_strided_slice %503 {offsets = [5, 0, 0], sizes = [1, 8, 8], strides = [1, 1, 1]} : vector<16x8x8xf32> to vector<1x8x8xf32>
    %515 = vector.shape_cast %514 : vector<1x8x8xf32> to vector<8x8xf32>
    %516 = vector.extract_strided_slice %503 {offsets = [6, 0, 0], sizes = [1, 8, 8], strides = [1, 1, 1]} : vector<16x8x8xf32> to vector<1x8x8xf32>
    %517 = vector.shape_cast %516 : vector<1x8x8xf32> to vector<8x8xf32>
    %518 = vector.extract_strided_slice %503 {offsets = [7, 0, 0], sizes = [1, 8, 8], strides = [1, 1, 1]} : vector<16x8x8xf32> to vector<1x8x8xf32>
    %519 = vector.shape_cast %518 : vector<1x8x8xf32> to vector<8x8xf32>
    %520 = tpu.concatenate %505, %507, %509, %511, %513, %515, %517, %519 in 1 : vector<8x8xf32>, vector<8x8xf32>, vector<8x8xf32>, vector<8x8xf32>, vector<8x8xf32>, vector<8x8xf32>, vector<8x8xf32>, vector<8x8xf32> -> vector<8x64xf32>
    %521 = vector.extract_strided_slice %503 {offsets = [8, 0, 0], sizes = [1, 8, 8], strides = [1, 1, 1]} : vector<16x8x8xf32> to vector<1x8x8xf32>
    %522 = vector.shape_cast %521 : vector<1x8x8xf32> to vector<8x8xf32>
    %523 = vector.extract_strided_slice %503 {offsets = [9, 0, 0], sizes = [1, 8, 8], strides = [1, 1, 1]} : vector<16x8x8xf32> to vector<1x8x8xf32>
    %524 = vector.shape_cast %523 : vector<1x8x8xf32> to vector<8x8xf32>
    %525 = vector.extract_strided_slice %503 {offsets = [10, 0, 0], sizes = [1, 8, 8], strides = [1, 1, 1]} : vector<16x8x8xf32> to vector<1x8x8xf32>
    %526 = vector.shape_cast %525 : vector<1x8x8xf32> to vector<8x8xf32>
    %527 = vector.extract_strided_slice %503 {offsets = [11, 0, 0], sizes = [1, 8, 8], strides = [1, 1, 1]} : vector<16x8x8xf32> to vector<1x8x8xf32>
    %528 = vector.shape_cast %527 : vector<1x8x8xf32> to vector<8x8xf32>
    %529 = vector.extract_strided_slice %503 {offsets = [12, 0, 0], sizes = [1, 8, 8], strides = [1, 1, 1]} : vector<16x8x8xf32> to vector<1x8x8xf32>
    %530 = vector.shape_cast %529 : vector<1x8x8xf32> to vector<8x8xf32>
    %531 = vector.extract_strided_slice %503 {offsets = [13, 0, 0], sizes = [1, 8, 8], strides = [1, 1, 1]} : vector<16x8x8xf32> to vector<1x8x8xf32>
    %532 = vector.shape_cast %531 : vector<1x8x8xf32> to vector<8x8xf32>
    %533 = vector.extract_strided_slice %503 {offsets = [14, 0, 0], sizes = [1, 8, 8], strides = [1, 1, 1]} : vector<16x8x8xf32> to vector<1x8x8xf32>
    %534 = vector.shape_cast %533 : vector<1x8x8xf32> to vector<8x8xf32>
    %535 = vector.extract_strided_slice %503 {offsets = [15, 0, 0], sizes = [1, 8, 8], strides = [1, 1, 1]} : vector<16x8x8xf32> to vector<1x8x8xf32>
    %536 = vector.shape_cast %535 : vector<1x8x8xf32> to vector<8x8xf32>
    %537 = tpu.concatenate %522, %524, %526, %528, %530, %532, %534, %536 in 1 : vector<8x8xf32>, vector<8x8xf32>, vector<8x8xf32>, vector<8x8xf32>, vector<8x8xf32>, vector<8x8xf32>, vector<8x8xf32>, vector<8x8xf32> -> vector<8x64xf32>
    %538 = tpu.concatenate %520, %537 in 0 : vector<8x64xf32>, vector<8x64xf32> -> vector<16x64xf32>
    %539 = arith.truncf %538 : vector<16x64xf32> to vector<16x64xbf16>
    %c0_70 = arith.constant 0 : index
    %c960 = arith.constant 960 : index
    %540 = vector.load %arg7[%c0_70, %c960] : memref<64x1280xbf16, #tpu.memory_space<vmem>>, vector<64x64xbf16>
    %cst_71 = arith.constant dense<0.000000e+00> : vector<16x64xf32>
    %541 = tpu.matmul %539, %540, %cst_71 {dimension_numbers = #tpu.dot_dimension_numbers<[1], [0], [0], [1], [0, 0, 1, 1], [], []>} : vector<16x64xbf16>, vector<64x64xbf16>, vector<16x64xf32> -> vector<16x64xf32>
    %c0_72 = arith.constant 0 : index
    %c1088 = arith.constant 1088 : index
    %542 = vector.load %arg10[%c0_72, %c1088] : memref<1x1443xf32, #tpu.memory_space<vmem>>, vector<1x64xf32>
    %543 = vector.broadcast %542 : vector<1x64xf32> to vector<16x64xf32>
    %544 = arith.addf %541, %543 : vector<16x64xf32>
    %545 = vector.extract_strided_slice %216 {offsets = [0, 256], sizes = [16, 64], strides = [1, 1]} : vector<16x384xf32> to vector<16x64xf32>
    %546 = vector.extract_strided_slice %216 {offsets = [0, 320], sizes = [16, 64], strides = [1, 1]} : vector<16x384xf32> to vector<16x64xf32>
    %547 = vector.extract_strided_slice %234 {offsets = [0, 0], sizes = [8, 8], strides = [1, 1]} : vector<16x64xf32> to vector<8x8xf32>
    %548 = vector.extract_strided_slice %234 {offsets = [0, 8], sizes = [8, 8], strides = [1, 1]} : vector<16x64xf32> to vector<8x8xf32>
    %549 = vector.extract_strided_slice %234 {offsets = [0, 16], sizes = [8, 8], strides = [1, 1]} : vector<16x64xf32> to vector<8x8xf32>
    %550 = vector.extract_strided_slice %234 {offsets = [0, 24], sizes = [8, 8], strides = [1, 1]} : vector<16x64xf32> to vector<8x8xf32>
    %551 = vector.extract_strided_slice %234 {offsets = [0, 32], sizes = [8, 8], strides = [1, 1]} : vector<16x64xf32> to vector<8x8xf32>
    %552 = vector.extract_strided_slice %234 {offsets = [0, 40], sizes = [8, 8], strides = [1, 1]} : vector<16x64xf32> to vector<8x8xf32>
    %553 = vector.extract_strided_slice %234 {offsets = [0, 48], sizes = [8, 8], strides = [1, 1]} : vector<16x64xf32> to vector<8x8xf32>
    %554 = vector.extract_strided_slice %234 {offsets = [0, 56], sizes = [8, 8], strides = [1, 1]} : vector<16x64xf32> to vector<8x8xf32>
    %555 = vector.extract_strided_slice %234 {offsets = [8, 0], sizes = [8, 8], strides = [1, 1]} : vector<16x64xf32> to vector<8x8xf32>
    %556 = vector.extract_strided_slice %234 {offsets = [8, 8], sizes = [8, 8], strides = [1, 1]} : vector<16x64xf32> to vector<8x8xf32>
    %557 = vector.extract_strided_slice %234 {offsets = [8, 16], sizes = [8, 8], strides = [1, 1]} : vector<16x64xf32> to vector<8x8xf32>
    %558 = vector.extract_strided_slice %234 {offsets = [8, 24], sizes = [8, 8], strides = [1, 1]} : vector<16x64xf32> to vector<8x8xf32>
    %559 = vector.extract_strided_slice %234 {offsets = [8, 32], sizes = [8, 8], strides = [1, 1]} : vector<16x64xf32> to vector<8x8xf32>
    %560 = vector.extract_strided_slice %234 {offsets = [8, 40], sizes = [8, 8], strides = [1, 1]} : vector<16x64xf32> to vector<8x8xf32>
    %561 = vector.extract_strided_slice %234 {offsets = [8, 48], sizes = [8, 8], strides = [1, 1]} : vector<16x64xf32> to vector<8x8xf32>
    %562 = vector.extract_strided_slice %234 {offsets = [8, 56], sizes = [8, 8], strides = [1, 1]} : vector<16x64xf32> to vector<8x8xf32>
    %563 = vector.shape_cast %547 : vector<8x8xf32> to vector<1x8x8xf32>
    %564 = vector.shape_cast %548 : vector<8x8xf32> to vector<1x8x8xf32>
    %565 = vector.shape_cast %549 : vector<8x8xf32> to vector<1x8x8xf32>
    %566 = vector.shape_cast %550 : vector<8x8xf32> to vector<1x8x8xf32>
    %567 = vector.shape_cast %551 : vector<8x8xf32> to vector<1x8x8xf32>
    %568 = vector.shape_cast %552 : vector<8x8xf32> to vector<1x8x8xf32>
    %569 = vector.shape_cast %553 : vector<8x8xf32> to vector<1x8x8xf32>
    %570 = vector.shape_cast %554 : vector<8x8xf32> to vector<1x8x8xf32>
    %571 = vector.shape_cast %555 : vector<8x8xf32> to vector<1x8x8xf32>
    %572 = vector.shape_cast %556 : vector<8x8xf32> to vector<1x8x8xf32>
    %573 = vector.shape_cast %557 : vector<8x8xf32> to vector<1x8x8xf32>
    %574 = vector.shape_cast %558 : vector<8x8xf32> to vector<1x8x8xf32>
    %575 = vector.shape_cast %559 : vector<8x8xf32> to vector<1x8x8xf32>
    %576 = vector.shape_cast %560 : vector<8x8xf32> to vector<1x8x8xf32>
    %577 = vector.shape_cast %561 : vector<8x8xf32> to vector<1x8x8xf32>
    %578 = vector.shape_cast %562 : vector<8x8xf32> to vector<1x8x8xf32>
    %579 = tpu.concatenate %563, %564, %565, %566, %567, %568, %569, %570, %571, %572, %573, %574, %575, %576, %577, %578 in 0 : vector<1x8x8xf32>, vector<1x8x8xf32>, vector<1x8x8xf32>, vector<1x8x8xf32>, vector<1x8x8xf32>, vector<1x8x8xf32>, vector<1x8x8xf32>, vector<1x8x8xf32>, vector<1x8x8xf32>, vector<1x8x8xf32>, vector<1x8x8xf32>, vector<1x8x8xf32>, vector<1x8x8xf32>, vector<1x8x8xf32>, vector<1x8x8xf32>, vector<1x8x8xf32> -> vector<16x8x8xf32>
    %580 = vector.extract_strided_slice %545 {offsets = [0, 0], sizes = [8, 8], strides = [1, 1]} : vector<16x64xf32> to vector<8x8xf32>
    %581 = vector.extract_strided_slice %545 {offsets = [0, 8], sizes = [8, 8], strides = [1, 1]} : vector<16x64xf32> to vector<8x8xf32>
    %582 = vector.extract_strided_slice %545 {offsets = [0, 16], sizes = [8, 8], strides = [1, 1]} : vector<16x64xf32> to vector<8x8xf32>
    %583 = vector.extract_strided_slice %545 {offsets = [0, 24], sizes = [8, 8], strides = [1, 1]} : vector<16x64xf32> to vector<8x8xf32>
    %584 = vector.extract_strided_slice %545 {offsets = [0, 32], sizes = [8, 8], strides = [1, 1]} : vector<16x64xf32> to vector<8x8xf32>
    %585 = vector.extract_strided_slice %545 {offsets = [0, 40], sizes = [8, 8], strides = [1, 1]} : vector<16x64xf32> to vector<8x8xf32>
    %586 = vector.extract_strided_slice %545 {offsets = [0, 48], sizes = [8, 8], strides = [1, 1]} : vector<16x64xf32> to vector<8x8xf32>
    %587 = vector.extract_strided_slice %545 {offsets = [0, 56], sizes = [8, 8], strides = [1, 1]} : vector<16x64xf32> to vector<8x8xf32>
    %588 = vector.extract_strided_slice %545 {offsets = [8, 0], sizes = [8, 8], strides = [1, 1]} : vector<16x64xf32> to vector<8x8xf32>
    %589 = vector.extract_strided_slice %545 {offsets = [8, 8], sizes = [8, 8], strides = [1, 1]} : vector<16x64xf32> to vector<8x8xf32>
    %590 = vector.extract_strided_slice %545 {offsets = [8, 16], sizes = [8, 8], strides = [1, 1]} : vector<16x64xf32> to vector<8x8xf32>
    %591 = vector.extract_strided_slice %545 {offsets = [8, 24], sizes = [8, 8], strides = [1, 1]} : vector<16x64xf32> to vector<8x8xf32>
    %592 = vector.extract_strided_slice %545 {offsets = [8, 32], sizes = [8, 8], strides = [1, 1]} : vector<16x64xf32> to vector<8x8xf32>
    %593 = vector.extract_strided_slice %545 {offsets = [8, 40], sizes = [8, 8], strides = [1, 1]} : vector<16x64xf32> to vector<8x8xf32>
    %594 = vector.extract_strided_slice %545 {offsets = [8, 48], sizes = [8, 8], strides = [1, 1]} : vector<16x64xf32> to vector<8x8xf32>
    %595 = vector.extract_strided_slice %545 {offsets = [8, 56], sizes = [8, 8], strides = [1, 1]} : vector<16x64xf32> to vector<8x8xf32>
    %596 = vector.shape_cast %580 : vector<8x8xf32> to vector<1x8x8xf32>
    %597 = vector.shape_cast %581 : vector<8x8xf32> to vector<1x8x8xf32>
    %598 = vector.shape_cast %582 : vector<8x8xf32> to vector<1x8x8xf32>
    %599 = vector.shape_cast %583 : vector<8x8xf32> to vector<1x8x8xf32>
    %600 = vector.shape_cast %584 : vector<8x8xf32> to vector<1x8x8xf32>
    %601 = vector.shape_cast %585 : vector<8x8xf32> to vector<1x8x8xf32>
    %602 = vector.shape_cast %586 : vector<8x8xf32> to vector<1x8x8xf32>
    %603 = vector.shape_cast %587 : vector<8x8xf32> to vector<1x8x8xf32>
    %604 = vector.shape_cast %588 : vector<8x8xf32> to vector<1x8x8xf32>
    %605 = vector.shape_cast %589 : vector<8x8xf32> to vector<1x8x8xf32>
    %606 = vector.shape_cast %590 : vector<8x8xf32> to vector<1x8x8xf32>
    %607 = vector.shape_cast %591 : vector<8x8xf32> to vector<1x8x8xf32>
    %608 = vector.shape_cast %592 : vector<8x8xf32> to vector<1x8x8xf32>
    %609 = vector.shape_cast %593 : vector<8x8xf32> to vector<1x8x8xf32>
    %610 = vector.shape_cast %594 : vector<8x8xf32> to vector<1x8x8xf32>
    %611 = vector.shape_cast %595 : vector<8x8xf32> to vector<1x8x8xf32>
    %612 = tpu.concatenate %596, %597, %598, %599, %600, %601, %602, %603, %604, %605, %606, %607, %608, %609, %610, %611 in 0 : vector<1x8x8xf32>, vector<1x8x8xf32>, vector<1x8x8xf32>, vector<1x8x8xf32>, vector<1x8x8xf32>, vector<1x8x8xf32>, vector<1x8x8xf32>, vector<1x8x8xf32>, vector<1x8x8xf32>, vector<1x8x8xf32>, vector<1x8x8xf32>, vector<1x8x8xf32>, vector<1x8x8xf32>, vector<1x8x8xf32>, vector<1x8x8xf32>, vector<1x8x8xf32> -> vector<16x8x8xf32>
    %613 = vector.extract_strided_slice %546 {offsets = [0, 0], sizes = [8, 8], strides = [1, 1]} : vector<16x64xf32> to vector<8x8xf32>
    %614 = vector.extract_strided_slice %546 {offsets = [0, 8], sizes = [8, 8], strides = [1, 1]} : vector<16x64xf32> to vector<8x8xf32>
    %615 = vector.extract_strided_slice %546 {offsets = [0, 16], sizes = [8, 8], strides = [1, 1]} : vector<16x64xf32> to vector<8x8xf32>
    %616 = vector.extract_strided_slice %546 {offsets = [0, 24], sizes = [8, 8], strides = [1, 1]} : vector<16x64xf32> to vector<8x8xf32>
    %617 = vector.extract_strided_slice %546 {offsets = [0, 32], sizes = [8, 8], strides = [1, 1]} : vector<16x64xf32> to vector<8x8xf32>
    %618 = vector.extract_strided_slice %546 {offsets = [0, 40], sizes = [8, 8], strides = [1, 1]} : vector<16x64xf32> to vector<8x8xf32>
    %619 = vector.extract_strided_slice %546 {offsets = [0, 48], sizes = [8, 8], strides = [1, 1]} : vector<16x64xf32> to vector<8x8xf32>
    %620 = vector.extract_strided_slice %546 {offsets = [0, 56], sizes = [8, 8], strides = [1, 1]} : vector<16x64xf32> to vector<8x8xf32>
    %621 = vector.extract_strided_slice %546 {offsets = [8, 0], sizes = [8, 8], strides = [1, 1]} : vector<16x64xf32> to vector<8x8xf32>
    %622 = vector.extract_strided_slice %546 {offsets = [8, 8], sizes = [8, 8], strides = [1, 1]} : vector<16x64xf32> to vector<8x8xf32>
    %623 = vector.extract_strided_slice %546 {offsets = [8, 16], sizes = [8, 8], strides = [1, 1]} : vector<16x64xf32> to vector<8x8xf32>
    %624 = vector.extract_strided_slice %546 {offsets = [8, 24], sizes = [8, 8], strides = [1, 1]} : vector<16x64xf32> to vector<8x8xf32>
    %625 = vector.extract_strided_slice %546 {offsets = [8, 32], sizes = [8, 8], strides = [1, 1]} : vector<16x64xf32> to vector<8x8xf32>
    %626 = vector.extract_strided_slice %546 {offsets = [8, 40], sizes = [8, 8], strides = [1, 1]} : vector<16x64xf32> to vector<8x8xf32>
    %627 = vector.extract_strided_slice %546 {offsets = [8, 48], sizes = [8, 8], strides = [1, 1]} : vector<16x64xf32> to vector<8x8xf32>
    %628 = vector.extract_strided_slice %546 {offsets = [8, 56], sizes = [8, 8], strides = [1, 1]} : vector<16x64xf32> to vector<8x8xf32>
    %629 = vector.shape_cast %613 : vector<8x8xf32> to vector<1x8x8xf32>
    %630 = vector.shape_cast %614 : vector<8x8xf32> to vector<1x8x8xf32>
    %631 = vector.shape_cast %615 : vector<8x8xf32> to vector<1x8x8xf32>
    %632 = vector.shape_cast %616 : vector<8x8xf32> to vector<1x8x8xf32>
    %633 = vector.shape_cast %617 : vector<8x8xf32> to vector<1x8x8xf32>
    %634 = vector.shape_cast %618 : vector<8x8xf32> to vector<1x8x8xf32>
    %635 = vector.shape_cast %619 : vector<8x8xf32> to vector<1x8x8xf32>
    %636 = vector.shape_cast %620 : vector<8x8xf32> to vector<1x8x8xf32>
    %637 = vector.shape_cast %621 : vector<8x8xf32> to vector<1x8x8xf32>
    %638 = vector.shape_cast %622 : vector<8x8xf32> to vector<1x8x8xf32>
    %639 = vector.shape_cast %623 : vector<8x8xf32> to vector<1x8x8xf32>
    %640 = vector.shape_cast %624 : vector<8x8xf32> to vector<1x8x8xf32>
    %641 = vector.shape_cast %625 : vector<8x8xf32> to vector<1x8x8xf32>
    %642 = vector.shape_cast %626 : vector<8x8xf32> to vector<1x8x8xf32>
    %643 = vector.shape_cast %627 : vector<8x8xf32> to vector<1x8x8xf32>
    %644 = vector.shape_cast %628 : vector<8x8xf32> to vector<1x8x8xf32>
    %645 = tpu.concatenate %629, %630, %631, %632, %633, %634, %635, %636, %637, %638, %639, %640, %641, %642, %643, %644 in 0 : vector<1x8x8xf32>, vector<1x8x8xf32>, vector<1x8x8xf32>, vector<1x8x8xf32>, vector<1x8x8xf32>, vector<1x8x8xf32>, vector<1x8x8xf32>, vector<1x8x8xf32>, vector<1x8x8xf32>, vector<1x8x8xf32>, vector<1x8x8xf32>, vector<1x8x8xf32>, vector<1x8x8xf32>, vector<1x8x8xf32>, vector<1x8x8xf32>, vector<1x8x8xf32> -> vector<16x8x8xf32>
    "tpu.trace_start"() <{level = 10 : i32, message = "gqd,gkd->gqk"}> : () -> ()
    %cst_73 = arith.constant dense<0.000000e+00> : vector<16x8x8xf32>
    %646 = tpu.matmul %579, %612, %cst_73 {dimension_numbers = #tpu.dot_dimension_numbers<[2], [2], [1], [1], [0, 0, 0, 1, 1, 1], [0], [0]>} : vector<16x8x8xf32>, vector<16x8x8xf32>, vector<16x8x8xf32> -> vector<16x8x8xf32>
    "tpu.trace_stop"() : () -> ()
    %cst_74 = arith.constant 0.353553385 : f32
    %647 = vector.broadcast %cst_74 : f32 to vector<16x8x8xf32>
    %648 = arith.mulf %646, %647 : vector<16x8x8xf32>
    %cst_75 = arith.constant dense<0xFF800000> : vector<16x8xf32>
    %649 = vector.multi_reduction <maximumf>, %648, %cst_75 [2] : vector<16x8x8xf32> to vector<16x8xf32>
    %650 = vector.shape_cast %649 : vector<16x8xf32> to vector<16x8x1xf32>
    %651 = vector.broadcast %650 : vector<16x8x1xf32> to vector<16x8x8xf32>
    %652 = arith.subf %648, %651 : vector<16x8x8xf32>
    %653 = math.exp %652 : vector<16x8x8xf32>
    %cst_76 = arith.constant dense<0.000000e+00> : vector<16x8xf32>
    %654 = vector.multi_reduction <add>, %653, %cst_76 [2] : vector<16x8x8xf32> to vector<16x8xf32>
    %655 = vector.shape_cast %654 : vector<16x8xf32> to vector<16x8x1xf32>
    %656 = vector.broadcast %655 : vector<16x8x1xf32> to vector<16x8x8xf32>
    %657 = arith.divf %653, %656 : vector<16x8x8xf32>
    "tpu.trace_start"() <{level = 10 : i32, message = "gqk,gkd->gqd"}> : () -> ()
    %cst_77 = arith.constant dense<0.000000e+00> : vector<16x8x8xf32>
    %658 = tpu.matmul %657, %645, %cst_77 {dimension_numbers = #tpu.dot_dimension_numbers<[2], [1], [1], [2], [0, 0, 0, 1, 1, 2], [0], [0]>} : vector<16x8x8xf32>, vector<16x8x8xf32>, vector<16x8x8xf32> -> vector<16x8x8xf32>
    "tpu.trace_stop"() : () -> ()
    %659 = vector.extract_strided_slice %658 {offsets = [0, 0, 0], sizes = [1, 8, 8], strides = [1, 1, 1]} : vector<16x8x8xf32> to vector<1x8x8xf32>
    %660 = vector.shape_cast %659 : vector<1x8x8xf32> to vector<8x8xf32>
    %661 = vector.extract_strided_slice %658 {offsets = [1, 0, 0], sizes = [1, 8, 8], strides = [1, 1, 1]} : vector<16x8x8xf32> to vector<1x8x8xf32>
    %662 = vector.shape_cast %661 : vector<1x8x8xf32> to vector<8x8xf32>
    %663 = vector.extract_strided_slice %658 {offsets = [2, 0, 0], sizes = [1, 8, 8], strides = [1, 1, 1]} : vector<16x8x8xf32> to vector<1x8x8xf32>
    %664 = vector.shape_cast %663 : vector<1x8x8xf32> to vector<8x8xf32>
    %665 = vector.extract_strided_slice %658 {offsets = [3, 0, 0], sizes = [1, 8, 8], strides = [1, 1, 1]} : vector<16x8x8xf32> to vector<1x8x8xf32>
    %666 = vector.shape_cast %665 : vector<1x8x8xf32> to vector<8x8xf32>
    %667 = vector.extract_strided_slice %658 {offsets = [4, 0, 0], sizes = [1, 8, 8], strides = [1, 1, 1]} : vector<16x8x8xf32> to vector<1x8x8xf32>
    %668 = vector.shape_cast %667 : vector<1x8x8xf32> to vector<8x8xf32>
    %669 = vector.extract_strided_slice %658 {offsets = [5, 0, 0], sizes = [1, 8, 8], strides = [1, 1, 1]} : vector<16x8x8xf32> to vector<1x8x8xf32>
    %670 = vector.shape_cast %669 : vector<1x8x8xf32> to vector<8x8xf32>
    %671 = vector.extract_strided_slice %658 {offsets = [6, 0, 0], sizes = [1, 8, 8], strides = [1, 1, 1]} : vector<16x8x8xf32> to vector<1x8x8xf32>
    %672 = vector.shape_cast %671 : vector<1x8x8xf32> to vector<8x8xf32>
    %673 = vector.extract_strided_slice %658 {offsets = [7, 0, 0], sizes = [1, 8, 8], strides = [1, 1, 1]} : vector<16x8x8xf32> to vector<1x8x8xf32>
    %674 = vector.shape_cast %673 : vector<1x8x8xf32> to vector<8x8xf32>
    %675 = tpu.concatenate %660, %662, %664, %666, %668, %670, %672, %674 in 1 : vector<8x8xf32>, vector<8x8xf32>, vector<8x8xf32>, vector<8x8xf32>, vector<8x8xf32>, vector<8x8xf32>, vector<8x8xf32>, vector<8x8xf32> -> vector<8x64xf32>
    %676 = vector.extract_strided_slice %658 {offsets = [8, 0, 0], sizes = [1, 8, 8], strides = [1, 1, 1]} : vector<16x8x8xf32> to vector<1x8x8xf32>
    %677 = vector.shape_cast %676 : vector<1x8x8xf32> to vector<8x8xf32>
    %678 = vector.extract_strided_slice %658 {offsets = [9, 0, 0], sizes = [1, 8, 8], strides = [1, 1, 1]} : vector<16x8x8xf32> to vector<1x8x8xf32>
    %679 = vector.shape_cast %678 : vector<1x8x8xf32> to vector<8x8xf32>
    %680 = vector.extract_strided_slice %658 {offsets = [10, 0, 0], sizes = [1, 8, 8], strides = [1, 1, 1]} : vector<16x8x8xf32> to vector<1x8x8xf32>
    %681 = vector.shape_cast %680 : vector<1x8x8xf32> to vector<8x8xf32>
    %682 = vector.extract_strided_slice %658 {offsets = [11, 0, 0], sizes = [1, 8, 8], strides = [1, 1, 1]} : vector<16x8x8xf32> to vector<1x8x8xf32>
    %683 = vector.shape_cast %682 : vector<1x8x8xf32> to vector<8x8xf32>
    %684 = vector.extract_strided_slice %658 {offsets = [12, 0, 0], sizes = [1, 8, 8], strides = [1, 1, 1]} : vector<16x8x8xf32> to vector<1x8x8xf32>
    %685 = vector.shape_cast %684 : vector<1x8x8xf32> to vector<8x8xf32>
    %686 = vector.extract_strided_slice %658 {offsets = [13, 0, 0], sizes = [1, 8, 8], strides = [1, 1, 1]} : vector<16x8x8xf32> to vector<1x8x8xf32>
    %687 = vector.shape_cast %686 : vector<1x8x8xf32> to vector<8x8xf32>
    %688 = vector.extract_strided_slice %658 {offsets = [14, 0, 0], sizes = [1, 8, 8], strides = [1, 1, 1]} : vector<16x8x8xf32> to vector<1x8x8xf32>
    %689 = vector.shape_cast %688 : vector<1x8x8xf32> to vector<8x8xf32>
    %690 = vector.extract_strided_slice %658 {offsets = [15, 0, 0], sizes = [1, 8, 8], strides = [1, 1, 1]} : vector<16x8x8xf32> to vector<1x8x8xf32>
    %691 = vector.shape_cast %690 : vector<1x8x8xf32> to vector<8x8xf32>
    %692 = tpu.concatenate %677, %679, %681, %683, %685, %687, %689, %691 in 1 : vector<8x8xf32>, vector<8x8xf32>, vector<8x8xf32>, vector<8x8xf32>, vector<8x8xf32>, vector<8x8xf32>, vector<8x8xf32>, vector<8x8xf32> -> vector<8x64xf32>
    %693 = tpu.concatenate %675, %692 in 0 : vector<8x64xf32>, vector<8x64xf32> -> vector<16x64xf32>
    %694 = arith.truncf %693 : vector<16x64xf32> to vector<16x64xbf16>
    %c0_78 = arith.constant 0 : index
    %c1024_79 = arith.constant 1024 : index
    %695 = vector.load %arg7[%c0_78, %c1024_79] : memref<64x1280xbf16, #tpu.memory_space<vmem>>, vector<64x64xbf16>
    %cst_80 = arith.constant dense<0.000000e+00> : vector<16x64xf32>
    %696 = tpu.matmul %694, %695, %cst_80 {dimension_numbers = #tpu.dot_dimension_numbers<[1], [0], [0], [1], [0, 0, 1, 1], [], []>} : vector<16x64xbf16>, vector<64x64xbf16>, vector<16x64xf32> -> vector<16x64xf32>
    %c0_81 = arith.constant 0 : index
    %c1152 = arith.constant 1152 : index
    %697 = vector.load %arg10[%c0_81, %c1152] : memref<1x1443xf32, #tpu.memory_space<vmem>>, vector<1x64xf32>
    %698 = vector.broadcast %697 : vector<1x64xf32> to vector<16x64xf32>
    %699 = arith.addf %696, %698 : vector<16x64xf32>
    %700 = arith.truncf %389 : vector<16x64xf32> to vector<16x64xbf16>
    %c0_82 = arith.constant 0 : index
    %c1088_83 = arith.constant 1088 : index
    %701 = vector.load %arg7[%c0_82, %c1088_83] : memref<64x1280xbf16, #tpu.memory_space<vmem>>, vector<64x64xbf16>
    %cst_84 = arith.constant dense<0.000000e+00> : vector<16x64xf32>
    %702 = tpu.matmul %700, %701, %cst_84 {dimension_numbers = #tpu.dot_dimension_numbers<[1], [0], [0], [1], [0, 0, 1, 1], [], []>} : vector<16x64xbf16>, vector<64x64xbf16>, vector<16x64xf32> -> vector<16x64xf32>
    %c0_85 = arith.constant 0 : index
    %c1216 = arith.constant 1216 : index
    %703 = vector.load %arg10[%c0_85, %c1216] : memref<1x1443xf32, #tpu.memory_space<vmem>>, vector<1x64xf32>
    %704 = vector.broadcast %703 : vector<1x64xf32> to vector<16x64xf32>
    %705 = arith.addf %702, %704 : vector<16x64xf32>
    %706 = arith.negf %705 : vector<16x64xf32>
    %707 = math.exp %706 : vector<16x64xf32>
    %cst_86 = arith.constant 1.000000e+00 : f32
    %708 = vector.broadcast %cst_86 : f32 to vector<16x64xf32>
    %709 = arith.addf %708, %707 : vector<16x64xf32>
    %710 = arith.divf %708, %709 : vector<16x64xf32>
    %711 = arith.mulf %389, %710 : vector<16x64xf32>
    %712 = arith.truncf %699 : vector<16x64xf32> to vector<16x64xbf16>
    %c0_87 = arith.constant 0 : index
    %c1152_88 = arith.constant 1152 : index
    %713 = vector.load %arg7[%c0_87, %c1152_88] : memref<64x1280xbf16, #tpu.memory_space<vmem>>, vector<64x64xbf16>
    %cst_89 = arith.constant dense<0.000000e+00> : vector<16x64xf32>
    %714 = tpu.matmul %712, %713, %cst_89 {dimension_numbers = #tpu.dot_dimension_numbers<[1], [0], [0], [1], [0, 0, 1, 1], [], []>} : vector<16x64xbf16>, vector<64x64xbf16>, vector<16x64xf32> -> vector<16x64xf32>
    %c0_90 = arith.constant 0 : index
    %c1280 = arith.constant 1280 : index
    %715 = vector.load %arg10[%c0_90, %c1280] : memref<1x1443xf32, #tpu.memory_space<vmem>>, vector<1x64xf32>
    %716 = vector.broadcast %715 : vector<1x64xf32> to vector<16x64xf32>
    %717 = arith.addf %714, %716 : vector<16x64xf32>
    %718 = arith.negf %717 : vector<16x64xf32>
    %719 = math.exp %718 : vector<16x64xf32>
    %cst_91 = arith.constant 1.000000e+00 : f32
    %720 = vector.broadcast %cst_91 : f32 to vector<16x64xf32>
    %721 = arith.addf %720, %719 : vector<16x64xf32>
    %722 = arith.divf %720, %721 : vector<16x64xf32>
    %723 = arith.mulf %699, %722 : vector<16x64xf32>
    %724 = arith.truncf %544 : vector<16x64xf32> to vector<16x64xbf16>
    %c0_92 = arith.constant 0 : index
    %c1216_93 = arith.constant 1216 : index
    %725 = vector.load %arg7[%c0_92, %c1216_93] : memref<64x1280xbf16, #tpu.memory_space<vmem>>, vector<64x64xbf16>
    %cst_94 = arith.constant dense<0.000000e+00> : vector<16x64xf32>
    %726 = tpu.matmul %724, %725, %cst_94 {dimension_numbers = #tpu.dot_dimension_numbers<[1], [0], [0], [1], [0, 0, 1, 1], [], []>} : vector<16x64xbf16>, vector<64x64xbf16>, vector<16x64xf32> -> vector<16x64xf32>
    %c0_95 = arith.constant 0 : index
    %c1344 = arith.constant 1344 : index
    %727 = vector.load %arg10[%c0_95, %c1344] : memref<1x1443xf32, #tpu.memory_space<vmem>>, vector<1x64xf32>
    %728 = vector.broadcast %727 : vector<1x64xf32> to vector<16x64xf32>
    %729 = arith.addf %726, %728 : vector<16x64xf32>
    %730 = arith.negf %729 : vector<16x64xf32>
    %731 = math.exp %730 : vector<16x64xf32>
    %cst_96 = arith.constant 1.000000e+00 : f32
    %732 = vector.broadcast %cst_96 : f32 to vector<16x64xf32>
    %733 = arith.addf %732, %731 : vector<16x64xf32>
    %734 = arith.divf %732, %733 : vector<16x64xf32>
    %735 = arith.mulf %544, %734 : vector<16x64xf32>
    %736 = vector.extract_strided_slice %210 {offsets = [0, 0], sizes = [8, 64], strides = [1, 1]} : vector<16x64xf32> to vector<8x64xf32>
    %cst_97 = arith.constant dense<0.000000e+00> : vector<64xf32>
    %737 = vector.multi_reduction <add>, %736, %cst_97 [0] : vector<8x64xf32> to vector<64xf32>
    %738 = vector.shape_cast %737 : vector<64xf32> to vector<1x64xf32>
    %cst_98 = arith.constant 8.000000e+00 : f32
    %739 = vector.broadcast %cst_98 : f32 to vector<1x64xf32>
    %740 = arith.divf %738, %739 : vector<1x64xf32>
    %741 = vector.extract_strided_slice %711 {offsets = [0, 0], sizes = [8, 64], strides = [1, 1]} : vector<16x64xf32> to vector<8x64xf32>
    %cst_99 = arith.constant dense<0.000000e+00> : vector<64xf32>
    %742 = vector.multi_reduction <add>, %741, %cst_99 [0] : vector<8x64xf32> to vector<64xf32>
    %743 = vector.shape_cast %742 : vector<64xf32> to vector<1x64xf32>
    %cst_100 = arith.constant 8.000000e+00 : f32
    %744 = vector.broadcast %cst_100 : f32 to vector<1x64xf32>
    %745 = arith.divf %743, %744 : vector<1x64xf32>
    %746 = vector.extract_strided_slice %723 {offsets = [0, 0], sizes = [8, 64], strides = [1, 1]} : vector<16x64xf32> to vector<8x64xf32>
    %cst_101 = arith.constant dense<0.000000e+00> : vector<64xf32>
    %747 = vector.multi_reduction <add>, %746, %cst_101 [0] : vector<8x64xf32> to vector<64xf32>
    %748 = vector.shape_cast %747 : vector<64xf32> to vector<1x64xf32>
    %cst_102 = arith.constant 8.000000e+00 : f32
    %749 = vector.broadcast %cst_102 : f32 to vector<1x64xf32>
    %750 = arith.divf %748, %749 : vector<1x64xf32>
    %751 = vector.extract_strided_slice %735 {offsets = [0, 0], sizes = [8, 64], strides = [1, 1]} : vector<16x64xf32> to vector<8x64xf32>
    %cst_103 = arith.constant dense<0.000000e+00> : vector<64xf32>
    %752 = vector.multi_reduction <add>, %751, %cst_103 [0] : vector<8x64xf32> to vector<64xf32>
    %753 = vector.shape_cast %752 : vector<64xf32> to vector<1x64xf32>
    %cst_104 = arith.constant 8.000000e+00 : f32
    %754 = vector.broadcast %cst_104 : f32 to vector<1x64xf32>
    %755 = arith.divf %753, %754 : vector<1x64xf32>
    %756 = tpu.concatenate %740, %745, %750, %755 in 1 : vector<1x64xf32>, vector<1x64xf32>, vector<1x64xf32>, vector<1x64xf32> -> vector<1x256xf32>
    %757 = vector.extract_strided_slice %210 {offsets = [8, 0], sizes = [8, 64], strides = [1, 1]} : vector<16x64xf32> to vector<8x64xf32>
    %cst_105 = arith.constant dense<0.000000e+00> : vector<64xf32>
    %758 = vector.multi_reduction <add>, %757, %cst_105 [0] : vector<8x64xf32> to vector<64xf32>
    %759 = vector.shape_cast %758 : vector<64xf32> to vector<1x64xf32>
    %cst_106 = arith.constant 8.000000e+00 : f32
    %760 = vector.broadcast %cst_106 : f32 to vector<1x64xf32>
    %761 = arith.divf %759, %760 : vector<1x64xf32>
    %762 = vector.extract_strided_slice %711 {offsets = [8, 0], sizes = [8, 64], strides = [1, 1]} : vector<16x64xf32> to vector<8x64xf32>
    %cst_107 = arith.constant dense<0.000000e+00> : vector<64xf32>
    %763 = vector.multi_reduction <add>, %762, %cst_107 [0] : vector<8x64xf32> to vector<64xf32>
    %764 = vector.shape_cast %763 : vector<64xf32> to vector<1x64xf32>
    %cst_108 = arith.constant 8.000000e+00 : f32
    %765 = vector.broadcast %cst_108 : f32 to vector<1x64xf32>
    %766 = arith.divf %764, %765 : vector<1x64xf32>
    %767 = vector.extract_strided_slice %723 {offsets = [8, 0], sizes = [8, 64], strides = [1, 1]} : vector<16x64xf32> to vector<8x64xf32>
    %cst_109 = arith.constant dense<0.000000e+00> : vector<64xf32>
    %768 = vector.multi_reduction <add>, %767, %cst_109 [0] : vector<8x64xf32> to vector<64xf32>
    %769 = vector.shape_cast %768 : vector<64xf32> to vector<1x64xf32>
    %cst_110 = arith.constant 8.000000e+00 : f32
    %770 = vector.broadcast %cst_110 : f32 to vector<1x64xf32>
    %771 = arith.divf %769, %770 : vector<1x64xf32>
    %772 = vector.extract_strided_slice %735 {offsets = [8, 0], sizes = [8, 64], strides = [1, 1]} : vector<16x64xf32> to vector<8x64xf32>
    %cst_111 = arith.constant dense<0.000000e+00> : vector<64xf32>
    %773 = vector.multi_reduction <add>, %772, %cst_111 [0] : vector<8x64xf32> to vector<64xf32>
    %774 = vector.shape_cast %773 : vector<64xf32> to vector<1x64xf32>
    %cst_112 = arith.constant 8.000000e+00 : f32
    %775 = vector.broadcast %cst_112 : f32 to vector<1x64xf32>
    %776 = arith.divf %774, %775 : vector<1x64xf32>
    %777 = tpu.concatenate %761, %766, %771, %776 in 1 : vector<1x64xf32>, vector<1x64xf32>, vector<1x64xf32>, vector<1x64xf32> -> vector<1x256xf32>
    %778 = tpu.concatenate %756, %777 in 0 : vector<1x256xf32>, vector<1x256xf32> -> vector<2x256xf32>
    %779 = arith.truncf %778 : vector<2x256xf32> to vector<2x256xbf16>
    %c0_113 = arith.constant 0 : index
    %c0_114 = arith.constant 0 : index
    %780 = vector.load %arg8[%c0_113, %c0_114] : memref<256x32xbf16, #tpu.memory_space<vmem>>, vector<256x32xbf16>
    %cst_115 = arith.constant dense<0.000000e+00> : vector<2x32xf32>
    %781 = tpu.matmul %779, %780, %cst_115 {dimension_numbers = #tpu.dot_dimension_numbers<[1], [0], [0], [1], [0, 0, 1, 1], [], []>} : vector<2x256xbf16>, vector<256x32xbf16>, vector<2x32xf32> -> vector<2x32xf32>
    %c0_116 = arith.constant 0 : index
    %c1408 = arith.constant 1408 : index
    %782 = vector.load %arg10[%c0_116, %c1408] : memref<1x1443xf32, #tpu.memory_space<vmem>>, vector<1x32xf32>
    %783 = vector.broadcast %782 : vector<1x32xf32> to vector<2x32xf32>
    %784 = arith.addf %781, %783 : vector<2x32xf32>
    %785 = arith.negf %784 : vector<2x32xf32>
    %786 = math.exp %785 : vector<2x32xf32>
    %cst_117 = arith.constant 1.000000e+00 : f32
    %787 = vector.broadcast %cst_117 : f32 to vector<2x32xf32>
    %788 = arith.addf %787, %786 : vector<2x32xf32>
    %789 = arith.divf %787, %788 : vector<2x32xf32>
    %790 = arith.truncf %789 : vector<2x32xf32> to vector<2x32xbf16>
    %c0_118 = arith.constant 0 : index
    %c0_119 = arith.constant 0 : index
    %791 = vector.load %arg9[%c0_118, %c0_119] : memref<32x3xbf16, #tpu.memory_space<vmem>>, vector<32x3xbf16>
    %cst_120 = arith.constant dense<0.000000e+00> : vector<2x3xf32>
    %792 = tpu.matmul %790, %791, %cst_120 {dimension_numbers = #tpu.dot_dimension_numbers<[1], [0], [0], [1], [0, 0, 1, 1], [], []>} : vector<2x32xbf16>, vector<32x3xbf16>, vector<2x3xf32> -> vector<2x3xf32>
    %c0_121 = arith.constant 0 : index
    %c1440 = arith.constant 1440 : index
    %793 = vector.load %arg10[%c0_121, %c1440] : memref<1x1443xf32, #tpu.memory_space<vmem>>, vector<1x3xf32>
    %794 = vector.broadcast %793 : vector<1x3xf32> to vector<2x3xf32>
    %795 = arith.addf %792, %794 : vector<2x3xf32>
    %c0_122 = arith.constant 0 : index
    %c0_123 = arith.constant 0 : index
    %796 = vector.load %arg11[%c0_122, %c0_123] : memref<2x3xf32, #tpu.memory_space<vmem>>, vector<2x3xf32>
    tpu.vector_store %arg11[%c0_122, %c0_123], %795 {strides = array<i32>} : memref<2x3xf32, #tpu.memory_space<vmem>>, vector<2x3xf32>,
    return
  }
  func.func @transform_0(%arg0: i32) -> (i32, i32) {
    %c0_i32 = arith.constant 0 : i32
    %c0_i32_0 = arith.constant 0 : i32
    %c0_i32_1 = arith.constant 0 : i32
    return %c0_i32, %c0_i32_0 : i32, i32
  }
  func.func @transform_1(%arg0: i32) -> (i32, i32) {
    %c0_i32 = arith.constant 0 : i32
    %c0_i32_0 = arith.constant 0 : i32
    %c0_i32_1 = arith.constant 0 : i32
    return %c0_i32, %c0_i32_0 : i32, i32
  }
  func.func @transform_2(%arg0: i32) -> (i32, i32) {
    %c0_i32 = arith.constant 0 : i32
    %c0_i32_0 = arith.constant 0 : i32
    %c0_i32_1 = arith.constant 0 : i32
    return %c0_i32, %c0_i32_0 : i32, i32
  }
  func.func @transform_3(%arg0: i32) -> (i32, i32) {
    %c0_i32 = arith.constant 0 : i32
    %c0_i32_0 = arith.constant 0 : i32
    %c0_i32_1 = arith.constant 0 : i32
    return %c0_i32, %c0_i32_0 : i32, i32
  }
  func.func @transform_4(%arg0: i32) -> (i32, i32) {
    %c0_i32 = arith.constant 0 : i32
    %c0_i32_0 = arith.constant 0 : i32
    %c0_i32_1 = arith.constant 0 : i32
    return %c0_i32, %c0_i32_0 : i32, i32
  }
  func.func @transform_5(%arg0: i32) -> (i32, i32) {
    %c0_i32 = arith.constant 0 : i32
    %c0_i32_0 = arith.constant 0 : i32
    %c0_i32_1 = arith.constant 0 : i32
    return %c0_i32, %c0_i32_0 : i32, i32
  }
  func.func @transform_6(%arg0: i32) -> (i32, i32) {
    %c0_i32 = arith.constant 0 : i32
    %c0_i32_0 = arith.constant 0 : i32
    %c0_i32_1 = arith.constant 0 : i32
    return %c0_i32, %c0_i32_0 : i32, i32
  }
  func.func @transform_7(%arg0: i32) -> (i32, i32) {
    %c0_i32 = arith.constant 0 : i32
    %c0_i32_0 = arith.constant 0 : i32
    %c0_i32_1 = arith.constant 0 : i32
    return %c0_i32, %c0_i32_0 : i32, i32
  }
  func.func @transform_8(%arg0: i32) -> (i32, i32) {
    %c0_i32 = arith.constant 0 : i32
    %c0_i32_0 = arith.constant 0 : i32
    %c0_i32_1 = arith.constant 0 : i32
    return %c0_i32, %c0_i32_0 : i32, i32
  }
  func.func @transform_9(%arg0: i32) -> (i32, i32) {
    %c0_i32 = arith.constant 0 : i32
    %c0_i32_0 = arith.constant 0 : i32
    %c0_i32_1 = arith.constant 0 : i32
    return %c0_i32, %c0_i32_0 : i32, i32
  }
  func.func @transform_10(%arg0: i32) -> (i32, i32) {
    %c0_i32 = arith.constant 0 : i32
    %c0_i32_0 = arith.constant 0 : i32
    %c0_i32_1 = arith.constant 0 : i32
    return %c0_i32, %c0_i32_0 : i32, i32
  }
}

</mosaic_0001>

<bundles_post_ra>
// kernel: chatglm_classifier_forward.1
= control target key start
LH: loop header
LB: loop body
LE: loop exit
PB: predicated region body
PF: predicated region fallthrough
CT: control target
= control target key end

     0   :  { %15 = vsyncpa [#allocation3], 0  ;;  %s14828_s13 = smov [#allocation2]   ;;  %s17285_s0 = inlined_call_operand.vmem [shape: f32[16,64], index: 0, kind: input, shape index: {}]   ;;  %s17286_s1 = inlined_call_operand.vmem [shape: f32[16,64], index: 1, kind: input, shape index: {}]   ;;  %s17287_s2 = inlined_call_operand.vmem [shape: f32[16,16], index: 2, kind: input, shape index: {}]   ;;  %s17288_s3 = inlined_call_operand.vmem [shape: f32[16,64], index: 3, kind: input, shape index: {}]   ;;  %s17289_s4 = inlined_call_operand.vmem [shape: f32[16,16], index: 4, kind: input, shape index: {}]   ;;  %s17290_s5 = inlined_call_operand.vmem [shape: bf16[16,128], index: 5, kind: input, shape index: {}]   ;;  %s17291_s6 = inlined_call_operand.hbm [shape: bf16[64,1280], index: 6, kind: input, shape index: {}]   ;;  %s17292_s7 = inlined_call_operand.vmem [shape: bf16[256,32], index: 7, kind: input, shape index: {}]   ;;  %s17293_s8 = inlined_call_operand.vmem [shape: bf16[32,3], index: 8, kind: input, shape index: {}]   ;;  %s17294_s9 = inlined_call_operand.vmem [shape: f32[1,1443], index: 9, kind: input, shape index: {}]   ;;  %s17295_s10 = inlined_call_operand.vmem [shape: f32[2,3], index: 10, kind: output, shape index: {}]  }
   0x1   :  { %s33_s14 = sshll.u32 %s14828_s13, 4  ;;  %s14804_s17 = scalar_lea.hbm %s17291_s6, 5120  ;;  %s34_s14 = int_to_ptr.vmem [resolvable:$true] %s33_s14 }
   0x2   :  { %p14805_p0 = scmp.ne.s32.totalorder %s17291_s6, %s14804_s17  ;;  %p14808_p1 = scmp.lt.u32.totalorder %s14804_s17, %s17291_s6 }
   0x4   :  { %p14810_p2 = pnand %p14808_p1, %p14805_p0 }
   0x6   :  { %14813 = shalt.err (!%p14810_p2)
}
   0x7   :  { %s14814_s22 = scalar_lea.vmem %s34_s14, 5120  ;;  %p14819_p4 = scmp.lt.s32.totalorder %s34_s14, %s34_s14 }
   0x8   :  { %p14815_p3 = scmp.ne.s32.totalorder %s34_s14, %s14814_s22  ;;  %p14820_p5 = scmp.lt.s32.totalorder %s14814_s22, %s14814_s22 }
   0xa   :  { %p14821_p6 = por %p14820_p5, %p14819_p4 }
   0xc   :  { %p14822_p7 = pnand %p14821_p6, %p14815_p3 }
   0xe   :  { %14825 = shalt.err (!%p14822_p7)
}
   0xf   :  { %s14829_s23 = smov 640   ;;  %s14830_s24 = smov 40  }
  0x10   :  { %39 = dma.hbm_to_vmem [thread:$0]  %s17291_s6, 5120, %s34_s14, [#allocation3], %s14829_s23, %s14829_s23, %s14830_s24  }
  0x11   :  { %14826 = dma.done.wait [#allocation3], 5120  }
  0x12   :  { %14827 = vsyncadd [#allocation3], 4294962176  ;;  %v14831_v0 = vmov 0.0   ;;  %vm14832_vm0 = vmmov 0   ;;  %v14408_v1 = vld [vmem:[%s17290_s5] sm:$0xff]   ;;  %s14833_s29 = smov 64   ;;  %v292_v19 = vlaneseq }
  0x13   :  { %13416 = vmatprep.subr.bf16.mxu1 %v14831_v0  ;;  %13418 = vmatprep.mubr.msk.bf16.mxu1 %vm14832_vm0, %v14831_v0  ;;  %v14409_v2 = vld [vmem:[#allocation2] ss:$40 sps:$4 sm:$0xff]   ;;  %v14411_v4 = vld [vmem:[#allocation2 + $0x4] ss:$40 sps:$4 sm:$0xff]   ;;  %v14414_v5 = vld [vmem:[#allocation2 + $0x50] ss:$40 sps:$4 sm:$0xff]  }
  0x14   :  { %13410 = vmatprep.subr.bf16.mxu0 %v14831_v0  ;;  %13412 = vmatprep.mubr.msk.bf16.mxu0 %vm14832_vm0, %v14831_v0  ;;  %v14929_v3 = vld [vmem:[%s17294_s9] ss:$0 sm:$0xff]  ;;  %v14412_v6 = vld [vmem:[#allocation2 + $0x54] ss:$40 sps:$4 sm:$0xff]   ;;  %v14415_v8 = vld [vmem:[#allocation2 + $0xa4] ss:$40 sps:$4 sm:$0xff]  }
  0x15   :  { %134 = vrot.lane.b32.xlu0 %v14408_v1, %s14833_s29  ;;  %13411 = vmatpush3.bf16.msra.mxu0 %v14408_v1  ;;  %v14417_v7 = vld [vmem:[#allocation2 + $0xa0] ss:$40 sps:$4 sm:$0xff]   ;;  %v14420_v9 = vld [vmem:[#allocation2 + $0xf0] ss:$40 sps:$4 sm:$0xff]   ;;  %v14418_v10 = vld [vmem:[#allocation2 + $0xf4] ss:$40 sps:$4 sm:$0xff]  }
  0x16   :  { %13446 = vmatprep.subr.mxu0 %v14831_v0  ;;  %332 = vrot.lane.b32.xlu1 %v14409_v2, %s14833_s29  ;;  %v58_v11 = vld [vmem:[%s17289_s4] sm:$0xff]  ;;  %v59_v12 = vld [vmem:[%s17289_s4 + $0x8] sm:$0xff]  ;;  %vm76_vm1 = vcmask 130048   ;;  %v14422_v16 = vld [vmem:[#allocation2 + $0x50] ss:$40 sps:$4 sm:$0xff]   ;;  %v14956_v20 = vshrl.u32 %v292_v19, 7 }
  0x17   :  { %v133_v14 = vpack.c.bf16 %v59_v12, %v58_v11  ;;  %v14421_v15 = vld [vmem:[#allocation2] ss:$40 sps:$4 sm:$0xff]   ;;  %v14424_v18 = vld [vmem:[#allocation2 + $0xf0] ss:$40 sps:$4 sm:$0xff]   ;;  %vm236_vm2 = vcmask 523264   ;;  %s14834_s25 = smov 112  }
  0x18   :  { %v14423_v17 = vld [vmem:[#allocation2 + $0xa0] ss:$40 sps:$4 sm:$0xff]   ;;  %v298_v22 = vsub.s32 1, %v14956_v20  ;;  %v294_v23 = vsub.s32 0, %v14956_v20  ;;  %s14835_s26 = smov 120   ;;  %s14837_s27 = smov 104  }
  0x19   :  { %137 = vrot.lane.b32.xlu0 %v14929_v3, %s14833_s29  ;;  %v290_v21 = vld [vmem:[%s17294_s9 + $0x1] sm:$0x3]  ;;  %v51_v54 = vld [vmem:[%s17285_s0 + $0x8] sm:$0xff]  ;;  %s14838_s28 = smov 80   ;;  %s14839_s6 = smov 88   ;;  %vm467_vm3 = vcmask 64512  }
  0x1a   :  { %334 = vrot.lane.b32.xlu1 %v14411_v4, %s14833_s29  ;;  %v299_v24 = vrot.slane %v290_v21, %v298_v22  ;;  %v295_v25 = vrot.slane %v290_v21, %v294_v23  ;;  %v50_v53 = vld [vmem:[%s17285_s0] sm:$0xff]  ;;  %v55_v58 = vld [vmem:[%s17287_s2 + $0x8] sm:$0xff]  ;;  %s14840_s30 = smov 72   ;;  %s14841_s5 = smov 8   ;;  %vm3090_vm4 = vcmask 195584   ;;  %vm3092_vm5 = vcmask 261120  }
  0x1b   :  { %v281_v56 = vpack.c.bf16 %v51_v54, %v50_v53  ;;  %v54_v57 = vld [vmem:[%s17287_s2] sm:$0xff]  ;;  %s14836_s2 = smov 96   ;;  %s14842_s11 = smov 16   ;;  %vm3094_vm6 = vcmask 326656   ;;  %vm3096_vm7 = vcmask 392192   ;;  %vm3098_vm8 = vcmask 457728  }
  0x1c   :  { %v60_v59 = vpack.c.bf16 %v55_v58, %v54_v57  ;;  %v12757_v60 = vld [vmem:[%s17294_s9 + $0x1] ss:$0 sm:$0xff]  ;;  %s14843_s12 = smov 24   ;;  %s14844_s13 = smov 32   ;;  %vm12493_vm9 = vcmask 1040384   ;;  %vm12742_vm10 = vcmask 17408  }
  0x1d   :  { %336 = vrot.lane.b32.xlu0 %v14414_v5, %s14833_s29  ;;  %s14845_s4 = smov 56   ;;  %s14846_s16 = smov 48  }
  0x1e   :  { %338 = vrot.lane.b32.xlu1 %v14412_v6, %s14833_s29  ;;  %13413 = vmatmul.mubr.msk.bf16.vlgmr.msra.gmra.mrb[0].mxu0 %vm76_vm1, %v60_v59 }
  0x1f   :  { %13448 = vmatprep.mubr.msk.f32.mxu0 %vm14832_vm0, %v14831_v0 }
  0x21   :  { %340 = vrot.lane.b32.xlu0 %v14417_v7, %s14833_s29 }
  0x22   :  { %342 = vrot.lane.b32.xlu1 %v14415_v8, %s14833_s29 }
  0x25   :  { %344 = vrot.lane.b32.xlu0 %v14420_v9, %s14833_s29 }
  0x26   :  { %346 = vrot.lane.b32.xlu1 %v14418_v10, %s14833_s29 }
  0x29   :  { %357 = vrot.lane.b32.xlu0 %v295_v25, %s14833_s29 }
  0x2a   :  { %359 = vrot.lane.b32.xlu1 %v299_v24, %s14833_s29 }
  0x87   :  { %v135_v13 = vpop.permute.xlu0 %134 }
  0x88   :  { %13417 = vmatpush3.bf16.msra.mxu1 %v135_v13  ;;  %v333_v37 = vpop.permute.xlu1 %332 }
  0x89   :  { %13422 = vmatprep.subr.bf16.mxu1 %v14831_v0 }
  0x8b   :  { %13419 = vmatmul.mubr.msk.bf16.vlgmr.msra.gmra.mrb[0].mxu1 %vm76_vm1, %v133_v14  ;;  %v138_v26 = vpop.permute.xlu0 %137 }
  0x8c   :  { %13430 = vmatprep.mubr.msk.bf16.mxu1 %vm14832_vm0, %v14831_v0  ;;  %13423 = vmatpush3.bf16.msra.mxu1 %v14421_v15  ;;  %v335_v40 = vpop.permute.xlu1 %334 }
  0x8d   :  { %13424 = vmatprep.subr.bf16.mxu1 %v14831_v0  ;;  %v349_v45 = vsel %vm236_vm2, %v333_v37, %v335_v40 }
  0x8f   :  { %v337_v42 = vpop.permute.xlu0 %336 }
  0x90   :  { %13425 = vmatpush3.bf16.msra.mxu1 %v14422_v16  ;;  %v339_v41 = vpop.permute.xlu1 %338 }
  0x91   :  { %13426 = vmatprep.subr.bf16.mxu1 %v14831_v0  ;;  %v350_v49 = vsel %vm236_vm2, %v337_v42, %v339_v41 }
  0x93   :  { %v341_v48 = vpop.permute.xlu0 %340 }
  0x94   :  { %13427 = vmatpush3.bf16.msra.mxu1 %v14423_v17  ;;  %v343_v47 = vpop.permute.xlu1 %342 }
  0x95   :  { %13428 = vmatprep.subr.bf16.mxu1 %v14831_v0  ;;  %v351_v50 = vsel %vm236_vm2, %v341_v48, %v343_v47 }
  0x97   :  { %v345_v52 = vpop.permute.xlu0 %344 }
  0x98   :  { %13429 = vmatpush3.bf16.msra.mxu1 %v14424_v18  ;;  %v347_v51 = vpop.permute.xlu1 %346 }
  0x99   :  { %13434 = vmatprep.subr.bf16.mxu1 %v14831_v0  ;;  %v352_v55 = vsel %vm236_vm2, %v345_v52, %v347_v51 }
  0x9b   :  { %v358_v5 = vpop.permute.xlu0 %357 }
  0x9c   :  { %v360_v4 = vpop.permute.xlu1 %359 }
  0x9d   :  { %v361_v7 = vsel %vm236_vm2, %v358_v5, %v360_v4 }
  0xf1   :  { %v15056_v14 = vpop.f32.mrb[0].mxu0 }
  0xf2   :  { %v13414_v15 = vpop.f32.mrb[1].mxu0 }
  0xf3   :  { %v15058_v16 = vpop.f32.mrb[2].mxu0 }
  0xf4   :  { %v13415_v17 = vpop.f32.mrb[3].mxu0  ;;  %v118_v51 = vadd.f32 %v14929_v3, %v15058_v16 }
  0xf6   :  { %v12753_v53 = vmul.f32 -1.442695, %v118_v51 }
 0x15e   :  { %v177_v27 = vpop.f32.mrb[0].mxu1 }
 0x15f   :  { %v178_v28 = vadd.f32 %v177_v27, %v138_v26  ;;  %v13420_v29 = vpop.f32.mrb[1].mxu1 }
 0x160   :  { %v180_v30 = vpop.f32.mrb[2].mxu1 }
 0x161   :  { %v12755_v31 = vmul.f32 -1.442695, %v178_v28  ;;  %v181_v32 = vadd.f32 %v180_v30, %v138_v26  ;;  %v13421_v33 = vpop.f32.mrb[3].mxu1 }
 0x163   :  { %14487 = vpow2.f32 %v12755_v31  ;;  %v12756_v34 = vmul.f32 -1.442695, %v181_v32 }
 0x165   :  { %14489 = vpow2.f32 %v12756_v34 }
 0x16d   :  { %v14488_v35 = vpop.eup %14487 }
 0x16e   :  { %v190_v36 = vadd.f32 1.0, %v14488_v35 }
 0x16f   :  { %v14490_v38 = vpop.eup %14489 }
 0x170   :  { %v191_v39 = vadd.f32 1.0, %v14490_v38  ;;  %14491 = vrcp.f32 %v190_v36 }
 0x172   :  { %14493 = vrcp.f32 %v191_v39 }
 0x17a   :  { %v14492_v43 = vpop.eup %14491 }
 0x17c   :  { %v14494_v44 = vpop.eup %14493 }
 0x17d   :  { %v196_v46 = vpack.c.bf16 %v14494_v44, %v14492_v43 }
 0x17f   :  { %13431 = vmatmul.mubr.msk.bf16.vlgmr.msra.gmra.mrb[4].mxu1 %vm236_vm2, %v196_v46 }
 0x180   :  { %13435 = vmatpush3.bf16.msra.mxu1 %v349_v45  ;;  %13442 = vmatprep.mubr.msk.bf16.mxu1 %vm14832_vm0, %v14831_v0 }
 0x181   :  { %13436 = vmatprep.subr.bf16.mxu1 %v14831_v0 }
 0x184   :  { %13437 = vmatpush3.bf16.msra.mxu1 %v350_v49 }
 0x185   :  { %13438 = vmatprep.subr.bf16.mxu1 %v14831_v0 }
 0x188   :  { %13439 = vmatpush3.bf16.msra.mxu1 %v351_v50  ;;  %v115_v50 = vadd.f32 %v14929_v3, %v15056_v14 }
 0x189   :  { %13440 = vmatprep.subr.bf16.mxu1 %v14831_v0 }
 0x18a   :  { %v12752_v52 = vmul.f32 -1.442695, %v115_v50 }
 0x18c   :  { %13441 = vmatpush3.bf16.msra.mxu1 %v352_v55  ;;  %14495 = vpow2.f32 %v12752_v52 }
 0x18d   :  { %13461 = vmatprep.subr.mxu1 %v14831_v0  ;;  %14497 = vpow2.f32 %v12753_v53 }
 0x18f   :  { %13443 = vmatmul.mubr.msk.bf16.vlgmr.msra.gmra.mrb[8].mxu1 %vm236_vm2, %v281_v56 }
 0x190   :  { %13463 = vmatprep.mubr.msk.f32.mxu1 %vm14832_vm0, %v14831_v0 }
 0x196   :  { %v14496_v54 = vpop.eup %14495 }
 0x197   :  { %v14498_v55 = vpop.eup %14497  ;;  %v127_v56 = vadd.f32 1.0, %v14496_v54 }
 0x198   :  { %v128_v57 = vadd.f32 1.0, %v14498_v55 }
 0x199   :  { %14499 = vrcp.f32 %v127_v56 }
 0x19a   :  { %14501 = vrcp.f32 %v128_v57 }
 0x252   :  { %v274_v61 = vpop.f32.mrb[4].mxu1 }
 0x253   :  { %v275_v62 = vadd.f32 %v12757_v60, %v274_v61  ;;  %v13432_v63 = vpop.f32.mrb[5].mxu1 }
 0x254   :  { %v277_v1 = vpop.f32.mrb[6].mxu1 }
 0x255   :  { %410 = vrot.lane.b32.xlu0 %v275_v62, %s14834_s25  ;;  %408 = vrot.lane.b32.xlu1 %v275_v62, %s14835_s26  ;;  %v13433_v2 = vpop.f32.mrb[7].mxu1  ;;  %v15007_v6 = vadd.f32 %v12757_v60, %v277_v1 }
 0x259   :  { %414 = vrot.lane.b32.xlu0 %v275_v62, %s14836_s2  ;;  %412 = vrot.lane.b32.xlu1 %v275_v62, %s14837_s27 }
 0x25d   :  { %418 = vrot.lane.b32.xlu0 %v275_v62, %s14838_s28  ;;  %416 = vrot.lane.b32.xlu1 %v275_v62, %s14839_s6 }
 0x261   :  { %420 = vrot.lane.b32.xlu1 %v275_v62, %s14840_s30  ;;  %425 = vrot.lane.b32.xlu0 %v15007_v6, %s14834_s25 }
 0x262   :  { %v400_v8 = vpop.f32.mrb[8].mxu1 }
 0x263   :  { %v401_v9 = vadd.f32 %v400_v8, %v361_v7  ;;  %v13444_v10 = vpop.f32.mrb[9].mxu1 }
 0x264   :  { %v403_v11 = vpop.f32.mrb[10].mxu1 }
 0x265   :  { %13447 = vmatpush3.xpose.msk.msra.mxu0 %vm467_vm3, %v401_v9  ;;  %429 = vrot.lane.b32.xlu0 %v15007_v6, %s14836_s2  ;;  %v13445_v12 = vpop.f32.mrb[11].mxu1  ;;  %v15031_v13 = vadd.f32 %v403_v11, %v361_v7 }
 0x266   :  { %423 = vrot.lane.b32.xlu1 %v15007_v6, %s14835_s26  ;;  %13451 = vmatprep.subr.mxu0 %v14831_v0 }
 0x268   :  { %13449 = vmatmul.mubr.msk.f32.vlgmr.msra.gmra.mrb[4].mxu0 %vm467_vm3, %v275_v62  ;;  %v15178_v62 = vpop.eup %14499 }
 0x269   :  { %438 = vrot.lane.b32.xlu0 %v401_v9, %s14835_s26  ;;  %13453 = vmatprep.mubr.msk.f32.mxu0 %vm14832_vm0, %v14831_v0  ;;  %v15180_v3 = vpop.eup %14501 }
 0x26a   :  { %427 = vrot.lane.b32.xlu1 %v15007_v6, %s14837_s27  ;;  %v3668_v63 = vpack.c.bf16 %v15180_v3, %v15178_v62  ;;  %v3356_v62 = vld [vmem:[%s17294_s9 + $0x5] sm:$0x7] }
 0x26b   :  { %v3361_v3 = vrot.slane %v3356_v62, %v294_v23 }
 0x26d   :  { %440 = vrot.lane.b32.xlu0 %v401_v9, %s14834_s25 }
 0x26e   :  { %442 = vrot.lane.b32.xlu1 %v401_v9, %s14837_s27 }
 0x271   :  { %444 = vrot.lane.b32.xlu0 %v401_v9, %s14836_s2 }
 0x272   :  { %446 = vrot.lane.b32.xlu1 %v401_v9, %s14839_s6 }
 0x275   :  { %448 = vrot.lane.b32.xlu0 %v401_v9, %s14838_s28 }
 0x276   :  { %450 = vrot.lane.b32.xlu1 %v401_v9, %s14840_s30 }
 0x279   :  { %453 = vrot.lane.b32.xlu0 %v15031_v13, %s14835_s26 }
 0x27a   :  { %431 = vrot.lane.b32.xlu1 %v15007_v6, %s14839_s6 }
 0x27d   :  { %455 = vrot.lane.b32.xlu0 %v15031_v13, %s14834_s25 }
 0x27e   :  { %457 = vrot.lane.b32.xlu1 %v15031_v13, %s14837_s27 }
 0x281   :  { %459 = vrot.lane.b32.xlu0 %v15031_v13, %s14836_s2 }
 0x282   :  { %461 = vrot.lane.b32.xlu1 %v15031_v13, %s14839_s6 }
 0x285   :  { %463 = vrot.lane.b32.xlu0 %v15031_v13, %s14838_s28 }
 0x286   :  { %465 = vrot.lane.b32.xlu1 %v15031_v13, %s14840_s30 }
 0x289   :  { %433 = vrot.lane.b32.xlu0 %v15007_v6, %s14838_s28 }
 0x28a   :  { %435 = vrot.lane.b32.xlu1 %v15007_v6, %s14840_s30 }
 0x28d   :  { %2452 = vrot.lane.b32.xlu0 %v15031_v13, %s14833_s29 }
 0x28e   :  { %1844 = vrot.lane.b32.xlu1 %v401_v9, %s14833_s29 }
 0x2c7   :  { %v411_v18 = vpop.permute.xlu0 %410  ;;  %v409_v19 = vpop.permute.xlu1 %408 }
 0x2cb   :  { %v415_v21 = vpop.permute.xlu0 %414  ;;  %v413_v24 = vpop.permute.xlu1 %412 }
 0x2cf   :  { %v419_v25 = vpop.permute.xlu0 %418  ;;  %v417_v26 = vpop.permute.xlu1 %416 }
 0x2d3   :  { %v421_v27 = vpop.permute.xlu1 %420  ;;  %v15060_v28 = vpop.permute.xlu0 %425 }
 0x2d7   :  { %v15062_v29 = vpop.permute.xlu0 %429 }
 0x2d8   :  { %v424_v30 = vpop.permute.xlu1 %423 }
 0x2db   :  { %v439_v31 = vpop.permute.xlu0 %438 }
 0x2dc   :  { %v428_v32 = vpop.permute.xlu1 %427  ;;  %13452 = vmatpush3.xpose.msk.msra.mxu0 %vm467_vm3, %v439_v31  ;;  %1920 = vrot.lane.b32.xlu0 %v439_v31, %s14833_s29 }
 0x2dd   :  { %13456 = vmatprep.subr.mxu0 %v14831_v0 }
 0x2df   :  { %v441_v33 = vpop.permute.xlu0 %440  ;;  %13454 = vmatmul.mubr.msk.f32.vlgmr.msra.gmra.mrb[6].mxu0 %vm467_vm3, %v409_v19 }
 0x2e0   :  { %v443_v34 = vpop.permute.xlu1 %442  ;;  %13457 = vmatpush3.xpose.msk.msra.mxu0 %vm467_vm3, %v441_v33  ;;  %1996 = vrot.lane.b32.xlu1 %v441_v33, %s14833_s29 }
 0x2e1   :  { %13462 = vmatpush3.xpose.msk.msra.mxu1 %vm467_vm3, %v443_v34  ;;  %2072 = vrot.lane.b32.xlu0 %v443_v34, %s14833_s29 }
 0x2e2   :  { %13458 = vmatprep.mubr.msk.f32.mxu0 %vm14832_vm0, %v14831_v0  ;;  %13471 = vmatprep.subr.mxu1 %v14831_v0 }
 0x2e3   :  { %v445_v35 = vpop.permute.xlu0 %444  ;;  %13459 = vmatmul.mubr.msk.f32.vlgmr.msra.gmra.mrb[8].mxu0 %vm467_vm3, %v411_v18  ;;  %13466 = vmatprep.subr.mxu0 %v14831_v0 }
 0x2e4   :  { %13464 = vmatmul.mubr.msk.f32.vlgmr.msra.gmra.mrb[12].mxu1 %vm467_vm3, %v413_v24  ;;  %v447_v36 = vpop.permute.xlu1 %446  ;;  %13467 = vmatpush3.xpose.msk.msra.mxu0 %vm467_vm3, %v445_v35 }
 0x2e5   :  { %13472 = vmatpush3.xpose.msk.msra.mxu1 %vm467_vm3, %v447_v36  ;;  %2148 = vrot.lane.b32.xlu1 %v445_v35, %s14833_s29 }
 0x2e6   :  { %13468 = vmatprep.mubr.msk.f32.mxu0 %vm14832_vm0, %v14831_v0  ;;  %13473 = vmatprep.mubr.msk.f32.mxu1 %vm14832_vm0, %v14831_v0 }
 0x2e7   :  { %13481 = vmatprep.subr.mxu1 %v14831_v0  ;;  %v449_v37 = vpop.permute.xlu0 %448  ;;  %13469 = vmatmul.mubr.msk.f32.vlgmr.msra.gmra.mrb[10].mxu0 %vm467_vm3, %v415_v21 }
 0x2e8   :  { %13474 = vmatmul.mubr.msk.f32.vlgmr.msra.gmra.mrb[14].mxu1 %vm467_vm3, %v417_v26  ;;  %v451_v38 = vpop.permute.xlu1 %450  ;;  %13476 = vmatprep.subr.mxu0 %v14831_v0 }
 0x2e9   :  { %13477 = vmatpush3.xpose.msk.msra.mxu0 %vm467_vm3, %v449_v37  ;;  %13482 = vmatpush3.xpose.msk.msra.mxu1 %vm467_vm3, %v451_v38 }
 0x2ea   :  { %2224 = vrot.lane.b32.xlu1 %v447_v36, %s14833_s29  ;;  %2300 = vrot.lane.b32.xlu0 %v449_v37, %s14833_s29 }
 0x2eb   :  { %13478 = vmatprep.mubr.msk.f32.mxu0 %vm14832_vm0, %v14831_v0  ;;  %13483 = vmatprep.mubr.msk.f32.mxu1 %vm14832_vm0, %v14831_v0  ;;  %v454_v39 = vpop.permute.xlu0 %453 }
 0x2ec   :  { %13484 = vmatmul.mubr.msk.f32.vlgmr.msra.gmra.mrb[16].mxu1 %vm467_vm3, %v421_v27  ;;  %13491 = vmatprep.subr.mxu1 %v14831_v0  ;;  %v432_v40 = vpop.permute.xlu1 %431 }
 0x2ed   :  { %13479 = vmatmul.mubr.msk.f32.vlgmr.msra.gmra.mrb[12].mxu0 %vm467_vm3, %v419_v25  ;;  %13486 = vmatprep.subr.mxu0 %v14831_v0 }
 0x2ee   :  { %2376 = vrot.lane.b32.xlu1 %v451_v38, %s14833_s29  ;;  %13487 = vmatpush3.xpose.msk.msra.mxu0 %vm467_vm3, %v15031_v13 }
 0x2ef   :  { %13492 = vmatpush3.xpose.msk.msra.mxu1 %vm467_vm3, %v454_v39  ;;  %13488 = vmatprep.mubr.msk.f32.mxu0 %vm14832_vm0, %v14831_v0  ;;  %v15107_v41 = vpop.permute.xlu0 %455 }
 0x2f0   :  { %13493 = vmatprep.mubr.msk.f32.mxu1 %vm14832_vm0, %v14831_v0  ;;  %v15111_v42 = vpop.permute.xlu1 %457  ;;  %13501 = vmatprep.subr.mxu1 %v14831_v0 }
 0x2f1   :  { %13489 = vmatmul.mubr.msk.f32.vlgmr.msra.gmra.mrb[14].mxu0 %vm467_vm3, %v15007_v6  ;;  %13496 = vmatprep.subr.mxu0 %v14831_v0 }
 0x2f2   :  { %13494 = vmatmul.mubr.msk.f32.vlgmr.msra.gmra.mrb[18].mxu1 %vm467_vm3, %v424_v30  ;;  %2528 = vrot.lane.b32.xlu1 %v454_v39, %s14833_s29 }
 0x2f3   :  { %13502 = vmatpush3.xpose.msk.msra.mxu1 %vm467_vm3, %v15111_v42  ;;  %13497 = vmatpush3.xpose.msk.msra.mxu0 %vm467_vm3, %v15107_v41  ;;  %v15123_v43 = vpop.permute.xlu0 %459 }
 0x2f4   :  { %13498 = vmatprep.mubr.msk.f32.mxu0 %vm14832_vm0, %v14831_v0  ;;  %13503 = vmatprep.mubr.msk.f32.mxu1 %vm14832_vm0, %v14831_v0  ;;  %v15129_v44 = vpop.permute.xlu1 %461 }
 0x2f5   :  { %13511 = vmatprep.subr.mxu1 %v14831_v0  ;;  %13506 = vmatprep.subr.mxu0 %v14831_v0 }
 0x2f6   :  { %13504 = vmatmul.mubr.msk.f32.vlgmr.msra.gmra.mrb[20].mxu1 %vm467_vm3, %v428_v32  ;;  %13499 = vmatmul.mubr.msk.f32.vlgmr.msra.gmra.mrb[16].mxu0 %vm467_vm3, %v15060_v28 }
 0x2f7   :  { %13507 = vmatpush3.xpose.msk.msra.mxu0 %vm467_vm3, %v15123_v43  ;;  %13512 = vmatpush3.xpose.msk.msra.mxu1 %vm467_vm3, %v15129_v44  ;;  %v15140_v45 = vpop.permute.xlu0 %463 }
 0x2f8   :  { %13508 = vmatprep.mubr.msk.f32.mxu0 %vm14832_vm0, %v14831_v0  ;;  %13513 = vmatprep.mubr.msk.f32.mxu1 %vm14832_vm0, %v14831_v0  ;;  %v15146_v46 = vpop.permute.xlu1 %465 }
 0x2f9   :  { %13521 = vmatprep.subr.mxu1 %v14831_v0  ;;  %13516 = vmatprep.subr.mxu0 %v14831_v0 }
 0x2fa   :  { %13514 = vmatmul.mubr.msk.f32.vlgmr.msra.gmra.mrb[22].mxu1 %vm467_vm3, %v432_v40  ;;  %13509 = vmatmul.mubr.msk.f32.vlgmr.msra.gmra.mrb[18].mxu0 %vm467_vm3, %v15062_v29 }
 0x2fb   :  { %13517 = vmatpush3.xpose.msk.msra.mxu0 %vm467_vm3, %v15140_v45  ;;  %13522 = vmatpush3.xpose.msk.msra.mxu1 %vm467_vm3, %v15146_v46  ;;  %v434_v47 = vpop.permute.xlu0 %433 }
 0x2fc   :  { %v436_v48 = vpop.permute.xlu1 %435  ;;  %13523 = vmatprep.mubr.msk.f32.mxu1 %vm14832_vm0, %v14831_v0  ;;  %13518 = vmatprep.mubr.msk.f32.mxu0 %vm14832_vm0, %v14831_v0 }
 0x2fd   :  { %13526 = vmatprep.subr.mxu0 %v14831_v0  ;;  %13531 = vmatprep.subr.mxu1 %v14831_v0 }
 0x2fe   :  { %13519 = vmatmul.mubr.msk.f32.vlgmr.msra.gmra.mrb[20].mxu0 %vm467_vm3, %v434_v47  ;;  %13524 = vmatmul.mubr.msk.f32.vlgmr.msra.gmra.mrb[24].mxu1 %vm467_vm3, %v436_v48 }
 0x2ff   :  { %13528 = vmatprep.mubr.msk.f32.mxu0 %vm14832_vm0, %v14831_v0  ;;  %13533 = vmatprep.mubr.msk.f32.mxu1 %vm14832_vm0, %v14831_v0  ;;  %v15184_v1 = vpop.permute.xlu0 %2452 }
 0x300   :  { %v1845_v49 = vpop.permute.xlu1 %1844 }
 0x301   :  { %13527 = vmatpush3.msra.mxu0 %v1845_v49 }
 0x302   :  { %13536 = vmatprep.subr.mxu0 %v14831_v0 }
 0x33b   :  { %v538_v58 = vpop.f32.mrb[4].mxu0 }
 0x33c   :  { %v15174_v59 = vmul.f32 0.35355338, %v538_v58  ;;  %v13450_v60 = vpop.f32.mrb[5].mxu0 }
 0x33e   :  { %v1668_v61 = vsel %vm467_vm3, %v15174_v59, -inf }
 0x33f   :  { %1669 = vmax.xlane.f32.xlu0 %v1668_v61 }
 0x34e   :  { %v1921_v2 = vpop.permute.xlu0 %1920 }
 0x34f   :  { %13532 = vmatpush3.msra.mxu1 %v1921_v2 }
 0x350   :  { %13541 = vmatprep.subr.mxu1 %v14831_v0 }
 0x3b2   :  { %v612_v4 = vpop.f32.mrb[6].mxu0 }
 0x3b3   :  { %v15187_v5 = vmul.f32 0.35355338, %v612_v4  ;;  %v13455_v6 = vpop.f32.mrb[7].mxu0 }
 0x3b5   :  { %v1671_v7 = vsel %vm467_vm3, %v15187_v5, -inf }
 0x3b6   :  { %v686_v8 = vpop.f32.mrb[8].mxu0  ;;  %1672 = vmax.xlane.f32.xlu1 %v1671_v7 }
 0x3b7   :  { %v760_v9 = vpop.f32.mrb[12].mxu1  ;;  %v13460_v10 = vpop.f32.mrb[9].mxu0  ;;  %v15193_v13 = vmul.f32 0.35355338, %v686_v8 }
 0x3b8   :  { %v15191_v11 = vmul.f32 0.35355338, %v760_v9  ;;  %v13465_v12 = vpop.f32.mrb[13].mxu1 }
 0x3b9   :  { %v1674_v25 = vsel %vm467_vm3, %v15193_v13, -inf }
 0x3ba   :  { %v834_v14 = vpop.f32.mrb[10].mxu0  ;;  %v1677_v15 = vsel %vm467_vm3, %v15191_v11, -inf }
 0x3bb   :  { %v15197_v16 = vmul.f32 0.35355338, %v834_v14  ;;  %1678 = vmax.xlane.f32.xlu0 %v1677_v15  ;;  %v908_v17 = vpop.f32.mrb[14].mxu1  ;;  %v13470_v18 = vpop.f32.mrb[11].mxu0 }
 0x3bc   :  { %v13475_v19 = vpop.f32.mrb[15].mxu1  ;;  %v15201_v24 = vmul.f32 0.35355338, %v908_v17 }
 0x3bd   :  { %v1680_v21 = vsel %vm467_vm3, %v15197_v16, -inf  ;;  %v15255_v19 = vpop.permute.xlu0 %2072 }
 0x3be   :  { %1681 = vmax.xlane.f32.xlu1 %v1680_v21  ;;  %v1683_v32 = vsel %vm467_vm3, %v15201_v24, -inf }
 0x3bf   :  { %1675 = vmax.xlane.f32.xlu0 %v1674_v25  ;;  %v1056_v26 = vpop.f32.mrb[16].mxu1 }
 0x3c0   :  { %v982_v27 = vpop.f32.mrb[12].mxu0  ;;  %v13485_v28 = vpop.f32.mrb[17].mxu1  ;;  %v15207_v31 = vmul.f32 0.35355338, %v1056_v26 }
 0x3c1   :  { %v15205_v29 = vmul.f32 0.35355338, %v982_v27  ;;  %v13480_v30 = vpop.f32.mrb[13].mxu0  ;;  %v15257_v21 = vpop.permute.xlu0 %2300 }
 0x3c2   :  { %v1689_v40 = vsel %vm467_vm3, %v15207_v31, -inf }
 0x3c3   :  { %v1686_v33 = vsel %vm467_vm3, %v15205_v29, -inf  ;;  %1684 = vmax.xlane.f32.xlu0 %v1683_v32 }
 0x3c4   :  { %1687 = vmax.xlane.f32.xlu1 %v1686_v33  ;;  %v1130_v34 = vpop.f32.mrb[14].mxu0 }
 0x3c5   :  { %v15213_v35 = vmul.f32 0.35355338, %v1130_v34  ;;  %v1204_v36 = vpop.f32.mrb[18].mxu1  ;;  %v13490_v37 = vpop.f32.mrb[15].mxu0 }
 0x3c6   :  { %v15215_v38 = vmul.f32 0.35355338, %v1204_v36  ;;  %v13495_v39 = vpop.f32.mrb[19].mxu1 }
 0x3c7   :  { %v1692_v47 = vsel %vm467_vm3, %v15213_v35, -inf  ;;  %1690 = vmax.xlane.f32.xlu0 %v1689_v40 }
 0x3c8   :  { %1693 = vmax.xlane.f32.xlu1 %v1692_v47  ;;  %v1695_v50 = vsel %vm467_vm3, %v15215_v38, -inf }
 0x3c9   :  { %v1278_v48 = vpop.f32.mrb[16].mxu0  ;;  %v1352_v49 = vpop.f32.mrb[20].mxu1 }
 0x3ca   :  { %v15223_v51 = vmul.f32 0.35355338, %v1278_v48  ;;  %v15225_v52 = vmul.f32 0.35355338, %v1352_v49  ;;  %v13500_v53 = vpop.f32.mrb[17].mxu0  ;;  %v13505_v54 = vpop.f32.mrb[21].mxu1 }
 0x3cb   :  { %1696 = vmax.xlane.f32.xlu0 %v1695_v50 }
 0x3cc   :  { %v1698_v55 = vsel %vm467_vm3, %v15223_v51, -inf  ;;  %v1701_v58 = vsel %vm467_vm3, %v15225_v52, -inf }
 0x3cd   :  { %1699 = vmax.xlane.f32.xlu1 %v1698_v55  ;;  %v1426_v56 = vpop.f32.mrb[18].mxu0  ;;  %v1500_v57 = vpop.f32.mrb[22].mxu1 }
 0x3ce   :  { %v15231_v60 = vmul.f32 0.35355338, %v1426_v56  ;;  %v15233_v61 = vmul.f32 0.35355338, %v1500_v57  ;;  %v13510_v2 = vpop.f32.mrb[19].mxu0  ;;  %v13515_v4 = vpop.f32.mrb[23].mxu1 }
 0x3cf   :  { %1702 = vmax.xlane.f32.xlu0 %v1701_v58 }
 0x3d0   :  { %v1704_v6 = vsel %vm467_vm3, %v15231_v60, -inf  ;;  %v1707_v14 = vsel %vm467_vm3, %v15233_v61, -inf }
 0x3d1   :  { %1705 = vmax.xlane.f32.xlu1 %v1704_v6  ;;  %v1574_v7 = vpop.f32.mrb[20].mxu0  ;;  %v1648_v8 = vpop.f32.mrb[24].mxu1 }
 0x3d2   :  { %v15237_v9 = vmul.f32 0.35355338, %v1648_v8  ;;  %v13520_v10 = vpop.f32.mrb[21].mxu0  ;;  %v13525_v12 = vpop.f32.mrb[25].mxu1  ;;  %v15249_v17 = vmul.f32 0.35355338, %v1574_v7 }
 0x3d3   :  { %1708 = vmax.xlane.f32.xlu0 %v1707_v14 }
 0x3d4   :  { %v1713_v15 = vsel %vm467_vm3, %v15237_v9, -inf  ;;  %v1710_v18 = vsel %vm467_vm3, %v15249_v17, -inf }
 0x3d7   :  { %1714 = vmax.xlane.f32.xlu0 %v1713_v15 }
 0x3e2   :  { %2680 = vrot.lane.b32.xlu1 %v15111_v42, %s14833_s29  ;;  %v1670_v42 = vpop.xlane.xlu0 %1669 }
 0x3e3   :  { %v1716_v25 = vsub.f32 %v15174_v59, %v1670_v42 }
 0x3e5   :  { %v1732_v26 = vmul.f32 1.442695, %v1716_v25 }
 0x3e7   :  { %14503 = vpow2.f32 %v1732_v26 }
 0x3ed   :  { %2604 = vrot.lane.b32.xlu0 %v15107_v41, %s14833_s29  ;;  %v15260_v41 = vpop.permute.xlu1 %1996 }
 0x3f1   :  { %2756 = vrot.lane.b32.xlu0 %v15123_v43, %s14833_s29  ;;  %v15262_v43 = vpop.permute.xlu1 %2148  ;;  %v15266_v28 = vpop.eup %14503 }
 0x3f5   :  { %v15264_v27 = vpop.permute.xlu1 %2224 }
 0x3f9   :  { %v15268_v30 = vpop.permute.xlu1 %2376 }
 0x3fd   :  { %v15272_v32 = vpop.permute.xlu1 %2528 }
 0x406   :  { %1711 = vmax.xlane.f32.xlu1 %v1710_v18 }
 0x417   :  { %2832 = vrot.lane.b32.xlu1 %v15129_v44, %s14833_s29  ;;  %v1764_v44 = vsel %vm467_vm3, %v15266_v28, 0.0 }
 0x43b   :  { %1765 = vadd.xlane.f32.xlu1 %v1764_v44 }
 0x443   :  { %v1673_v33 = vpop.xlane.xlu1 %1672 }
 0x444   :  { %v1717_v59 = vsub.f32 %v15187_v5, %v1673_v33 }
 0x446   :  { %v1734_v34 = vmul.f32 1.442695, %v1717_v59 }
 0x448   :  { %14505 = vpow2.f32 %v1734_v34  ;;  %v1679_v36 = vpop.xlane.xlu0 %1678 }
 0x449   :  { %v1719_v37 = vsub.f32 %v15191_v11, %v1679_v36 }
 0x44b   :  { %v1738_v39 = vmul.f32 1.442695, %v1719_v37  ;;  %v1682_v40 = vpop.xlane.xlu1 %1681 }
 0x44c   :  { %v1720_v47 = vsub.f32 %v15197_v16, %v1682_v40  ;;  %v1676_v48 = vpop.xlane.xlu0 %1675 }
 0x44d   :  { %14507 = vpow2.f32 %v1738_v39  ;;  %v1718_v49 = vsub.f32 %v15193_v13, %v1676_v48 }
 0x44e   :  { %v1740_v50 = vmul.f32 1.442695, %v1720_v47 }
 0x44f   :  { %v1736_v53 = vmul.f32 1.442695, %v1718_v49 }
 0x450   :  { %v1685_v54 = vpop.xlane.xlu0 %1684 }
 0x451   :  { %14509 = vpow2.f32 %v1736_v53  ;;  %v1688_v55 = vpop.xlane.xlu1 %1687  ;;  %v1721_v5 = vsub.f32 %v15201_v24, %v1685_v54 }
 0x452   :  { %v15279_v56 = vpop.eup %14505  ;;  %v1722_v57 = vsub.f32 %v15205_v29, %v1688_v55  ;;  %14511 = vpow2.f32 %v1740_v50 }
 0x453   :  { %v1742_v11 = vmul.f32 1.442695, %v1721_v5  ;;  %v1767_v16 = vsel %vm467_vm3, %v15279_v56, 0.0 }
 0x454   :  { %v1744_v58 = vmul.f32 1.442695, %v1722_v57  ;;  %v1691_v2 = vpop.xlane.xlu0 %1690  ;;  %1768 = vadd.xlane.f32.xlu0 %v1767_v16 }
 0x455   :  { %14513 = vpow2.f32 %v1742_v11  ;;  %v1694_v13 = vpop.xlane.xlu1 %1693  ;;  %v1723_v4 = vsub.f32 %v15207_v31, %v1691_v2 }
 0x456   :  { %v1724_v6 = vsub.f32 %v15213_v35, %v1694_v13  ;;  %14515 = vpow2.f32 %v1744_v58 }
 0x457   :  { %v15286_v7 = vpop.eup %14507  ;;  %v1746_v24 = vmul.f32 1.442695, %v1723_v4 }
 0x458   :  { %v1748_v8 = vmul.f32 1.442695, %v1724_v6  ;;  %v1697_v29 = vpop.xlane.xlu0 %1696  ;;  %v1773_v10 = vsel %vm467_vm3, %v15286_v7, 0.0 }
 0x459   :  { %14517 = vpow2.f32 %v1746_v24  ;;  %v1725_v12 = vsub.f32 %v15215_v38, %v1697_v29  ;;  %1774 = vadd.xlane.f32.xlu0 %v1773_v10 }
 0x45a   :  { %v1700_v14 = vpop.xlane.xlu1 %1699  ;;  %14519 = vpow2.f32 %v1748_v8 }
 0x45b   :  { %v15291_v15 = vpop.eup %14509  ;;  %v1726_v31 = vsub.f32 %v15223_v51, %v1700_v14  ;;  %v1750_v35 = vmul.f32 1.442695, %v1725_v12 }
 0x45c   :  { %v1703_v18 = vpop.xlane.xlu0 %1702  ;;  %v1770_v42 = vsel %vm467_vm3, %v15291_v15, 0.0  ;;  %v15296_v25 = vpop.eup %14511 }
 0x45d   :  { %v1752_v26 = vmul.f32 1.442695, %v1726_v31  ;;  %14521 = vpow2.f32 %v1750_v35  ;;  %v1727_v44 = vsub.f32 %v15225_v52, %v1703_v18  ;;  %1771 = vadd.xlane.f32.xlu1 %v1770_v42  ;;  %v1776_v36 = vsel %vm467_vm3, %v15296_v25, 0.0 }
 0x45e   :  { %v1706_v38 = vpop.xlane.xlu1 %1705 }
 0x45f   :  { %v15299_v33 = vpop.eup %14513  ;;  %14523 = vpow2.f32 %v1752_v26  ;;  %v1728_v59 = vsub.f32 %v15231_v60, %v1706_v38  ;;  %v1754_v34 = vmul.f32 1.442695, %v1727_v44 }
 0x460   :  { %v1709_v51 = vpop.xlane.xlu0 %1708  ;;  %v1779_v37 = vsel %vm467_vm3, %v15299_v33, 0.0  ;;  %v15306_v39 = vpop.eup %14515 }
 0x461   :  { %v1756_v40 = vmul.f32 1.442695, %v1728_v59  ;;  %14525 = vpow2.f32 %v1754_v34  ;;  %v1729_v52 = vsub.f32 %v15233_v61, %v1709_v51  ;;  %1777 = vadd.xlane.f32.xlu1 %v1776_v36  ;;  %1780 = vadd.xlane.f32.xlu0 %v1779_v37  ;;  %v1782_v49 = vsel %vm467_vm3, %v15306_v39, 0.0 }
 0x462   :  { %v15346_v29 = vpop.permute.xlu1 %2680 }
 0x463   :  { %v15309_v47 = vpop.eup %14517  ;;  %14527 = vpow2.f32 %v1756_v40  ;;  %v1758_v60 = vmul.f32 1.442695, %v1729_v52 }
 0x464   :  { %v1715_v48 = vpop.xlane.xlu0 %1714  ;;  %v1785_v50 = vsel %vm467_vm3, %v15309_v47, 0.0  ;;  %v15315_v53 = vpop.eup %14519 }
 0x465   :  { %14529 = vpow2.f32 %v1758_v60  ;;  %v1731_v54 = vsub.f32 %v15237_v9, %v1715_v48  ;;  %1783 = vadd.xlane.f32.xlu1 %v1782_v49  ;;  %1786 = vadd.xlane.f32.xlu0 %v1785_v50  ;;  %v1788_v5 = vsel %vm467_vm3, %v15315_v53, 0.0 }
 0x467   :  { %v15318_v61 = vpop.eup %14521  ;;  %v1762_v55 = vmul.f32 1.442695, %v1731_v54 }
 0x468   :  { %v1791_v57 = vsel %vm467_vm3, %v15318_v61, 0.0 }
 0x469   :  { %v15324_v11 = vpop.eup %14523  ;;  %14531 = vpow2.f32 %v1762_v55  ;;  %1789 = vadd.xlane.f32.xlu1 %v1788_v5  ;;  %1792 = vadd.xlane.f32.xlu0 %v1791_v57 }
 0x46a   :  { %v1794_v9 = vsel %vm467_vm3, %v15324_v11, 0.0 }
 0x46b   :  { %v15326_v16 = vpop.eup %14525 }
 0x46c   :  { %v1797_v58 = vsel %vm467_vm3, %v15326_v16, 0.0 }
 0x46d   :  { %v15332_v2 = vpop.eup %14527  ;;  %1795 = vadd.xlane.f32.xlu1 %v1794_v9  ;;  %1798 = vadd.xlane.f32.xlu0 %v1797_v58 }
 0x46e   :  { %v1800_v4 = vsel %vm467_vm3, %v15332_v2, 0.0 }
 0x46f   :  { %v15334_v13 = vpop.eup %14529 }
 0x470   :  { %v1803_v6 = vsel %vm467_vm3, %v15334_v13, 0.0 }
 0x471   :  { %1801 = vadd.xlane.f32.xlu1 %v1800_v4  ;;  %1804 = vadd.xlane.f32.xlu0 %v1803_v6 }
 0x473   :  { %v15340_v24 = vpop.eup %14531 }
 0x474   :  { %v1809_v8 = vsel %vm467_vm3, %v15340_v24, 0.0 }
 0x475   :  { %1810 = vadd.xlane.f32.xlu0 %v1809_v8 }
 0x48b   :  { %2908 = vrot.lane.b32.xlu0 %v15140_v45, %s14833_s29 }
 0x493   :  { %v1712_v10 = vpop.xlane.xlu1 %1711 }
 0x494   :  { %v1730_v12 = vsub.f32 %v15249_v17, %v1712_v10  ;;  %v15359_v17 = vpop.permute.xlu0 %2604 }
 0x496   :  { %v1760_v14 = vmul.f32 1.442695, %v1730_v12 }
 0x497   :  { %v15355_v18 = vpop.permute.xlu1 %2832 }
 0x498   :  { %14533 = vpow2.f32 %v1760_v14  ;;  %v15365_v44 = vpop.permute.xlu0 %2756  ;;  %v14425_v14 = vld [vmem:[#allocation2 + $0x54] ss:$40 sps:$4 sm:$0xff]  }
 0x4a2   :  { %v15349_v31 = vpop.eup %14533 }
 0x4a3   :  { %v1806_v35 = vsel %vm467_vm3, %v15349_v31, 0.0 }
 0x4a4   :  { %1807 = vadd.xlane.f32.xlu1 %v1806_v35  ;;  %v14426_v35 = vld [vmem:[#allocation2 + $0x4] ss:$40 sps:$4 sm:$0xff]  }
 0x4a5   :  { %3170 = vrot.lane.b32.xlu0 %v14426_v35, %s14833_s29 }
 0x4b5   :  { %2984 = vrot.lane.b32.xlu1 %v15146_v46, %s14833_s29 }
 0x4b9   :  { %3172 = vrot.lane.b32.xlu1 %v14425_v14, %s14833_s29 }
 0x4c8   :  { %v1766_v42 = vpop.xlane.xlu1 %1765 }
 0x4c9   :  { %14535 = vrcp.f32 %v1766_v42 }
 0x4d3   :  { %v14536_v45 = vpop.eup %14535 }
 0x4d4   :  { %v1813_v26 = vmul.f32 %v14536_v45, %v15266_v28 }
 0x4d6   :  { %13529 = vmatmul.mubr.msk.f32.vlgmr.msra.gmra.mrb[22].mxu0 %vm467_vm3, %v1813_v26 }
 0x4d7   :  { %13537 = vmatpush3.msra.mxu0 %v15260_v41  ;;  %13538 = vmatprep.mubr.msk.f32.mxu0 %vm14832_vm0, %v14831_v0 }
 0x4d8   :  { %13546 = vmatprep.subr.mxu0 %v14831_v0 }
 0x4e1   :  { %v1769_v46 = vpop.xlane.xlu0 %1768 }
 0x4e2   :  { %14537 = vrcp.f32 %v1769_v46 }
 0x4e6   :  { %v1775_v38 = vpop.xlane.xlu0 %1774 }
 0x4e7   :  { %14539 = vrcp.f32 %v1775_v38 }
 0x4ea   :  { %v1772_v59 = vpop.xlane.xlu1 %1771 }
 0x4eb   :  { %14541 = vrcp.f32 %v1772_v59 }
 0x4ec   :  { %v14538_v28 = vpop.eup %14537 }
 0x4ed   :  { %v1815_v34 = vmul.f32 %v14538_v28, %v15279_v56 }
 0x4ee   :  { %v1778_v51 = vpop.xlane.xlu1 %1777  ;;  %v1781_v36 = vpop.xlane.xlu0 %1780 }
 0x4ef   :  { %14543 = vrcp.f32 %v1778_v51  ;;  %13534 = vmatmul.mubr.msk.f32.vlgmr.msra.gmra.mrb[26].mxu1 %vm467_vm3, %v1815_v34 }
 0x4f0   :  { %14545 = vrcp.f32 %v1781_v36  ;;  %13542 = vmatpush3.msra.mxu1 %v15255_v19  ;;  %13543 = vmatprep.mubr.msk.f32.mxu1 %vm14832_vm0, %v14831_v0 }
 0x4f1   :  { %v14540_v41 = vpop.eup %14539  ;;  %13551 = vmatprep.subr.mxu1 %v14831_v0 }
 0x4f2   :  { %v1784_v37 = vpop.xlane.xlu1 %1783  ;;  %v1787_v40 = vpop.xlane.xlu0 %1786  ;;  %v1819_v52 = vmul.f32 %v14540_v41, %v15286_v7 }
 0x4f3   :  { %14547 = vrcp.f32 %v1784_v37 }
 0x4f4   :  { %14549 = vrcp.f32 %v1787_v40  ;;  %13544 = vmatmul.mubr.msk.f32.vlgmr.msra.gmra.mrb[28].mxu1 %vm467_vm3, %v1819_v52 }
 0x4f5   :  { %v14542_v56 = vpop.eup %14541  ;;  %13552 = vmatpush3.msra.mxu1 %v15264_v27  ;;  %13553 = vmatprep.mubr.msk.f32.mxu1 %vm14832_vm0, %v14831_v0 }
 0x4f6   :  { %v1790_v19 = vpop.xlane.xlu1 %1789  ;;  %v1793_v60 = vpop.xlane.xlu0 %1792  ;;  %v1817_v48 = vmul.f32 %v14542_v56, %v15291_v15  ;;  %13561 = vmatprep.subr.mxu1 %v14831_v0 }
 0x4f7   :  { %14551 = vrcp.f32 %v1790_v19 }
 0x4f8   :  { %14553 = vrcp.f32 %v1793_v60  ;;  %13539 = vmatmul.mubr.msk.f32.vlgmr.msra.gmra.mrb[24].mxu0 %vm467_vm3, %v1817_v48 }
 0x4f9   :  { %v14544_v7 = vpop.eup %14543  ;;  %13547 = vmatpush3.msra.mxu0 %v15262_v43  ;;  %13548 = vmatprep.mubr.msk.f32.mxu0 %vm14832_vm0, %v14831_v0 }
 0x4fa   :  { %v14546_v27 = vpop.eup %14545  ;;  %v1796_v49 = vpop.xlane.xlu1 %1795  ;;  %13556 = vmatprep.subr.mxu0 %v14831_v0  ;;  %v1821_v54 = vmul.f32 %v14544_v7, %v15296_v25 }
 0x4fb   :  { %v1799_v50 = vpop.xlane.xlu0 %1798  ;;  %14555 = vrcp.f32 %v1796_v49  ;;  %v1823_v15 = vmul.f32 %v14546_v27, %v15299_v33 }
 0x4fc   :  { %14557 = vrcp.f32 %v1799_v50  ;;  %13549 = vmatmul.mubr.msk.f32.vlgmr.msra.gmra.mrb[26].mxu0 %vm467_vm3, %v1821_v54 }
 0x4fd   :  { %v14548_v55 = vpop.eup %14547  ;;  %13554 = vmatmul.mubr.msk.f32.vlgmr.msra.gmra.mrb[30].mxu1 %vm467_vm3, %v1823_v15  ;;  %13557 = vmatpush3.msra.mxu0 %v15257_v21 }
 0x4fe   :  { %v14550_v43 = vpop.eup %14549  ;;  %13562 = vmatpush3.msra.mxu1 %v15268_v30  ;;  %v1802_v5 = vpop.xlane.xlu1 %1801  ;;  %13558 = vmatprep.mubr.msk.f32.mxu0 %vm14832_vm0, %v14831_v0  ;;  %v1825_v25 = vmul.f32 %v14548_v55, %v15306_v39 }
 0x4ff   :  { %v1805_v57 = vpop.xlane.xlu0 %1804  ;;  %14559 = vrcp.f32 %v1802_v5  ;;  %13563 = vmatprep.mubr.msk.f32.mxu1 %vm14832_vm0, %v14831_v0  ;;  %13566 = vmatprep.subr.mxu0 %v14831_v0  ;;  %v1827_v33 = vmul.f32 %v14550_v43, %v15309_v47 }
 0x500   :  { %14561 = vrcp.f32 %v1805_v57  ;;  %13571 = vmatprep.subr.mxu1 %v14831_v0  ;;  %13559 = vmatmul.mubr.msk.f32.vlgmr.msra.gmra.mrb[28].mxu0 %vm467_vm3, %v1825_v25 }
 0x501   :  { %v14552_v21 = vpop.eup %14551  ;;  %13564 = vmatmul.mubr.msk.f32.vlgmr.msra.gmra.mrb[32].mxu1 %vm467_vm3, %v1827_v33  ;;  %13567 = vmatpush3.msra.mxu0 %v15184_v1 }
 0x502   :  { %v14554_v30 = vpop.eup %14553  ;;  %13572 = vmatpush3.msra.mxu1 %v15272_v32  ;;  %13568 = vmatprep.mubr.msk.f32.mxu0 %vm14832_vm0, %v14831_v0  ;;  %v1829_v39 = vmul.f32 %v14552_v21, %v15315_v53 }
 0x503   :  { %13573 = vmatprep.mubr.msk.f32.mxu1 %vm14832_vm0, %v14831_v0  ;;  %13576 = vmatprep.subr.mxu0 %v14831_v0  ;;  %v1831_v47 = vmul.f32 %v14554_v30, %v15318_v61  ;;  %v1811_v9 = vpop.xlane.xlu0 %1810 }
 0x504   :  { %13581 = vmatprep.subr.mxu1 %v14831_v0  ;;  %13569 = vmatmul.mubr.msk.f32.vlgmr.msra.gmra.mrb[30].mxu0 %vm467_vm3, %v1829_v39  ;;  %14563 = vrcp.f32 %v1811_v9  ;;  %v14429_v9 = vld [vmem:[#allocation2 + $0x8] ss:$40 sps:$4 sm:$0xff]  }
 0x505   :  { %v14556_v1 = vpop.eup %14555  ;;  %13574 = vmatmul.mubr.msk.f32.vlgmr.msra.gmra.mrb[34].mxu1 %vm467_vm3, %v1831_v47  ;;  %13577 = vmatpush3.msra.mxu0 %v15359_v17 }
 0x506   :  { %v14558_v32 = vpop.eup %14557  ;;  %13582 = vmatpush3.msra.mxu1 %v15346_v29  ;;  %13578 = vmatprep.mubr.msk.f32.mxu0 %vm14832_vm0, %v14831_v0  ;;  %v1833_v53 = vmul.f32 %v14556_v1, %v15324_v11 }
 0x507   :  { %13583 = vmatprep.mubr.msk.f32.mxu1 %vm14832_vm0, %v14831_v0  ;;  %13586 = vmatprep.subr.mxu0 %v14831_v0  ;;  %v1835_v61 = vmul.f32 %v14558_v32, %v15326_v16  ;;  %v2909_v6 = vpop.permute.xlu0 %2908  ;;  %v12820_v32 = vld [vmem:[%s17294_s9 + $0x2] ss:$0 sm:$0xff] }
 0x508   :  { %13591 = vmatprep.subr.mxu1 %v14831_v0  ;;  %13579 = vmatmul.mubr.msk.f32.vlgmr.msra.gmra.mrb[32].mxu0 %vm467_vm3, %v1833_v53  ;;  %v14430_v53 = vld [vmem:[#allocation2 + $0x58] ss:$40 sps:$4 sm:$0xff]  }
 0x509   :  { %v14560_v58 = vpop.eup %14559  ;;  %13584 = vmatmul.mubr.msk.f32.vlgmr.msra.gmra.mrb[36].mxu1 %vm467_vm3, %v1835_v61  ;;  %13587 = vmatpush3.msra.mxu0 %v15365_v44 }
 0x50a   :  { %v14562_v4 = vpop.eup %14561  ;;  %13592 = vmatpush3.msra.mxu1 %v15355_v18  ;;  %13588 = vmatprep.mubr.msk.f32.mxu0 %vm14832_vm0, %v14831_v0  ;;  %v1837_v11 = vmul.f32 %v14560_v58, %v15332_v2 }
 0x50b   :  { %13593 = vmatprep.mubr.msk.f32.mxu1 %vm14832_vm0, %v14831_v0  ;;  %13596 = vmatprep.subr.mxu0 %v14831_v0  ;;  %v1839_v16 = vmul.f32 %v14562_v4, %v15334_v13 }
 0x50c   :  { %13589 = vmatmul.mubr.msk.f32.vlgmr.msra.gmra.mrb[34].mxu0 %vm467_vm3, %v1837_v11  ;;  %13601 = vmatprep.subr.mxu1 %v14831_v0  ;;  %v14428_v11 = vld [vmem:[#allocation2 + $0xf4] ss:$40 sps:$4 sm:$0xff]  }
 0x50d   :  { %13594 = vmatmul.mubr.msk.f32.vlgmr.msra.gmra.mrb[38].mxu1 %vm467_vm3, %v1839_v16  ;;  %13597 = vmatpush3.msra.mxu0 %v2909_v6  ;;  %v14431_v16 = vld [vmem:[#allocation2 + $0xa8] ss:$40 sps:$4 sm:$0xff]  }
 0x50e   :  { %13603 = vmatprep.mubr.msk.f32.mxu1 %vm14832_vm0, %v14831_v0  ;;  %13598 = vmatprep.mubr.msk.f32.mxu0 %vm14832_vm0, %v14831_v0  ;;  %v14564_v8 = vpop.eup %14563 }
 0x50f   :  { %13606 = vmatprep.subr.bf16.mxu0 %v14831_v0  ;;  %v1843_v29 = vmul.f32 %v14564_v8, %v15340_v24  ;;  %v14427_v24 = vld [vmem:[#allocation2 + $0xa4] ss:$40 sps:$4 sm:$0xff]  }
 0x510   :  { %3174 = vrot.lane.b32.xlu1 %v14427_v24, %s14833_s29 }
 0x517   :  { %v3171_v44 = vpop.permute.xlu0 %3170 }
 0x531   :  { %v1808_v2 = vpop.xlane.xlu1 %1807 }
 0x532   :  { %14565 = vrcp.f32 %v1808_v2 }
 0x535   :  { %v2985_v13 = vpop.permute.xlu1 %2984 }
 0x536   :  { %13602 = vmatpush3.msra.mxu1 %v2985_v13 }
 0x537   :  { %13604 = vmatmul.mubr.msk.f32.vlgmr.msra.gmra.mrb[40].mxu1 %vm467_vm3, %v1843_v29  ;;  %13618 = vmatprep.subr.bf16.mxu1 %v14831_v0 }
 0x538   :  { %13626 = vmatprep.mubr.msk.bf16.mxu1 %vm14832_vm0, %v14831_v0  ;;  %13619 = vmatpush3.bf16.msra.mxu1 %v14429_v9 }
 0x539   :  { %v3173_v38 = vpop.permute.xlu1 %3172  ;;  %13620 = vmatprep.subr.bf16.mxu1 %v14831_v0 }
 0x53c   :  { %v14566_v10 = vpop.eup %14565  ;;  %13621 = vmatpush3.bf16.msra.mxu1 %v14430_v53 }
 0x53d   :  { %v1841_v12 = vmul.f32 %v14566_v10, %v15349_v31  ;;  %13622 = vmatprep.subr.bf16.mxu1 %v14831_v0 }
 0x53f   :  { %13599 = vmatmul.mubr.msk.f32.vlgmr.msra.gmra.mrb[36].mxu0 %vm467_vm3, %v1841_v12 }
 0x540   :  { %13614 = vmatprep.mubr.msk.bf16.mxu0 %vm14832_vm0, %v14831_v0  ;;  %13607 = vmatpush3.bf16.msra.mxu0 %v3171_v44 }
 0x541   :  { %13608 = vmatprep.subr.bf16.mxu0 %v14831_v0  ;;  %13623 = vmatpush3.bf16.msra.mxu1 %v14431_v16 }
 0x542   :  { %13624 = vmatprep.subr.bf16.mxu1 %v14831_v0 }
 0x544   :  { %13609 = vmatpush3.bf16.msra.mxu0 %v3173_v38 }
 0x545   :  { %13610 = vmatprep.subr.bf16.mxu0 %v14831_v0 }
 0x582   :  { %v3175_v41 = vpop.permute.xlu1 %3174 }
 0x583   :  { %13611 = vmatpush3.bf16.msra.mxu0 %v3175_v41 }
 0x584   :  { %13612 = vmatprep.subr.bf16.mxu0 %v14831_v0 }
 0x5a9   :  { %v15454_v18 = vpop.f32.mrb[22].mxu0 }
 0x5aa   :  { %v13530_v42 = vpop.f32.mrb[23].mxu0 }
 0x5c2   :  { %v1992_v45 = vpop.f32.mrb[26].mxu1 }
 0x5c3   :  { %v13535_v26 = vpop.f32.mrb[27].mxu1 }
 0x5c7   :  { %v2144_v31 = vpop.f32.mrb[28].mxu1 }
 0x5c8   :  { %v13545_v17 = vpop.f32.mrb[29].mxu1 }
 0x5cb   :  { %v2068_v46 = vpop.f32.mrb[24].mxu0 }
 0x5cc   :  { %v13540_v59 = vpop.f32.mrb[25].mxu0 }
 0x5cf   :  { %v2220_v28 = vpop.f32.mrb[26].mxu0 }
 0x5d0   :  { %v2296_v34 = vpop.f32.mrb[30].mxu1  ;;  %v13550_v51 = vpop.f32.mrb[27].mxu0 }
 0x5d1   :  { %v13555_v36 = vpop.f32.mrb[31].mxu1 }
 0x5d3   :  { %v2372_v37 = vpop.f32.mrb[28].mxu0 }
 0x5d4   :  { %v2448_v40 = vpop.f32.mrb[32].mxu1  ;;  %v13560_v52 = vpop.f32.mrb[29].mxu0 }
 0x5d5   :  { %v13565_v56 = vpop.f32.mrb[33].mxu1 }
 0x5d7   :  { %v2524_v19 = vpop.f32.mrb[30].mxu0 }
 0x5d8   :  { %v2600_v60 = vpop.f32.mrb[34].mxu1  ;;  %v13570_v48 = vpop.f32.mrb[31].mxu0 }
 0x5d9   :  { %v14258_v7 = vpack.i.bf16 %v2600_v60, %v1992_v45  ;;  %v13575_v27 = vpop.f32.mrb[35].mxu1 }
 0x5db   :  { %14259 = vrot.lane.b32.xlu0 %v14258_v7, %s14841_s5  ;;  %v2676_v49 = vpop.f32.mrb[32].mxu0 }
 0x5dc   :  { %v14263_v50 = vpack.i.bf16 %v2676_v49, %v2068_v46  ;;  %v2752_v54 = vpop.f32.mrb[36].mxu1  ;;  %v13580_v15 = vpop.f32.mrb[33].mxu0 }
 0x5dd   :  { %v14268_v55 = vpack.i.bf16 %v2752_v54, %v2144_v31  ;;  %v13585_v43 = vpop.f32.mrb[37].mxu1  ;;  %v14432_v15 = vld [vmem:[#allocation2 + $0xf8] ss:$40 sps:$4 sm:$0xff]  }
 0x5de   :  { %14264 = vrot.lane.b32.xlu1 %v14263_v50, %s14842_s11  ;;  %13625 = vmatpush3.bf16.msra.mxu1 %v14432_v15  ;;  %v15498_v43 = vld [vmem:[#allocation2 + $0xc] ss:$40 sps:$4 sm:$0xff]  }
 0x5df   :  { %14269 = vrot.lane.b32.xlu0 %v14268_v55, %s14843_s12  ;;  %v2828_v5 = vpop.f32.mrb[34].mxu0  ;;  %13630 = vmatprep.subr.bf16.mxu1 %v14831_v0  ;;  %v12826_v55 = vld [vmem:[%s17294_s9 + $0x3] ss:$0 sm:$0xff] }
 0x5e0   :  { %v14273_v57 = vpack.i.bf16 %v2828_v5, %v2220_v28  ;;  %v2904_v25 = vpop.f32.mrb[38].mxu1  ;;  %v13590_v33 = vpop.f32.mrb[35].mxu0  ;;  %v15501_v5 = vld [vmem:[#allocation2 + $0x5c] ss:$40 sps:$4 sm:$0xff]  }
 0x5e1   :  { %v14278_v21 = vpack.i.bf16 %v2904_v25, %v2296_v34  ;;  %v13595_v30 = vpop.f32.mrb[39].mxu1  ;;  %v15511_v25 = vld [vmem:[#allocation2 + $0xfc] ss:$40 sps:$4 sm:$0xff]  }
 0x5e3   :  { %14274 = vrot.lane.b32.xlu0 %v14273_v57, %s14844_s13  ;;  %14279 = vrot.lane.b32.xlu1 %v14278_v21, %s14830_s24  ;;  %v15505_v57 = vld [vmem:[#allocation2 + $0xac] ss:$40 sps:$4 sm:$0xff]  }
 0x60a   :  { %v3056_v39 = vpop.f32.mrb[40].mxu1 }
 0x60b   :  { %v14288_v47 = vpack.i.bf16 %v3056_v39, %v2448_v40  ;;  %v13605_v1 = vpop.f32.mrb[41].mxu1 }
 0x60d   :  { %14289 = vrot.lane.b32.xlu1 %v14288_v47, %s14845_s4 }
 0x611   :  { %3182 = vrot.lane.b32.xlu1 %v12820_v32, %s14833_s29 }
 0x612   :  { %v2980_v61 = vpop.f32.mrb[36].mxu0 }
 0x613   :  { %v14283_v58 = vpack.i.bf16 %v2980_v61, %v2372_v37  ;;  %v13600_v4 = vpop.f32.mrb[37].mxu0  ;;  %v14437_v61 = vld [vmem:[#allocation2 + $0x10] ss:$40 sps:$4 sm:$0xff]  }
 0x614   :  { %v14441_v4 = vld [vmem:[#allocation2 + $0x60] ss:$40 sps:$4 sm:$0xff]  }
 0x615   :  { %14284 = vrot.lane.b32.xlu0 %v14283_v58, %s14846_s16  ;;  %3527 = vrot.lane.b32.xlu1 %v14430_v53, %s14833_s29  ;;  %v14439_v53 = vld [vmem:[#allocation2 + $0x14] ss:$40 sps:$4 sm:$0xff]   ;;  %v14440_v58 = vld [vmem:[#allocation2 + $0x18] ss:$40 sps:$4 sm:$0xff]  }
 0x619   :  { %3176 = vrot.lane.b32.xlu0 %v14428_v11, %s14833_s29  ;;  %3531 = vrot.lane.b32.xlu1 %v14432_v15, %s14833_s29  ;;  %v14443_v11 = vld [vmem:[#allocation2 + $0x64] ss:$40 sps:$4 sm:$0xff]  }
 0x61a   :  { %v53_v15 = vld [vmem:[%s17286_s1 + $0x8] sm:$0xff] }
 0x61d   :  { %3525 = vrot.lane.b32.xlu0 %v14429_v9, %s14833_s29  ;;  %3669 = vrot.lane.b32.xlu1 %v15498_v43, %s14833_s29 }
 0x621   :  { %3529 = vrot.lane.b32.xlu0 %v14431_v16, %s14833_s29  ;;  %3673 = vrot.lane.b32.xlu1 %v15505_v57, %s14833_s29  ;;  %v14444_v16 = vld [vmem:[#allocation2 + $0x68] ss:$40 sps:$4 sm:$0xff]  }
 0x625   :  { %3537 = vrot.lane.b32.xlu0 %v12826_v55, %s14833_s29  ;;  %3675 = vrot.lane.b32.xlu1 %v15511_v25, %s14833_s29 }
 0x629   :  { %3671 = vrot.lane.b32.xlu0 %v15501_v5, %s14833_s29 }
 0x64d   :  { %v14260_v6 = vpop.permute.xlu0 %14259 }
 0x64e   :  { %v14262_v13 = vunpack.i.h.bf16 %v14260_v6  ;;  %v14261_v29 = vunpack.i.l.bf16 %v14260_v6  ;;  %v14447_v6 = vld [vmem:[#allocation2 + $0xb4] ss:$40 sps:$4 sm:$0xff]  }
 0x650   :  { %v14265_v8 = vpop.permute.xlu1 %14264  ;;  %v3128_v35 = vsel %vm467_vm3, %v2524_v19, %v14262_v13  ;;  %v3088_v24 = vsel %vm467_vm3, %v15454_v18, %v14261_v29  ;;  %v14448_v13 = vld [vmem:[#allocation2 + $0xb8] ss:$40 sps:$4 sm:$0xff]   ;;  %v14451_v29 = vld [vmem:[#allocation2 + $0x104] ss:$40 sps:$4 sm:$0xff]  }
 0x651   :  { %v14270_v2 = vpop.permute.xlu0 %14269  ;;  %v14267_v10 = vunpack.i.h.bf16 %v14265_v8  ;;  %v14266_v12 = vunpack.i.l.bf16 %v14265_v8  ;;  %v14847_v8 = vmov 0  }
 0x652   :  { %v14272_v42 = vunpack.i.h.bf16 %v14270_v2  ;;  %v14271_v45 = vunpack.i.l.bf16 %v14270_v2  ;;  %v14445_v2 = vld [vmem:[#allocation2 + $0xb0] ss:$40 sps:$4 sm:$0xff]  }
 0x653   :  { %v3089_v26 = vsel %vm76_vm1, %v3088_v24, %v14266_v12  ;;  %v3129_v31 = vsel %vm76_vm1, %v3128_v35, %v14267_v10  ;;  %v14449_v10 = vld [vmem:[#allocation2 + $0x100] ss:$40 sps:$4 sm:$0xff]  }
 0x654   :  { %v3130_v38 = vsel %vm3090_vm4, %v3129_v31, %v14272_v42  ;;  %v3091_v59 = vsel %vm3090_vm4, %v3089_v26, %v14271_v45  ;;  %v14452_v12 = vld [vmem:[#allocation2 + $0x108] ss:$40 sps:$4 sm:$0xff]  }
 0x655   :  { %v14275_v14 = vpop.permute.xlu0 %14274  ;;  %v14280_v46 = vpop.permute.xlu1 %14279 }
 0x656   :  { %v14277_v17 = vunpack.i.h.bf16 %v14275_v14  ;;  %v14276_v44 = vunpack.i.l.bf16 %v14275_v14  ;;  %v14282_v28 = vunpack.i.h.bf16 %v14280_v46  ;;  %v14281_v34 = vunpack.i.l.bf16 %v14280_v46 }
 0x658   :  { %v3093_v51 = vsel %vm3092_vm5, %v3091_v59, %v14276_v44  ;;  %v3131_v18 = vsel %vm3092_vm5, %v3130_v38, %v14277_v17 }
 0x659   :  { %v3132_v52 = vsel %vm3094_vm6, %v3131_v18, %v14282_v28  ;;  %v3095_v56 = vsel %vm3094_vm6, %v3093_v51, %v14281_v34 }
 0x67f   :  { %v14290_v36 = vpop.permute.xlu1 %14289 }
 0x680   :  { %v14292_v19 = vunpack.i.h.bf16 %v14290_v36  ;;  %v14291_v60 = vunpack.i.l.bf16 %v14290_v36 }
 0x683   :  { %v3183_v33 = vpop.permute.xlu1 %3182 }
 0x687   :  { %v14285_v41 = vpop.permute.xlu0 %14284 }
 0x688   :  { %v14287_v37 = vunpack.i.h.bf16 %v14285_v41  ;;  %v14286_v40 = vunpack.i.l.bf16 %v14285_v41 }
 0x68a   :  { %v3097_v48 = vsel %vm3096_vm7, %v3095_v56, %v14286_v40  ;;  %v3133_v7 = vsel %vm3096_vm7, %v3132_v52, %v14287_v37 }
 0x68b   :  { %v3099_v27 = vsel %vm3098_vm8, %v3097_v48, %v14291_v60  ;;  %v3134_v49 = vsel %vm3098_vm8, %v3133_v7, %v14292_v19  ;;  %v3177_v50 = vpop.permute.xlu0 %3176 }
 0x68c   :  { %v3135_v54 = vpack.c.bf16 %v3134_v49, %v3099_v27  ;;  %13613 = vmatpush3.bf16.msra.mxu0 %v3177_v50  ;;  %v3528_v27 = vpop.permute.xlu1 %3527 }
 0x68d   :  { %3440 = vmatprep.subr.bf16.mxu0 %v14439_v53 }
 0x68f   :  { %13615 = vmatmul.mubr.msk.bf16.vlgmr.msra.gmra.mrb[40].mxu0 %vm236_vm2, %v3135_v54  ;;  %v3526_v48 = vpop.permute.xlu0 %3525  ;;  %v52_v54 = vld [vmem:[%s17286_s1] sm:$0xff] }
 0x690   :  { %3441 = vmatpush1.bf16.msra.mxu0 %v14437_v61  ;;  %3472 = vmatprep.mubr.bf16.mxu0 %v14847_v8  ;;  %v3532_v50 = vpop.permute.xlu1 %3531 }
 0x691   :  { %3442 = vmatprep.subr.bf16.mxu0 %v14443_v11 }
 0x693   :  { %v3530_v49 = vpop.permute.xlu0 %3529 }
 0x694   :  { %3443 = vmatpush1.bf16.msra.mxu0 %v14441_v4 }
 0x695   :  { %3444 = vmatprep.subr.bf16.mxu0 %v14447_v6 }
 0x698   :  { %3445 = vmatpush1.bf16.msra.mxu0 %v14445_v2 }
 0x699   :  { %3446 = vmatprep.subr.bf16.mxu0 %v14451_v29 }
 0x69c   :  { %3447 = vmatpush1.bf16.msra.mxu0 %v14449_v10 }
 0x69d   :  { %13642 = vmatprep.subr.bf16.mxu0 %v14831_v0 }
 0x762   :  { %v3222_v21 = vpop.f32.mrb[40].mxu0 }
 0x763   :  { %v13616_v30 = vpop.f32.mrb[41].mxu0  ;;  %v15515_v47 = vadd.f32 %v3222_v21, %v3183_v33 }
 0x764   :  { %v3225_v39 = vpop.f32.mrb[42].mxu0  ;;  %v57_v30 = vld [vmem:[%s17288_s3 + $0x8] sm:$0xff] }
 0x765   :  { %v15517_v1 = vadd.f32 %v3225_v39, %v3183_v33  ;;  %v13617_v32 = vpop.f32.mrb[43].mxu0 }
 0x767   :  { %v3229_v9 = vpack.c.bf16 %v15517_v1, %v15515_v47 }
 0x769   :  { %13627 = vmatmul.mubr.msk.bf16.vlgmr.msra.gmra.mrb[44].mxu1 %vm236_vm2, %v3229_v9 }
 0x76a   :  { %13638 = vmatprep.mubr.msk.bf16.mxu1 %vm14832_vm0, %v14831_v0  ;;  %13631 = vmatpush3.bf16.msra.mxu1 %v14440_v58  ;;  %v15599_v58 = vrot.slane %v3356_v62, %v298_v22 }
 0x76b   :  { %13632 = vmatprep.subr.bf16.mxu1 %v14831_v0 }
 0x76e   :  { %13633 = vmatpush3.bf16.msra.mxu1 %v14444_v16 }
 0x76f   :  { %13634 = vmatprep.subr.bf16.mxu1 %v14831_v0 }
 0x772   :  { %13635 = vmatpush3.bf16.msra.mxu1 %v14448_v13 }
 0x773   :  { %13636 = vmatprep.subr.bf16.mxu1 %v14831_v0 }
 0x776   :  { %13637 = vmatpush3.bf16.msra.mxu1 %v14452_v12 }
 0x777   :  { %13654 = vmatprep.subr.bf16.mxu1 %v14831_v0 }
 0x83c   :  { %v3306_v14 = vpop.f32.mrb[44].mxu1 }
 0x83d   :  { %v3307_v35 = vadd.f32 %v12826_v55, %v3306_v14  ;;  %v13628_v24 = vpop.f32.mrb[45].mxu1 }
 0x83e   :  { %v3309_v42 = vpop.f32.mrb[46].mxu1 }
 0x83f   :  { %v12832_v45 = vmul.f32 -1.442695, %v3307_v35  ;;  %v3310_v26 = vadd.f32 %v12826_v55, %v3309_v42  ;;  %v13629_v31 = vpop.f32.mrb[47].mxu1  ;;  %v15558_v55 = vpop.permute.xlu0 %3537 }
 0x841   :  { %14567 = vpow2.f32 %v12832_v45  ;;  %v12833_v17 = vmul.f32 -1.442695, %v3310_v26 }
 0x843   :  { %14569 = vpow2.f32 %v12833_v17 }
 0x84b   :  { %v14568_v44 = vpop.eup %14567 }
 0x84c   :  { %v3319_v46 = vadd.f32 1.0, %v14568_v44 }
 0x84d   :  { %v14570_v38 = vpop.eup %14569 }
 0x84e   :  { %14571 = vrcp.f32 %v3319_v46  ;;  %v3320_v59 = vadd.f32 1.0, %v14570_v38 }
 0x850   :  { %14573 = vrcp.f32 %v3320_v59 }
 0x858   :  { %v14572_v28 = vpop.eup %14571 }
 0x859   :  { %v12834_v34 = vmul.f32 -1.442695, %v14572_v28 }
 0x85a   :  { %v14574_v51 = vpop.eup %14573 }
 0x85b   :  { %14575 = vpow2.f32 %v12834_v34  ;;  %v12835_v18 = vmul.f32 -1.442695, %v14574_v51 }
 0x85d   :  { %14577 = vpow2.f32 %v12835_v18 }
 0x865   :  { %v14576_v36 = vpop.eup %14575 }
 0x866   :  { %v3331_v41 = vadd.f32 1.0, %v14576_v36 }
 0x867   :  { %v14578_v37 = vpop.eup %14577 }
 0x868   :  { %14579 = vrcp.f32 %v3331_v41  ;;  %v3332_v40 = vadd.f32 1.0, %v14578_v37 }
 0x86a   :  { %14581 = vrcp.f32 %v3332_v40 }
 0x872   :  { %v14580_v52 = vpop.eup %14579 }
 0x873   :  { %v15530_v19 = vmul.f32 %v14580_v52, %v15515_v47 }
 0x874   :  { %v14582_v56 = vpop.eup %14581 }
 0x875   :  { %v15533_v60 = vmul.f32 %v14582_v56, %v15517_v1 }
 0x877   :  { %v3339_v7 = vpack.c.bf16 %v15533_v60, %v15530_v19 }
 0x879   :  { %12848 = vmatmul.mubr.msk.bf16.vlgmr.msra.gmra.mrb[44].mxu0 %vm236_vm2, %v3339_v7  ;;  %13639 = vmatmul.mubr.msk.bf16.vlgmr.msra.gmra.mrb[48].mxu1 %vm236_vm2, %v3339_v7 }
 0x87a   :  { %13643 = vmatpush3.bf16.msra.mxu0 %v3526_v48  ;;  %13650 = vmatprep.mubr.msk.bf16.mxu0 %vm14832_vm0, %v14831_v0 }
 0x87b   :  { %13644 = vmatprep.subr.bf16.mxu0 %v14831_v0  ;;  %13655 = vmatpush3.bf16.msra.mxu1 %v15498_v43  ;;  %v3524_v43 = vpack.c.bf16 %v53_v15, %v52_v54 }
 0x87c   :  { %13656 = vmatprep.subr.bf16.mxu1 %v14831_v0  ;;  %13662 = vmatprep.mubr.msk.bf16.mxu1 %vm14832_vm0, %v14831_v0 }
 0x87e   :  { %13645 = vmatpush3.bf16.msra.mxu0 %v3528_v27 }
 0x87f   :  { %13646 = vmatprep.subr.bf16.mxu0 %v14831_v0  ;;  %13657 = vmatpush3.bf16.msra.mxu1 %v15501_v5  ;;  %v3670_v5 = vpop.permute.xlu1 %3669 }
 0x880   :  { %13658 = vmatprep.subr.bf16.mxu1 %v14831_v0 }
 0x882   :  { %13647 = vmatpush3.bf16.msra.mxu0 %v3530_v49 }
 0x883   :  { %13648 = vmatprep.subr.bf16.mxu0 %v14831_v0  ;;  %13659 = vmatpush3.bf16.msra.mxu1 %v15505_v57  ;;  %v3672_v57 = vpop.permute.xlu0 %3671  ;;  %v3674_v33 = vpop.permute.xlu1 %3673 }
 0x884   :  { %13660 = vmatprep.subr.bf16.mxu1 %v14831_v0 }
 0x886   :  { %13649 = vmatpush3.bf16.msra.mxu0 %v3532_v50 }
 0x887   :  { %13666 = vmatprep.subr.bf16.mxu0 %v14831_v0  ;;  %13661 = vmatpush3.bf16.msra.mxu1 %v15511_v25  ;;  %v3676_v21 = vpop.permute.xlu1 %3675  ;;  %v56_v25 = vld [vmem:[%s17288_s3] sm:$0xff] }
 0x888   :  { %13678 = vmatprep.subr.mxu1 %v14831_v0  ;;  %v3584_v39 = vpack.c.bf16 %v57_v30, %v56_v25 }
 0x889   :  { %13651 = vmatmul.mubr.msk.bf16.vlgmr.msra.gmra.mrb[48].mxu0 %vm236_vm2, %v3524_v43 }
 0x88a   :  { %13667 = vmatpush3.bf16.msra.mxu0 %v3670_v5  ;;  %13674 = vmatprep.mubr.msk.bf16.mxu0 %vm14832_vm0, %v14831_v0 }
 0x88b   :  { %13668 = vmatprep.subr.bf16.mxu0 %v14831_v0  ;;  %13663 = vmatmul.mubr.msk.bf16.vlgmr.msra.gmra.mrb[52].mxu1 %vm236_vm2, %v3584_v39 }
 0x88c   :  { %13680 = vmatprep.mubr.msk.f32.mxu1 %vm14832_vm0, %v14831_v0 }
 0x88e   :  { %13669 = vmatpush3.bf16.msra.mxu0 %v3672_v57 }
 0x88f   :  { %13670 = vmatprep.subr.bf16.mxu0 %v14831_v0 }
 0x892   :  { %13671 = vmatpush3.bf16.msra.mxu0 %v3674_v33 }
 0x893   :  { %13672 = vmatprep.subr.bf16.mxu0 %v14831_v0 }
 0x896   :  { %13673 = vmatpush3.bf16.msra.mxu0 %v3676_v21 }
 0x897   :  { %13698 = vmatprep.subr.mxu0 %v14831_v0 }
 0x899   :  { %13675 = vmatmul.mubr.msk.bf16.vlgmr.msra.gmra.mrb[52].mxu0 %vm236_vm2, %v3668_v63  ;;  %v3368_v63 = vsub.s32 2, %v14956_v20 }
 0x89a   :  { %13700 = vmatprep.mubr.msk.f32.mxu0 %vm14832_vm0, %v14831_v0 }
 0x89b   :  { %v15593_v9 = vrot.slane %v3356_v62, %v3368_v63 }
 0x94c   :  { %v3474_v47 = vpop.f32.mrb[44].mxu0  ;;  %v15591_v1 = vpop.f32.mrb[48].mxu1 }
 0x94d   :  { %v3475_v32 = vadd.f32 %v3474_v47, %v3361_v3  ;;  %v15595_v53 = vpop.f32.mrb[45].mxu0  ;;  %v13640_v61 = vpop.f32.mrb[49].mxu1 }
 0x94e   :  { %v3478_v4 = vpop.f32.mrb[46].mxu0  ;;  %v3520_v11 = vpop.f32.mrb[50].mxu1 }
 0x94f   :  { %v15602_v16 = vadd.f32 %v3520_v11, %v15593_v9  ;;  %v3480_v23 = vpop.f32.mrb[47].mxu0  ;;  %3761 = vrot.lane.b32.xlu1 %v3475_v32, %s14834_s25  ;;  %3759 = vrot.lane.b32.xlu0 %v3475_v32, %s14835_s26  ;;  %v13641_v6 = vpop.f32.mrb[51].mxu1  ;;  %v15615_v20 = vadd.f32 %v3478_v4, %v3361_v3 }
 0x950   :  { %v15607_v2 = vadd.f32 %v3480_v23, %v15599_v58  ;;  %13679 = vmatpush3.xpose.msk.msra.mxu1 %vm467_vm3, %v3475_v32 }
 0x951   :  { %13683 = vmatprep.subr.mxu1 %v14831_v0 }
 0x953   :  { %3763 = vrot.lane.b32.xlu1 %v3475_v32, %s14837_s27  ;;  %3767 = vrot.lane.b32.xlu0 %v3475_v32, %s14839_s6 }
 0x957   :  { %3765 = vrot.lane.b32.xlu1 %v3475_v32, %s14836_s2  ;;  %3771 = vrot.lane.b32.xlu0 %v3475_v32, %s14840_s30 }
 0x95b   :  { %3769 = vrot.lane.b32.xlu1 %v3475_v32, %s14838_s28  ;;  %3778 = vrot.lane.b32.xlu0 %v15615_v20, %s14837_s27 }
 0x95c   :  { %v3577_v22 = vpop.f32.mrb[48].mxu0 }
 0x95d   :  { %v3578_v8 = vadd.f32 %v3577_v22, %v15558_v55  ;;  %v13652_v13 = vpop.f32.mrb[49].mxu0 }
 0x95e   :  { %v3580_v29 = vpop.f32.mrb[50].mxu0  ;;  %v15667_v45 = vpop.f32.mrb[52].mxu1 }
 0x95f   :  { %13681 = vmatmul.mubr.msk.f32.vlgmr.msra.gmra.mrb[42].mxu1 %vm467_vm3, %v3578_v8  ;;  %3774 = vrot.lane.b32.xlu1 %v15615_v20, %s14835_s26  ;;  %v13653_v10 = vpop.f32.mrb[51].mxu0  ;;  %v15647_v42 = vadd.f32 %v3580_v29, %v15558_v55  ;;  %v13664_v26 = vpop.f32.mrb[53].mxu1 }
 0x960   :  { %3782 = vrot.lane.b32.xlu0 %v15615_v20, %s14839_s6  ;;  %13685 = vmatprep.mubr.msk.f32.mxu1 %vm14832_vm0, %v14831_v0  ;;  %v15669_v31 = vpop.f32.mrb[54].mxu1 }
 0x961   :  { %v13665_v17 = vpop.f32.mrb[55].mxu1 }
 0x963   :  { %3776 = vrot.lane.b32.xlu1 %v15615_v20, %s14834_s25 }
 0x964   :  { %3729 = vrot.lane.b32.xlu0 %v3578_v8, %s14835_s26 }
 0x967   :  { %3780 = vrot.lane.b32.xlu1 %v15615_v20, %s14836_s2 }
 0x968   :  { %3731 = vrot.lane.b32.xlu0 %v3578_v8, %s14834_s25 }
 0x96b   :  { %3735 = vrot.lane.b32.xlu1 %v3578_v8, %s14836_s2 }
 0x96c   :  { %v15635_v12 = vpop.f32.mrb[52].mxu0  ;;  %3733 = vrot.lane.b32.xlu0 %v3578_v8, %s14837_s27 }
 0x96d   :  { %v13676_v14 = vpop.f32.mrb[53].mxu0 }
 0x96e   :  { %v15638_v35 = vpop.f32.mrb[54].mxu0 }
 0x96f   :  { %v13677_v24 = vpop.f32.mrb[55].mxu0  ;;  %3739 = vrot.lane.b32.xlu1 %v3578_v8, %s14838_s28 }
 0x970   :  { %3737 = vrot.lane.b32.xlu0 %v3578_v8, %s14839_s6 }
 0x973   :  { %3784 = vrot.lane.b32.xlu1 %v15615_v20, %s14838_s28 }
 0x974   :  { %3786 = vrot.lane.b32.xlu0 %v15615_v20, %s14840_s30 }
 0x977   :  { %3746 = vrot.lane.b32.xlu1 %v15647_v42, %s14834_s25 }
 0x978   :  { %3741 = vrot.lane.b32.xlu0 %v3578_v8, %s14840_s30 }
 0x97b   :  { %3750 = vrot.lane.b32.xlu1 %v15647_v42, %s14836_s2 }
 0x97c   :  { %3744 = vrot.lane.b32.xlu0 %v15647_v42, %s14835_s26 }
 0x97f   :  { %3754 = vrot.lane.b32.xlu1 %v15647_v42, %s14838_s28 }
 0x980   :  { %3748 = vrot.lane.b32.xlu0 %v15647_v42, %s14837_s27 }
 0x983   :  { %5772 = vrot.lane.b32.xlu1 %v15615_v20, %s14833_s29 }
 0x984   :  { %3752 = vrot.lane.b32.xlu0 %v15647_v42, %s14839_s6 }
 0x988   :  { %3756 = vrot.lane.b32.xlu0 %v15647_v42, %s14840_s30 }
 0x98c   :  { %5164 = vrot.lane.b32.xlu0 %v3475_v32, %s14833_s29 }
 0x9c1   :  { %v3762_v44 = vpop.permute.xlu1 %3761  ;;  %v3760_v46 = vpop.permute.xlu0 %3759 }
 0x9c2   :  { %5316 = vrot.lane.b32.xlu0 %v3762_v44, %s14833_s29  ;;  %5240 = vrot.lane.b32.xlu1 %v3760_v46, %s14833_s29 }
 0x9c3   :  { %13684 = vmatpush3.xpose.msk.msra.mxu1 %vm467_vm3, %v3760_v46 }
 0x9c4   :  { %13688 = vmatprep.subr.mxu1 %v14831_v0 }
 0x9c5   :  { %v3764_v38 = vpop.permute.xlu1 %3763  ;;  %v3768_v59 = vpop.permute.xlu0 %3767 }
 0x9c6   :  { %5392 = vrot.lane.b32.xlu1 %v3764_v38, %s14833_s29  ;;  %5544 = vrot.lane.b32.xlu0 %v3768_v59, %s14833_s29 }
 0x9c9   :  { %v3766_v28 = vpop.permute.xlu1 %3765  ;;  %v3772_v34 = vpop.permute.xlu0 %3771 }
 0x9ca   :  { %13699 = vmatpush3.xpose.msk.msra.mxu0 %vm467_vm3, %v3766_v28  ;;  %5468 = vrot.lane.b32.xlu1 %v3766_v28, %s14833_s29 }
 0x9cb   :  { %5696 = vrot.lane.b32.xlu0 %v3772_v34, %s14833_s29  ;;  %13708 = vmatprep.subr.mxu0 %v14831_v0 }
 0x9cd   :  { %v3770_v51 = vpop.permute.xlu1 %3769  ;;  %v15681_v18 = vpop.permute.xlu0 %3778 }
 0x9ce   :  { %5620 = vrot.lane.b32.xlu1 %v3770_v51, %s14833_s29 }
 0x9d1   :  { %v15684_v36 = vpop.permute.xlu1 %3774 }
 0x9d2   :  { %v15686_v41 = vpop.permute.xlu0 %3782 }
 0x9d5   :  { %v15688_v37 = vpop.permute.xlu1 %3776 }
 0x9d6   :  { %v3730_v40 = vpop.permute.xlu0 %3729 }
 0x9d7   :  { %13686 = vmatmul.mubr.msk.f32.vlgmr.msra.gmra.mrb[56].mxu1 %vm467_vm3, %v3730_v40 }
 0x9d8   :  { %13689 = vmatpush3.xpose.msk.msra.mxu1 %vm467_vm3, %v3762_v44  ;;  %13690 = vmatprep.mubr.msk.f32.mxu1 %vm14832_vm0, %v14831_v0 }
 0x9d9   :  { %v15694_v52 = vpop.permute.xlu1 %3780  ;;  %13693 = vmatprep.subr.mxu1 %v14831_v0 }
 0x9da   :  { %v3732_v56 = vpop.permute.xlu0 %3731 }
 0x9db   :  { %13691 = vmatmul.mubr.msk.f32.vlgmr.msra.gmra.mrb[58].mxu1 %vm467_vm3, %v3732_v56 }
 0x9dc   :  { %13694 = vmatpush3.xpose.msk.msra.mxu1 %vm467_vm3, %v3764_v38  ;;  %13695 = vmatprep.mubr.msk.f32.mxu1 %vm14832_vm0, %v14831_v0 }
 0x9dd   :  { %v3736_v48 = vpop.permute.xlu1 %3735  ;;  %13703 = vmatprep.subr.mxu1 %v14831_v0 }
 0x9de   :  { %v3734_v7 = vpop.permute.xlu0 %3733  ;;  %13701 = vmatmul.mubr.msk.f32.vlgmr.msra.gmra.mrb[38].mxu0 %vm467_vm3, %v3736_v48 }
 0x9df   :  { %13696 = vmatmul.mubr.msk.f32.vlgmr.msra.gmra.mrb[60].mxu1 %vm467_vm3, %v3734_v7  ;;  %13709 = vmatpush3.xpose.msk.msra.mxu0 %vm467_vm3, %v3770_v51 }
 0x9e0   :  { %13704 = vmatpush3.xpose.msk.msra.mxu1 %vm467_vm3, %v3768_v59  ;;  %13710 = vmatprep.mubr.msk.f32.mxu0 %vm14832_vm0, %v14831_v0 }
 0x9e1   :  { %13718 = vmatprep.subr.mxu0 %v14831_v0  ;;  %v3740_v27 = vpop.permute.xlu1 %3739  ;;  %13705 = vmatprep.mubr.msk.f32.mxu1 %vm14832_vm0, %v14831_v0 }
 0x9e2   :  { %v3738_v49 = vpop.permute.xlu0 %3737  ;;  %13713 = vmatprep.subr.mxu1 %v14831_v0  ;;  %13711 = vmatmul.mubr.msk.f32.vlgmr.msra.gmra.mrb[56].mxu0 %vm467_vm3, %v3740_v27 }
 0x9e3   :  { %13706 = vmatmul.mubr.msk.f32.vlgmr.msra.gmra.mrb[62].mxu1 %vm467_vm3, %v3738_v49  ;;  %13719 = vmatpush3.xpose.msk.msra.mxu0 %vm467_vm3, %v15615_v20 }
 0x9e4   :  { %13714 = vmatpush3.xpose.msk.msra.mxu1 %vm467_vm3, %v3772_v34  ;;  %13720 = vmatprep.mubr.msk.f32.mxu0 %vm14832_vm0, %v14831_v0 }
 0x9e5   :  { %13728 = vmatprep.subr.mxu0 %v14831_v0  ;;  %v15720_v50 = vpop.permute.xlu1 %3784  ;;  %13715 = vmatprep.mubr.msk.f32.mxu1 %vm14832_vm0, %v14831_v0 }
 0x9e6   :  { %v15724_v54 = vpop.permute.xlu0 %3786  ;;  %13721 = vmatmul.mubr.msk.f32.vlgmr.msra.gmra.mrb[58].mxu0 %vm467_vm3, %v15647_v42  ;;  %13723 = vmatprep.subr.mxu1 %v14831_v0 }
 0x9e7   :  { %13729 = vmatpush3.xpose.msk.msra.mxu0 %vm467_vm3, %v15688_v37  ;;  %13730 = vmatprep.mubr.msk.f32.mxu0 %vm14832_vm0, %v14831_v0 }
 0x9e8   :  { %13738 = vmatprep.subr.mxu0 %v14831_v0 }
 0x9e9   :  { %v3747_v15 = vpop.permute.xlu1 %3746 }
 0x9ea   :  { %v3742_v55 = vpop.permute.xlu0 %3741  ;;  %13731 = vmatmul.mubr.msk.f32.vlgmr.msra.gmra.mrb[60].mxu0 %vm467_vm3, %v3747_v15 }
 0x9eb   :  { %13716 = vmatmul.mubr.msk.f32.vlgmr.msra.gmra.mrb[64].mxu1 %vm467_vm3, %v3742_v55  ;;  %13739 = vmatpush3.xpose.msk.msra.mxu0 %vm467_vm3, %v15694_v52 }
 0x9ec   :  { %13724 = vmatpush3.xpose.msk.msra.mxu1 %vm467_vm3, %v15684_v36  ;;  %13740 = vmatprep.mubr.msk.f32.mxu0 %vm14832_vm0, %v14831_v0 }
 0x9ed   :  { %13748 = vmatprep.subr.mxu0 %v14831_v0  ;;  %v3751_v43 = vpop.permute.xlu1 %3750  ;;  %13725 = vmatprep.mubr.msk.f32.mxu1 %vm14832_vm0, %v14831_v0 }
 0x9ee   :  { %v3745_v5 = vpop.permute.xlu0 %3744  ;;  %13733 = vmatprep.subr.mxu1 %v14831_v0  ;;  %13741 = vmatmul.mubr.msk.f32.vlgmr.msra.gmra.mrb[62].mxu0 %vm467_vm3, %v3751_v43 }
 0x9ef   :  { %13726 = vmatmul.mubr.msk.f32.vlgmr.msra.gmra.mrb[66].mxu1 %vm467_vm3, %v3745_v5  ;;  %13749 = vmatpush3.xpose.msk.msra.mxu0 %vm467_vm3, %v15720_v50 }
 0x9f0   :  { %13734 = vmatpush3.xpose.msk.msra.mxu1 %vm467_vm3, %v15681_v18  ;;  %13750 = vmatprep.mubr.msk.f32.mxu0 %vm14832_vm0, %v14831_v0 }
 0x9f1   :  { %v3755_v57 = vpop.permute.xlu1 %3754  ;;  %13735 = vmatprep.mubr.msk.f32.mxu1 %vm14832_vm0, %v14831_v0  ;;  %13743 = vmatprep.subr.mxu1 %v14831_v0 }
 0x9f2   :  { %v3749_v33 = vpop.permute.xlu0 %3748  ;;  %13751 = vmatmul.mubr.msk.f32.vlgmr.msra.gmra.mrb[64].mxu0 %vm467_vm3, %v3755_v57  ;;  %13758 = vmatprep.subr.mxu0 %v14831_v0 }
 0x9f3   :  { %13736 = vmatmul.mubr.msk.f32.vlgmr.msra.gmra.mrb[68].mxu1 %vm467_vm3, %v3749_v33  ;;  %13760 = vmatprep.mubr.msk.f32.mxu0 %vm14832_vm0, %v14831_v0 }
 0x9f4   :  { %13744 = vmatpush3.xpose.msk.msra.mxu1 %vm467_vm3, %v15686_v41  ;;  %13745 = vmatprep.mubr.msk.f32.mxu1 %vm14832_vm0, %v14831_v0 }
 0x9f5   :  { %13753 = vmatprep.subr.mxu1 %v14831_v0  ;;  %v15777_v39 = vpop.permute.xlu1 %5772 }
 0x9f6   :  { %v3753_v21 = vpop.permute.xlu0 %3752 }
 0x9f7   :  { %13746 = vmatmul.mubr.msk.f32.vlgmr.msra.gmra.mrb[70].mxu1 %vm467_vm3, %v3753_v21 }
 0x9f8   :  { %13754 = vmatpush3.xpose.msk.msra.mxu1 %vm467_vm3, %v15724_v54  ;;  %13755 = vmatprep.mubr.msk.f32.mxu1 %vm14832_vm0, %v14831_v0 }
 0x9f9   :  { %13763 = vmatprep.subr.mxu1 %v14831_v0 }
 0x9fa   :  { %v3757_v25 = vpop.permute.xlu0 %3756 }
 0x9fb   :  { %13756 = vmatmul.mubr.msk.f32.vlgmr.msra.gmra.mrb[72].mxu1 %vm467_vm3, %v3757_v25 }
 0x9fc   :  { %13765 = vmatprep.mubr.msk.f32.mxu1 %vm14832_vm0, %v14831_v0 }
 0x9fe   :  { %v5165_v30 = vpop.permute.xlu0 %5164 }
 0x9ff   :  { %13759 = vmatpush3.msra.mxu0 %v5165_v30 }
 0xa00   :  { %13768 = vmatprep.subr.mxu0 %v14831_v0 }
 0xa32   :  { %v3858_v62 = vpop.f32.mrb[42].mxu1 }
 0xa33   :  { %v15779_v3 = vmul.f32 0.35355338, %v3858_v62  ;;  %v13682_v63 = vpop.f32.mrb[43].mxu1 }
 0xa34   :  { %v5241_v47 = vpop.permute.xlu1 %5240 }
 0xa35   :  { %13764 = vmatpush3.msra.mxu1 %v5241_v47  ;;  %v4988_v32 = vsel %vm467_vm3, %v15779_v3, -inf }
 0xa36   :  { %4989 = vmax.xlane.f32.xlu1 %v4988_v32  ;;  %13773 = vmatprep.subr.mxu1 %v14831_v0 }
 0xa47   :  { %5924 = vrot.lane.b32.xlu1 %v15688_v37, %s14833_s29 }
 0xaaa   :  { %v3932_v61 = vpop.f32.mrb[56].mxu1 }
 0xaab   :  { %v15786_v4 = vmul.f32 0.35355338, %v3932_v61  ;;  %v13687_v11 = vpop.f32.mrb[57].mxu1 }
 0xaad   :  { %v4991_v23 = vsel %vm467_vm3, %v15786_v4, -inf }
 0xaae   :  { %4992 = vmax.xlane.f32.xlu0 %v4991_v23  ;;  %v4006_v6 = vpop.f32.mrb[58].mxu1 }
 0xaaf   :  { %v13692_v20 = vpop.f32.mrb[59].mxu1  ;;  %v15794_v24 = vmul.f32 0.35355338, %v4006_v6 }
 0xab1   :  { %v4154_v22 = vpop.f32.mrb[38].mxu0  ;;  %v4994_v28 = vsel %vm467_vm3, %v15794_v24, -inf }
 0xab2   :  { %v4080_v8 = vpop.f32.mrb[60].mxu1  ;;  %v15790_v13 = vmul.f32 0.35355338, %v4154_v22  ;;  %v13702_v29 = vpop.f32.mrb[39].mxu0 }
 0xab3   :  { %v15792_v10 = vmul.f32 0.35355338, %v4080_v8  ;;  %v13697_v14 = vpop.f32.mrb[61].mxu1 }
 0xab4   :  { %v5000_v42 = vsel %vm467_vm3, %v15790_v13, -inf }
 0xab5   :  { %v4302_v26 = vpop.f32.mrb[56].mxu0  ;;  %5001 = vmax.xlane.f32.xlu0 %v5000_v42  ;;  %v4997_v17 = vsel %vm467_vm3, %v15792_v10, -inf }
 0xab6   :  { %4998 = vmax.xlane.f32.xlu1 %v4997_v17  ;;  %v4228_v44 = vpop.f32.mrb[62].mxu1  ;;  %v13712_v46 = vpop.f32.mrb[57].mxu0  ;;  %v15830_v29 = vmul.f32 0.35355338, %v4302_v26 }
 0xab7   :  { %v15800_v38 = vmul.f32 0.35355338, %v4228_v44  ;;  %v13707_v59 = vpop.f32.mrb[63].mxu1 }
 0xab8   :  { %v5006_v42 = vsel %vm467_vm3, %v15830_v29, -inf }
 0xab9   :  { %v4450_v34 = vpop.f32.mrb[58].mxu0  ;;  %4995 = vmax.xlane.f32.xlu0 %v4994_v28  ;;  %v5003_v51 = vsel %vm467_vm3, %v15800_v38, -inf  ;;  %v15850_v28 = vpop.permute.xlu1 %5392 }
 0xaba   :  { %5004 = vmax.xlane.f32.xlu1 %v5003_v51  ;;  %v13722_v37 = vpop.f32.mrb[59].mxu0  ;;  %v15832_v14 = vmul.f32 0.35355338, %v4450_v34 }
 0xabd   :  { %v4598_v40 = vpop.f32.mrb[60].mxu0  ;;  %v15852_v34 = vpop.permute.xlu1 %5468 }
 0xabe   :  { %v4376_v56 = vpop.f32.mrb[64].mxu1  ;;  %v13732_v48 = vpop.f32.mrb[61].mxu0  ;;  %v15836_v17 = vmul.f32 0.35355338, %v4598_v40 }
 0xabf   :  { %v15806_v7 = vmul.f32 0.35355338, %v4376_v56  ;;  %v13717_v27 = vpop.f32.mrb[65].mxu1  ;;  %v15861_v48 = vpop.permute.xlu0 %5316 }
 0xac0   :  { %v5018_v46 = vsel %vm467_vm3, %v15836_v17, -inf }
 0xac1   :  { %v4746_v49 = vpop.f32.mrb[62].mxu0  ;;  %v5009_v15 = vsel %vm467_vm3, %v15806_v7, -inf  ;;  %v15858_v51 = vpop.permute.xlu1 %5620 }
 0xac2   :  { %5010 = vmax.xlane.f32.xlu1 %v5009_v15  ;;  %v4524_v55 = vpop.f32.mrb[66].mxu1  ;;  %v13742_v43 = vpop.f32.mrb[63].mxu0  ;;  %v15840_v44 = vmul.f32 0.35355338, %v4746_v49 }
 0xac3   :  { %v15810_v5 = vmul.f32 0.35355338, %v4524_v55  ;;  %v13727_v57 = vpop.f32.mrb[67].mxu1  ;;  %v15863_v27 = vpop.permute.xlu0 %5544 }
 0xac4   :  { %v5024_v26 = vsel %vm467_vm3, %v15840_v44, -inf }
 0xac5   :  { %v4894_v33 = vpop.f32.mrb[64].mxu0  ;;  %v5015_v21 = vsel %vm467_vm3, %v15810_v5, -inf  ;;  %v4990_v37 = vpop.xlane.xlu1 %4989 }
 0xac6   :  { %5016 = vmax.xlane.f32.xlu1 %v5015_v21  ;;  %v4672_v25 = vpop.f32.mrb[68].mxu1  ;;  %v13752_v30 = vpop.f32.mrb[65].mxu0  ;;  %v5036_v40 = vsub.f32 %v15779_v3, %v4990_v37 }
 0xac7   :  { %v15814_v62 = vmul.f32 0.35355338, %v4672_v25  ;;  %v13737_v63 = vpop.f32.mrb[69].mxu1 }
 0xac8   :  { %v5052_v56 = vmul.f32 1.442695, %v5036_v40 }
 0xac9   :  { %v5021_v47 = vsel %vm467_vm3, %v15814_v62, -inf  ;;  %v15872_v57 = vpop.permute.xlu1 %5924 }
 0xaca   :  { %5022 = vmax.xlane.f32.xlu1 %v5021_v47  ;;  %v4820_v32 = vpop.f32.mrb[70].mxu1  ;;  %14583 = vpow2.f32 %v5052_v56 }
 0xacb   :  { %v15818_v61 = vmul.f32 0.35355338, %v4820_v32  ;;  %v13747_v11 = vpop.f32.mrb[71].mxu1 }
 0xacd   :  { %v5027_v23 = vsel %vm467_vm3, %v15818_v61, -inf }
 0xace   :  { %5028 = vmax.xlane.f32.xlu1 %v5027_v23  ;;  %v4968_v6 = vpop.f32.mrb[72].mxu1 }
 0xacf   :  { %v15822_v20 = vmul.f32 0.35355338, %v4968_v6  ;;  %v13757_v22 = vpop.f32.mrb[73].mxu1  ;;  %5848 = vrot.lane.b32.xlu0 %v15684_v36, %s14833_s29  ;;  %v5012_v36 = vsel %vm467_vm3, %v15832_v14, -inf }
 0xad1   :  { %v5033_v8 = vsel %vm467_vm3, %v15822_v20, -inf }
 0xad2   :  { %5034 = vmax.xlane.f32.xlu1 %v5033_v8 }
 0xad4   :  { %v15865_v49 = vpop.eup %14583 }
 0xad5   :  { %v5084_v15 = vsel %vm467_vm3, %v15865_v49, 0.0 }
 0xae3   :  { %6076 = vrot.lane.b32.xlu1 %v15694_v52, %s14833_s29  ;;  %v15844_v52 = vmul.f32 0.35355338, %v4894_v33 }
 0xae5   :  { %v5030_v59 = vsel %vm467_vm3, %v15844_v52, -inf }
 0xaee   :  { %5007 = vmax.xlane.f32.xlu0 %v5006_v42 }
 0xaf2   :  { %5013 = vmax.xlane.f32.xlu0 %v5012_v36 }
 0xaf6   :  { %5019 = vmax.xlane.f32.xlu0 %v5018_v46 }
 0xafa   :  { %5025 = vmax.xlane.f32.xlu0 %v5024_v26 }
 0xafe   :  { %5031 = vmax.xlane.f32.xlu0 %v5030_v59 }
 0xb14   :  { %6000 = vrot.lane.b32.xlu0 %v15681_v18, %s14833_s29  ;;  %v15869_v18 = vpop.permute.xlu0 %5696 }
 0xb18   :  { %6152 = vrot.lane.b32.xlu0 %v15686_v41, %s14833_s29 }
 0xb37   :  { %5085 = vadd.xlane.f32.xlu0 %v5084_v15 }
 0xb3b   :  { %v4993_v41 = vpop.xlane.xlu0 %4992 }
 0xb3c   :  { %v5037_v55 = vsub.f32 %v15786_v4, %v4993_v41 }
 0xb3e   :  { %v5054_v43 = vmul.f32 1.442695, %v5037_v55 }
 0xb40   :  { %14585 = vpow2.f32 %v5054_v43 }
 0xb42   :  { %v5002_v3 = vpop.xlane.xlu0 %5001 }
 0xb43   :  { %v5040_v33 = vsub.f32 %v15790_v13, %v5002_v3  ;;  %v4999_v21 = vpop.xlane.xlu1 %4998 }
 0xb44   :  { %v5039_v25 = vsub.f32 %v15792_v10, %v4999_v21 }
 0xb45   :  { %v5060_v30 = vmul.f32 1.442695, %v5040_v33 }
 0xb46   :  { %v5058_v63 = vmul.f32 1.442695, %v5039_v25  ;;  %v4996_v47 = vpop.xlane.xlu0 %4995 }
 0xb47   :  { %14587 = vpow2.f32 %v5060_v30  ;;  %v5038_v32 = vsub.f32 %v15794_v24, %v4996_v47  ;;  %v5005_v11 = vpop.xlane.xlu1 %5004 }
 0xb48   :  { %14589 = vpow2.f32 %v5058_v63  ;;  %v5041_v4 = vsub.f32 %v15800_v38, %v5005_v11 }
 0xb49   :  { %v5056_v23 = vmul.f32 1.442695, %v5038_v32 }
 0xb4a   :  { %v15878_v6 = vpop.eup %14585  ;;  %v5062_v22 = vmul.f32 1.442695, %v5041_v4  ;;  %v15908_v3 = vpop.permute.xlu0 %5848 }
 0xb4b   :  { %14591 = vpow2.f32 %v5056_v23  ;;  %v5087_v13 = vsel %vm467_vm3, %v15878_v6, 0.0 }
 0xb4c   :  { %14593 = vpow2.f32 %v5062_v22  ;;  %5088 = vadd.xlane.f32.xlu1 %v5087_v13 }
 0xb4f   :  { %v5011_v10 = vpop.xlane.xlu1 %5010 }
 0xb50   :  { %v5043_v8 = vsub.f32 %v15806_v7, %v5011_v10 }
 0xb51   :  { %v15883_v42 = vpop.eup %14587 }
 0xb52   :  { %v15885_v24 = vpop.eup %14589  ;;  %v5066_v36 = vmul.f32 1.442695, %v5043_v8  ;;  %v5096_v38 = vsel %vm467_vm3, %v15883_v42, 0.0 }
 0xb53   :  { %v5017_v46 = vpop.xlane.xlu1 %5016  ;;  %5097 = vadd.xlane.f32.xlu0 %v5096_v38  ;;  %v5093_v26 = vsel %vm467_vm3, %v15885_v24, 0.0 }
 0xb54   :  { %14595 = vpow2.f32 %v5066_v36  ;;  %v5045_v59 = vsub.f32 %v15810_v5, %v5017_v46  ;;  %5094 = vadd.xlane.f32.xlu1 %v5093_v26 }
 0xb55   :  { %v15892_v37 = vpop.eup %14591 }
 0xb56   :  { %v15894_v7 = vpop.eup %14593  ;;  %v5070_v40 = vmul.f32 1.442695, %v5045_v59  ;;  %v5090_v56 = vsel %vm467_vm3, %v15892_v37, 0.0 }
 0xb57   :  { %5091 = vadd.xlane.f32.xlu0 %v5090_v56  ;;  %v5099_v15 = vsel %vm467_vm3, %v15894_v7, 0.0  ;;  %v5023_v33 = vpop.xlane.xlu1 %5022 }
 0xb58   :  { %14597 = vpow2.f32 %v5070_v40  ;;  %5100 = vadd.xlane.f32.xlu1 %v5099_v15  ;;  %v5047_v38 = vsub.f32 %v15814_v62, %v5023_v33 }
 0xb5a   :  { %v5074_v40 = vmul.f32 1.442695, %v5047_v38 }
 0xb5b   :  { %v5029_v30 = vpop.xlane.xlu1 %5028 }
 0xb5c   :  { %v5049_v56 = vsub.f32 %v15818_v61, %v5029_v30 }
 0xb5e   :  { %v15900_v41 = vpop.eup %14595 }
 0xb5f   :  { %v5105_v5 = vsel %vm467_vm3, %v15900_v41, 0.0  ;;  %v5035_v4 = vpop.xlane.xlu1 %5034 }
 0xb60   :  { %5106 = vadd.xlane.f32.xlu1 %v5105_v5  ;;  %v5051_v13 = vsub.f32 %v15822_v20, %v5035_v4  ;;  %v5078_v5 = vmul.f32 1.442695, %v5049_v56  ;;  %v15954_v4 = vadd.f32 %v15595_v53, %v15599_v58 }
 0xb62   :  { %v15904_v55 = vpop.eup %14597  ;;  %v5082_v46 = vmul.f32 1.442695, %v5051_v13 }
 0xb63   :  { %v5111_v43 = vsel %vm467_vm3, %v15904_v55, 0.0  ;;  %v15999_v13 = vpop.permute.xlu1 %6076 }
 0xb64   :  { %5112 = vadd.xlane.f32.xlu1 %v5111_v43 }
 0xb7b   :  { %v5008_v21 = vpop.xlane.xlu0 %5007 }
 0xb7c   :  { %v5042_v25 = vsub.f32 %v15830_v29, %v5008_v21 }
 0xb7e   :  { %v5064_v63 = vmul.f32 1.442695, %v5042_v25 }
 0xb7f   :  { %v5014_v47 = vpop.xlane.xlu0 %5013 }
 0xb80   :  { %14599 = vpow2.f32 %v5064_v63  ;;  %v5044_v32 = vsub.f32 %v15832_v14, %v5014_v47 }
 0xb82   :  { %v5068_v11 = vmul.f32 1.442695, %v5044_v32 }
 0xb83   :  { %v5020_v23 = vpop.xlane.xlu0 %5019 }
 0xb84   :  { %14601 = vpow2.f32 %v5068_v11  ;;  %v5046_v22 = vsub.f32 %v15836_v17, %v5020_v23  ;;  %v15963_v23 = vld [vmem:[%s17294_s9 + $0x4] ss:$0 sm:$0xff] }
 0xb85   :  { %v15973_v53 = vadd.f32 %v15963_v23, %v15667_v45 }
 0xb86   :  { %v5072_v10 = vmul.f32 1.442695, %v5046_v22 }
 0xb87   :  { %v5026_v8 = vpop.xlane.xlu0 %5025 }
 0xb88   :  { %14603 = vpow2.f32 %v5072_v10  ;;  %v5048_v36 = vsub.f32 %v15840_v44, %v5026_v8 }
 0xb8a   :  { %v15915_v29 = vpop.eup %14599  ;;  %v5076_v26 = vmul.f32 1.442695, %v5048_v36 }
 0xb8b   :  { %v5032_v14 = vpop.xlane.xlu0 %5031  ;;  %v5102_v59 = vsel %vm467_vm3, %v15915_v29, 0.0 }
 0xb8c   :  { %14605 = vpow2.f32 %v5076_v26  ;;  %v5050_v17 = vsub.f32 %v15844_v52, %v5032_v14  ;;  %5103 = vadd.xlane.f32.xlu0 %v5102_v59 }
 0xb8d   :  { %14607 = vpow2.f32 %v5082_v46 }
 0xb8e   :  { %v15921_v20 = vpop.eup %14601  ;;  %v5080_v44 = vmul.f32 1.442695, %v5050_v17 }
 0xb8f   :  { %v5108_v62 = vsel %vm467_vm3, %v15921_v20, 0.0  ;;  %v15967_v22 = vpop.permute.xlu0 %6000 }
 0xb90   :  { %14609 = vpow2.f32 %v5080_v44  ;;  %5109 = vadd.xlane.f32.xlu0 %v5108_v62 }
 0xb91   :  { %14611 = vpow2.f32 %v5074_v40 }
 0xb92   :  { %v15926_v15 = vpop.eup %14603  ;;  %14613 = vpow2.f32 %v5078_v5 }
 0xb93   :  { %v5114_v52 = vsel %vm467_vm3, %v15926_v15, 0.0  ;;  %v15979_v58 = vpop.permute.xlu0 %6152 }
 0xb94   :  { %5115 = vadd.xlane.f32.xlu0 %v5114_v52 }
 0xb96   :  { %v15930_v43 = vpop.eup %14605 }
 0xb97   :  { %v5120_v61 = vsel %vm467_vm3, %v15930_v43, 0.0  ;;  %v15934_v33 = vpop.eup %14607 }
 0xb98   :  { %5121 = vadd.xlane.f32.xlu0 %v5120_v61  ;;  %v5129_v30 = vsel %vm467_vm3, %v15934_v33, 0.0 }
 0xb9a   :  { %v15936_v21 = vpop.eup %14609 }
 0xb9b   :  { %v5126_v25 = vsel %vm467_vm3, %v15936_v21, 0.0  ;;  %v15942_v63 = vpop.eup %14611 }
 0xb9c   :  { %5127 = vadd.xlane.f32.xlu1 %v5126_v25  ;;  %5130 = vadd.xlane.f32.xlu0 %v5129_v30  ;;  %v5117_v47 = vsel %vm467_vm3, %v15942_v63, 0.0  ;;  %v15946_v32 = vpop.eup %14613 }
 0xb9d   :  { %v5123_v11 = vsel %vm467_vm3, %v15946_v32, 0.0 }
 0xba0   :  { %5118 = vadd.xlane.f32.xlu1 %v5117_v47 }
 0xba4   :  { %5124 = vadd.xlane.f32.xlu1 %v5123_v11 }
 0xbb2   :  { %6304 = vrot.lane.b32.xlu0 %v15724_v54, %s14833_s29 }
 0xbb5   :  { %6228 = vrot.lane.b32.xlu1 %v15720_v50, %s14833_s29 }
 0xbb6   :  { %6569 = vrot.lane.b32.xlu0 %v15954_v4, %s14837_s27 }
 0xbb9   :  { %6565 = vrot.lane.b32.xlu1 %v15954_v4, %s14835_s26 }
 0xbba   :  { %6571 = vrot.lane.b32.xlu0 %v15954_v4, %s14836_s2 }
 0xbbd   :  { %6535 = vrot.lane.b32.xlu1 %v15973_v53, %s14835_s26 }
 0xbbe   :  { %6541 = vrot.lane.b32.xlu0 %v15973_v53, %s14836_s2 }
 0xbc1   :  { %6567 = vrot.lane.b32.xlu1 %v15954_v4, %s14834_s25 }
 0xbc2   :  { %6575 = vrot.lane.b32.xlu0 %v15954_v4, %s14838_s28 }
 0xbc4   :  { %v5086_v50 = vpop.xlane.xlu0 %5085 }
 0xbc5   :  { %14615 = vrcp.f32 %v5086_v50  ;;  %6537 = vrot.lane.b32.xlu1 %v15973_v53, %s14834_s25 }
 0xbc9   :  { %6539 = vrot.lane.b32.xlu1 %v15973_v53, %s14837_s27 }
 0xbcd   :  { %6573 = vrot.lane.b32.xlu1 %v15954_v4, %s14839_s6 }
 0xbcf   :  { %v14616_v45 = vpop.eup %14615 }
 0xbd0   :  { %v5133_v54 = vmul.f32 %v14616_v45, %v15865_v49 }
 0xbd1   :  { %6543 = vrot.lane.b32.xlu1 %v15973_v53, %s14839_s6 }
 0xbd2   :  { %13761 = vmatmul.mubr.msk.f32.vlgmr.msra.gmra.mrb[66].mxu0 %vm467_vm3, %v5133_v54 }
 0xbd3   :  { %13769 = vmatpush3.msra.mxu0 %v15861_v48  ;;  %13770 = vmatprep.mubr.msk.f32.mxu0 %vm14832_vm0, %v14831_v0 }
 0xbd4   :  { %13778 = vmatprep.subr.mxu0 %v14831_v0 }
 0xbd9   :  { %v5089_v10 = vpop.xlane.xlu1 %5088 }
 0xbda   :  { %14617 = vrcp.f32 %v5089_v10 }
 0xbe0   :  { %v5098_v8 = vpop.xlane.xlu0 %5097 }
 0xbe1   :  { %v5095_v36 = vpop.xlane.xlu1 %5094 }
 0xbe2   :  { %14619 = vrcp.f32 %v5095_v36 }
 0xbe4   :  { %v14618_v49 = vpop.eup %14617  ;;  %v5092_v38 = vpop.xlane.xlu0 %5091 }
 0xbe5   :  { %14621 = vrcp.f32 %v5092_v38  ;;  %v5101_v46 = vpop.xlane.xlu1 %5100  ;;  %v5135_v26 = vmul.f32 %v14618_v49, %v15878_v6 }
 0xbe6   :  { %14623 = vrcp.f32 %v5101_v46 }
 0xbe7   :  { %14625 = vrcp.f32 %v5098_v8  ;;  %13766 = vmatmul.mubr.msk.f32.vlgmr.msra.gmra.mrb[74].mxu1 %vm467_vm3, %v5135_v26 }
 0xbe8   :  { %13774 = vmatpush3.msra.mxu1 %v15850_v28  ;;  %13775 = vmatprep.mubr.msk.f32.mxu1 %vm14832_vm0, %v14831_v0 }
 0xbe9   :  { %13783 = vmatprep.subr.mxu1 %v14831_v0 }
 0xbec   :  { %v14620_v48 = vpop.eup %14619 }
 0xbed   :  { %v5107_v14 = vpop.xlane.xlu1 %5106  ;;  %v5139_v59 = vmul.f32 %v14620_v48, %v15885_v24 }
 0xbee   :  { %14627 = vrcp.f32 %v5107_v14 }
 0xbef   :  { %v14622_v17 = vpop.eup %14621  ;;  %13776 = vmatmul.mubr.msk.f32.vlgmr.msra.gmra.mrb[76].mxu1 %vm467_vm3, %v5139_v59 }
 0xbf0   :  { %v14624_v6 = vpop.eup %14623  ;;  %13784 = vmatpush3.msra.mxu1 %v15863_v27  ;;  %13785 = vmatprep.mubr.msk.f32.mxu1 %vm14832_vm0, %v14831_v0  ;;  %v5137_v28 = vmul.f32 %v14622_v17, %v15892_v37 }
 0xbf1   :  { %v14626_v40 = vpop.eup %14625  ;;  %v5113_v56 = vpop.xlane.xlu1 %5112  ;;  %13793 = vmatprep.subr.mxu1 %v14831_v0  ;;  %v5143_v44 = vmul.f32 %v14624_v6, %v15894_v7 }
 0xbf2   :  { %14629 = vrcp.f32 %v5113_v56  ;;  %13771 = vmatmul.mubr.msk.f32.vlgmr.msra.gmra.mrb[68].mxu0 %vm467_vm3, %v5137_v28  ;;  %v5141_v27 = vmul.f32 %v14626_v40, %v15883_v42 }
 0xbf3   :  { %13779 = vmatpush3.msra.mxu0 %v15852_v34  ;;  %13786 = vmatmul.mubr.msk.f32.vlgmr.msra.gmra.mrb[78].mxu1 %vm467_vm3, %v5143_v44 }
 0xbf4   :  { %13794 = vmatpush3.msra.mxu1 %v15869_v18  ;;  %13780 = vmatprep.mubr.msk.f32.mxu0 %vm14832_vm0, %v14831_v0 }
 0xbf5   :  { %13788 = vmatprep.subr.mxu0 %v14831_v0  ;;  %13795 = vmatprep.mubr.msk.f32.mxu1 %vm14832_vm0, %v14831_v0 }
 0xbf6   :  { %13781 = vmatmul.mubr.msk.f32.vlgmr.msra.gmra.mrb[70].mxu0 %vm467_vm3, %v5141_v27  ;;  %13803 = vmatprep.subr.mxu1 %v14831_v0 }
 0xbf7   :  { %13789 = vmatpush3.msra.mxu0 %v15858_v51  ;;  %13790 = vmatprep.mubr.msk.f32.mxu0 %vm14832_vm0, %v14831_v0 }
 0xbf8   :  { %v14628_v34 = vpop.eup %14627  ;;  %13798 = vmatprep.subr.mxu0 %v14831_v0 }
 0xbf9   :  { %v5147_v18 = vmul.f32 %v14628_v34, %v15900_v41 }
 0xbfb   :  { %13796 = vmatmul.mubr.msk.f32.vlgmr.msra.gmra.mrb[80].mxu1 %vm467_vm3, %v5147_v18 }
 0xbfc   :  { %v14630_v42 = vpop.eup %14629  ;;  %13804 = vmatpush3.msra.mxu1 %v15908_v3  ;;  %13805 = vmatprep.mubr.msk.f32.mxu1 %vm14832_vm0, %v14831_v0 }
 0xbfd   :  { %13813 = vmatprep.subr.mxu1 %v14831_v0  ;;  %v5151_v51 = vmul.f32 %v14630_v42, %v15904_v55 }
 0xbff   :  { %13806 = vmatmul.mubr.msk.f32.vlgmr.msra.gmra.mrb[82].mxu1 %vm467_vm3, %v5151_v51 }
 0xc00   :  { %13814 = vmatpush3.msra.mxu1 %v15967_v22  ;;  %13815 = vmatprep.mubr.msk.f32.mxu1 %vm14832_vm0, %v14831_v0 }
 0xc01   :  { %13823 = vmatprep.subr.mxu1 %v14831_v0 }
 0xc19   :  { %v5104_v24 = vpop.xlane.xlu0 %5103 }
 0xc1a   :  { %14631 = vrcp.f32 %v5104_v24 }
 0xc1d   :  { %v5110_v37 = vpop.xlane.xlu0 %5109 }
 0xc1e   :  { %14633 = vrcp.f32 %v5110_v37 }
 0xc21   :  { %v5116_v7 = vpop.xlane.xlu0 %5115 }
 0xc22   :  { %14635 = vrcp.f32 %v5116_v7 }
 0xc24   :  { %v14632_v41 = vpop.eup %14631 }
 0xc25   :  { %v5122_v3 = vpop.xlane.xlu0 %5121  ;;  %v5145_v62 = vmul.f32 %v14632_v41, %v15915_v29 }
 0xc26   :  { %14637 = vrcp.f32 %v5122_v3 }
 0xc27   :  { %13791 = vmatmul.mubr.msk.f32.vlgmr.msra.gmra.mrb[72].mxu0 %vm467_vm3, %v5145_v62  ;;  %v14453_v62 = vld [vmem:[#allocation2 + $0x1c] ss:$40 sps:$4 sm:$0xff]  }
 0xc28   :  { %v14634_v55 = vpop.eup %14633  ;;  %13799 = vmatpush3.msra.mxu0 %v15777_v39  ;;  %13800 = vmatprep.mubr.msk.f32.mxu0 %vm14832_vm0, %v14831_v0 }
 0xc29   :  { %v5128_v5 = vpop.xlane.xlu1 %5127  ;;  %13808 = vmatprep.subr.mxu0 %v14831_v0  ;;  %v5149_v52 = vmul.f32 %v14634_v55, %v15921_v20  ;;  %v5131_v20 = vpop.xlane.xlu0 %5130 }
 0xc2a   :  { %14639 = vrcp.f32 %v5128_v5 }
 0xc2b   :  { %13801 = vmatmul.mubr.msk.f32.vlgmr.msra.gmra.mrb[74].mxu0 %vm467_vm3, %v5149_v52 }
 0xc2c   :  { %v14636_v61 = vpop.eup %14635  ;;  %13809 = vmatpush3.msra.mxu0 %v15872_v57  ;;  %13810 = vmatprep.mubr.msk.f32.mxu0 %vm14832_vm0, %v14831_v0 }
 0xc2d   :  { %v5119_v29 = vpop.xlane.xlu1 %5118  ;;  %13818 = vmatprep.subr.mxu0 %v14831_v0  ;;  %v5153_v39 = vmul.f32 %v14636_v61, %v15926_v15  ;;  %v14454_v61 = vld [vmem:[#allocation2 + $0x6c] ss:$40 sps:$4 sm:$0xff]  }
 0xc2e   :  { %14641 = vrcp.f32 %v5119_v29 }
 0xc2f   :  { %13811 = vmatmul.mubr.msk.f32.vlgmr.msra.gmra.mrb[76].mxu0 %vm467_vm3, %v5153_v39 }
 0xc30   :  { %v14638_v25 = vpop.eup %14637  ;;  %13819 = vmatpush3.msra.mxu0 %v15999_v13  ;;  %13820 = vmatprep.mubr.msk.f32.mxu0 %vm14832_vm0, %v14831_v0  ;;  %v6305_v13 = vpop.permute.xlu0 %6304 }
 0xc31   :  { %v5125_v30 = vpop.xlane.xlu1 %5124  ;;  %v5157_v57 = vmul.f32 %v14638_v25, %v15930_v43  ;;  %13828 = vmatprep.subr.mxu0 %v14831_v0 }
 0xc32   :  { %14643 = vrcp.f32 %v5125_v30 }
 0xc33   :  { %13821 = vmatmul.mubr.msk.f32.vlgmr.msra.gmra.mrb[78].mxu0 %vm467_vm3, %v5157_v57  ;;  %14645 = vrcp.f32 %v5131_v20  ;;  %v14455_v20 = vld [vmem:[#allocation2 + $0xbc] ss:$40 sps:$4 sm:$0xff]  }
 0xc34   :  { %13830 = vmatprep.mubr.msk.f32.mxu0 %vm14832_vm0, %v14831_v0  ;;  %v14640_v15 = vpop.eup %14639 }
 0xc35   :  { %v6229_v47 = vpop.permute.xlu1 %6228  ;;  %v5161_v11 = vmul.f32 %v14640_v15, %v15936_v21 }
 0xc36   :  { %13829 = vmatpush3.msra.mxu0 %v6229_v47  ;;  %v14456_v47 = vld [vmem:[#allocation2 + $0x10c] ss:$40 sps:$4 sm:$0xff]  }
 0xc37   :  { %13838 = vmatprep.subr.bf16.mxu0 %v14831_v0  ;;  %13831 = vmatmul.mubr.msk.f32.vlgmr.msra.gmra.mrb[80].mxu0 %vm467_vm3, %v5161_v11 }
 0xc38   :  { %v14642_v22 = vpop.eup %14641  ;;  %13846 = vmatprep.mubr.msk.bf16.mxu0 %vm14832_vm0, %v14831_v0  ;;  %13839 = vmatpush3.bf16.msra.mxu0 %v14453_v62 }
 0xc39   :  { %v5155_v43 = vmul.f32 %v14642_v22, %v15942_v63  ;;  %v16075_v45 = vpop.permute.xlu1 %6565  ;;  %13840 = vmatprep.subr.bf16.mxu0 %v14831_v0 }
 0xc3b   :  { %13816 = vmatmul.mubr.msk.f32.vlgmr.msra.gmra.mrb[84].mxu1 %vm467_vm3, %v5155_v43 }
 0xc3c   :  { %v14644_v50 = vpop.eup %14643  ;;  %13824 = vmatpush3.msra.mxu1 %v15979_v58  ;;  %13825 = vmatprep.mubr.msk.f32.mxu1 %vm14832_vm0, %v14831_v0 }
 0xc3d   :  { %13833 = vmatprep.subr.mxu1 %v14831_v0  ;;  %v5159_v21 = vmul.f32 %v14644_v50, %v15946_v32  ;;  %v14646_v54 = vpop.eup %14645  ;;  %v6536_v58 = vpop.permute.xlu1 %6535  ;;  %13841 = vmatpush3.bf16.msra.mxu0 %v14454_v61 }
 0xc3e   :  { %v5163_v63 = vmul.f32 %v14646_v54, %v15934_v33  ;;  %v16089_v32 = vpop.permute.xlu0 %6569  ;;  %13842 = vmatprep.subr.bf16.mxu0 %v14831_v0 }
 0xc3f   :  { %13826 = vmatmul.mubr.msk.f32.vlgmr.msra.gmra.mrb[86].mxu1 %vm467_vm3, %v5159_v21  ;;  %v16147_v21 = vadd.f32 %v15963_v23, %v15669_v31 }
 0xc40   :  { %13834 = vmatpush3.msra.mxu1 %v6305_v13  ;;  %13835 = vmatprep.mubr.msk.f32.mxu1 %vm14832_vm0, %v14831_v0 }
 0xc41   :  { %13850 = vmatprep.subr.mxu1 %v14831_v0  ;;  %v16092_v10 = vpop.permute.xlu1 %6567  ;;  %13843 = vmatpush3.bf16.msra.mxu0 %v14455_v20 }
 0xc42   :  { %v16101_v33 = vpop.permute.xlu0 %6571  ;;  %13844 = vmatprep.subr.bf16.mxu0 %v14831_v0 }
 0xc43   :  { %13836 = vmatmul.mubr.msk.f32.vlgmr.msra.gmra.mrb[88].mxu1 %vm467_vm3, %v5163_v63 }
 0xc44   :  { %13852 = vmatprep.mubr.msk.f32.mxu1 %vm14832_vm0, %v14831_v0 }
 0xc45   :  { %v6538_v8 = vpop.permute.xlu1 %6537  ;;  %13845 = vmatpush3.bf16.msra.mxu0 %v14456_v47 }
 0xc46   :  { %v6542_v36 = vpop.permute.xlu0 %6541  ;;  %13875 = vmatprep.subr.mxu0 %v14831_v0 }
 0xc47   :  { %13851 = vmatpush3.xpose.msk.msra.mxu1 %vm467_vm3, %v15954_v4 }
 0xc48   :  { %13855 = vmatprep.subr.mxu1 %v14831_v0 }
 0xc49   :  { %v6540_v49 = vpop.permute.xlu1 %6539 }
 0xc4a   :  { %13853 = vmatmul.mubr.msk.f32.vlgmr.msra.gmra.mrb[90].mxu1 %vm467_vm3, %v15973_v53  ;;  %v16121_v38 = vpop.permute.xlu0 %6575 }
 0xc4b   :  { %13856 = vmatpush3.xpose.msk.msra.mxu1 %vm467_vm3, %v16075_v45  ;;  %13857 = vmatprep.mubr.msk.f32.mxu1 %vm14832_vm0, %v14831_v0 }
 0xc4c   :  { %13860 = vmatprep.subr.mxu1 %v14831_v0 }
 0xc4e   :  { %13858 = vmatmul.mubr.msk.f32.vlgmr.msra.gmra.mrb[92].mxu1 %vm467_vm3, %v6536_v58 }
 0xc4f   :  { %13861 = vmatpush3.xpose.msk.msra.mxu1 %vm467_vm3, %v16092_v10  ;;  %13862 = vmatprep.mubr.msk.f32.mxu1 %vm14832_vm0, %v14831_v0 }
 0xc50   :  { %13865 = vmatprep.subr.mxu1 %v14831_v0 }
 0xc52   :  { %13863 = vmatmul.mubr.msk.f32.vlgmr.msra.gmra.mrb[94].mxu1 %vm467_vm3, %v6538_v8 }
 0xc53   :  { %13866 = vmatpush3.xpose.msk.msra.mxu1 %vm467_vm3, %v16089_v32  ;;  %13867 = vmatprep.mubr.msk.f32.mxu1 %vm14832_vm0, %v14831_v0 }
 0xc54   :  { %13870 = vmatprep.subr.mxu1 %v14831_v0 }
 0xc56   :  { %13868 = vmatmul.mubr.msk.f32.vlgmr.msra.gmra.mrb[96].mxu1 %vm467_vm3, %v6540_v49 }
 0xc57   :  { %13871 = vmatpush3.xpose.msk.msra.mxu1 %vm467_vm3, %v16101_v33  ;;  %13872 = vmatprep.mubr.msk.f32.mxu1 %vm14832_vm0, %v14831_v0 }
 0xc58   :  { %13880 = vmatprep.subr.mxu1 %v14831_v0 }
 0xc5a   :  { %13873 = vmatmul.mubr.msk.f32.vlgmr.msra.gmra.mrb[98].mxu1 %vm467_vm3, %v6542_v36 }
 0xc5b   :  { %13881 = vmatpush3.xpose.msk.msra.mxu1 %vm467_vm3, %v16121_v38  ;;  %13882 = vmatprep.mubr.msk.f32.mxu1 %vm14832_vm0, %v14831_v0 }
 0xc5c   :  { %13890 = vmatprep.subr.mxu1 %v14831_v0 }
 0xca5   :  { %v16129_v46 = vpop.f32.mrb[66].mxu0 }
 0xca6   :  { %v13762_v26 = vpop.f32.mrb[67].mxu0 }
 0xcba   :  { %v5312_v48 = vpop.f32.mrb[74].mxu1 }
 0xcbb   :  { %v13767_v14 = vpop.f32.mrb[75].mxu1 }
 0xcc2   :  { %v5464_v59 = vpop.f32.mrb[76].mxu1 }
 0xcc3   :  { %v13777_v17 = vpop.f32.mrb[77].mxu1 }
 0xcc5   :  { %v5388_v6 = vpop.f32.mrb[68].mxu0 }
 0xcc6   :  { %v5616_v28 = vpop.f32.mrb[78].mxu1  ;;  %v13772_v40 = vpop.f32.mrb[69].mxu0 }
 0xcc7   :  { %v13787_v56 = vpop.f32.mrb[79].mxu1 }
 0xcc9   :  { %v5540_v44 = vpop.f32.mrb[70].mxu0 }
 0xcca   :  { %v13782_v27 = vpop.f32.mrb[71].mxu0 }
 0xccb   :  { %v16212_v27 = vpop.permute.xlu1 %6573 }
 0xcce   :  { %v5768_v34 = vpop.f32.mrb[80].mxu1 }
 0xccf   :  { %v13797_v18 = vpop.f32.mrb[81].mxu1 }
 0xcd2   :  { %v5920_v42 = vpop.f32.mrb[82].mxu1 }
 0xcd3   :  { %v14293_v51 = vpack.i.bf16 %v5920_v42, %v5312_v48  ;;  %v13807_v24 = vpop.f32.mrb[83].mxu1 }
 0xcd5   :  { %14294 = vrot.lane.b32.xlu1 %v14293_v51, %s14841_s5 }
 0xcfa   :  { %v5692_v37 = vpop.f32.mrb[72].mxu0 }
 0xcfb   :  { %v13792_v7 = vpop.f32.mrb[73].mxu0 }
 0xcfe   :  { %v16132_v41 = vpop.f32.mrb[74].mxu0 }
 0xcff   :  { %v13802_v3 = vpop.f32.mrb[75].mxu0 }
 0xd02   :  { %v5996_v55 = vpop.f32.mrb[76].mxu0 }
 0xd03   :  { %v14298_v5 = vpack.i.bf16 %v5996_v55, %v5388_v6  ;;  %v13812_v52 = vpop.f32.mrb[77].mxu0 }
 0xd05   :  { %14299 = vrot.lane.b32.xlu0 %v14298_v5, %s14842_s11 }
 0xd06   :  { %v6148_v29 = vpop.f32.mrb[78].mxu0 }
 0xd07   :  { %v14308_v39 = vpack.i.bf16 %v6148_v29, %v5540_v44  ;;  %v13822_v25 = vpop.f32.mrb[79].mxu0 }
 0xd09   :  { %14309 = vrot.lane.b32.xlu1 %v14308_v39, %s14844_s13 }
 0xd0a   :  { %v6300_v30 = vpop.f32.mrb[80].mxu0 }
 0xd0b   :  { %v14318_v57 = vpack.i.bf16 %v6300_v30, %v5692_v37  ;;  %v13832_v15 = vpop.f32.mrb[81].mxu0 }
 0xd0d   :  { %6577 = vrot.lane.b32.xlu1 %v15954_v4, %s14840_s30 }
 0xd0e   :  { %v6072_v11 = vpop.f32.mrb[84].mxu1 }
 0xd0f   :  { %v14303_v22 = vpack.i.bf16 %v6072_v11, %v5464_v59  ;;  %v13817_v43 = vpop.f32.mrb[85].mxu1 }
 0xd11   :  { %6547 = vrot.lane.b32.xlu1 %v15973_v53, %s14840_s30  ;;  %14304 = vrot.lane.b32.xlu0 %v14303_v22, %s14843_s12 }
 0xd12   :  { %v6224_v50 = vpop.f32.mrb[86].mxu1 }
 0xd13   :  { %v14313_v54 = vpack.i.bf16 %v6224_v50, %v5616_v28  ;;  %v13827_v13 = vpop.f32.mrb[87].mxu1 }
 0xd15   :  { %6550 = vrot.lane.b32.xlu1 %v16147_v21, %s14835_s26  ;;  %14314 = vrot.lane.b32.xlu0 %v14313_v54, %s14830_s24 }
 0xd16   :  { %v6376_v63 = vpop.f32.mrb[88].mxu1 }
 0xd17   :  { %v14323_v58 = vpack.i.bf16 %v6376_v63, %v5768_v34  ;;  %v13837_v8 = vpop.f32.mrb[89].mxu1  ;;  %v6544_v34 = vpop.permute.xlu1 %6543 }
 0xd19   :  { %6584 = vrot.lane.b32.xlu1 %v15607_v2, %s14837_s27  ;;  %14319 = vrot.lane.b32.xlu0 %v14318_v57, %s14846_s16 }
 0xd1d   :  { %v6664_v36 = vpop.f32.mrb[90].mxu1  ;;  %6554 = vrot.lane.b32.xlu1 %v16147_v21, %s14837_s27  ;;  %14324 = vrot.lane.b32.xlu0 %v14323_v58, %s14845_s4 }
 0xd1e   :  { %v13854_v31 = vpop.f32.mrb[91].mxu1 }
 0xd21   :  { %v6738_v23 = vpop.f32.mrb[92].mxu1  ;;  %6588 = vrot.lane.b32.xlu1 %v15607_v2, %s14839_s6  ;;  %6545 = vrot.lane.b32.xlu0 %v15973_v53, %s14838_s28 }
 0xd22   :  { %v13859_v49 = vpop.f32.mrb[93].mxu1 }
 0xd25   :  { %v6812_v26 = vpop.f32.mrb[94].mxu1  ;;  %6558 = vrot.lane.b32.xlu1 %v16147_v21, %s14839_s6  ;;  %6580 = vrot.lane.b32.xlu0 %v15607_v2, %s14835_s26 }
 0xd26   :  { %v13864_v48 = vpop.f32.mrb[95].mxu1  ;;  %v16202_v40 = vmul.f32 0.35355338, %v6812_v26 }
 0xd28   :  { %v7800_v56 = vsel %vm467_vm3, %v16202_v40, -inf }
 0xd29   :  { %v6886_v14 = vpop.f32.mrb[96].mxu1  ;;  %6592 = vrot.lane.b32.xlu1 %v15607_v2, %s14840_s30  ;;  %6582 = vrot.lane.b32.xlu0 %v15607_v2, %s14834_s25 }
 0xd2a   :  { %v13869_v59 = vpop.f32.mrb[97].mxu1 }
 0xd2d   :  { %v6960_v17 = vpop.f32.mrb[98].mxu1  ;;  %6562 = vrot.lane.b32.xlu1 %v16147_v21, %s14840_s30  ;;  %6552 = vrot.lane.b32.xlu0 %v16147_v21, %s14834_s25 }
 0xd2e   :  { %v13874_v53 = vpop.f32.mrb[99].mxu1 }
 0xd31   :  { %7970 = vrot.lane.b32.xlu1 %v15954_v4, %s14833_s29  ;;  %6586 = vrot.lane.b32.xlu0 %v15607_v2, %s14836_s2  ;;  %v16192_v4 = vmul.f32 0.35355338, %v6738_v23 }
 0xd33   :  { %v7797_v6 = vsel %vm467_vm3, %v16192_v4, -inf }
 0xd35   :  { %8122 = vrot.lane.b32.xlu1 %v16092_v10, %s14833_s29  ;;  %6556 = vrot.lane.b32.xlu0 %v16147_v21, %s14836_s2  ;;  %v16194_v10 = vmul.f32 0.35355338, %v6960_v17 }
 0xd37   :  { %v7806_v28 = vsel %vm467_vm3, %v16194_v10, -inf }
 0xd39   :  { %8274 = vrot.lane.b32.xlu1 %v16101_v33, %s14833_s29  ;;  %6590 = vrot.lane.b32.xlu0 %v15607_v2, %s14838_s28  ;;  %v16198_v33 = vmul.f32 0.35355338, %v6664_v36 }
 0xd3d   :  { %6560 = vrot.lane.b32.xlu0 %v16147_v21, %s14838_s28 }
 0xd41   :  { %8046 = vrot.lane.b32.xlu0 %v16075_v45, %s14833_s29  ;;  %v7794_v45 = vsel %vm467_vm3, %v16198_v33, -inf }
 0xd45   :  { %8198 = vrot.lane.b32.xlu0 %v16089_v32, %s14833_s29  ;;  %v16206_v32 = vmul.f32 0.35355338, %v6886_v14 }
 0xd47   :  { %v7803_v44 = vsel %vm467_vm3, %v16206_v32, -inf  ;;  %v14295_v18 = vpop.permute.xlu1 %14294 }
 0xd48   :  { %v14297_v3 = vunpack.i.h.bf16 %v14295_v18  ;;  %v14296_v62 = vunpack.i.l.bf16 %v14295_v18 }
 0xd4a   :  { %v6443_v25 = vsel %vm467_vm3, %v16132_v41, %v14297_v3  ;;  %v6408_v20 = vsel %vm467_vm3, %v16129_v46, %v14296_v62 }
 0xd5d   :  { %7798 = vmax.xlane.f32.xlu1 %v7797_v6 }
 0xd61   :  { %7807 = vmax.xlane.f32.xlu1 %v7806_v28 }
 0xd64   :  { %7795 = vmax.xlane.f32.xlu0 %v7794_v45 }
 0xd68   :  { %7801 = vmax.xlane.f32.xlu0 %v7800_v56 }
 0xd6c   :  { %7804 = vmax.xlane.f32.xlu0 %v7803_v44 }
 0xd77   :  { %v14300_v51 = vpop.permute.xlu0 %14299 }
 0xd78   :  { %v14302_v55 = vunpack.i.h.bf16 %v14300_v51  ;;  %v14301_v5 = vunpack.i.l.bf16 %v14300_v51 }
 0xd7a   :  { %v6409_v30 = vsel %vm76_vm1, %v6408_v20, %v14301_v5  ;;  %v6444_v57 = vsel %vm76_vm1, %v6443_v25, %v14302_v55 }
 0xd7b   :  { %v14310_v42 = vpop.permute.xlu1 %14309 }
 0xd7c   :  { %v14312_v54 = vunpack.i.h.bf16 %v14310_v42  ;;  %v14311_v13 = vunpack.i.l.bf16 %v14310_v42 }
 0xd7f   :  { %v16214_v24 = vpop.permute.xlu1 %6577 }
 0xd83   :  { %v6548_v37 = vpop.permute.xlu1 %6547  ;;  %v14305_v7 = vpop.permute.xlu0 %14304 }
 0xd84   :  { %v14307_v29 = vunpack.i.h.bf16 %v14305_v7  ;;  %v14306_v39 = vunpack.i.l.bf16 %v14305_v7 }
 0xd86   :  { %v6445_v47 = vsel %vm3090_vm4, %v6444_v57, %v14307_v29  ;;  %v6410_v11 = vsel %vm3090_vm4, %v6409_v30, %v14306_v39 }
 0xd87   :  { %v6551_v52 = vpop.permute.xlu1 %6550  ;;  %v14315_v61 = vpop.permute.xlu0 %14314  ;;  %v6411_v58 = vsel %vm3092_vm5, %v6410_v11, %v14311_v13  ;;  %v6446_v46 = vsel %vm3092_vm5, %v6445_v47, %v14312_v54 }
 0xd88   :  { %v14317_v22 = vunpack.i.h.bf16 %v14315_v61  ;;  %v14316_v43 = vunpack.i.l.bf16 %v14315_v61 }
 0xd8a   :  { %v6447_v36 = vsel %vm3094_vm6, %v6446_v46, %v14317_v22  ;;  %v6412_v31 = vsel %vm3094_vm6, %v6411_v58, %v14316_v43 }
 0xd8b   :  { %v14320_v15 = vpop.permute.xlu0 %14319  ;;  %v16224_v50 = vpop.permute.xlu1 %6584 }
 0xd8c   :  { %v14322_v63 = vunpack.i.h.bf16 %v14320_v15  ;;  %v14321_v41 = vunpack.i.l.bf16 %v14320_v15 }
 0xd8e   :  { %v6413_v26 = vsel %vm3096_vm7, %v6412_v31, %v14321_v41  ;;  %v6448_v48 = vsel %vm3096_vm7, %v6447_v36, %v14322_v63 }
 0xd8f   :  { %v14325_v8 = vpop.permute.xlu0 %14324  ;;  %v6555_v14 = vpop.permute.xlu1 %6554 }
 0xd90   :  { %v14327_v23 = vunpack.i.h.bf16 %v14325_v8  ;;  %v14326_v49 = vunpack.i.l.bf16 %v14325_v8 }
 0xd92   :  { %v6449_v59 = vsel %vm3098_vm8, %v6448_v48, %v14327_v23  ;;  %v6414_v17 = vsel %vm3098_vm8, %v6413_v26, %v14326_v49 }
 0xd93   :  { %v6450_v53 = vpack.c.bf16 %v6449_v59, %v6414_v17  ;;  %v6546_v6 = vpop.permute.xlu0 %6545  ;;  %v16247_v45 = vpop.permute.xlu1 %6588 }
 0xd94   :  { %13883 = vmatmul.mubr.msk.f32.vlgmr.msra.gmra.mrb[100].mxu1 %vm467_vm3, %v6546_v6 }
 0xd95   :  { %13891 = vmatpush3.xpose.msk.msra.mxu1 %vm467_vm3, %v15607_v2  ;;  %13847 = vmatmul.mubr.msk.bf16.vlgmr.msra.gmra.mrb[84].mxu0 %vm236_vm2, %v6450_v53 }
 0xd96   :  { %13876 = vmatpush3.xpose.msk.msra.mxu0 %vm467_vm3, %v16212_v27  ;;  %13892 = vmatprep.mubr.msk.f32.mxu1 %vm14832_vm0, %v14831_v0 }
 0xd97   :  { %v16242_v28 = vpop.permute.xlu0 %6580  ;;  %13900 = vmatprep.subr.mxu1 %v14831_v0  ;;  %13877 = vmatprep.mubr.msk.f32.mxu0 %vm14832_vm0, %v14831_v0  ;;  %v6559_v44 = vpop.permute.xlu1 %6558 }
 0xd98   :  { %13893 = vmatmul.mubr.msk.f32.vlgmr.msra.gmra.mrb[102].mxu1 %vm467_vm3, %v16147_v21  ;;  %13885 = vmatprep.subr.mxu0 %v14831_v0 }
 0xd99   :  { %13902 = vmatprep.mubr.msk.f32.mxu1 %vm14832_vm0, %v14831_v0 }
 0xd9b   :  { %v16254_v56 = vpop.permute.xlu0 %6582  ;;  %v16276_v18 = vpop.permute.xlu1 %6592 }
 0xd9c   :  { %13901 = vmatpush3.xpose.msk.msra.mxu1 %vm467_vm3, %v16254_v56 }
 0xd9d   :  { %13878 = vmatmul.mubr.msk.f32.vlgmr.msra.gmra.mrb[82].mxu0 %vm467_vm3, %v6544_v34  ;;  %13910 = vmatprep.subr.mxu1 %v14831_v0 }
 0xd9e   :  { %13886 = vmatpush3.xpose.msk.msra.mxu0 %vm467_vm3, %v16214_v24  ;;  %13887 = vmatprep.mubr.msk.f32.mxu0 %vm14832_vm0, %v14831_v0 }
 0xd9f   :  { %v6553_v21 = vpop.permute.xlu0 %6552  ;;  %13895 = vmatprep.subr.mxu0 %v14831_v0  ;;  %v6563_v51 = vpop.permute.xlu1 %6562 }
 0xda0   :  { %13903 = vmatmul.mubr.msk.f32.vlgmr.msra.gmra.mrb[104].mxu1 %vm467_vm3, %v6553_v21 }
 0xda1   :  { %13888 = vmatmul.mubr.msk.f32.vlgmr.msra.gmra.mrb[88].mxu0 %vm467_vm3, %v6548_v37  ;;  %13912 = vmatprep.mubr.msk.f32.mxu1 %vm14832_vm0, %v14831_v0 }
 0xda2   :  { %13896 = vmatpush3.xpose.msk.msra.mxu0 %vm467_vm3, %v16242_v28  ;;  %13897 = vmatprep.mubr.msk.f32.mxu0 %vm14832_vm0, %v14831_v0 }
 0xda3   :  { %v16273_v34 = vpop.permute.xlu0 %6586  ;;  %13905 = vmatprep.subr.mxu0 %v14831_v0  ;;  %v7971_v3 = vpop.permute.xlu1 %7970 }
 0xda4   :  { %13911 = vmatpush3.xpose.msk.msra.mxu1 %vm467_vm3, %v16273_v34 }
 0xda5   :  { %13898 = vmatmul.mubr.msk.f32.vlgmr.msra.gmra.mrb[90].mxu0 %vm467_vm3, %v6551_v52  ;;  %13920 = vmatprep.subr.mxu1 %v14831_v0 }
 0xda6   :  { %13906 = vmatpush3.xpose.msk.msra.mxu0 %vm467_vm3, %v16224_v50  ;;  %13907 = vmatprep.mubr.msk.f32.mxu0 %vm14832_vm0, %v14831_v0 }
 0xda7   :  { %v6557_v42 = vpop.permute.xlu0 %6556  ;;  %13915 = vmatprep.subr.mxu0 %v14831_v0  ;;  %v16315_v55 = vpop.permute.xlu1 %8122 }
 0xda8   :  { %13913 = vmatmul.mubr.msk.f32.vlgmr.msra.gmra.mrb[106].mxu1 %vm467_vm3, %v6557_v42 }
 0xda9   :  { %13908 = vmatmul.mubr.msk.f32.vlgmr.msra.gmra.mrb[92].mxu0 %vm467_vm3, %v6555_v14  ;;  %13922 = vmatprep.mubr.msk.f32.mxu1 %vm14832_vm0, %v14831_v0 }
 0xdaa   :  { %13916 = vmatpush3.xpose.msk.msra.mxu0 %vm467_vm3, %v16247_v45  ;;  %13917 = vmatprep.mubr.msk.f32.mxu0 %vm14832_vm0, %v14831_v0 }
 0xdab   :  { %v16295_v37 = vpop.permute.xlu0 %6590  ;;  %13925 = vmatprep.subr.mxu0 %v14831_v0  ;;  %v16317_v5 = vpop.permute.xlu1 %8274 }
 0xdac   :  { %13921 = vmatpush3.xpose.msk.msra.mxu1 %vm467_vm3, %v16295_v37 }
 0xdad   :  { %13918 = vmatmul.mubr.msk.f32.vlgmr.msra.gmra.mrb[94].mxu0 %vm467_vm3, %v6559_v44  ;;  %13930 = vmatprep.subr.mxu1 %v14831_v0 }
 0xdae   :  { %13926 = vmatpush3.xpose.msk.msra.mxu0 %vm467_vm3, %v16276_v18  ;;  %13927 = vmatprep.mubr.msk.f32.mxu0 %vm14832_vm0, %v14831_v0 }
 0xdaf   :  { %v6561_v7 = vpop.permute.xlu0 %6560  ;;  %13935 = vmatprep.subr.mxu0 %v14831_v0 }
 0xdb0   :  { %13923 = vmatmul.mubr.msk.f32.vlgmr.msra.gmra.mrb[108].mxu1 %vm467_vm3, %v6561_v7 }
 0xdb1   :  { %13931 = vmatpush3.msra.mxu1 %v7971_v3  ;;  %13928 = vmatmul.mubr.msk.f32.vlgmr.msra.gmra.mrb[96].mxu0 %vm467_vm3, %v6563_v51 }
 0xdb2   :  { %13937 = vmatprep.mubr.msk.f32.mxu0 %vm14832_vm0, %v14831_v0  ;;  %13932 = vmatprep.mubr.msk.f32.mxu1 %vm14832_vm0, %v14831_v0 }
 0xdb3   :  { %v8047_v62 = vpop.permute.xlu0 %8046  ;;  %13940 = vmatprep.subr.mxu1 %v14831_v0 }
 0xdb4   :  { %13936 = vmatpush3.msra.mxu0 %v8047_v62 }
 0xdb5   :  { %13945 = vmatprep.subr.mxu0 %v14831_v0 }
 0xdb7   :  { %v16320_v29 = vpop.permute.xlu0 %8198 }
 0xdea   :  { %v7799_v52 = vpop.xlane.xlu1 %7798 }
 0xdeb   :  { %v7843_v61 = vsub.f32 %v16192_v4, %v7799_v52 }
 0xded   :  { %v7860_v39 = vmul.f32 1.442695, %v7843_v61 }
 0xdef   :  { %14647 = vpow2.f32 %v7860_v39 }
 0xdf1   :  { %v16322_v25 = vpop.xlane.xlu0 %7795 }
 0xdf5   :  { %v16324_v20 = vpop.xlane.xlu0 %7801 }
 0xdf9   :  { %v16326_v30 = vpop.eup %14647  ;;  %v7805_v57 = vpop.xlane.xlu0 %7804 }
 0xdfa   :  { %v7845_v15 = vsub.f32 %v16206_v32, %v7805_v57  ;;  %v7893_v47 = vsel %vm467_vm3, %v16326_v30, 0.0 }
 0xdfb   :  { %7894 = vadd.xlane.f32.xlu0 %v7893_v47 }
 0xdfc   :  { %v7864_v11 = vmul.f32 1.442695, %v7845_v15 }
 0xdfe   :  { %14649 = vpow2.f32 %v7864_v11 }
 0xe08   :  { %v16331_v4 = vpop.eup %14649 }
 0xe09   :  { %v7899_v22 = vsel %vm467_vm3, %v16331_v4, 0.0 }
 0xe0a   :  { %7900 = vadd.xlane.f32.xlu0 %v7899_v22 }
 0xe67   :  { %v7108_v43 = vpop.f32.mrb[100].mxu1 }
 0xe68   :  { %v16335_v54 = vmul.f32 0.35355338, %v7108_v43  ;;  %v16337_v13 = vpop.f32.mrb[84].mxu0  ;;  %v13884_v63 = vpop.f32.mrb[101].mxu1 }
 0xe69   :  { %v13848_v41 = vpop.f32.mrb[85].mxu0 }
 0xe6a   :  { %v16339_v32 = vpop.f32.mrb[86].mxu0  ;;  %v7812_v58 = vsel %vm467_vm3, %v16335_v54, -inf }
 0xe6b   :  { %v13849_v46 = vpop.f32.mrb[87].mxu0  ;;  %7813 = vmax.xlane.f32.xlu1 %v7812_v58  ;;  %v7256_v8 = vpop.f32.mrb[102].mxu1 }
 0xe6c   :  { %v16343_v36 = vmul.f32 0.35355338, %v7256_v8  ;;  %v13894_v31 = vpop.f32.mrb[103].mxu1 }
 0xe6e   :  { %v7818_v23 = vsel %vm467_vm3, %v16343_v36, -inf }
 0xe6f   :  { %7819 = vmax.xlane.f32.xlu1 %v7818_v23 }
 0xe70   :  { %v7034_v49 = vpop.f32.mrb[82].mxu0 }
 0xe71   :  { %v16347_v26 = vmul.f32 0.35355338, %v7034_v49  ;;  %v13879_v48 = vpop.f32.mrb[83].mxu0 }
 0xe73   :  { %v7404_v14 = vpop.f32.mrb[104].mxu1  ;;  %v7809_v59 = vsel %vm467_vm3, %v16347_v26, -inf }
 0xe74   :  { %v16351_v17 = vmul.f32 0.35355338, %v7404_v14  ;;  %v7182_v53 = vpop.f32.mrb[88].mxu0  ;;  %7810 = vmax.xlane.f32.xlu0 %v7809_v59  ;;  %v13904_v6 = vpop.f32.mrb[105].mxu1 }
 0xe75   :  { %v16353_v44 = vmul.f32 0.35355338, %v7182_v53  ;;  %v13889_v21 = vpop.f32.mrb[89].mxu0 }
 0xe76   :  { %v7824_v42 = vsel %vm467_vm3, %v16351_v17, -inf }
 0xe77   :  { %7825 = vmax.xlane.f32.xlu1 %v7824_v42  ;;  %v7815_v51 = vsel %vm467_vm3, %v16353_v44, -inf }
 0xe78   :  { %v7330_v7 = vpop.f32.mrb[90].mxu0  ;;  %7816 = vmax.xlane.f32.xlu0 %v7815_v51 }
 0xe79   :  { %v16359_v3 = vmul.f32 0.35355338, %v7330_v7  ;;  %v13899_v62 = vpop.f32.mrb[91].mxu0 }
 0xe7b   :  { %v7552_v52 = vpop.f32.mrb[106].mxu1  ;;  %v7821_v61 = vsel %vm467_vm3, %v16359_v3, -inf }
 0xe7c   :  { %v16363_v39 = vmul.f32 0.35355338, %v7552_v52  ;;  %v7478_v57 = vpop.f32.mrb[92].mxu0  ;;  %7822 = vmax.xlane.f32.xlu0 %v7821_v61  ;;  %v13914_v15 = vpop.f32.mrb[107].mxu1 }
 0xe7d   :  { %v16365_v47 = vmul.f32 0.35355338, %v7478_v57  ;;  %v13909_v11 = vpop.f32.mrb[93].mxu0 }
 0xe7e   :  { %v7830_v22 = vsel %vm467_vm3, %v16363_v39, -inf }
 0xe7f   :  { %7831 = vmax.xlane.f32.xlu1 %v7830_v22  ;;  %v7827_v43 = vsel %vm467_vm3, %v16365_v47, -inf }
 0xe80   :  { %v7626_v63 = vpop.f32.mrb[94].mxu0  ;;  %7828 = vmax.xlane.f32.xlu0 %v7827_v43 }
 0xe81   :  { %v16371_v41 = vmul.f32 0.35355338, %v7626_v63  ;;  %v13919_v58 = vpop.f32.mrb[95].mxu0 }
 0xe83   :  { %v7700_v46 = vpop.f32.mrb[108].mxu1  ;;  %v7833_v8 = vsel %vm467_vm3, %v16371_v41, -inf }
 0xe84   :  { %v16375_v31 = vmul.f32 0.35355338, %v7700_v46  ;;  %v7774_v23 = vpop.f32.mrb[96].mxu0  ;;  %7834 = vmax.xlane.f32.xlu0 %v7833_v8  ;;  %v13924_v49 = vpop.f32.mrb[109].mxu1 }
 0xe85   :  { %v16377_v48 = vmul.f32 0.35355338, %v7774_v23  ;;  %v13929_v14 = vpop.f32.mrb[97].mxu0 }
 0xe86   :  { %v7836_v59 = vsel %vm467_vm3, %v16375_v31, -inf }
 0xe87   :  { %7837 = vmax.xlane.f32.xlu1 %v7836_v59  ;;  %v7839_v53 = vsel %vm467_vm3, %v16377_v48, -inf }
 0xe88   :  { %7840 = vmax.xlane.f32.xlu0 %v7839_v53  ;;  %v7895_v6 = vpop.xlane.xlu0 %7894 }
 0xe89   :  { %14651 = vrcp.f32 %v7895_v6 }
 0xe93   :  { %v14652_v21 = vpop.eup %14651 }
 0xe94   :  { %v7941_v42 = vmul.f32 %v14652_v21, %v16326_v30 }
 0xe96   :  { %13938 = vmatmul.mubr.msk.f32.vlgmr.msra.gmra.mrb[98].mxu0 %vm467_vm3, %v7941_v42 }
 0xe97   :  { %13946 = vmatpush3.msra.mxu0 %v16320_v29  ;;  %v7901_v51 = vpop.xlane.xlu0 %7900  ;;  %13947 = vmatprep.mubr.msk.f32.mxu0 %vm14832_vm0, %v14831_v0  ;;  %v7842_v29 = vsub.f32 %v16198_v33, %v16322_v25 }
 0xe98   :  { %14653 = vrcp.f32 %v7901_v51  ;;  %8350 = vrot.lane.b32.xlu1 %v16212_v27, %s14833_s29  ;;  %13955 = vmatprep.subr.mxu0 %v14831_v0 }
 0xe99   :  { %v7858_v27 = vmul.f32 1.442695, %v7842_v29 }
 0xe9b   :  { %14655 = vpow2.f32 %v7858_v27 }
 0xe9e   :  { %8426 = vrot.lane.b32.xlu0 %v16121_v38, %s14833_s29  ;;  %v7844_v38 = vsub.f32 %v16202_v40, %v16324_v20 }
 0xea0   :  { %v7862_v62 = vmul.f32 1.442695, %v7844_v38 }
 0xea2   :  { %v14654_v7 = vpop.eup %14653  ;;  %8578 = vrot.lane.b32.xlu0 %v15607_v2, %s14833_s29  ;;  %v7808_v2 = vpop.xlane.xlu1 %7807  ;;  %14657 = vpow2.f32 %v7862_v62 }
 0xea3   :  { %v7945_v30 = vmul.f32 %v14654_v7, %v16331_v4  ;;  %v7846_v4 = vsub.f32 %v16194_v10, %v7808_v2 }
 0xea5   :  { %13948 = vmatmul.mubr.msk.f32.vlgmr.msra.gmra.mrb[100].mxu0 %vm467_vm3, %v7945_v30  ;;  %v7866_v52 = vmul.f32 1.442695, %v7846_v4  ;;  %v16408_v33 = vpop.eup %14655 }
 0xea6   :  { %8730 = vrot.lane.b32.xlu0 %v16254_v56, %s14833_s29  ;;  %13957 = vmatprep.mubr.msk.f32.mxu0 %vm14832_vm0, %v14831_v0  ;;  %v7890_v56 = vsel %vm467_vm3, %v16408_v33, 0.0 }
 0xea7   :  { %14659 = vpow2.f32 %v7866_v52 }
 0xeaa   :  { %8882 = vrot.lane.b32.xlu0 %v16273_v34, %s14833_s29 }
 0xeac   :  { %v16412_v25 = vpop.eup %14657 }
 0xead   :  { %v7896_v40 = vsel %vm467_vm3, %v16412_v25, 0.0 }
 0xeb1   :  { %v16416_v34 = vpop.eup %14659 }
 0xeb2   :  { %v7902_v10 = vsel %vm467_vm3, %v16416_v34, 0.0 }
 0xebc   :  { %7891 = vadd.xlane.f32.xlu1 %v7890_v56 }
 0xec0   :  { %7897 = vadd.xlane.f32.xlu1 %v7896_v40 }
 0xec4   :  { %7903 = vadd.xlane.f32.xlu1 %v7902_v10 }
 0xef8   :  { %v7814_v20 = vpop.xlane.xlu1 %7813 }
 0xef9   :  { %v7848_v61 = vsub.f32 %v16335_v54, %v7814_v20 }
 0xefb   :  { %v7870_v57 = vmul.f32 1.442695, %v7848_v61 }
 0xefc   :  { %v7820_v15 = vpop.xlane.xlu1 %7819 }
 0xefd   :  { %14661 = vpow2.f32 %v7870_v57  ;;  %v7850_v11 = vsub.f32 %v16343_v36, %v7820_v15 }
 0xeff   :  { %v7874_v22 = vmul.f32 1.442695, %v7850_v11 }
 0xf01   :  { %14663 = vpow2.f32 %v7874_v22  ;;  %v7811_v43 = vpop.xlane.xlu0 %7810 }
 0xf02   :  { %v7847_v63 = vsub.f32 %v16347_v26, %v7811_v43 }
 0xf04   :  { %v7868_v58 = vmul.f32 1.442695, %v7847_v63  ;;  %v7826_v46 = vpop.xlane.xlu1 %7825 }
 0xf05   :  { %v7852_v8 = vsub.f32 %v16351_v17, %v7826_v46  ;;  %v7817_v23 = vpop.xlane.xlu0 %7816 }
 0xf06   :  { %14665 = vpow2.f32 %v7868_v58  ;;  %v7849_v49 = vsub.f32 %v16353_v44, %v7817_v23 }
 0xf07   :  { %v16425_v14 = vpop.eup %14661  ;;  %v7878_v54 = vmul.f32 1.442695, %v7852_v8 }
 0xf08   :  { %v7872_v59 = vmul.f32 1.442695, %v7849_v49  ;;  %v7908_v36 = vsel %vm467_vm3, %v16425_v14, 0.0 }
 0xf09   :  { %14667 = vpow2.f32 %v7878_v54  ;;  %v7823_v53 = vpop.xlane.xlu0 %7822  ;;  %7909 = vadd.xlane.f32.xlu1 %v7908_v36  ;;  %v14803_v54 = vld [vmem:[%s17294_s9 + $0x4] ss:$0 sm:$0xff] }
 0xf0a   :  { %14669 = vpow2.f32 %v7872_v59  ;;  %v7851_v26 = vsub.f32 %v16359_v3, %v7823_v53  ;;  %v14457_v59 = vld [vmem:[#allocation2 + $0x6c] ss:$40 sps:$4 sm:$0xff]  }
 0xf0b   :  { %v16430_v6 = vpop.eup %14663 }
 0xf0c   :  { %v7876_v17 = vmul.f32 1.442695, %v7851_v26  ;;  %v7832_v21 = vpop.xlane.xlu1 %7831  ;;  %v7914_v44 = vsel %vm467_vm3, %v16430_v6, 0.0 }
 0xf0d   :  { %v7854_v42 = vsub.f32 %v16363_v39, %v7832_v21  ;;  %v7829_v51 = vpop.xlane.xlu0 %7828  ;;  %7915 = vadd.xlane.f32.xlu1 %v7914_v44 }
 0xf0e   :  { %14671 = vpow2.f32 %v7876_v17  ;;  %v7853_v7 = vsub.f32 %v16365_v47, %v7829_v51 }
 0xf0f   :  { %v7882_v30 = vmul.f32 1.442695, %v7854_v42 }
 0xf10   :  { %v16436_v29 = vpop.eup %14665  ;;  %v7880_v27 = vmul.f32 1.442695, %v7853_v7 }
 0xf11   :  { %14673 = vpow2.f32 %v7882_v30  ;;  %v7835_v3 = vpop.xlane.xlu0 %7834  ;;  %v7905_v38 = vsel %vm467_vm3, %v16436_v29, 0.0 }
 0xf12   :  { %14675 = vpow2.f32 %v7880_v27  ;;  %v7855_v2 = vsub.f32 %v16371_v41, %v7835_v3  ;;  %7906 = vadd.xlane.f32.xlu0 %v7905_v38 }
 0xf13   :  { %v16441_v4 = vpop.eup %14667 }
 0xf14   :  { %v16443_v39 = vpop.eup %14669  ;;  %v7884_v62 = vmul.f32 1.442695, %v7855_v2  ;;  %v7838_v52 = vpop.xlane.xlu1 %7837  ;;  %v7920_v47 = vsel %vm467_vm3, %v16441_v4, 0.0 }
 0xf15   :  { %v7856_v56 = vsub.f32 %v16375_v31, %v7838_v52  ;;  %v7841_v40 = vpop.xlane.xlu0 %7840  ;;  %7921 = vadd.xlane.f32.xlu1 %v7920_v47  ;;  %v7911_v10 = vsel %vm467_vm3, %v16443_v39, 0.0 }
 0xf16   :  { %14677 = vpow2.f32 %v7884_v62  ;;  %v7857_v41 = vsub.f32 %v16377_v48, %v7841_v40  ;;  %7912 = vadd.xlane.f32.xlu0 %v7911_v10 }
 0xf17   :  { %v7886_v20 = vmul.f32 1.442695, %v7856_v56 }
 0xf18   :  { %v16451_v61 = vpop.eup %14671  ;;  %v7888_v57 = vmul.f32 1.442695, %v7857_v41  ;;  %v8351_v15 = vpop.permute.xlu1 %8350 }
 0xf19   :  { %14679 = vpow2.f32 %v7886_v20  ;;  %13956 = vmatpush3.msra.mxu0 %v8351_v15  ;;  %v7917_v11 = vsel %vm467_vm3, %v16451_v61, 0.0 }
 0xf1a   :  { %14681 = vpow2.f32 %v7888_v57  ;;  %7918 = vadd.xlane.f32.xlu0 %v7917_v11  ;;  %13965 = vmatprep.subr.mxu0 %v14831_v0 }
 0xf1b   :  { %v16456_v31 = vpop.eup %14673 }
 0xf1c   :  { %v16458_v22 = vpop.eup %14675  ;;  %v7926_v48 = vsel %vm467_vm3, %v16456_v31, 0.0 }
 0xf1d   :  { %7927 = vadd.xlane.f32.xlu1 %v7926_v48  ;;  %v7923_v43 = vsel %vm467_vm3, %v16458_v22, 0.0 }
 0xf1e   :  { %7924 = vadd.xlane.f32.xlu0 %v7923_v43 }
 0xf20   :  { %v16464_v63 = vpop.eup %14677 }
 0xf21   :  { %v7929_v58 = vsel %vm467_vm3, %v16464_v63, 0.0 }
 0xf22   :  { %7930 = vadd.xlane.f32.xlu0 %v7929_v58 }
 0xf23   :  { %v16468_v46 = vpop.eup %14679 }
 0xf24   :  { %v16470_v8 = vpop.eup %14681  ;;  %v7932_v23 = vsel %vm467_vm3, %v16468_v46, 0.0 }
 0xf25   :  { %7933 = vadd.xlane.f32.xlu1 %v7932_v23  ;;  %v7935_v49 = vsel %vm467_vm3, %v16470_v8, 0.0 }
 0xf26   :  { %7936 = vadd.xlane.f32.xlu0 %v7935_v49 }
 0xf36   :  { %8502 = vrot.lane.b32.xlu1 %v16214_v24, %s14833_s29  ;;  %v16493_v24 = vadd.f32 %v15591_v1, %v15593_v9 }
 0xf3a   :  { %8654 = vrot.lane.b32.xlu1 %v16242_v28, %s14833_s29 }
 0xf3c   :  { %9034 = vrot.lane.b32.xlu0 %v16295_v37, %s14833_s29  ;;  %v14459_v37 = vld [vmem:[#allocation2 + $0xbc] ss:$40 sps:$4 sm:$0xff]  }
 0xf3e   :  { %8806 = vrot.lane.b32.xlu1 %v16224_v50, %s14833_s29  ;;  %v14458_v50 = vld [vmem:[#allocation2 + $0x1c] ss:$40 sps:$4 sm:$0xff]  }
 0xf40   :  { %3681 = vrot.lane.b32.xlu0 %v14803_v54, %s14833_s29 }
 0xf42   :  { %8958 = vrot.lane.b32.xlu1 %v16247_v45, %s14833_s29 }
 0xf44   :  { %9293 = vrot.lane.b32.xlu0 %v14457_v59, %s14833_s29 }
 0xf46   :  { %9110 = vrot.lane.b32.xlu1 %v16276_v18, %s14833_s29 }
 0xf48   :  { %9381 = vrot.lane.b32.xlu0 %v16493_v24, %s14835_s26 }
 0xf49   :  { %v7892_v28 = vpop.xlane.xlu1 %7891 }
 0xf4a   :  { %14683 = vrcp.f32 %v7892_v28  ;;  %9291 = vrot.lane.b32.xlu1 %v14458_v50, %s14833_s29 }
 0xf4d   :  { %v7898_v36 = vpop.xlane.xlu1 %7897 }
 0xf4e   :  { %14685 = vrcp.f32 %v7898_v36  ;;  %9295 = vrot.lane.b32.xlu1 %v14459_v37, %s14833_s29  ;;  %v14460_v37 = vld [vmem:[#allocation2 + $0x10c] ss:$40 sps:$4 sm:$0xff]  }
 0xf51   :  { %v7904_v45 = vpop.xlane.xlu1 %7903 }
 0xf52   :  { %14687 = vrcp.f32 %v7904_v45  ;;  %9383 = vrot.lane.b32.xlu1 %v16493_v24, %s14834_s25 }
 0xf54   :  { %v14684_v1 = vpop.eup %14683 }
 0xf55   :  { %v7939_v9 = vmul.f32 %v14684_v1, %v16408_v33 }
 0xf57   :  { %13933 = vmatmul.mubr.msk.f32.vlgmr.msra.gmra.mrb[110].mxu1 %vm467_vm3, %v7939_v9 }
 0xf58   :  { %v14686_v18 = vpop.eup %14685  ;;  %13941 = vmatpush3.msra.mxu1 %v16315_v55  ;;  %13942 = vmatprep.mubr.msk.f32.mxu1 %vm14832_vm0, %v14831_v0  ;;  %v8427_v55 = vpop.permute.xlu0 %8426 }
 0xf59   :  { %13950 = vmatprep.subr.mxu1 %v14831_v0  ;;  %v7943_v53 = vmul.f32 %v14686_v18, %v16412_v25 }
 0xf5b   :  { %13943 = vmatmul.mubr.msk.f32.vlgmr.msra.gmra.mrb[112].mxu1 %vm467_vm3, %v7943_v53 }
 0xf5c   :  { %v14688_v26 = vpop.eup %14687  ;;  %13951 = vmatpush3.msra.mxu1 %v16317_v5  ;;  %13952 = vmatprep.mubr.msk.f32.mxu1 %vm14832_vm0, %v14831_v0  ;;  %v8579_v44 = vpop.permute.xlu0 %8578 }
 0xf5d   :  { %13960 = vmatprep.subr.mxu1 %v14831_v0  ;;  %v7947_v33 = vmul.f32 %v14688_v26, %v16416_v34 }
 0xf5f   :  { %13953 = vmatmul.mubr.msk.f32.vlgmr.msra.gmra.mrb[114].mxu1 %vm467_vm3, %v7947_v33 }
 0xf60   :  { %13961 = vmatpush3.msra.mxu1 %v8427_v55  ;;  %13962 = vmatprep.mubr.msk.f32.mxu1 %vm14832_vm0, %v14831_v0  ;;  %v8731_v42 = vpop.permute.xlu0 %8730 }
 0xf61   :  { %13970 = vmatprep.subr.mxu1 %v14831_v0 }
 0xf64   :  { %v8883_v7 = vpop.permute.xlu0 %8882 }
 0xf69   :  { %v16520_v25 = vpop.f32.mrb[98].mxu0 }
 0xf6a   :  { %v13939_v17 = vpop.f32.mrb[99].mxu0 }
 0xf78   :  { %v16522_v5 = vpop.f32.mrb[100].mxu0 }
 0xf79   :  { %v13949_v21 = vpop.f32.mrb[101].mxu0 }
 0xf96   :  { %v7910_v51 = vpop.xlane.xlu1 %7909 }
 0xf97   :  { %14689 = vrcp.f32 %v7910_v51 }
 0xf9a   :  { %v7916_v34 = vpop.xlane.xlu1 %7915 }
 0xf9b   :  { %14691 = vrcp.f32 %v7916_v34 }
 0xf9f   :  { %v7907_v30 = vpop.xlane.xlu0 %7906 }
 0xfa0   :  { %14693 = vrcp.f32 %v7907_v30 }
 0xfa1   :  { %v14690_v27 = vpop.eup %14689 }
 0xfa2   :  { %v7922_v3 = vpop.xlane.xlu1 %7921  ;;  %v7951_v38 = vmul.f32 %v14690_v27, %v16425_v14 }
 0xfa3   :  { %14695 = vrcp.f32 %v7922_v3  ;;  %v7913_v2 = vpop.xlane.xlu0 %7912 }
 0xfa4   :  { %13963 = vmatmul.mubr.msk.f32.vlgmr.msra.gmra.mrb[116].mxu1 %vm467_vm3, %v7951_v38  ;;  %14697 = vrcp.f32 %v7913_v2 }
 0xfa5   :  { %v14692_v62 = vpop.eup %14691  ;;  %13971 = vmatpush3.msra.mxu1 %v8579_v44  ;;  %13972 = vmatprep.mubr.msk.f32.mxu1 %vm14832_vm0, %v14831_v0 }
 0xfa6   :  { %13980 = vmatprep.subr.mxu1 %v14831_v0  ;;  %v7955_v52 = vmul.f32 %v14692_v62, %v16430_v6 }
 0xfa7   :  { %v7919_v47 = vpop.xlane.xlu0 %7918 }
 0xfa8   :  { %13973 = vmatmul.mubr.msk.f32.vlgmr.msra.gmra.mrb[118].mxu1 %vm467_vm3, %v7955_v52 }
 0xfa9   :  { %13981 = vmatpush3.msra.mxu1 %v8731_v42  ;;  %13982 = vmatprep.mubr.msk.f32.mxu1 %vm14832_vm0, %v14831_v0 }
 0xfaa   :  { %v14694_v14 = vpop.eup %14693  ;;  %v7928_v56 = vpop.xlane.xlu1 %7927  ;;  %13990 = vmatprep.subr.mxu1 %v14831_v0 }
 0xfab   :  { %14699 = vrcp.f32 %v7928_v56  ;;  %v7925_v40 = vpop.xlane.xlu0 %7924  ;;  %v7949_v10 = vmul.f32 %v14694_v14, %v16436_v29 }
 0xfac   :  { %14701 = vrcp.f32 %v7919_v47 }
 0xfad   :  { %v14696_v41 = vpop.eup %14695  ;;  %13958 = vmatmul.mubr.msk.f32.vlgmr.msra.gmra.mrb[102].mxu0 %vm467_vm3, %v7949_v10  ;;  %14703 = vrcp.f32 %v7925_v40 }
 0xfae   :  { %v7959_v6 = vmul.f32 %v14696_v41, %v16441_v4  ;;  %13967 = vmatprep.mubr.msk.f32.mxu0 %vm14832_vm0, %v14831_v0  ;;  %v14698_v29 = vpop.eup %14697 }
 0xfaf   :  { %v7931_v20 = vpop.xlane.xlu0 %7930  ;;  %v7953_v48 = vmul.f32 %v14698_v29, %v16443_v39 }
 0xfb0   :  { %13983 = vmatmul.mubr.msk.f32.vlgmr.msra.gmra.mrb[120].mxu1 %vm467_vm3, %v7959_v6 }
 0xfb1   :  { %13991 = vmatpush3.msra.mxu1 %v8883_v7  ;;  %13992 = vmatprep.mubr.msk.f32.mxu1 %vm14832_vm0, %v14831_v0 }
 0xfb2   :  { %v7934_v57 = vpop.xlane.xlu1 %7933  ;;  %14000 = vmatprep.subr.mxu1 %v14831_v0 }
 0xfb3   :  { %14705 = vrcp.f32 %v7934_v57  ;;  %v7937_v15 = vpop.xlane.xlu0 %7936 }
 0xfb4   :  { %14707 = vrcp.f32 %v7931_v20 }
 0xfb5   :  { %v14700_v11 = vpop.eup %14699  ;;  %14709 = vrcp.f32 %v7937_v15 }
 0xfb6   :  { %v8503_v4 = vpop.permute.xlu1 %8502  ;;  %v7963_v43 = vmul.f32 %v14700_v11, %v16456_v31  ;;  %v14702_v58 = vpop.eup %14701 }
 0xfb7   :  { %v9035_v23 = vpop.permute.xlu0 %9034  ;;  %13966 = vmatpush3.msra.mxu0 %v8503_v4  ;;  %v7957_v54 = vmul.f32 %v14702_v58, %v16451_v61  ;;  %v14704_v39 = vpop.eup %14703 }
 0xfb8   :  { %13968 = vmatmul.mubr.msk.f32.vlgmr.msra.gmra.mrb[104].mxu0 %vm467_vm3, %v7953_v48  ;;  %13993 = vmatmul.mubr.msk.f32.vlgmr.msra.gmra.mrb[122].mxu1 %vm467_vm3, %v7963_v43  ;;  %v7961_v28 = vmul.f32 %v14704_v39, %v16458_v22 }
 0xfb9   :  { %14001 = vmatpush3.msra.mxu1 %v9035_v23  ;;  %13975 = vmatprep.subr.mxu0 %v14831_v0 }
 0xfba   :  { %v8655_v49 = vpop.permute.xlu1 %8654  ;;  %13977 = vmatprep.mubr.msk.f32.mxu0 %vm14832_vm0, %v14831_v0  ;;  %14002 = vmatprep.mubr.msk.f32.mxu1 %vm14832_vm0, %v14831_v0 }
 0xfbb   :  { %v16553_v31 = vpop.permute.xlu0 %3681  ;;  %13976 = vmatpush3.msra.mxu0 %v8655_v49  ;;  %14010 = vmatprep.subr.bf16.mxu1 %v14831_v0 }
 0xfbc   :  { %v16558_v59 = vadd.f32 %v15635_v12, %v16553_v31  ;;  %13978 = vmatmul.mubr.msk.f32.vlgmr.msra.gmra.mrb[106].mxu0 %vm467_vm3, %v7957_v54  ;;  %13985 = vmatprep.subr.mxu0 %v14831_v0 }
 0xfbd   :  { %v14706_v50 = vpop.eup %14705  ;;  %13987 = vmatprep.mubr.msk.f32.mxu0 %vm14832_vm0, %v14831_v0 }
 0xfbe   :  { %9351 = vrot.lane.b32.xlu0 %v16558_v59, %s14835_s26  ;;  %9353 = vrot.lane.b32.xlu1 %v16558_v59, %s14834_s25  ;;  %v8807_v61 = vpop.permute.xlu1 %8806  ;;  %v7967_v12 = vmul.f32 %v14706_v50, %v16468_v46  ;;  %v14708_v36 = vpop.eup %14707 }
 0xfbf   :  { %13986 = vmatpush3.msra.mxu0 %v8807_v61  ;;  %v7965_v46 = vmul.f32 %v14708_v36, %v16464_v63  ;;  %v14710_v45 = vpop.eup %14709  ;;  %v9294_v18 = vpop.permute.xlu0 %9293 }
 0xfc0   :  { %13988 = vmatmul.mubr.msk.f32.vlgmr.msra.gmra.mrb[108].mxu0 %vm467_vm3, %v7961_v28  ;;  %14003 = vmatmul.mubr.msk.f32.vlgmr.msra.gmra.mrb[124].mxu1 %vm467_vm3, %v7967_v12  ;;  %v7969_v63 = vmul.f32 %v14710_v45, %v16470_v8 }
 0xfc1   :  { %13995 = vmatprep.subr.mxu0 %v14831_v0  ;;  %13997 = vmatprep.mubr.msk.f32.mxu0 %vm14832_vm0, %v14831_v0 }
 0xfc2   :  { %9297 = vrot.lane.b32.xlu0 %v14460_v37, %s14833_s29  ;;  %9355 = vrot.lane.b32.xlu1 %v16558_v59, %s14837_s27  ;;  %v8959_v22 = vpop.permute.xlu1 %8958 }
 0xfc3   :  { %13996 = vmatpush3.msra.mxu0 %v8959_v22  ;;  %14018 = vmatprep.mubr.msk.bf16.mxu1 %vm14832_vm0, %v14831_v0  ;;  %v16605_v8 = vpop.permute.xlu0 %9381 }
 0xfc4   :  { %13998 = vmatmul.mubr.msk.f32.vlgmr.msra.gmra.mrb[110].mxu0 %vm467_vm3, %v7965_v46  ;;  %14005 = vmatprep.subr.mxu0 %v14831_v0  ;;  %v16675_v46 = vadd.f32 %v15638_v35, %v16553_v31 }
 0xfc5   :  { %14007 = vmatprep.mubr.msk.f32.mxu0 %vm14832_vm0, %v14831_v0 }
 0xfc6   :  { %9385 = vrot.lane.b32.xlu0 %v16493_v24, %s14837_s27  ;;  %9389 = vrot.lane.b32.xlu1 %v16493_v24, %s14839_s6  ;;  %v9111_v1 = vpop.permute.xlu1 %9110 }
 0xfc7   :  { %14006 = vmatpush3.msra.mxu0 %v9111_v1 }
 0xfc8   :  { %14008 = vmatmul.mubr.msk.f32.vlgmr.msra.gmra.mrb[112].mxu0 %vm467_vm3, %v7969_v63  ;;  %14022 = vmatprep.subr.mxu0 %v14831_v0 }
 0xfc9   :  { %14024 = vmatprep.mubr.msk.f32.mxu0 %vm14832_vm0, %v14831_v0 }
 0xfca   :  { %9387 = vrot.lane.b32.xlu0 %v16493_v24, %s14836_s2  ;;  %9359 = vrot.lane.b32.xlu1 %v16558_v59, %s14839_s6  ;;  %v9292_v9 = vpop.permute.xlu1 %9291 }
 0xfcb   :  { %14011 = vmatpush3.bf16.msra.mxu1 %v9292_v9 }
 0xfcc   :  { %14012 = vmatprep.subr.bf16.mxu1 %v14831_v0 }
 0xfce   :  { %9357 = vrot.lane.b32.xlu0 %v16558_v59, %s14836_s2  ;;  %14023 = vmatpush3.xpose.msk.msra.mxu0 %vm467_vm3, %v16493_v24  ;;  %v9296_v53 = vpop.permute.xlu1 %9295 }
 0xfcf   :  { %14027 = vmatprep.subr.mxu0 %v14831_v0  ;;  %14013 = vmatpush3.bf16.msra.mxu1 %v9294_v18 }
 0xfd0   :  { %14014 = vmatprep.subr.bf16.mxu1 %v14831_v0 }
 0xfd1   :  { %14025 = vmatmul.mubr.msk.f32.vlgmr.msra.gmra.mrb[114].mxu0 %vm467_vm3, %v16558_v59 }
 0xfd2   :  { %9391 = vrot.lane.b32.xlu0 %v16493_v24, %s14838_s28  ;;  %14028 = vmatpush3.xpose.msk.msra.mxu0 %vm467_vm3, %v16605_v8  ;;  %v16619_v21 = vpop.permute.xlu1 %9383 }
 0xfd3   :  { %14029 = vmatprep.mubr.msk.f32.mxu0 %vm14832_vm0, %v14831_v0  ;;  %14032 = vmatprep.subr.mxu0 %v14831_v0 }
 0xfd4   :  { %14015 = vmatpush3.bf16.msra.mxu1 %v9296_v53 }
 0xfd5   :  { %14016 = vmatprep.subr.bf16.mxu1 %v14831_v0 }
0x102a   :  { %v16617_v26 = vpop.f32.mrb[110].mxu1 }
0x102b   :  { %v13934_v33 = vpop.f32.mrb[111].mxu1 }
0x102e   :  { %v8194_v55 = vpop.f32.mrb[112].mxu1 }
0x102f   :  { %v13944_v17 = vpop.f32.mrb[113].mxu1 }
0x1030   :  { %v9352_v44 = vpop.permute.xlu0 %9351  ;;  %v9354_v34 = vpop.permute.xlu1 %9353 }
0x1031   :  { %14030 = vmatmul.mubr.msk.f32.vlgmr.msra.gmra.mrb[116].mxu0 %vm467_vm3, %v9352_v44 }
0x1032   :  { %14033 = vmatpush3.xpose.msk.msra.mxu0 %vm467_vm3, %v16619_v21  ;;  %v8346_v42 = vpop.f32.mrb[114].mxu1  ;;  %14034 = vmatprep.mubr.msk.f32.mxu0 %vm14832_vm0, %v14831_v0 }
0x1033   :  { %v13954_v51 = vpop.f32.mrb[115].mxu1  ;;  %14037 = vmatprep.subr.mxu0 %v14831_v0 }
0x1034   :  { %v9298_v7 = vpop.permute.xlu0 %9297  ;;  %v9356_v27 = vpop.permute.xlu1 %9355 }
0x1035   :  { %14035 = vmatmul.mubr.msk.f32.vlgmr.msra.gmra.mrb[118].mxu0 %vm467_vm3, %v9354_v34  ;;  %14017 = vmatpush3.bf16.msra.mxu1 %v9298_v7 }
0x1036   :  { %14039 = vmatprep.mubr.msk.f32.mxu0 %vm14832_vm0, %v14831_v0  ;;  %14047 = vmatprep.subr.mxu1 %v14831_v0 }
0x1038   :  { %v16631_v30 = vpop.permute.xlu0 %9385 }
0x1039   :  { %14038 = vmatpush3.xpose.msk.msra.mxu0 %vm467_vm3, %v16631_v30 }
0x103a   :  { %14042 = vmatprep.subr.mxu0 %v14831_v0 }
0x103c   :  { %v16636_v3 = vpop.permute.xlu0 %9387  ;;  %14040 = vmatmul.mubr.msk.f32.vlgmr.msra.gmra.mrb[120].mxu0 %vm467_vm3, %v9356_v27 }
0x103d   :  { %14043 = vmatpush3.xpose.msk.msra.mxu0 %vm467_vm3, %v16636_v3  ;;  %14044 = vmatprep.mubr.msk.f32.mxu0 %vm14832_vm0, %v14831_v0 }
0x103e   :  { %14052 = vmatprep.subr.mxu0 %v14831_v0 }
0x1040   :  { %v9358_v38 = vpop.permute.xlu0 %9357 }
0x1041   :  { %14045 = vmatmul.mubr.msk.f32.vlgmr.msra.gmra.mrb[122].mxu0 %vm467_vm3, %v9358_v38 }
0x1042   :  { %14054 = vmatprep.mubr.msk.f32.mxu0 %vm14832_vm0, %v14831_v0 }
0x1044   :  { %v16647_v2 = vpop.permute.xlu0 %9391 }
0x1045   :  { %14053 = vmatpush3.xpose.msk.msra.mxu0 %vm467_vm3, %v16647_v2 }
0x1046   :  { %14062 = vmatprep.subr.mxu0 %v14831_v0 }
0x1077   :  { %v8498_v62 = vpop.f32.mrb[116].mxu1 }
0x1078   :  { %v13964_v52 = vpop.f32.mrb[117].mxu1 }
0x107b   :  { %v16652_v47 = vpop.f32.mrb[118].mxu1 }
0x107c   :  { %v13974_v14 = vpop.f32.mrb[119].mxu1 }
0x1080   :  { %v8422_v56 = vpop.f32.mrb[102].mxu0 }
0x1081   :  { %v13959_v40 = vpop.f32.mrb[103].mxu0 }
0x1083   :  { %v8802_v10 = vpop.f32.mrb[120].mxu1 }
0x1084   :  { %v14328_v41 = vpack.i.bf16 %v8802_v10, %v8194_v55  ;;  %v13984_v6 = vpop.f32.mrb[121].mxu1 }
0x1086   :  { %14329 = vrot.lane.b32.xlu0 %v14328_v41, %s14842_s11 }
0x108b   :  { %v8574_v20 = vpop.f32.mrb[104].mxu0  ;;  %v8954_v57 = vpop.f32.mrb[122].mxu1 }
0x108c   :  { %v14333_v29 = vpack.i.bf16 %v8954_v57, %v8346_v42  ;;  %v13969_v15 = vpop.f32.mrb[105].mxu0  ;;  %v13994_v11 = vpop.f32.mrb[123].mxu1 }
0x108e   :  { %14334 = vrot.lane.b32.xlu0 %v14333_v29, %s14844_s13 }
0x108f   :  { %v8726_v4 = vpop.f32.mrb[106].mxu0 }
0x1090   :  { %v14343_v48 = vpack.i.bf16 %v8726_v4, %v16520_v25  ;;  %v13979_v43 = vpop.f32.mrb[107].mxu0 }
0x1093   :  { %v8878_v58 = vpop.f32.mrb[108].mxu0  ;;  %v9106_v23 = vpop.f32.mrb[124].mxu1 }
0x1094   :  { %v14348_v49 = vpack.i.bf16 %v8878_v58, %v16522_v5  ;;  %v14338_v54 = vpack.i.bf16 %v9106_v23, %v8498_v62  ;;  %v13989_v39 = vpop.f32.mrb[109].mxu0  ;;  %v14004_v50 = vpop.f32.mrb[125].mxu1 }
0x1096   :  { %14339 = vrot.lane.b32.xlu1 %v14338_v54, %s14846_s16 }
0x1097   :  { %v9030_v61 = vpop.f32.mrb[110].mxu0 }
0x1098   :  { %v14353_v28 = vpack.i.bf16 %v9030_v61, %v8422_v56  ;;  %v13999_v12 = vpop.f32.mrb[111].mxu0 }
0x109a   :  { %14344 = vrot.lane.b32.xlu1 %v14343_v48, %s14841_s5 }
0x109b   :  { %v9182_v37 = vpop.f32.mrb[112].mxu0 }
0x109c   :  { %v14358_v36 = vpack.i.bf16 %v9182_v37, %v8574_v20  ;;  %v14009_v22 = vpop.f32.mrb[113].mxu0 }
0x109e   :  { %14359 = vrot.lane.b32.xlu0 %v14358_v36, %s14845_s4  ;;  %14349 = vrot.lane.b32.xlu1 %v14348_v49, %s14843_s12 }
0x10a2   :  { %9361 = vrot.lane.b32.xlu0 %v16558_v59, %s14838_s28  ;;  %14354 = vrot.lane.b32.xlu1 %v14353_v28, %s14830_s24 }
0x10a4   :  { %v9480_v25 = vpop.f32.mrb[114].mxu0 }
0x10a5   :  { %v14026_v5 = vpop.f32.mrb[115].mxu0  ;;  %v16711_v35 = vmul.f32 0.35355338, %v9480_v25 }
0x10a6   :  { %9396 = vrot.lane.b32.xlu0 %v15602_v16, %s14835_s26  ;;  %9393 = vrot.lane.b32.xlu1 %v16493_v24, %s14840_s30 }
0x10a7   :  { %v10610_v31 = vsel %vm467_vm3, %v16711_v35, -inf }
0x10aa   :  { %9398 = vrot.lane.b32.xlu0 %v15602_v16, %s14834_s25  ;;  %9363 = vrot.lane.b32.xlu1 %v16558_v59, %s14840_s30  ;;  %v16715_v59 = vpop.permute.xlu1 %9389 }
0x10ae   :  { %9368 = vrot.lane.b32.xlu0 %v16675_v46, %s14834_s25  ;;  %9366 = vrot.lane.b32.xlu1 %v16675_v46, %s14835_s26  ;;  %v16717_v45 = vpop.permute.xlu1 %9359 }
0x10b2   :  { %9402 = vrot.lane.b32.xlu0 %v15602_v16, %s14836_s2  ;;  %9400 = vrot.lane.b32.xlu1 %v15602_v16, %s14837_s27 }
0x10b6   :  { %9372 = vrot.lane.b32.xlu0 %v16675_v46, %s14836_s2  ;;  %9370 = vrot.lane.b32.xlu1 %v16675_v46, %s14837_s27 }
0x10ba   :  { %9406 = vrot.lane.b32.xlu0 %v15602_v16, %s14838_s28  ;;  %9404 = vrot.lane.b32.xlu1 %v15602_v16, %s14839_s6 }
0x10be   :  { %9376 = vrot.lane.b32.xlu0 %v16675_v46, %s14838_s28  ;;  %9374 = vrot.lane.b32.xlu1 %v16675_v46, %s14839_s6 }
0x10c2   :  { %10862 = vrot.lane.b32.xlu0 %v16605_v8, %s14833_s29  ;;  %9408 = vrot.lane.b32.xlu1 %v15602_v16, %s14840_s30 }
0x10c6   :  { %11014 = vrot.lane.b32.xlu0 %v16631_v30, %s14833_s29  ;;  %9378 = vrot.lane.b32.xlu1 %v16675_v46, %s14840_s30 }
0x10ca   :  { %10786 = vrot.lane.b32.xlu1 %v16493_v24, %s14833_s29 }
0x10ce   :  { %10938 = vrot.lane.b32.xlu1 %v16619_v21, %s14833_s29 }
0x10d2   :  { %11090 = vrot.lane.b32.xlu1 %v16636_v3, %s14833_s29 }
0x10e5   :  { %10611 = vmax.xlane.f32.xlu0 %v10610_v31 }
0x10f8   :  { %v14330_v9 = vpop.permute.xlu0 %14329 }
0x10f9   :  { %v14332_v62 = vunpack.i.h.bf16 %v14330_v9  ;;  %v14331_v52 = vunpack.i.l.bf16 %v14330_v9 }
0x1100   :  { %v14335_v21 = vpop.permute.xlu0 %14334 }
0x1101   :  { %v14337_v29 = vunpack.i.h.bf16 %v14335_v21  ;;  %v14336_v15 = vunpack.i.l.bf16 %v14335_v21 }
0x1104   :  { %v9554_v1 = vpop.f32.mrb[116].mxu0 }
0x1105   :  { %v16719_v63 = vmul.f32 0.35355338, %v9554_v1  ;;  %v14031_v24 = vpop.f32.mrb[117].mxu0 }
0x1107   :  { %v10613_v18 = vsel %vm467_vm3, %v16719_v63, -inf }
0x1108   :  { %v9628_v8 = vpop.f32.mrb[118].mxu0  ;;  %10614 = vmax.xlane.f32.xlu1 %v10613_v18  ;;  %v14340_v53 = vpop.permute.xlu1 %14339 }
0x1109   :  { %v16723_v33 = vmul.f32 0.35355338, %v9628_v8  ;;  %v14036_v55 = vpop.f32.mrb[119].mxu0  ;;  %v14342_v43 = vunpack.i.h.bf16 %v14340_v53  ;;  %v14341_v49 = vunpack.i.l.bf16 %v14340_v53 }
0x110b   :  { %v10616_v17 = vsel %vm467_vm3, %v16723_v33, -inf }
0x110c   :  { %10617 = vmax.xlane.f32.xlu0 %v10616_v17  ;;  %v14345_v44 = vpop.permute.xlu1 %14344 }
0x110d   :  { %v14347_v42 = vunpack.i.h.bf16 %v14345_v44  ;;  %v14346_v51 = vunpack.i.l.bf16 %v14345_v44 }
0x110f   :  { %v9702_v34 = vpop.f32.mrb[120].mxu0  ;;  %v9249_v7 = vsel %vm467_vm3, %v16652_v47, %v14347_v42  ;;  %v9214_v30 = vsel %vm467_vm3, %v16617_v26, %v14346_v51 }
0x1110   :  { %v16731_v27 = vmul.f32 0.35355338, %v9702_v34  ;;  %v14041_v3 = vpop.f32.mrb[121].mxu0  ;;  %v14360_v38 = vpop.permute.xlu0 %14359  ;;  %v9215_v41 = vsel %vm76_vm1, %v9214_v30, %v14331_v52  ;;  %v9250_v6 = vsel %vm76_vm1, %v9249_v7, %v14332_v62 }
0x1111   :  { %v14350_v14 = vpop.permute.xlu1 %14349  ;;  %v14362_v61 = vunpack.i.h.bf16 %v14360_v38  ;;  %v14361_v28 = vunpack.i.l.bf16 %v14360_v38 }
0x1112   :  { %v14352_v56 = vunpack.i.h.bf16 %v14350_v14  ;;  %v14351_v40 = vunpack.i.l.bf16 %v14350_v14  ;;  %v10619_v10 = vsel %vm467_vm3, %v16731_v27, -inf }
0x1113   :  { %10620 = vmax.xlane.f32.xlu0 %v10619_v10 }
0x1114   :  { %v9216_v47 = vsel %vm3090_vm4, %v9215_v41, %v14351_v40  ;;  %v9251_v26 = vsel %vm3090_vm4, %v9250_v6, %v14352_v56  ;;  %v9776_v20 = vpop.f32.mrb[122].mxu0  ;;  %v9362_v57 = vpop.permute.xlu0 %9361 }
0x1115   :  { %v16739_v11 = vmul.f32 0.35355338, %v9776_v20  ;;  %v14355_v4 = vpop.permute.xlu1 %14354  ;;  %v14046_v48 = vpop.f32.mrb[123].mxu0  ;;  %14055 = vmatmul.mubr.msk.f32.vlgmr.msra.gmra.mrb[124].mxu0 %vm467_vm3, %v9362_v57  ;;  %v9217_v54 = vsel %vm3092_vm5, %v9216_v47, %v14336_v15  ;;  %v9252_v39 = vsel %vm3092_vm5, %v9251_v26, %v14337_v29 }
0x1116   :  { %v14357_v58 = vunpack.i.h.bf16 %v14355_v4  ;;  %v14356_v23 = vunpack.i.l.bf16 %v14355_v4  ;;  %14063 = vmatpush3.xpose.msk.msra.mxu0 %vm467_vm3, %v15602_v16  ;;  %14064 = vmatprep.mubr.msk.f32.mxu0 %vm14832_vm0, %v14831_v0 }
0x1117   :  { %v10622_v50 = vsel %vm467_vm3, %v16739_v11, -inf  ;;  %14072 = vmatprep.subr.mxu0 %v14831_v0 }
0x1118   :  { %v9218_v12 = vsel %vm3094_vm6, %v9217_v54, %v14356_v23  ;;  %v9253_v37 = vsel %vm3094_vm6, %v9252_v39, %v14357_v58  ;;  %v16753_v36 = vpop.permute.xlu0 %9396  ;;  %10623 = vmax.xlane.f32.xlu1 %v10622_v50 }
0x1119   :  { %v9219_v22 = vsel %vm3096_vm7, %v9218_v12, %v14341_v49  ;;  %v9254_v25 = vsel %vm3096_vm7, %v9253_v37, %v14342_v43  ;;  %v16757_v5 = vpop.permute.xlu1 %9393  ;;  %14065 = vmatmul.mubr.msk.f32.vlgmr.msra.gmra.mrb[126].mxu0 %vm467_vm3, %v16675_v46 }
0x111a   :  { %v9220_v31 = vsel %vm3098_vm8, %v9219_v22, %v14361_v28  ;;  %v9255_v1 = vsel %vm3098_vm8, %v9254_v25, %v14362_v61  ;;  %14074 = vmatprep.mubr.msk.f32.mxu0 %vm14832_vm0, %v14831_v0 }
0x111b   :  { %v9256_v24 = vpack.c.bf16 %v9255_v1, %v9220_v31 }
0x111c   :  { %v16765_v9 = vpop.permute.xlu0 %9398 }
0x111d   :  { %v9364_v18 = vpop.permute.xlu1 %9363  ;;  %14019 = vmatmul.mubr.msk.bf16.vlgmr.msra.gmra.mrb[128].mxu1 %vm236_vm2, %v9256_v24  ;;  %14073 = vmatpush3.xpose.msk.msra.mxu0 %vm467_vm3, %v16765_v9 }
0x111e   :  { %14048 = vmatpush3.xpose.msk.msra.mxu1 %vm467_vm3, %v16715_v59  ;;  %14049 = vmatprep.mubr.msk.f32.mxu1 %vm14832_vm0, %v14831_v0 }
0x111f   :  { %14057 = vmatprep.subr.mxu1 %v14831_v0  ;;  %14082 = vmatprep.subr.mxu0 %v14831_v0 }
0x1120   :  { %v9369_v46 = vpop.permute.xlu0 %9368 }
0x1121   :  { %v9367_v8 = vpop.permute.xlu1 %9366  ;;  %14075 = vmatmul.mubr.msk.f32.vlgmr.msra.gmra.mrb[128].mxu0 %vm467_vm3, %v9369_v46 }
0x1122   :  { %14084 = vmatprep.mubr.msk.f32.mxu0 %vm14832_vm0, %v14831_v0 }
0x1124   :  { %v16779_v53 = vpop.permute.xlu0 %9402 }
0x1125   :  { %v16781_v55 = vpop.permute.xlu1 %9400  ;;  %14050 = vmatmul.mubr.msk.f32.vlgmr.msra.gmra.mrb[126].mxu1 %vm467_vm3, %v16717_v45  ;;  %14083 = vmatpush3.xpose.msk.msra.mxu0 %vm467_vm3, %v16779_v53 }
0x1126   :  { %14058 = vmatpush3.xpose.msk.msra.mxu1 %vm467_vm3, %v16757_v5  ;;  %14059 = vmatprep.mubr.msk.f32.mxu1 %vm14832_vm0, %v14831_v0 }
0x1127   :  { %14067 = vmatprep.subr.mxu1 %v14831_v0  ;;  %14092 = vmatprep.subr.mxu0 %v14831_v0 }
0x1128   :  { %v9373_v17 = vpop.permute.xlu0 %9372 }
0x1129   :  { %v9371_v21 = vpop.permute.xlu1 %9370  ;;  %14060 = vmatmul.mubr.msk.f32.vlgmr.msra.gmra.mrb[132].mxu1 %vm467_vm3, %v9364_v18  ;;  %14085 = vmatmul.mubr.msk.f32.vlgmr.msra.gmra.mrb[130].mxu0 %vm467_vm3, %v9373_v17 }
0x112a   :  { %14068 = vmatpush3.xpose.msk.msra.mxu1 %vm467_vm3, %v16753_v36  ;;  %14069 = vmatprep.mubr.msk.f32.mxu1 %vm14832_vm0, %v14831_v0 }
0x112b   :  { %14077 = vmatprep.subr.mxu1 %v14831_v0  ;;  %14094 = vmatprep.mubr.msk.f32.mxu0 %vm14832_vm0, %v14831_v0 }
0x112c   :  { %v16802_v45 = vpop.permute.xlu0 %9406 }
0x112d   :  { %v16804_v44 = vpop.permute.xlu1 %9404  ;;  %14070 = vmatmul.mubr.msk.f32.vlgmr.msra.gmra.mrb[134].mxu1 %vm467_vm3, %v9367_v8  ;;  %14093 = vmatpush3.xpose.msk.msra.mxu0 %vm467_vm3, %v16802_v45 }
0x112e   :  { %14078 = vmatpush3.xpose.msk.msra.mxu1 %vm467_vm3, %v16781_v55  ;;  %14079 = vmatprep.mubr.msk.f32.mxu1 %vm14832_vm0, %v14831_v0 }
0x112f   :  { %14087 = vmatprep.subr.mxu1 %v14831_v0  ;;  %14102 = vmatprep.subr.mxu0 %v14831_v0 }
0x1130   :  { %v9377_v42 = vpop.permute.xlu0 %9376 }
0x1131   :  { %v9375_v51 = vpop.permute.xlu1 %9374  ;;  %14080 = vmatmul.mubr.msk.f32.vlgmr.msra.gmra.mrb[136].mxu1 %vm467_vm3, %v9371_v21  ;;  %14095 = vmatmul.mubr.msk.f32.vlgmr.msra.gmra.mrb[132].mxu0 %vm467_vm3, %v9377_v42 }
0x1132   :  { %14088 = vmatpush3.xpose.msk.msra.mxu1 %vm467_vm3, %v16804_v44  ;;  %14089 = vmatprep.mubr.msk.f32.mxu1 %vm14832_vm0, %v14831_v0 }
0x1133   :  { %14097 = vmatprep.subr.mxu1 %v14831_v0  ;;  %14104 = vmatprep.mubr.msk.f32.mxu0 %vm14832_vm0, %v14831_v0 }
0x1134   :  { %v10863_v30 = vpop.permute.xlu0 %10862 }
0x1135   :  { %v16824_v34 = vpop.permute.xlu1 %9408  ;;  %14090 = vmatmul.mubr.msk.f32.vlgmr.msra.gmra.mrb[138].mxu1 %vm467_vm3, %v9375_v51 }
0x1136   :  { %14098 = vmatpush3.xpose.msk.msra.mxu1 %vm467_vm3, %v16824_v34  ;;  %14099 = vmatprep.mubr.msk.f32.mxu1 %vm14832_vm0, %v14831_v0 }
0x1137   :  { %14107 = vmatprep.subr.mxu1 %v14831_v0 }
0x1138   :  { %v16841_v52 = vpop.permute.xlu0 %11014 }
0x1139   :  { %v9379_v7 = vpop.permute.xlu1 %9378 }
0x113a   :  { %14100 = vmatmul.mubr.msk.f32.vlgmr.msra.gmra.mrb[140].mxu1 %vm467_vm3, %v9379_v7 }
0x113b   :  { %14108 = vmatpush3.msra.mxu1 %v10863_v30  ;;  %14109 = vmatprep.mubr.msk.f32.mxu1 %vm14832_vm0, %v14831_v0 }
0x113c   :  { %14117 = vmatprep.subr.mxu1 %v14831_v0 }
0x113d   :  { %v10787_v3 = vpop.permute.xlu1 %10786 }
0x113e   :  { %14103 = vmatpush3.msra.mxu0 %v10787_v3 }
0x113f   :  { %14112 = vmatprep.subr.mxu0 %v14831_v0 }
0x1141   :  { %v16837_v38 = vpop.permute.xlu1 %10938 }
0x1145   :  { %v16839_v62 = vpop.permute.xlu1 %11090 }
0x1172   :  { %v16844_v40 = vpop.xlane.xlu0 %10611 }
0x1195   :  { %v10615_v14 = vpop.xlane.xlu1 %10614 }
0x1196   :  { %v10659_v56 = vsub.f32 %v16719_v63, %v10615_v14 }
0x1198   :  { %v10676_v10 = vmul.f32 1.442695, %v10659_v56 }
0x1199   :  { %v16846_v41 = vpop.xlane.xlu0 %10617 }
0x119a   :  { %14711 = vpow2.f32 %v10676_v10 }
0x11a0   :  { %v10621_v6 = vpop.xlane.xlu0 %10620 }
0x11a1   :  { %v10661_v47 = vsub.f32 %v16731_v27, %v10621_v6 }
0x11a3   :  { %v10680_v26 = vmul.f32 1.442695, %v10661_v47 }
0x11a4   :  { %v16849_v20 = vpop.eup %14711 }
0x11a5   :  { %14713 = vpow2.f32 %v10680_v26  ;;  %v10709_v57 = vsel %vm467_vm3, %v16849_v20, 0.0 }
0x11a6   :  { %10710 = vadd.xlane.f32.xlu0 %v10709_v57 }
0x11af   :  { %v16853_v29 = vpop.eup %14713 }
0x11b0   :  { %v10715_v63 = vsel %vm467_vm3, %v16853_v29, 0.0 }
0x11b1   :  { %10716 = vadd.xlane.f32.xlu0 %v10715_v63 }
0x11e8   :  { %v9924_v15 = vpop.f32.mrb[124].mxu0 }
0x11e9   :  { %v16857_v4 = vmul.f32 0.35355338, %v9924_v15  ;;  %v14056_v48 = vpop.f32.mrb[125].mxu0 }
0x11eb   :  { %v10628_v27 = vsel %vm467_vm3, %v16857_v4, -inf }
0x11ec   :  { %v10072_v43 = vpop.f32.mrb[126].mxu0  ;;  %10629 = vmax.xlane.f32.xlu1 %v10628_v27 }
0x11ed   :  { %v16861_v58 = vmul.f32 0.35355338, %v10072_v43  ;;  %v14066_v23 = vpop.f32.mrb[127].mxu0 }
0x11ef   :  { %v10634_v49 = vsel %vm467_vm3, %v16861_v58, -inf }
0x11f0   :  { %v16865_v54 = vpop.f32.mrb[128].mxu1  ;;  %10635 = vmax.xlane.f32.xlu1 %v10634_v49 }
0x11f1   :  { %v14020_v39 = vpop.f32.mrb[129].mxu1 }
0x11f2   :  { %v16867_v50 = vpop.f32.mrb[130].mxu1 }
0x11f3   :  { %v14021_v61 = vpop.f32.mrb[131].mxu1 }
0x11f4   :  { %v10220_v28 = vpop.f32.mrb[128].mxu0 }
0x11f5   :  { %v16869_v12 = vmul.f32 0.35355338, %v10220_v28  ;;  %v14076_v37 = vpop.f32.mrb[129].mxu0 }
0x11f7   :  { %v10640_v22 = vsel %vm467_vm3, %v16869_v12, -inf }
0x11f8   :  { %v9850_v25 = vpop.f32.mrb[126].mxu1  ;;  %10641 = vmax.xlane.f32.xlu1 %v10640_v22  ;;  %v10658_v22 = vsub.f32 %v16711_v35, %v16844_v40 }
0x11f9   :  { %v16873_v31 = vmul.f32 0.35355338, %v9850_v25  ;;  %v14051_v1 = vpop.f32.mrb[127].mxu1 }
0x11fa   :  { %v10674_v25 = vmul.f32 1.442695, %v10658_v22  ;;  %v10660_v1 = vsub.f32 %v16723_v33, %v16846_v41 }
0x11fb   :  { %v10625_v24 = vsel %vm467_vm3, %v16873_v31, -inf }
0x11fc   :  { %10626 = vmax.xlane.f32.xlu0 %v10625_v24  ;;  %v9998_v18 = vpop.f32.mrb[132].mxu1  ;;  %v10368_v46 = vpop.f32.mrb[130].mxu0  ;;  %14715 = vpow2.f32 %v10674_v25 }
0x11fd   :  { %v16877_v8 = vmul.f32 0.35355338, %v9998_v18  ;;  %v14061_v17 = vpop.f32.mrb[133].mxu1  ;;  %v16879_v21 = vmul.f32 0.35355338, %v10368_v46  ;;  %v14086_v42 = vpop.f32.mrb[131].mxu0 }
0x11fe   :  { %v10624_v24 = vpop.xlane.xlu1 %10623  ;;  %v10678_v18 = vmul.f32 1.442695, %v10660_v1 }
0x11ff   :  { %v10631_v51 = vsel %vm467_vm3, %v16877_v8, -inf  ;;  %v10646_v7 = vsel %vm467_vm3, %v16879_v21, -inf  ;;  %v10662_v46 = vsub.f32 %v16739_v11, %v10624_v24 }
0x1200   :  { %10632 = vmax.xlane.f32.xlu0 %v10631_v51  ;;  %v10146_v30 = vpop.f32.mrb[134].mxu1  ;;  %10647 = vmax.xlane.f32.xlu1 %v10646_v7  ;;  %14717 = vpow2.f32 %v10678_v18 }
0x1201   :  { %v16885_v3 = vmul.f32 0.35355338, %v10146_v30  ;;  %v14071_v14 = vpop.f32.mrb[135].mxu1  ;;  %v10682_v35 = vmul.f32 1.442695, %v10662_v46 }
0x1203   :  { %v10637_v56 = vsel %vm467_vm3, %v16885_v3, -inf }
0x1204   :  { %10638 = vmax.xlane.f32.xlu0 %v10637_v56  ;;  %v10294_v10 = vpop.f32.mrb[136].mxu1  ;;  %v10516_v6 = vpop.f32.mrb[132].mxu0 }
0x1205   :  { %v16889_v47 = vmul.f32 0.35355338, %v10294_v10  ;;  %v14081_v26 = vpop.f32.mrb[137].mxu1  ;;  %v16891_v57 = vmul.f32 0.35355338, %v10516_v6  ;;  %v14096_v63 = vpop.f32.mrb[133].mxu0 }
0x1207   :  { %v10643_v15 = vsel %vm467_vm3, %v16889_v47, -inf  ;;  %v10652_v48 = vsel %vm467_vm3, %v16891_v57, -inf }
0x1208   :  { %10644 = vmax.xlane.f32.xlu0 %v10643_v15  ;;  %v10442_v27 = vpop.f32.mrb[138].mxu1  ;;  %10653 = vmax.xlane.f32.xlu1 %v10652_v48 }
0x1209   :  { %v16897_v43 = vmul.f32 0.35355338, %v10442_v27  ;;  %v14091_v23 = vpop.f32.mrb[139].mxu1 }
0x120b   :  { %v10649_v49 = vsel %vm467_vm3, %v16897_v43, -inf }
0x120c   :  { %10650 = vmax.xlane.f32.xlu0 %v10649_v49 }
0x120d   :  { %v10590_v39 = vpop.f32.mrb[140].mxu1 }
0x120e   :  { %v16901_v61 = vmul.f32 0.35355338, %v10590_v39  ;;  %v14101_v28 = vpop.f32.mrb[141].mxu1 }
0x1210   :  { %v10655_v37 = vsel %vm467_vm3, %v16901_v61, -inf }
0x1211   :  { %10656 = vmax.xlane.f32.xlu0 %v10655_v37 }
0x1219   :  { %11166 = vrot.lane.b32.xlu1 %v16715_v59, %s14833_s29  ;;  %v16920_v59 = vpop.eup %14715 }
0x121a   :  { %v16924_v33 = vpop.eup %14717 }
0x121b   :  { %v10712_v41 = vsel %vm467_vm3, %v16924_v33, 0.0 }
0x1227   :  { %11242 = vrot.lane.b32.xlu0 %v16647_v2, %s14833_s29 }
0x122b   :  { %11394 = vrot.lane.b32.xlu0 %v15602_v16, %s14833_s29  ;;  %v10706_v16 = vsel %vm467_vm3, %v16920_v59, 0.0 }
0x122f   :  { %11546 = vrot.lane.b32.xlu0 %v16765_v9, %s14833_s29 }
0x1233   :  { %11698 = vrot.lane.b32.xlu0 %v16779_v53, %s14833_s29  ;;  %v10711_v2 = vpop.xlane.xlu0 %10710 }
0x1234   :  { %14719 = vrcp.f32 %v10711_v2 }
0x1235   :  { %14721 = vpow2.f32 %v10682_v35 }
0x123d   :  { %10707 = vadd.xlane.f32.xlu1 %v10706_v16 }
0x123e   :  { %v14720_v11 = vpop.eup %14719  ;;  %v10717_v40 = vpop.xlane.xlu0 %10716 }
0x123f   :  { %v10757_v9 = vmul.f32 %v14720_v11, %v16849_v20  ;;  %14723 = vrcp.f32 %v10717_v40  ;;  %v16929_v53 = vpop.eup %14721 }
0x1240   :  { %v10718_v17 = vsel %vm467_vm3, %v16929_v53, 0.0 }
0x1241   :  { %10713 = vadd.xlane.f32.xlu1 %v10712_v41  ;;  %14110 = vmatmul.mubr.msk.f32.vlgmr.msra.gmra.mrb[142].mxu1 %vm467_vm3, %v10757_v9 }
0x1242   :  { %14118 = vmatpush3.msra.mxu1 %v16841_v52  ;;  %14119 = vmatprep.mubr.msk.f32.mxu1 %vm14832_vm0, %v14831_v0 }
0x1243   :  { %14127 = vmatprep.subr.mxu1 %v14831_v0 }
0x1245   :  { %10719 = vadd.xlane.f32.xlu1 %v10718_v17 }
0x1249   :  { %v14724_v20 = vpop.eup %14723 }
0x124a   :  { %v10761_v42 = vmul.f32 %v14724_v20, %v16853_v29 }
0x124c   :  { %14120 = vmatmul.mubr.msk.f32.vlgmr.msra.gmra.mrb[144].mxu1 %vm467_vm3, %v10761_v42 }
0x124d   :  { %14129 = vmatprep.mubr.msk.f32.mxu1 %vm14832_vm0, %v14831_v0 }
0x1279   :  { %v10630_v51 = vpop.xlane.xlu1 %10629 }
0x127a   :  { %v10664_v52 = vsub.f32 %v16857_v4, %v10630_v51 }
0x127c   :  { %v10686_v7 = vmul.f32 1.442695, %v10664_v52 }
0x127d   :  { %v10636_v30 = vpop.xlane.xlu1 %10635 }
0x127e   :  { %14725 = vpow2.f32 %v10686_v7  ;;  %v10666_v14 = vsub.f32 %v16861_v58, %v10636_v30 }
0x1280   :  { %v10690_v56 = vmul.f32 1.442695, %v10666_v14 }
0x1282   :  { %14727 = vpow2.f32 %v10690_v56 }
0x1285   :  { %v10642_v10 = vpop.xlane.xlu1 %10641 }
0x1286   :  { %v10668_v6 = vsub.f32 %v16869_v12, %v10642_v10 }
0x1288   :  { %v16945_v26 = vpop.eup %14725  ;;  %v10694_v29 = vmul.f32 1.442695, %v10668_v6 }
0x1289   :  { %v10627_v63 = vpop.xlane.xlu0 %10626  ;;  %v10724_v15 = vsel %vm467_vm3, %v16945_v26, 0.0 }
0x128a   :  { %14729 = vpow2.f32 %v10694_v29  ;;  %v10663_v4 = vsub.f32 %v16873_v31, %v10627_v63  ;;  %10725 = vadd.xlane.f32.xlu1 %v10724_v15 }
0x128c   :  { %v16950_v48 = vpop.eup %14727  ;;  %v10684_v27 = vmul.f32 1.442695, %v10663_v4 }
0x128d   :  { %v10633_v58 = vpop.xlane.xlu0 %10632  ;;  %v10648_v23 = vpop.xlane.xlu1 %10647  ;;  %v10730_v49 = vsel %vm467_vm3, %v16950_v48, 0.0 }
0x128e   :  { %14731 = vpow2.f32 %v10684_v27  ;;  %v10665_v12 = vsub.f32 %v16877_v8, %v10633_v58  ;;  %v10670_v39 = vsub.f32 %v16879_v21, %v10648_v23  ;;  %10731 = vadd.xlane.f32.xlu1 %v10730_v49 }
0x1290   :  { %v10688_v28 = vmul.f32 1.442695, %v10665_v12  ;;  %v10698_v37 = vmul.f32 1.442695, %v10670_v39 }
0x1291   :  { %v10639_v22 = vpop.xlane.xlu0 %10638 }
0x1292   :  { %14733 = vpow2.f32 %v10688_v28  ;;  %v10667_v31 = vsub.f32 %v16885_v3, %v10639_v22 }
0x1293   :  { %14735 = vpow2.f32 %v10698_v37 }
0x1294   :  { %v16957_v25 = vpop.eup %14729  ;;  %v10692_v1 = vmul.f32 1.442695, %v10667_v31 }
0x1295   :  { %v10645_v24 = vpop.xlane.xlu0 %10644  ;;  %v10654_v18 = vpop.xlane.xlu1 %10653  ;;  %v10736_v46 = vsel %vm467_vm3, %v16957_v25, 0.0 }
0x1296   :  { %14737 = vpow2.f32 %v10692_v1  ;;  %v10669_v8 = vsub.f32 %v16889_v47, %v10645_v24  ;;  %v10672_v21 = vsub.f32 %v16891_v57, %v10654_v18  ;;  %10737 = vadd.xlane.f32.xlu1 %v10736_v46 }
0x1298   :  { %v16963_v35 = vpop.eup %14731  ;;  %v10696_v2 = vmul.f32 1.442695, %v10669_v8  ;;  %v10702_v16 = vmul.f32 1.442695, %v10672_v21 }
0x1299   :  { %v10651_v3 = vpop.xlane.xlu0 %10650  ;;  %v11167_v11 = vpop.permute.xlu1 %11166  ;;  %v10721_v40 = vsel %vm467_vm3, %v16963_v35, 0.0 }
0x129a   :  { %14739 = vpow2.f32 %v10696_v2  ;;  %v10671_v9 = vsub.f32 %v16897_v43, %v10651_v3  ;;  %10722 = vadd.xlane.f32.xlu0 %v10721_v40  ;;  %14128 = vmatpush3.msra.mxu1 %v11167_v11 }
0x129b   :  { %14741 = vpow2.f32 %v10702_v16  ;;  %14137 = vmatprep.subr.mxu1 %v14831_v0 }
0x129c   :  { %v16969_v47 = vpop.eup %14733  ;;  %v10700_v57 = vmul.f32 1.442695, %v10671_v9 }
0x129d   :  { %v16971_v41 = vpop.eup %14735  ;;  %v10727_v17 = vsel %vm467_vm3, %v16969_v47, 0.0 }
0x129e   :  { %14743 = vpow2.f32 %v10700_v57  ;;  %10728 = vadd.xlane.f32.xlu0 %v10727_v17  ;;  %v10657_v20 = vpop.xlane.xlu0 %10656  ;;  %v10742_v42 = vsel %vm467_vm3, %v16971_v41, 0.0 }
0x129f   :  { %v10673_v43 = vsub.f32 %v16901_v61, %v10657_v20  ;;  %10743 = vadd.xlane.f32.xlu1 %v10742_v42 }
0x12a0   :  { %v16978_v51 = vpop.eup %14737 }
0x12a1   :  { %v10704_v52 = vmul.f32 1.442695, %v10673_v43  ;;  %v10733_v7 = vsel %vm467_vm3, %v16978_v51, 0.0 }
0x12a2   :  { %10734 = vadd.xlane.f32.xlu0 %v10733_v7 }
0x12a3   :  { %14745 = vpow2.f32 %v10704_v52 }
0x12a4   :  { %v16982_v30 = vpop.eup %14739 }
0x12a5   :  { %v16984_v14 = vpop.eup %14741  ;;  %v10739_v56 = vsel %vm467_vm3, %v16982_v30, 0.0 }
0x12a6   :  { %10740 = vadd.xlane.f32.xlu0 %v10739_v56  ;;  %v10748_v61 = vsel %vm467_vm3, %v16984_v14, 0.0 }
0x12a7   :  { %10749 = vadd.xlane.f32.xlu1 %v10748_v61 }
0x12a8   :  { %v16990_v10 = vpop.eup %14743 }
0x12a9   :  { %v10745_v6 = vsel %vm467_vm3, %v16990_v10, 0.0 }
0x12aa   :  { %10746 = vadd.xlane.f32.xlu0 %v10745_v6 }
0x12ad   :  { %v16994_v29 = vpop.eup %14745 }
0x12ae   :  { %v10751_v63 = vsel %vm467_vm3, %v16994_v29, 0.0 }
0x12af   :  { %10752 = vadd.xlane.f32.xlu0 %v10751_v63 }
0x12b8   :  { %11318 = vrot.lane.b32.xlu1 %v16757_v5, %s14833_s29 }
0x12bc   :  { %11470 = vrot.lane.b32.xlu1 %v16753_v36, %s14833_s29 }
0x12c0   :  { %11622 = vrot.lane.b32.xlu1 %v16781_v55, %s14833_s29 }
0x12c4   :  { %11774 = vrot.lane.b32.xlu1 %v16804_v44, %s14833_s29 }
0x12c5   :  { %11850 = vrot.lane.b32.xlu0 %v16802_v45, %s14833_s29 }
0x12c8   :  { %11926 = vrot.lane.b32.xlu1 %v16824_v34, %s14833_s29 }
0x12ca   :  { %v10708_v15 = vpop.xlane.xlu1 %10707 }
0x12cb   :  { %14747 = vrcp.f32 %v10708_v15  ;;  %v14461_v15 = vld [vmem:[#allocation2 + $0x20] ss:$40 sps:$4 sm:$0xff]  }
0x12ce   :  { %v10714_v4 = vpop.xlane.xlu1 %10713 }
0x12cf   :  { %14749 = vrcp.f32 %v10714_v4  ;;  %v14462_v4 = vld [vmem:[#allocation2 + $0x70] ss:$40 sps:$4 sm:$0xff]  }
0x12d2   :  { %v10720_v5 = vpop.xlane.xlu1 %10719 }
0x12d3   :  { %14751 = vrcp.f32 %v10720_v5  ;;  %v14463_v5 = vld [vmem:[#allocation2 + $0xc0] ss:$40 sps:$4 sm:$0xff]  }
0x12d5   :  { %v14748_v27 = vpop.eup %14747 }
0x12d6   :  { %v10755_v36 = vmul.f32 %v14748_v27, %v16920_v59 }
0x12d8   :  { %14105 = vmatmul.mubr.msk.f32.vlgmr.msra.gmra.mrb[134].mxu0 %vm467_vm3, %v10755_v36 }
0x12d9   :  { %v14750_v55 = vpop.eup %14749  ;;  %14113 = vmatpush3.msra.mxu0 %v16837_v38  ;;  %14114 = vmatprep.mubr.msk.f32.mxu0 %vm14832_vm0, %v14831_v0  ;;  %v11243_v38 = vpop.permute.xlu0 %11242 }
0x12da   :  { %v10759_v45 = vmul.f32 %v14750_v55, %v16924_v33  ;;  %14122 = vmatprep.subr.mxu0 %v14831_v0 }
0x12dc   :  { %14115 = vmatmul.mubr.msk.f32.vlgmr.msra.gmra.mrb[136].mxu0 %vm467_vm3, %v10759_v45 }
0x12dd   :  { %v14752_v44 = vpop.eup %14751  ;;  %14123 = vmatpush3.msra.mxu0 %v16839_v62  ;;  %14124 = vmatprep.mubr.msk.f32.mxu0 %vm14832_vm0, %v14831_v0  ;;  %v11395_v62 = vpop.permute.xlu0 %11394 }
0x12de   :  { %v10763_v34 = vmul.f32 %v14752_v44, %v16929_v53  ;;  %14132 = vmatprep.subr.mxu0 %v14831_v0 }
0x12e0   :  { %14125 = vmatmul.mubr.msk.f32.vlgmr.msra.gmra.mrb[138].mxu0 %vm467_vm3, %v10763_v34 }
0x12e1   :  { %14133 = vmatpush3.msra.mxu0 %v11243_v38  ;;  %14134 = vmatprep.mubr.msk.f32.mxu0 %vm14832_vm0, %v14831_v0  ;;  %v11547_v53 = vpop.permute.xlu0 %11546 }
0x12e2   :  { %14142 = vmatprep.subr.mxu0 %v14831_v0 }
0x12e5   :  { %v11699_v28 = vpop.permute.xlu0 %11698 }
0x1314   :  { %v17027_v59 = vpop.f32.mrb[142].mxu1 }
0x1315   :  { %v14111_v33 = vpop.f32.mrb[143].mxu1 }
0x1317   :  { %v10726_v58 = vpop.xlane.xlu1 %10725 }
0x1318   :  { %14753 = vrcp.f32 %v10726_v58 }
0x131b   :  { %v10732_v23 = vpop.xlane.xlu1 %10731 }
0x131c   :  { %14755 = vrcp.f32 %v10732_v23 }
0x131f   :  { %v17029_v49 = vpop.f32.mrb[144].mxu1 }
0x1320   :  { %v14121_v12 = vpop.f32.mrb[145].mxu1 }
0x1322   :  { %v14754_v39 = vpop.eup %14753 }
0x1323   :  { %v10767_v37 = vmul.f32 %v14754_v39, %v16945_v26  ;;  %v10738_v22 = vpop.xlane.xlu1 %10737 }
0x1324   :  { %14757 = vrcp.f32 %v10738_v22 }
0x1325   :  { %14135 = vmatmul.mubr.msk.f32.vlgmr.msra.gmra.mrb[140].mxu0 %vm467_vm3, %v10767_v37 }
0x1326   :  { %v14756_v31 = vpop.eup %14755  ;;  %14143 = vmatpush3.msra.mxu0 %v11395_v62  ;;  %14144 = vmatprep.mubr.msk.f32.mxu0 %vm14832_vm0, %v14831_v0 }
0x1327   :  { %v10771_v1 = vmul.f32 %v14756_v31, %v16950_v48  ;;  %v10723_v24 = vpop.xlane.xlu0 %10722  ;;  %14152 = vmatprep.subr.mxu0 %v14831_v0 }
0x1328   :  { %14759 = vrcp.f32 %v10723_v24 }
0x1329   :  { %14145 = vmatmul.mubr.msk.f32.vlgmr.msra.gmra.mrb[142].mxu0 %vm467_vm3, %v10771_v1 }
0x132a   :  { %14153 = vmatpush3.msra.mxu0 %v11547_v53  ;;  %14154 = vmatprep.mubr.msk.f32.mxu0 %vm14832_vm0, %v14831_v0 }
0x132b   :  { %v10729_v26 = vpop.xlane.xlu0 %10728  ;;  %14162 = vmatprep.subr.mxu0 %v14831_v0 }
0x132c   :  { %14761 = vrcp.f32 %v10729_v26  ;;  %v10744_v18 = vpop.xlane.xlu1 %10743 }
0x132d   :  { %14763 = vrcp.f32 %v10744_v18 }
0x132e   :  { %v14758_v46 = vpop.eup %14757 }
0x132f   :  { %v10775_v8 = vmul.f32 %v14758_v46, %v16957_v25  ;;  %v10735_v48 = vpop.xlane.xlu0 %10734 }
0x1330   :  { %14765 = vrcp.f32 %v10735_v48 }
0x1331   :  { %14155 = vmatmul.mubr.msk.f32.vlgmr.msra.gmra.mrb[144].mxu0 %vm467_vm3, %v10775_v8 }
0x1332   :  { %v14760_v21 = vpop.eup %14759  ;;  %14163 = vmatpush3.msra.mxu0 %v11699_v28  ;;  %14164 = vmatprep.mubr.msk.f32.mxu0 %vm14832_vm0, %v14831_v0 }
0x1333   :  { %v10765_v2 = vmul.f32 %v14760_v21, %v16963_v35  ;;  %v10741_v16 = vpop.xlane.xlu0 %10740  ;;  %14172 = vmatprep.subr.mxu0 %v14831_v0 }
0x1334   :  { %14767 = vrcp.f32 %v10741_v16  ;;  %v10750_v3 = vpop.xlane.xlu1 %10749 }
0x1335   :  { %14769 = vrcp.f32 %v10750_v3  ;;  %14130 = vmatmul.mubr.msk.f32.vlgmr.msra.gmra.mrb[146].mxu1 %vm467_vm3, %v10765_v2 }
0x1336   :  { %v14762_v25 = vpop.eup %14761  ;;  %14139 = vmatprep.mubr.msk.f32.mxu1 %vm14832_vm0, %v14831_v0 }
0x1337   :  { %v14764_v11 = vpop.eup %14763  ;;  %v10769_v40 = vmul.f32 %v14762_v25, %v16969_v47  ;;  %v10747_v9 = vpop.xlane.xlu0 %10746 }
0x1338   :  { %v10779_v57 = vmul.f32 %v14764_v11, %v16971_v41  ;;  %14771 = vrcp.f32 %v10747_v9  ;;  %v11319_v35 = vpop.permute.xlu1 %11318 }
0x1339   :  { %14138 = vmatpush3.msra.mxu1 %v11319_v35  ;;  %v17103_v35 = vld [vmem:[#allocation2 + $0xc4] ss:$40 sps:$4 sm:$0xff]  }
0x133a   :  { %v14766_v17 = vpop.eup %14765  ;;  %14140 = vmatmul.mubr.msk.f32.vlgmr.msra.gmra.mrb[148].mxu1 %vm467_vm3, %v10769_v40  ;;  %14165 = vmatmul.mubr.msk.f32.vlgmr.msra.gmra.mrb[146].mxu0 %vm467_vm3, %v10779_v57 }
0x133b   :  { %v10773_v20 = vmul.f32 %v14766_v17, %v16978_v51  ;;  %14147 = vmatprep.subr.mxu1 %v14831_v0  ;;  %14149 = vmatprep.mubr.msk.f32.mxu1 %vm14832_vm0, %v14831_v0  ;;  %v14465_v17 = vld [vmem:[#allocation2 + $0x74] ss:$40 sps:$4 sm:$0xff]  }
0x133c   :  { %v11471_v42 = vpop.permute.xlu1 %11470  ;;  %v10753_v47 = vpop.xlane.xlu0 %10752  ;;  %14174 = vmatprep.mubr.msk.f32.mxu0 %vm14832_vm0, %v14831_v0 }
0x133d   :  { %14773 = vrcp.f32 %v10753_v47  ;;  %14148 = vmatpush3.msra.mxu1 %v11471_v42  ;;  %v12960_v42 = vld [vmem:[%s17294_s9 + $0x8] ss:$0 sm:$0xff]  ;;  %v17120_v47 = vld [vmem:[%s17294_s9 + $0x9] ss:$0 sm:$0xff] }
0x133e   :  { %v14768_v41 = vpop.eup %14767  ;;  %14150 = vmatmul.mubr.msk.f32.vlgmr.msra.gmra.mrb[150].mxu1 %vm467_vm3, %v10773_v20  ;;  %14157 = vmatprep.subr.mxu1 %v14831_v0  ;;  %v17108_v20 = vld [vmem:[#allocation2 + $0x114] ss:$40 sps:$4 sm:$0xff]  }
0x133f   :  { %v14770_v43 = vpop.eup %14769  ;;  %v10777_v51 = vmul.f32 %v14768_v41, %v16982_v30  ;;  %14159 = vmatprep.mubr.msk.f32.mxu1 %vm14832_vm0, %v14831_v0  ;;  %v17125_v41 = vld [vmem:[%s17294_s9 + $0xa] ss:$0 sm:$0xff] }
0x1340   :  { %v10783_v52 = vmul.f32 %v14770_v43, %v16984_v14  ;;  %v11623_v7 = vpop.permute.xlu1 %11622  ;;  %v11851_v56 = vpop.permute.xlu0 %11850 }
0x1341   :  { %14158 = vmatpush3.msra.mxu1 %v11623_v7  ;;  %14173 = vmatpush3.msra.mxu0 %v11851_v56 }
0x1342   :  { %v14772_v61 = vpop.eup %14771  ;;  %14160 = vmatmul.mubr.msk.f32.vlgmr.msra.gmra.mrb[152].mxu1 %vm467_vm3, %v10777_v51  ;;  %14175 = vmatmul.mubr.msk.f32.vlgmr.msra.gmra.mrb[148].mxu0 %vm467_vm3, %v10783_v52 }
0x1343   :  { %v10781_v6 = vmul.f32 %v14772_v61, %v16990_v10  ;;  %14167 = vmatprep.subr.mxu1 %v14831_v0  ;;  %14169 = vmatprep.mubr.msk.f32.mxu1 %vm14832_vm0, %v14831_v0 }
0x1344   :  { %v11775_v30 = vpop.permute.xlu1 %11774  ;;  %14182 = vmatprep.subr.bf16.mxu0 %v14831_v0  ;;  %14190 = vmatprep.mubr.msk.bf16.mxu0 %vm14832_vm0, %v14831_v0 }
0x1345   :  { %14168 = vmatpush3.msra.mxu1 %v11775_v30  ;;  %14183 = vmatpush3.bf16.msra.mxu0 %v14461_v15 }
0x1346   :  { %14170 = vmatmul.mubr.msk.f32.vlgmr.msra.gmra.mrb[154].mxu1 %vm467_vm3, %v10781_v6  ;;  %14177 = vmatprep.subr.mxu1 %v14831_v0 }
0x1347   :  { %v14774_v14 = vpop.eup %14773  ;;  %14179 = vmatprep.mubr.msk.f32.mxu1 %vm14832_vm0, %v14831_v0  ;;  %14184 = vmatprep.subr.bf16.mxu0 %v14831_v0 }
0x1348   :  { %v10785_v10 = vmul.f32 %v14774_v14, %v16994_v29  ;;  %v11927_v63 = vpop.permute.xlu1 %11926  ;;  %v14464_v29 = vld [vmem:[#allocation2 + $0x110] ss:$40 sps:$4 sm:$0xff]  }
0x1349   :  { %14178 = vmatpush3.msra.mxu1 %v11927_v63  ;;  %14185 = vmatpush3.bf16.msra.mxu0 %v14462_v4 }
0x134a   :  { %14180 = vmatmul.mubr.msk.f32.vlgmr.msra.gmra.mrb[156].mxu1 %vm467_vm3, %v10785_v10  ;;  %14194 = vmatprep.subr.bf16.mxu1 %v14831_v0 }
0x134b   :  { %14202 = vmatprep.mubr.msk.bf16.mxu1 %vm14832_vm0, %v14831_v0  ;;  %14186 = vmatprep.subr.bf16.mxu0 %v14831_v0 }
0x134d   :  { %14187 = vmatpush3.bf16.msra.mxu0 %v14463_v5 }
0x134e   :  { %14188 = vmatprep.subr.bf16.mxu0 %v14831_v0 }
0x1351   :  { %14189 = vmatpush3.bf16.msra.mxu0 %v14464_v29 }
0x1352   :  { %14206 = vmatprep.subr.bf16.mxu0 %v14831_v0 }
0x13ab   :  { %v17087_v27 = vpop.f32.mrb[134].mxu0 }
0x13ac   :  { %v14106_v36 = vpop.f32.mrb[135].mxu0 }
0x13af   :  { %v11010_v55 = vpop.f32.mrb[136].mxu0 }
0x13b0   :  { %v14116_v45 = vpop.f32.mrb[137].mxu0 }
0x13b3   :  { %v11162_v44 = vpop.f32.mrb[138].mxu0 }
0x13b4   :  { %v14126_v34 = vpop.f32.mrb[139].mxu0 }
0x13f8   :  { %v11314_v38 = vpop.f32.mrb[140].mxu0 }
0x13f9   :  { %v14136_v33 = vpop.f32.mrb[141].mxu0 }
0x13fc   :  { %v11466_v62 = vpop.f32.mrb[142].mxu0 }
0x13fd   :  { %v14146_v58 = vpop.f32.mrb[143].mxu0 }
0x1404   :  { %v11618_v23 = vpop.f32.mrb[144].mxu0 }
0x1405   :  { %v14363_v53 = vpack.i.bf16 %v11618_v23, %v11010_v55  ;;  %v14156_v12 = vpop.f32.mrb[145].mxu0 }
0x1407   :  { %14364 = vrot.lane.b32.xlu1 %v14363_v53, %s14842_s11 }
0x1408   :  { %v11238_v39 = vpop.f32.mrb[146].mxu1 }
0x1409   :  { %v14131_v28 = vpop.f32.mrb[147].mxu1 }
0x140d   :  { %v11390_v37 = vpop.f32.mrb[148].mxu1  ;;  %v11770_v22 = vpop.f32.mrb[146].mxu0 }
0x140e   :  { %v14368_v31 = vpack.i.bf16 %v11770_v22, %v11162_v44  ;;  %v14141_v1 = vpop.f32.mrb[149].mxu1  ;;  %v14166_v24 = vpop.f32.mrb[147].mxu0 }
0x1410   :  { %14369 = vrot.lane.b32.xlu1 %v14368_v31, %s14844_s13 }
0x1411   :  { %v11542_v26 = vpop.f32.mrb[150].mxu1 }
0x1412   :  { %v14378_v18 = vpack.i.bf16 %v11542_v26, %v17027_v59  ;;  %v14151_v46 = vpop.f32.mrb[151].mxu1 }
0x1414   :  { %14379 = vrot.lane.b32.xlu0 %v14378_v18, %s14841_s5 }
0x1415   :  { %v11694_v8 = vpop.f32.mrb[152].mxu1  ;;  %v11922_v48 = vpop.f32.mrb[148].mxu0 }
0x1416   :  { %v14383_v21 = vpack.i.bf16 %v11694_v8, %v17029_v49  ;;  %v14373_v2 = vpack.i.bf16 %v11922_v48, %v11314_v38  ;;  %v14161_v16 = vpop.f32.mrb[153].mxu1  ;;  %v14176_v3 = vpop.f32.mrb[149].mxu0  ;;  %v14466_v49 = vld [vmem:[#allocation2 + $0x24] ss:$40 sps:$4 sm:$0xff]   ;;  %v12906_v48 = vld [vmem:[%s17294_s9 + $0x8] ss:$0 sm:$0xff] }
0x1417   :  { %v17160_v16 = vadd.f32 %v12906_v48, %v16337_v13 }
0x1418   :  { %14374 = vrot.lane.b32.xlu1 %v14373_v2, %s14846_s16  ;;  %14384 = vrot.lane.b32.xlu0 %v14383_v21, %s14843_s12  ;;  %v17156_v21 = vadd.f32 %v12906_v48, %v16339_v32 }
0x1419   :  { %v11846_v25 = vpop.f32.mrb[154].mxu1 }
0x141a   :  { %v14388_v11 = vpack.i.bf16 %v11846_v25, %v11238_v39  ;;  %v14171_v40 = vpop.f32.mrb[155].mxu1  ;;  %v12156_v3 = vpack.c.bf16 %v17156_v21, %v17160_v16 }
0x141c   :  { %14389 = vrot.lane.b32.xlu0 %v14388_v11, %s14830_s24  ;;  %12157 = vrot.lane.b32.xlu1 %v14461_v15, %s14833_s29 }
0x141d   :  { %v11998_v59 = vpop.f32.mrb[156].mxu1 }
0x141e   :  { %v14393_v9 = vpack.i.bf16 %v11998_v59, %v11390_v37  ;;  %v14181_v57 = vpop.f32.mrb[157].mxu1 }
0x1420   :  { %14394 = vrot.lane.b32.xlu0 %v14393_v9, %s14845_s4  ;;  %12161 = vrot.lane.b32.xlu1 %v14463_v5, %s14833_s29 }
0x1424   :  { %12159 = vrot.lane.b32.xlu0 %v14462_v4, %s14833_s29  ;;  %12329 = vrot.lane.b32.xlu1 %v14466_v49, %s14833_s29 }
0x1428   :  { %12163 = vrot.lane.b32.xlu0 %v14464_v29, %s14833_s29  ;;  %12333 = vrot.lane.b32.xlu1 %v17103_v35, %s14833_s29 }
0x142c   :  { %12331 = vrot.lane.b32.xlu0 %v14465_v17, %s14833_s29  ;;  %12335 = vrot.lane.b32.xlu1 %v17108_v20, %s14833_s29 }
0x1430   :  { %9303 = vrot.lane.b32.xlu0 %v12960_v42, %s14833_s29  ;;  %12169 = vrot.lane.b32.xlu1 %v17120_v47, %s14833_s29 }
0x1434   :  { %12341 = vrot.lane.b32.xlu0 %v17125_v41, %s14833_s29 }
0x1479   :  { %v14365_v43 = vpop.permute.xlu1 %14364 }
0x147a   :  { %v14367_v30 = vunpack.i.h.bf16 %v14365_v43  ;;  %v14366_v14 = vunpack.i.l.bf16 %v14365_v43 }
0x1482   :  { %v14370_v51 = vpop.permute.xlu1 %14369 }
0x1483   :  { %v14372_v45 = vunpack.i.h.bf16 %v14370_v51  ;;  %v14371_v44 = vunpack.i.l.bf16 %v14370_v51 }
0x1486   :  { %v14380_v52 = vpop.permute.xlu0 %14379 }
0x1487   :  { %v14382_v7 = vunpack.i.h.bf16 %v14380_v52  ;;  %v14381_v56 = vunpack.i.l.bf16 %v14380_v52 }
0x1489   :  { %v12065_v61 = vsel %vm467_vm3, %v11466_v62, %v14382_v7  ;;  %v12030_v6 = vsel %vm467_vm3, %v17087_v27, %v14381_v56 }
0x148a   :  { %v14375_v10 = vpop.permute.xlu1 %14374  ;;  %v14385_v63 = vpop.permute.xlu0 %14384  ;;  %v12031_v5 = vsel %vm76_vm1, %v12030_v6, %v14366_v14  ;;  %v12066_v29 = vsel %vm76_vm1, %v12065_v61, %v14367_v30 }
0x148b   :  { %v14387_v15 = vunpack.i.h.bf16 %v14385_v63  ;;  %v14386_v4 = vunpack.i.l.bf16 %v14385_v63  ;;  %v14377_v12 = vunpack.i.h.bf16 %v14375_v10  ;;  %v14376_v39 = vunpack.i.l.bf16 %v14375_v10 }
0x148d   :  { %v12067_v36 = vsel %vm3090_vm4, %v12066_v29, %v14387_v15  ;;  %v12032_v55 = vsel %vm3090_vm4, %v12031_v5, %v14386_v4 }
0x148e   :  { %v14390_v34 = vpop.permute.xlu0 %14389  ;;  %v12158_v38 = vpop.permute.xlu1 %12157  ;;  %v12033_v62 = vsel %vm3092_vm5, %v12032_v55, %v14371_v44  ;;  %v12068_v58 = vsel %vm3092_vm5, %v12067_v36, %v14372_v45 }
0x148f   :  { %v14392_v33 = vunpack.i.h.bf16 %v14390_v34  ;;  %v14391_v27 = vunpack.i.l.bf16 %v14390_v34  ;;  %14195 = vmatpush3.bf16.msra.mxu1 %v12158_v38 }
0x1490   :  { %14196 = vmatprep.subr.bf16.mxu1 %v14831_v0 }
0x1491   :  { %v12069_v23 = vsel %vm3094_vm6, %v12068_v58, %v14392_v33  ;;  %v12034_v53 = vsel %vm3094_vm6, %v12033_v62, %v14391_v27 }
0x1492   :  { %v14395_v28 = vpop.permute.xlu0 %14394  ;;  %v12035_v31 = vsel %vm3096_vm7, %v12034_v53, %v14376_v39  ;;  %v12070_v1 = vsel %vm3096_vm7, %v12069_v23, %v14377_v12  ;;  %v12162_v8 = vpop.permute.xlu1 %12161 }
0x1493   :  { %v14397_v37 = vunpack.i.h.bf16 %v14395_v28  ;;  %v14396_v22 = vunpack.i.l.bf16 %v14395_v28 }
0x1495   :  { %v12071_v24 = vsel %vm3098_vm8, %v12070_v1, %v14397_v37  ;;  %v12036_v26 = vsel %vm3098_vm8, %v12035_v31, %v14396_v22 }
0x1496   :  { %v12072_v18 = vpack.c.bf16 %v12071_v24, %v12036_v26  ;;  %v12160_v46 = vpop.permute.xlu0 %12159  ;;  %v12330_v25 = vpop.permute.xlu1 %12329 }
0x1497   :  { %14197 = vmatpush3.bf16.msra.mxu1 %v12160_v46 }
0x1498   :  { %14191 = vmatmul.mubr.msk.bf16.vlgmr.msra.gmra.mrb[152].mxu0 %vm236_vm2, %v12072_v18  ;;  %14198 = vmatprep.subr.bf16.mxu1 %v14831_v0 }
0x1499   :  { %14207 = vmatpush3.bf16.msra.mxu0 %v14466_v49  ;;  %14214 = vmatprep.mubr.msk.bf16.mxu0 %vm14832_vm0, %v14831_v0 }
0x149a   :  { %14208 = vmatprep.subr.bf16.mxu0 %v14831_v0  ;;  %v12164_v2 = vpop.permute.xlu0 %12163  ;;  %v12334_v13 = vpop.permute.xlu1 %12333 }
0x149b   :  { %14199 = vmatpush3.bf16.msra.mxu1 %v12162_v8 }
0x149c   :  { %14200 = vmatprep.subr.bf16.mxu1 %v14831_v0 }
0x149d   :  { %14209 = vmatpush3.bf16.msra.mxu0 %v14465_v17 }
0x149e   :  { %14210 = vmatprep.subr.bf16.mxu0 %v14831_v0  ;;  %v12332_v32 = vpop.permute.xlu0 %12331  ;;  %v12336_v9 = vpop.permute.xlu1 %12335 }
0x149f   :  { %14201 = vmatpush3.bf16.msra.mxu1 %v12164_v2 }
0x14a0   :  { %14218 = vmatprep.subr.bf16.mxu1 %v14831_v0 }
0x14a1   :  { %14211 = vmatpush3.bf16.msra.mxu0 %v17103_v35 }
0x14a2   :  { %14203 = vmatmul.mubr.msk.bf16.vlgmr.msra.gmra.mrb[160].mxu1 %vm236_vm2, %v12156_v3  ;;  %14212 = vmatprep.subr.bf16.mxu0 %v14831_v0  ;;  %v9304_v11 = vpop.permute.xlu0 %9303  ;;  %v12170_v43 = vpop.permute.xlu1 %12169 }
0x14a3   :  { %14219 = vmatpush3.bf16.msra.mxu1 %v12330_v25  ;;  %14226 = vmatprep.mubr.msk.bf16.mxu1 %vm14832_vm0, %v14831_v0  ;;  %v17175_v40 = vadd.f32 %v16865_v54, %v9304_v11  ;;  %v17178_v59 = vadd.f32 %v16867_v50, %v9304_v11 }
0x14a4   :  { %14220 = vmatprep.subr.bf16.mxu1 %v14831_v0 }
0x14a5   :  { %14213 = vmatpush3.bf16.msra.mxu0 %v17108_v20  ;;  %v12328_v57 = vpack.c.bf16 %v17178_v59, %v17175_v40 }
0x14a6   :  { %v12342_v10 = vpop.permute.xlu0 %12341 }
0x14a7   :  { %14221 = vmatpush3.bf16.msra.mxu1 %v12332_v32 }
0x14a8   :  { %14222 = vmatprep.subr.bf16.mxu1 %v14831_v0 }
0x14ab   :  { %14223 = vmatpush3.bf16.msra.mxu1 %v12334_v13 }
0x14ac   :  { %14224 = vmatprep.subr.bf16.mxu1 %v14831_v0 }
0x14af   :  { %14225 = vmatpush3.bf16.msra.mxu1 %v12336_v9 }
0x14b0   :  { %14230 = vmatprep.subr.bf16.mxu1 %v14831_v0 }
0x14b2   :  { %14227 = vmatmul.mubr.msk.bf16.vlgmr.msra.gmra.mrb[164].mxu1 %vm236_vm2, %v12328_v57 }
0x14b3   :  { %14234 = vmatprep.mubr.msk.bf16.mxu1 %vm14832_vm0, %v14831_v0 }
0x156b   :  { %v12149_v49 = vpop.f32.mrb[152].mxu0 }
0x156c   :  { %v14192_v54 = vpop.f32.mrb[153].mxu0  ;;  %v17188_v50 = vadd.f32 %v17120_v47, %v12149_v49 }
0x156d   :  { %v12152_v35 = vpop.f32.mrb[154].mxu0 }
0x156e   :  { %v17191_v17 = vadd.f32 %v17120_v47, %v12152_v35  ;;  %v14193_v20 = vpop.f32.mrb[155].mxu0 }
0x1570   :  { %v12230_v42 = vpack.c.bf16 %v17191_v17, %v17188_v50 }
0x1572   :  { %14215 = vmatmul.mubr.msk.bf16.vlgmr.msra.gmra.mrb[156].mxu0 %vm236_vm2, %v12230_v42 }
0x1575   :  { %v12209_v51 = vpop.f32.mrb[160].mxu1 }
0x1576   :  { %v12210_v52 = vadd.f32 %v12209_v51, %v12170_v43  ;;  %v14204_v7 = vpop.f32.mrb[161].mxu1 }
0x1577   :  { %v12212_v56 = vpop.f32.mrb[162].mxu1 }
0x1578   :  { %v13021_v61 = vmul.f32 -1.442695, %v12210_v52  ;;  %v12213_v6 = vadd.f32 %v12212_v56, %v12170_v43  ;;  %v14205_v30 = vpop.f32.mrb[163].mxu1 }
0x157a   :  { %14775 = vpow2.f32 %v13021_v61  ;;  %v13022_v14 = vmul.f32 -1.442695, %v12213_v6 }
0x157c   :  { %14777 = vpow2.f32 %v13022_v14 }
0x1584   :  { %v14776_v47 = vpop.eup %14775 }
0x1585   :  { %v12222_v63 = vadd.f32 1.0, %v14776_v47  ;;  %v12381_v15 = vpop.f32.mrb[164].mxu1  ;;  %v14469_v47 = vld [vmem:[%s17292_s7 + $0x40] sm:$0xff]  }
0x1586   :  { %v14778_v4 = vpop.eup %14777  ;;  %v12382_v5 = vadd.f32 %v12381_v15, %v12342_v10  ;;  %v14228_v29 = vpop.f32.mrb[165].mxu1  ;;  %13385 = vmatprep.subr.bf16.mxu0 %v14469_v47  ;;  %v14471_v15 = vld [vmem:[%s17292_s7 + $0x48] sm:$0xff]  }
0x1587   :  { %14779 = vrcp.f32 %v12222_v63  ;;  %v12223_v36 = vadd.f32 1.0, %v14778_v4  ;;  %v12384_v55 = vpop.f32.mrb[166].mxu1  ;;  %v14470_v63 = vld [vmem:[%s17292_s7] sm:$0xff]   ;;  %v14472_v4 = vld [vmem:[%s17292_s7 + $0x8] sm:$0xff]   ;;  %v14474_v29 = vld [vmem:[%s17292_s7 + $0x10] sm:$0xff]  }
0x1588   :  { %v13032_v45 = vmul.f32 -1.442695, %v12382_v5  ;;  %v12385_v44 = vadd.f32 %v12384_v55, %v12342_v10  ;;  %v14229_v34 = vpop.f32.mrb[167].mxu1  ;;  %13386 = vmatpush3.bf16.msra.mxu0 %v14470_v63  ;;  %v14473_v5 = vld [vmem:[%s17292_s7 + $0x50] sm:$0xff]   ;;  %v14476_v55 = vld [vmem:[%s17292_s7 + $0x18] sm:$0xff]  }
0x1589   :  { %14781 = vrcp.f32 %v12223_v36  ;;  %13387 = vmatprep.subr.bf16.mxu0 %v14471_v15  ;;  %v14475_v36 = vld [vmem:[%s17292_s7 + $0x58] sm:$0xff]   ;;  %v14479_v34 = vld [vmem:[%s17292_s7 + $0x68] sm:$0xff]  }
0x158a   :  { %14783 = vpow2.f32 %v13032_v45  ;;  %v13033_v38 = vmul.f32 -1.442695, %v12385_v44  ;;  %v14477_v45 = vld [vmem:[%s17292_s7 + $0x60] sm:$0xff]  }
0x158b   :  { %v14478_v44 = vld [vmem:[%s17292_s7 + $0x20] sm:$0xff]  }
0x158c   :  { %14785 = vpow2.f32 %v13033_v38  ;;  %13388 = vmatpush3.bf16.msra.mxu0 %v14472_v4  ;;  %v14480_v38 = vld [vmem:[%s17292_s7 + $0x28] sm:$0xff]  }
0x158d   :  { %13389 = vmatprep.subr.bf16.mxu0 %v14473_v5 }
0x1590   :  { %13390 = vmatpush3.bf16.msra.mxu0 %v14474_v29 }
0x1591   :  { %v14780_v33 = vpop.eup %14779  ;;  %13391 = vmatprep.subr.bf16.mxu0 %v14475_v36 }
0x1592   :  { %v12228_v27 = vmul.f32 %v14780_v33, %v17160_v16  ;;  %v14481_v33 = vld [vmem:[%s17292_s7 + $0x70] sm:$0xff]  }
0x1593   :  { %v14782_v62 = vpop.eup %14781 }
0x1594   :  { %v14784_v58 = vpop.eup %14783  ;;  %v12229_v23 = vmul.f32 %v14782_v62, %v17156_v21  ;;  %v12411_v39 = vsel %vm236_vm2, %v12228_v27, 0.0  ;;  %13392 = vmatpush3.bf16.msra.mxu0 %v14476_v55  ;;  %v14482_v27 = vld [vmem:[%s17292_s7 + $0x30] sm:$0xff]   ;;  %v14483_v62 = vld [vmem:[%s17292_s7 + $0x78] sm:$0xff]  }
0x1595   :  { %v12394_v53 = vadd.f32 1.0, %v14784_v58  ;;  %v12412_v22 = vrot.slane %v12411_v39, 4  ;;  %13393 = vmatprep.subr.bf16.mxu0 %v14477_v45  ;;  %v14484_v58 = vld [vmem:[%s17292_s7 + $0x38] sm:$0xff]  }
0x1596   :  { %v14786_v12 = vpop.eup %14785  ;;  %v12453_v37 = vsel %vm236_vm2, %v12229_v23, 0.0  ;;  %v12445_v23 = vsel %vm236_vm2, %v15533_v60, 0.0 }
0x1597   :  { %14787 = vrcp.f32 %v12394_v53  ;;  %v12395_v28 = vadd.f32 1.0, %v14786_v12  ;;  %v12454_v31 = vrot.slane %v12453_v37, 4  ;;  %v12413_v1 = vadd.f32 %v12412_v22, %v12411_v39 }
0x1598   :  { %13394 = vmatpush3.bf16.msra.mxu0 %v14478_v44  ;;  %v12402_v53 = vsel %vm236_vm2, %v15530_v19, 0.0  ;;  %v12446_v12 = vrot.slane %v12445_v23, 4 }
0x1599   :  { %14789 = vrcp.f32 %v12395_v28  ;;  %v12455_v24 = vadd.f32 %v12454_v31, %v12453_v37  ;;  %v12414_v18 = vrot.slane %v12413_v1, 2  ;;  %13395 = vmatprep.subr.bf16.mxu0 %v14479_v34  ;;  %v12403_v39 = vrot.slane %v12402_v53, 4 }
0x159a   :  { %v12447_v28 = vadd.f32 %v12446_v12, %v12445_v23  ;;  %v14485_v12 = vld [vmem:[%s17293_s8] sm:$0xff]  }
0x159b   :  { %v12456_v48 = vrot.slane %v12455_v24, 2  ;;  %v12415_v16 = vadd.f32 %v12414_v18, %v12413_v1  ;;  %v12404_v37 = vadd.f32 %v12403_v39, %v12402_v53  ;;  %v13034_v53 = vld [vmem:[%s17294_s9 + $0xb] ss:$0 sm:$0xff]  ;;  %14231 = vmatpush3.bf16.msra.mxu1 %v14485_v12 }
0x159c   :  { %13396 = vmatpush3.bf16.msra.mxu0 %v14480_v38  ;;  %v12448_v22 = vrot.slane %v12447_v28, 2  ;;  %14232 = vmatprep.subr.bf16.mxu1 %v14831_v0  ;;  %v14486_v39 = vld [vmem:[%s17293_s8 + $0x8] sm:$0xff]  }
0x159d   :  { %v12457_v13 = vadd.f32 %v12456_v48, %v12455_v24  ;;  %v12416_v9 = vrot.slane %v12415_v16, 1  ;;  %13397 = vmatprep.subr.bf16.mxu0 %v14481_v33  ;;  %v12405_v31 = vrot.slane %v12404_v37, 2 }
0x159e   :  { %v12449_v1 = vadd.f32 %v12448_v22, %v12447_v28 }
0x159f   :  { %v12458_v35 = vrot.slane %v12457_v13, 1  ;;  %v12406_v24 = vadd.f32 %v12405_v31, %v12404_v37  ;;  %14233 = vmatpush3.bf16.msra.mxu1 %v14486_v39 }
0x15a0   :  { %13398 = vmatpush3.bf16.msra.mxu0 %v14482_v27 }
0x15a1   :  { %v14788_v26 = vpop.eup %14787  ;;  %13399 = vmatprep.subr.bf16.mxu0 %v14483_v62  ;;  %v12407_v18 = vrot.slane %v12406_v24, 1 }
0x15a2   :  { %v12400_v46 = vmul.f32 %v14788_v26, %v17175_v40  ;;  %v12417_v40 = vadd.f32 %v12416_v9, %v12415_v16  ;;  %v12450_v26 = vrot.slane %v12449_v1, 1 }
0x15a3   :  { %v14790_v8 = vpop.eup %14789  ;;  %v12408_v48 = vadd.f32 %v12407_v18, %v12406_v24 }
0x15a4   :  { %v12401_v21 = vmul.f32 %v14790_v8, %v17178_v59  ;;  %v12427_v2 = vsel %vm236_vm2, %v12400_v46, 0.0  ;;  %v12459_v59 = vadd.f32 %v12458_v35, %v12457_v13  ;;  %v12418_v7 = vmul.f32 0.125, %v12417_v40  ;;  %13400 = vmatpush3.bf16.msra.mxu0 %v14484_v58 }
0x15a5   :  { %v12428_v3 = vrot.slane %v12427_v2, 4  ;;  %v12451_v46 = vadd.f32 %v12450_v26, %v12449_v1 }
0x15a6   :  { %v12469_v25 = vsel %vm236_vm2, %v12401_v21, 0.0  ;;  %v12460_v30 = vmul.f32 0.125, %v12459_v59 }
0x15a7   :  { %v12429_v32 = vadd.f32 %v12428_v3, %v12427_v2  ;;  %v12470_v11 = vrot.slane %v12469_v25, 4  ;;  %v12452_v16 = vmul.f32 0.125, %v12451_v46  ;;  %v12410_v3 = vmul.f32 0.125, %v12408_v48 }
0x15a9   :  { %v12430_v57 = vrot.slane %v12429_v32, 2  ;;  %v12471_v49 = vadd.f32 %v12470_v11, %v12469_v25 }
0x15ab   :  { %v12431_v54 = vadd.f32 %v12430_v57, %v12429_v32  ;;  %v12472_v20 = vrot.slane %v12471_v49, 2 }
0x15ad   :  { %v12432_v42 = vrot.slane %v12431_v54, 1  ;;  %v12473_v43 = vadd.f32 %v12472_v20, %v12471_v49 }
0x15af   :  { %v12433_v51 = vadd.f32 %v12432_v42, %v12431_v54  ;;  %v12474_v52 = vrot.slane %v12473_v43, 1 }
0x15b1   :  { %v12434_v56 = vmul.f32 0.125, %v12433_v51  ;;  %v12475_v61 = vadd.f32 %v12474_v52, %v12473_v43 }
0x15b3   :  { %v14403_v6 = vpack.i.bf16 %v12418_v7, %v12434_v56  ;;  %v12476_v14 = vmul.f32 0.125, %v12475_v61 }
0x15b5   :  { %14404 = vrot.lane.b32.xlu1 %v14403_v6, %s14833_s29  ;;  %v14398_v10 = vpack.i.bf16 %v12460_v30, %v12476_v14 }
0x15b7   :  { %14399 = vrot.lane.b32.xlu0 %v14398_v10, %s14833_s29 }
0x15bb   :  { %12696 = vrot.lane.b32.xlu0 %v13034_v53, %s14836_s2 }
0x1627   :  { %v14405_v8 = vpop.permute.xlu1 %14404 }
0x1628   :  { %v14407_v2 = vunpack.i.h.bf16 %v14405_v8 }
0x1629   :  { %v14400_v21 = vpop.permute.xlu0 %14399 }
0x162a   :  { %v14402_v60 = vunpack.i.h.bf16 %v14400_v21  ;;  %v12443_v32 = vsel %vm236_vm2, %v12410_v3, %v14407_v2 }
0x162c   :  { %v12485_v19 = vsel %vm236_vm2, %v12452_v16, %v14402_v60 }
0x162d   :  { %v12489_v25 = vrot.slane %v12485_v19, 7  ;;  %v12697_v0 = vpop.permute.xlu0 %12696 }
0x162f   :  { %v12494_v13 = vsel %vm12493_vm9, %v12443_v32, %v12489_v25 }
0x1630   :  { %v12496_v23 = vpack.c.bf16 %v12494_v13, %v12494_v13 }
0x1645   :  { %v12307_v11 = vpop.f32.mrb[156].mxu0 }
0x1646   :  { %v12308_v9 = vadd.f32 %v17125_v41, %v12307_v11  ;;  %v14216_v57 = vpop.f32.mrb[157].mxu0 }
0x1647   :  { %v12310_v49 = vpop.f32.mrb[158].mxu0 }
0x1648   :  { %v13029_v54 = vmul.f32 -1.442695, %v12308_v9  ;;  %v12311_v35 = vadd.f32 %v17125_v41, %v12310_v49  ;;  %v14217_v20 = vpop.f32.mrb[159].mxu0 }
0x164a   :  { %14791 = vpow2.f32 %v13029_v54  ;;  %v13030_v40 = vmul.f32 -1.442695, %v12311_v35 }
0x164c   :  { %14793 = vpow2.f32 %v13030_v40 }
0x1654   :  { %v14792_v42 = vpop.eup %14791 }
0x1655   :  { %v12320_v43 = vadd.f32 1.0, %v14792_v42 }
0x1656   :  { %v14794_v51 = vpop.eup %14793 }
0x1657   :  { %14795 = vrcp.f32 %v12320_v43  ;;  %v12321_v59 = vadd.f32 1.0, %v14794_v51 }
0x1659   :  { %14797 = vrcp.f32 %v12321_v59 }
0x1661   :  { %v14796_v52 = vpop.eup %14795 }
0x1662   :  { %v12326_v7 = vmul.f32 %v14796_v52, %v17188_v50  ;;  %v14401_v50 = vunpack.i.l.bf16 %v14400_v21 }
0x1663   :  { %v14798_v56 = vpop.eup %14797 }
0x1664   :  { %v12327_v61 = vmul.f32 %v14798_v56, %v17191_v17  ;;  %v12419_v6 = vsel %vm236_vm2, %v12326_v7, 0.0  ;;  %v14406_v17 = vunpack.i.l.bf16 %v14405_v8 }
0x1665   :  { %v12420_v30 = vrot.slane %v12419_v6, 4 }
0x1666   :  { %v12461_v41 = vsel %vm236_vm2, %v12327_v61, 0.0 }
0x1667   :  { %v12462_v14 = vrot.slane %v12461_v41, 4  ;;  %v12421_v10 = vadd.f32 %v12420_v30, %v12419_v6 }
0x1669   :  { %v12422_v47 = vrot.slane %v12421_v10, 2  ;;  %v12463_v63 = vadd.f32 %v12462_v14, %v12461_v41 }
0x166b   :  { %v12423_v15 = vadd.f32 %v12422_v47, %v12421_v10  ;;  %v12464_v4 = vrot.slane %v12463_v63, 2 }
0x166d   :  { %v12424_v5 = vrot.slane %v12423_v15, 1  ;;  %v12465_v29 = vadd.f32 %v12464_v4, %v12463_v63 }
0x166f   :  { %v12425_v36 = vadd.f32 %v12424_v5, %v12423_v15  ;;  %v12466_v55 = vrot.slane %v12465_v29, 1 }
0x1671   :  { %v12467_v45 = vadd.f32 %v12466_v55, %v12465_v29  ;;  %v12426_v44 = vmul.f32 0.125, %v12425_v36 }
0x1673   :  { %v12468_v34 = vmul.f32 0.125, %v12467_v45  ;;  %v12444_v27 = vsel %vm236_vm2, %v12426_v44, %v14406_v17 }
0x1675   :  { %v12486_v38 = vsel %vm236_vm2, %v12468_v34, %v14401_v50 }
0x1676   :  { %v12490_v33 = vrot.slane %v12486_v38, 7 }
0x1678   :  { %v12495_v62 = vsel %vm12493_vm9, %v12444_v27, %v12490_v33 }
0x1679   :  { %v12497_v58 = vpack.c.bf16 %v12495_v62, %v12495_v62 }
0x167b   :  { %12665 = vmatprep.mubr.bf16.mxu0 %v12497_v58 }
0x167c   :  { %12666 = vmatmul.mubr.bf16.vlgmr.msra.gmra.mrb[160].mxu0 %v12496_v23 }
0x174f   :  { %v13401_v28 = vpop.f32.mrb[160].mxu0 }
0x1750   :  { %v13402_v37 = vpop.f32.mrb[161].mxu0 }
0x1751   :  { %v13403_v22 = vadd.f32 %v13402_v37, %v13401_v28  ;;  %v13404_v31 = vpop.f32.mrb[162].mxu0 }
0x1752   :  { %v13405_v1 = vpop.f32.mrb[163].mxu0 }
0x1753   :  { %v12668_v24 = vadd.f32 %v13403_v22, %v13034_v53 }
0x1755   :  { %v13051_v26 = vmul.f32 -1.442695, %v12668_v24 }
0x1757   :  { %14799 = vpow2.f32 %v13051_v26 }
0x1761   :  { %v14800_v18 = vpop.eup %14799 }
0x1762   :  { %v12676_v46 = vadd.f32 1.0, %v14800_v18 }
0x1764   :  { %14801 = vrcp.f32 %v12676_v46 }
0x176e   :  { %v14802_v8 = vpop.eup %14801 }
0x176f   :  { %v12679_v48 = vpack.c.bf16 %v14802_v8, %v14802_v8 }
0x1771   :  { %14235 = vmatmul.mubr.msk.bf16.vlgmr.msra.gmra.mrb[168].mxu1 %vm3092_vm5, %v12679_v48 }
0x1844   :  { %v12736_v21 = vpop.f32.mrb[168].mxu1 }
0x1845   :  { %v12737_v2 = vadd.f32 %v12736_v21, %v12697_v0  ;;  %v14236_v16 = vpop.f32.mrb[169].mxu1 }
0x1846   :  { %v12739_v60 = vpop.f32.mrb[170].mxu1 }
0x1847   :  { %12743 = vst.msk [vmem:[%s17295_s10] sm:$0x3] %vm12742_vm10, %v12737_v2  ;;  %v14237_v3 = vpop.f32.mrb[171].mxu1 }
0x1848   :  { %12748 = vsyncpa [#allocation3], 1 }

</bundles_post_ra>
